<compile_context>
chip_gen: v5e
topology: v5e:2x2
jax: 0.10.0
libtpu: 0.0.40
codegen_flags: <defaults>
</compile_context>

<pallas_src>
import math

import jax
import jax.numpy as jnp
from jax.experimental import pallas as pl
from jax.experimental.pallas import tpu as pltpu

NUM_CLS = 80            # one_hot(x, 81)[:, 1:]  ->  80 foreground classes
GRAD_CH = 3             # grad head channels
COUT_PAD = 128          # head output lanes: [0:3]=grad, [3:83]=hm, rest zero padding
CIN_PAD = 8             # padded input channels for the 1x1-conv matmul
HM_LO = GRAD_CH         # first hm lane
HM_HI = GRAD_CH + NUM_CLS

_LOG_LO = math.log(1e-4)
_LOG_HI = math.log(1.0 - 1e-4)
_VMEM_LIMIT = 32 * 1024 * 1024   # safe on v5e/v6e (128 MiB) and v7x (64 MiB physical)


def _pick_row_tile(n):
    for tm in (1024, 512, 256, 128, 64, 32, 16, 8):
        if n % tm == 0:
            return tm
    return n


# ----------------------------------------------------------------------------
# Kernel A: 1x1-conv head (channels-last matmul) + fused focal-loss partials
# ----------------------------------------------------------------------------
def _head_focal_kernel(x_ref, w_ref, b_ref, ann_ref, grad_ref, part_ref):
    # (TM, CIN_PAD)bf16 @ (CIN_PAD, 128)bf16 -> f32 on the MXU, + bias.
    y = jnp.dot(x_ref[...], w_ref[...], preferred_element_type=jnp.float32) + b_ref[...]

    # grad head lives on lanes [0:GRAD_CH]; written out channels-last (no transpose).
    grad_ref[...] = y[:, :GRAD_CH]

    # ---- focal loss on hm lanes [3:83]; masks built from the int label map.
    lane = jax.lax.broadcasted_iota(jnp.int32, y.shape, 1)
    valid = jnp.logical_and(lane >= HM_LO, lane < HM_HI)
    a = ann_ref[...]                                  # (TM, 1) int labels in [0, 80]
    hit = a == (lane - (HM_LO - 1))                   # lane L <-> foreground class L-2
    posf = jnp.logical_and(valid, hit).astype(jnp.float32)
    negf = jnp.logical_and(valid, jnp.logical_not(hit)).astype(jnp.float32)

    # clamped sigmoid + logs with ONE exp and ONE log per element:
    #   pred = 1/(1+e), e = exp(-y);  log(pred) = -log(1+e);  log(1-pred) = -y - log(1+e)
    # clamping pred to [1e-4, 1-1e-4] == clamping the logs to [log(1e-4), log(1-1e-4)].
    e = jnp.exp(-y)
    pred = jnp.clip(pl.reciprocal(1.0 + e, approx=True), 1e-4, 1.0 - 1e-4)
    log1pe = jnp.log(1.0 + e)
    log_p = jnp.clip(-log1pe, _LOG_LO, _LOG_HI)
    log_1mp = jnp.clip(-y - log1pe, _LOG_LO, _LOG_HI)

    pos_loss = log_p * jnp.square(1.0 - pred) * posf
    neg_loss = log_1mp * jnp.square(pred) * negf

    # Per-lane partial sums for this block (single sublane-reduce per quantity);
    # the final cross-lane / cross-block reduce happens once in JAX on (nb, 3, 128).
    part_ref[0, 0:1, :] = jnp.sum(pos_loss, axis=0, keepdims=True)
    part_ref[0, 1:2, :] = jnp.sum(neg_loss, axis=0, keepdims=True)
    part_ref[0, 2:3, :] = jnp.sum(posf, axis=0, keepdims=True)


# ----------------------------------------------------------------------------
# Kernel B: bilinear resize (align_corners=True) + fused SmoothL1 partials
# ----------------------------------------------------------------------------
def _resize_sl1_kernel(g_ref, rh_ref, rwT_ref, gx_ref, gy_ref, ann_ref, part_ref):
    rh = rh_ref[...]            # (Hf, Hg)  bf16
    rwT = rwT_ref[...]          # (Wg, Wf)  bf16

    def resized(c):
        t = jnp.dot(rh, g_ref[0, c].astype(jnp.bfloat16),
                    preferred_element_type=jnp.float32)            # (Hf, Wg)
        return jnp.dot(t.astype(jnp.bfloat16), rwT,
                       preferred_element_type=jnp.float32)         # (Hf, Wf)

    def sl1(d):                 # SmoothL1, beta = 1
        ad = jnp.abs(d)
        return jnp.where(ad < 1.0, 0.5 * d * d, ad - 0.5)

    posf = (ann_ref[0] > 0).astype(jnp.float32)   # (Hf, Wf)
    mask = posf * 2.0 - 1.0                       # +1 where ann>0, -1 elsewhere

    acc = sl1(resized(0) - gx_ref[0])
    acc = acc + sl1(resized(1) - gy_ref[0])
    acc = acc + sl1(resized(2) - mask)

    # Per-lane partials; final reduce in JAX on a tiny (B, 2, Wf) array.
    part_ref[0, 0:1, :] = jnp.sum(acc, axis=0, keepdims=True)
    part_ref[0, 1:2, :] = jnp.sum(posf, axis=0, keepdims=True)


def interp_matrix(n_out, n_in, dtype=jnp.bfloat16):
    """Row-interpolation matrix for bilinear resize with align_corners=True."""
    i = jnp.arange(n_out, dtype=jnp.float32)
    denom = max(n_out - 1, 1)                       # guard n_out == 1
    src = i * (n_in - 1) / denom
    lo = jnp.clip(jnp.floor(src).astype(jnp.int32), 0, max(n_in - 2, 0))
    hi = jnp.minimum(lo + 1, n_in - 1)
    w_hi = src - lo.astype(jnp.float32)
    w_lo = 1.0 - w_hi
    cols = jnp.arange(n_in)
    R = (w_lo[:, None] * (cols[None, :] == lo[:, None]).astype(jnp.float32)
         + w_hi[:, None] * (cols[None, :] == hi[:, None]).astype(jnp.float32))
    return R.astype(dtype)


# ----------------------------------------------------------------------------
# NetwithLoss.forward
# ----------------------------------------------------------------------------
def netwithloss_forward(images, anns_hm, anns_full, gx, gy, w, b):
    B, Cin, H, W = images.shape
    Hf, Wf = gx.shape[-2:]
    Cout = NUM_CLS + GRAD_CH

    # ---------------- Kernel A: channels-last conv head + fused focal loss
    N = B * H * W
    xf = images.transpose(0, 2, 3, 1).reshape(N, Cin)       # tiny (Cin-channel) transpose
    xf = jnp.pad(xf, ((0, 0), (0, CIN_PAD - Cin))).astype(jnp.bfloat16)

    # reorder head columns to [grad(3) | hm(80)] so grad sits on lanes 0:3
    w_r = jnp.concatenate([w[:, NUM_CLS:], w[:, :NUM_CLS]], axis=1)
    b_r = jnp.concatenate([b[NUM_CLS:], b[:NUM_CLS]])
    w_pad = jnp.pad(w_r, ((0, CIN_PAD - Cin), (0, COUT_PAD - Cout))).astype(jnp.bfloat16)
    b_pad = jnp.pad(b_r, (0, COUT_PAD - Cout)).reshape(1, COUT_PAD).astype(jnp.float32)
    ann_flat = anns_hm.reshape(N, 1).astype(jnp.int32)

    TM = _pick_row_tile(N)
    nb = N // TM

    grad_flat, focal_parts = pl.pallas_call(
        _head_focal_kernel,
        grid=(nb,),
        in_specs=[
            pl.BlockSpec((TM, CIN_PAD), lambda i: (i, 0)),
            pl.BlockSpec((CIN_PAD, COUT_PAD), lambda i: (0, 0)),
            pl.BlockSpec((1, COUT_PAD), lambda i: (0, 0)),
            pl.BlockSpec((TM, 1), lambda i: (i, 0)),
        ],
        out_specs=[
            pl.BlockSpec((TM, GRAD_CH), lambda i: (i, 0)),
            pl.BlockSpec((1, 3, COUT_PAD), lambda i: (i, 0, 0)),
        ],
        out_shape=[
            jax.ShapeDtypeStruct((N, GRAD_CH), jnp.float32),
            jax.ShapeDtypeStruct((nb, 3, COUT_PAD), jnp.float32),
        ],
        compiler_params=pltpu.CompilerParams(
            dimension_semantics=("parallel",),
            vmem_limit_bytes=_VMEM_LIMIT),
    )(xf, w_pad, b_pad, ann_flat)

    pf = focal_parts.sum(axis=(0, 2))                 # [sum(pos_loss), sum(neg_loss), num_pos]
    pos_loss, neg_loss, num_pos = pf[0], pf[1], pf[2]
    loss_cls = jnp.where(num_pos > 0,
                         -(pos_loss + neg_loss) / jnp.maximum(num_pos, 1.0),
                         -neg_loss)

    # ---------------- Kernel B: bilinear resize + fused SmoothL1 / positive count
    grad_hw = grad_flat.reshape(B, H, W, GRAD_CH).transpose(0, 3, 1, 2)  # small tensor
    rh = interp_matrix(Hf, H)            # (Hf, H)  bf16
    rwT = interp_matrix(Wf, W).T         # (W,  Wf) bf16
    ann_sq = jnp.squeeze(anns_full, axis=1).astype(jnp.int32)

    sl1_parts = pl.pallas_call(
        _resize_sl1_kernel,
        grid=(B,),
        in_specs=[
            pl.BlockSpec((1, GRAD_CH, H, W), lambda i: (i, 0, 0, 0)),
            pl.BlockSpec((Hf, H), lambda i: (0, 0)),
            pl.BlockSpec((W, Wf), lambda i: (0, 0)),
            pl.BlockSpec((1, Hf, Wf), lambda i: (i, 0, 0)),
            pl.BlockSpec((1, Hf, Wf), lambda i: (i, 0, 0)),
            pl.BlockSpec((1, Hf, Wf), lambda i: (i, 0, 0)),
        ],
        out_specs=pl.BlockSpec((1, 2, Wf), lambda i: (i, 0, 0)),
        out_shape=jax.ShapeDtypeStruct((B, 2, Wf), jnp.float32),
        compiler_params=pltpu.CompilerParams(
            dimension_semantics=("parallel",),
            vmem_limit_bytes=_VMEM_LIMIT),
    )(grad_hw, rh, rwT, gx, gy, ann_sq)

    ps = sl1_parts.sum(axis=(0, 2))                   # [sl1_sum, pos_count]
    loss_grad_sum, pos_count = ps[0], ps[1]
    mp = pos_count * 3.0
    loss_grad_term = 0.1 * jnp.where(mp > 0,
                                     loss_grad_sum / jnp.maximum(mp, 1.0),
                                     1.0)
    return loss_cls, loss_grad_term


if __name__ == "__main__":
    key = jax.random.PRNGKey(0)
    B, Cin, H, W = 2, 3, 32, 32     # net-head (heatmap) resolution
    Hf, Wf = 128, 128               # stands in for the 512x512 interpolate target

    k1, k2, k3, k4, k5, k6, k7 = jax.random.split(key, 7)
    images = jax.random.normal(k1, (B, Cin, H, W), jnp.float32)
    anns_hm = jax.random.randint(k2, (B, H, W), 0, 81)          # `anns` class ids, 0 = bg
    anns_full = jax.random.randint(k3, (B, 1, Hf, Wf), 0, 81)   # batch['anns']
    gx = jax.random.normal(k4, (B, Hf, Wf), jnp.float32)
    gy = jax.random.normal(k5, (B, Hf, Wf), jnp.float32)

    # deterministic "net" parameters (1x1 conv head: 3 -> 80 hm channels + 3 grad channels)
    w = 0.1 * jax.random.normal(k6, (Cin, NUM_CLS + GRAD_CH), jnp.float32)
    b = 0.1 * jax.random.normal(k7, (NUM_CLS + GRAD_CH,), jnp.float32)

    fwd = jax.jit(netwithloss_forward)
    loss_cls, loss_grad = fwd(images, anns_hm, anns_full, gx, gy, w, b)
    jax.block_until_ready((loss_cls, loss_grad))
    print("KERNEL_OK")
</pallas_src>

<mosaic_0001>
module attributes {stable_mosaic.version = 11 : i64} {
  func.func @_head_focal_kernel(%arg0: i32, %arg1: memref<1024x8xbf16, #tpu.memory_space<vmem>>, %arg2: memref<8x128xbf16, #tpu.memory_space<vmem>>, %arg3: memref<1x128xf32, #tpu.memory_space<vmem>>, %arg4: memref<1024x1xi32, #tpu.memory_space<vmem>>, %arg5: memref<1024x3xf32, #tpu.memory_space<vmem>>, %arg6: memref<1x3x128xf32, #tpu.memory_space<vmem>>) attributes {dimension_semantics = [#tpu.dimension_semantics<parallel>], iteration_bounds = array<i64: 2>, scalar_prefetch = 0 : i64, scratch_operands = 0 : i64, tpu.core_type = #tpu.core_type<tc>, window_params = [{transform_indices = @transform_0, window_bounds = array<i64: 1024, 8>}, {pipeline_mode = #tpu.pipeline_mode<synchronous>, transform_indices = @transform_1, window_bounds = array<i64: 8, 128>}, {pipeline_mode = #tpu.pipeline_mode<synchronous>, transform_indices = @transform_2, window_bounds = array<i64: 1, 128>}, {transform_indices = @transform_3, window_bounds = array<i64: 1024, 1>}, {transform_indices = @transform_4, window_bounds = array<i64: 1024, 3>}, {transform_indices = @transform_5, window_bounds = array<i64: 1, 3, 128>}]} {
    %c0 = arith.constant 0 : index
    %c0_0 = arith.constant 0 : index
    %0 = vector.load %arg1[%c0, %c0_0] : memref<1024x8xbf16, #tpu.memory_space<vmem>>, vector<1024x8xbf16>
    %c0_1 = arith.constant 0 : index
    %c0_2 = arith.constant 0 : index
    %1 = vector.load %arg2[%c0_1, %c0_2] : memref<8x128xbf16, #tpu.memory_space<vmem>>, vector<8x128xbf16>
    %cst = arith.constant dense<0.000000e+00> : vector<1024x128xf32>
    %2 = tpu.matmul %0, %1, %cst {dimension_numbers = #tpu.dot_dimension_numbers<[1], [0], [0], [1], [0, 0, 1, 1], [], []>} : vector<1024x8xbf16>, vector<8x128xbf16>, vector<1024x128xf32> -> vector<1024x128xf32>
    %c0_3 = arith.constant 0 : index
    %c0_4 = arith.constant 0 : index
    %3 = vector.load %arg3[%c0_3, %c0_4] : memref<1x128xf32, #tpu.memory_space<vmem>>, vector<1x128xf32>
    %4 = vector.broadcast %3 : vector<1x128xf32> to vector<1024x128xf32>
    %5 = arith.addf %2, %4 : vector<1024x128xf32>
    %6 = vector.extract_strided_slice %5 {offsets = [0, 0], sizes = [1024, 3], strides = [1, 1]} : vector<1024x128xf32> to vector<1024x3xf32>
    %c0_5 = arith.constant 0 : index
    %c0_6 = arith.constant 0 : index
    %7 = vector.load %arg5[%c0_5, %c0_6] : memref<1024x3xf32, #tpu.memory_space<vmem>>, vector<1024x3xf32>
    tpu.vector_store %arg5[%c0_5, %c0_6], %6 {strides = array<i32>} : memref<1024x3xf32, #tpu.memory_space<vmem>>, vector<1024x3xf32>,
    %8 = tpu.iota {dimensions = array<i32: 1>} : vector<1024x128xi32>
    %c3_i32 = arith.constant 3 : i32
    %9 = vector.broadcast %c3_i32 : i32 to vector<1024x128xi32>
    %10 = arith.cmpi sge, %8, %9 : vector<1024x128xi32>
    %c83_i32 = arith.constant 83 : i32
    %11 = vector.broadcast %c83_i32 : i32 to vector<1024x128xi32>
    %12 = arith.cmpi slt, %8, %11 : vector<1024x128xi32>
    %13 = arith.andi %10, %12 : vector<1024x128xi1>
    %c0_7 = arith.constant 0 : index
    %c0_8 = arith.constant 0 : index
    %14 = vector.load %arg4[%c0_7, %c0_8] : memref<1024x1xi32, #tpu.memory_space<vmem>>, vector<1024x1xi32>
    %c2_i32 = arith.constant 2 : i32
    %15 = vector.broadcast %c2_i32 : i32 to vector<1024x128xi32>
    %16 = arith.subi %8, %15 : vector<1024x128xi32>
    %17 = vector.broadcast %14 : vector<1024x1xi32> to vector<1024x128xi32>
    %18 = arith.cmpi eq, %17, %16 : vector<1024x128xi32>
    %19 = arith.andi %13, %18 : vector<1024x128xi1>
    %20 = arith.extui %19 : vector<1024x128xi1> to vector<1024x128xi32>
    %21 = arith.sitofp %20 : vector<1024x128xi32> to vector<1024x128xf32>
    %cst_9 = arith.constant dense<true> : vector<1024x128xi1>
    %22 = arith.xori %18, %cst_9 : vector<1024x128xi1>
    %23 = arith.andi %13, %22 : vector<1024x128xi1>
    %24 = arith.extui %23 : vector<1024x128xi1> to vector<1024x128xi32>
    %25 = arith.sitofp %24 : vector<1024x128xi32> to vector<1024x128xf32>
    %cst_10 = arith.constant 0.000000e+00 : f32
    %26 = vector.broadcast %cst_10 : f32 to vector<1024x128xf32>
    %27 = arith.subf %26, %5 : vector<1024x128xf32>
    %28 = math.exp %27 : vector<1024x128xf32>
    %cst_11 = arith.constant 1.000000e+00 : f32
    %29 = vector.broadcast %cst_11 : f32 to vector<1024x128xf32>
    %30 = arith.addf %29, %28 : vector<1024x128xf32>
    %31 = tpu.reciprocal %30 {approx = true} : vector<1024x128xf32> -> vector<1024x128xf32>
    %cst_12 = arith.constant 9.99999974E-5 : f32
    %cst_13 = arith.constant 0.999899983 : f32
    %32 = vector.broadcast %cst_12 : f32 to vector<1024x128xf32>
    %33 = arith.maximumf %32, %31 : vector<1024x128xf32>
    %34 = vector.broadcast %cst_13 : f32 to vector<1024x128xf32>
    %35 = arith.minimumf %34, %33 : vector<1024x128xf32>
    %cst_14 = arith.constant 1.000000e+00 : f32
    %36 = vector.broadcast %cst_14 : f32 to vector<1024x128xf32>
    %37 = arith.addf %36, %28 : vector<1024x128xf32>
    %38 = math.log %37 : vector<1024x128xf32>
    %cst_15 = arith.constant 0.000000e+00 : f32
    %39 = vector.broadcast %cst_15 : f32 to vector<1024x128xf32>
    %40 = arith.subf %39, %38 : vector<1024x128xf32>
    %cst_16 = arith.constant -9.21034049 : f32
    %cst_17 = arith.constant -1.000050e-04 : f32
    %41 = vector.broadcast %cst_16 : f32 to vector<1024x128xf32>
    %42 = arith.maximumf %41, %40 : vector<1024x128xf32>
    %43 = vector.broadcast %cst_17 : f32 to vector<1024x128xf32>
    %44 = arith.minimumf %43, %42 : vector<1024x128xf32>
    %cst_18 = arith.constant 0.000000e+00 : f32
    %45 = vector.broadcast %cst_18 : f32 to vector<1024x128xf32>
    %46 = arith.subf %45, %5 : vector<1024x128xf32>
    %47 = arith.subf %46, %38 : vector<1024x128xf32>
    %cst_19 = arith.constant -9.21034049 : f32
    %cst_20 = arith.constant -1.000050e-04 : f32
    %48 = vector.broadcast %cst_19 : f32 to vector<1024x128xf32>
    %49 = arith.maximumf %48, %47 : vector<1024x128xf32>
    %50 = vector.broadcast %cst_20 : f32 to vector<1024x128xf32>
    %51 = arith.minimumf %50, %49 : vector<1024x128xf32>
    %cst_21 = arith.constant 1.000000e+00 : f32
    %52 = vector.broadcast %cst_21 : f32 to vector<1024x128xf32>
    %53 = arith.subf %52, %35 : vector<1024x128xf32>
    %54 = arith.mulf %53, %53 : vector<1024x128xf32>
    %55 = arith.mulf %44, %54 : vector<1024x128xf32>
    %56 = arith.mulf %55, %21 : vector<1024x128xf32>
    %57 = arith.mulf %35, %35 : vector<1024x128xf32>
    %58 = arith.mulf %51, %57 : vector<1024x128xf32>
    %59 = arith.mulf %58, %25 : vector<1024x128xf32>
    %cst_22 = arith.constant dense<0.000000e+00> : vector<128xf32>
    %60 = vector.multi_reduction <add>, %56, %cst_22 [0] : vector<1024x128xf32> to vector<128xf32>
    %61 = vector.shape_cast %60 : vector<128xf32> to vector<1x128xf32>
    %c0_23 = arith.constant 0 : index
    %c0_24 = arith.constant 0 : index
    %c0_25 = arith.constant 0 : index
    %62 = vector.load %arg6[%c0_23, %c0_24, %c0_25] : memref<1x3x128xf32, #tpu.memory_space<vmem>>, vector<1x1x128xf32>
    %63 = vector.shape_cast %62 : vector<1x1x128xf32> to vector<1x128xf32>
    %64 = vector.shape_cast %61 : vector<1x128xf32> to vector<1x1x128xf32>
    tpu.vector_store %arg6[%c0_23, %c0_24, %c0_25], %64 {strides = array<i32>} : memref<1x3x128xf32, #tpu.memory_space<vmem>>, vector<1x1x128xf32>,
    %cst_26 = arith.constant dense<0.000000e+00> : vector<128xf32>
    %65 = vector.multi_reduction <add>, %59, %cst_26 [0] : vector<1024x128xf32> to vector<128xf32>
    %66 = vector.shape_cast %65 : vector<128xf32> to vector<1x128xf32>
    %c0_27 = arith.constant 0 : index
    %c1 = arith.constant 1 : index
    %c0_28 = arith.constant 0 : index
    %67 = vector.load %arg6[%c0_27, %c1, %c0_28] : memref<1x3x128xf32, #tpu.memory_space<vmem>>, vector<1x1x128xf32>
    %68 = vector.shape_cast %67 : vector<1x1x128xf32> to vector<1x128xf32>
    %69 = vector.shape_cast %66 : vector<1x128xf32> to vector<1x1x128xf32>
    tpu.vector_store %arg6[%c0_27, %c1, %c0_28], %69 {strides = array<i32>} : memref<1x3x128xf32, #tpu.memory_space<vmem>>, vector<1x1x128xf32>,
    %cst_29 = arith.constant dense<0.000000e+00> : vector<128xf32>
    %70 = vector.multi_reduction <add>, %21, %cst_29 [0] : vector<1024x128xf32> to vector<128xf32>
    %71 = vector.shape_cast %70 : vector<128xf32> to vector<1x128xf32>
    %c0_30 = arith.constant 0 : index
    %c2 = arith.constant 2 : index
    %c0_31 = arith.constant 0 : index
    %72 = vector.load %arg6[%c0_30, %c2, %c0_31] : memref<1x3x128xf32, #tpu.memory_space<vmem>>, vector<1x1x128xf32>
    %73 = vector.shape_cast %72 : vector<1x1x128xf32> to vector<1x128xf32>
    %74 = vector.shape_cast %71 : vector<1x128xf32> to vector<1x1x128xf32>
    tpu.vector_store %arg6[%c0_30, %c2, %c0_31], %74 {strides = array<i32>} : memref<1x3x128xf32, #tpu.memory_space<vmem>>, vector<1x1x128xf32>,
    return
  }
  func.func @transform_0(%arg0: i32) -> (i32, i32) {
    %c0_i32 = arith.constant 0 : i32
    %c0_i32_0 = arith.constant 0 : i32
    return %arg0, %c0_i32 : i32, i32
  }
  func.func @transform_1(%arg0: i32) -> (i32, i32) {
    %c0_i32 = arith.constant 0 : i32
    %c0_i32_0 = arith.constant 0 : i32
    %c0_i32_1 = arith.constant 0 : i32
    return %c0_i32, %c0_i32_0 : i32, i32
  }
  func.func @transform_2(%arg0: i32) -> (i32, i32) {
    %c0_i32 = arith.constant 0 : i32
    %c0_i32_0 = arith.constant 0 : i32
    %c0_i32_1 = arith.constant 0 : i32
    return %c0_i32, %c0_i32_0 : i32, i32
  }
  func.func @transform_3(%arg0: i32) -> (i32, i32) {
    %c0_i32 = arith.constant 0 : i32
    %c0_i32_0 = arith.constant 0 : i32
    return %arg0, %c0_i32 : i32, i32
  }
  func.func @transform_4(%arg0: i32) -> (i32, i32) {
    %c0_i32 = arith.constant 0 : i32
    %c0_i32_0 = arith.constant 0 : i32
    return %arg0, %c0_i32 : i32, i32
  }
  func.func @transform_5(%arg0: i32) -> (i32, i32, i32) {
    %c0_i32 = arith.constant 0 : i32
    %c0_i32_0 = arith.constant 0 : i32
    %c0_i32_1 = arith.constant 0 : i32
    return %arg0, %c0_i32, %c0_i32_0 : i32, i32, i32
  }
}

module attributes {stable_mosaic.version = 11 : i64} {
  func.func @_resize_sl1_kernel(%arg0: i32, %arg1: memref<1x3x32x32xf32, #tpu.memory_space<vmem>>, %arg2: memref<128x32xbf16, #tpu.memory_space<vmem>>, %arg3: memref<32x128xbf16, #tpu.memory_space<vmem>>, %arg4: memref<1x128x128xf32, #tpu.memory_space<vmem>>, %arg5: memref<1x128x128xf32, #tpu.memory_space<vmem>>, %arg6: memref<1x128x128xi32, #tpu.memory_space<vmem>>, %arg7: memref<1x2x128xf32, #tpu.memory_space<vmem>>) attributes {dimension_semantics = [#tpu.dimension_semantics<parallel>], iteration_bounds = array<i64: 2>, scalar_prefetch = 0 : i64, scratch_operands = 0 : i64, tpu.core_type = #tpu.core_type<tc>, window_params = [{transform_indices = @transform_0, window_bounds = array<i64: 1, 3, 32, 32>}, {pipeline_mode = #tpu.pipeline_mode<synchronous>, transform_indices = @transform_1, window_bounds = array<i64: 128, 32>}, {pipeline_mode = #tpu.pipeline_mode<synchronous>, transform_indices = @transform_2, window_bounds = array<i64: 32, 128>}, {transform_indices = @transform_3, window_bounds = array<i64: 1, 128, 128>}, {transform_indices = @transform_4, window_bounds = array<i64: 1, 128, 128>}, {transform_indices = @transform_5, window_bounds = array<i64: 1, 128, 128>}, {transform_indices = @transform_6, window_bounds = array<i64: 1, 2, 128>}]} {
    %c0 = arith.constant 0 : index
    %c0_0 = arith.constant 0 : index
    %0 = vector.load %arg2[%c0, %c0_0] : memref<128x32xbf16, #tpu.memory_space<vmem>>, vector<128x32xbf16>
    %c0_1 = arith.constant 0 : index
    %c0_2 = arith.constant 0 : index
    %1 = vector.load %arg3[%c0_1, %c0_2] : memref<32x128xbf16, #tpu.memory_space<vmem>>, vector<32x128xbf16>
    %c0_3 = arith.constant 0 : index
    %c0_4 = arith.constant 0 : index
    %c0_5 = arith.constant 0 : index
    %2 = vector.load %arg6[%c0_3, %c0_4, %c0_5] : memref<1x128x128xi32, #tpu.memory_space<vmem>>, vector<1x128x128xi32>
    %3 = vector.shape_cast %2 : vector<1x128x128xi32> to vector<128x128xi32>
    %c0_i32 = arith.constant 0 : i32
    %4 = vector.broadcast %c0_i32 : i32 to vector<128x128xi32>
    %5 = arith.cmpi sgt, %3, %4 : vector<128x128xi32>
    %6 = arith.extui %5 : vector<128x128xi1> to vector<128x128xi32>
    %7 = arith.sitofp %6 : vector<128x128xi32> to vector<128x128xf32>
    %cst = arith.constant 2.000000e+00 : f32
    %8 = vector.broadcast %cst : f32 to vector<128x128xf32>
    %9 = arith.mulf %7, %8 : vector<128x128xf32>
    %cst_6 = arith.constant 1.000000e+00 : f32
    %10 = vector.broadcast %cst_6 : f32 to vector<128x128xf32>
    %11 = arith.subf %9, %10 : vector<128x128xf32>
    %c0_7 = arith.constant 0 : index
    %c0_8 = arith.constant 0 : index
    %c0_9 = arith.constant 0 : index
    %c0_10 = arith.constant 0 : index
    %12 = vector.load %arg1[%c0_7, %c0_8, %c0_9, %c0_10] : memref<1x3x32x32xf32, #tpu.memory_space<vmem>>, vector<1x1x32x32xf32>
    %13 = vector.shape_cast %12 : vector<1x1x32x32xf32> to vector<32x32xf32>
    %14 = arith.truncf %13 : vector<32x32xf32> to vector<32x32xbf16>
    %cst_11 = arith.constant dense<0.000000e+00> : vector<128x32xf32>
    %15 = tpu.matmul %0, %14, %cst_11 {dimension_numbers = #tpu.dot_dimension_numbers<[1], [0], [0], [1], [0, 0, 1, 1], [], []>} : vector<128x32xbf16>, vector<32x32xbf16>, vector<128x32xf32> -> vector<128x32xf32>
    %16 = arith.truncf %15 : vector<128x32xf32> to vector<128x32xbf16>
    %cst_12 = arith.constant dense<0.000000e+00> : vector<128x128xf32>
    %17 = tpu.matmul %16, %1, %cst_12 {dimension_numbers = #tpu.dot_dimension_numbers<[1], [0], [0], [1], [0, 0, 1, 1], [], []>} : vector<128x32xbf16>, vector<32x128xbf16>, vector<128x128xf32> -> vector<128x128xf32>
    %c0_13 = arith.constant 0 : index
    %c0_14 = arith.constant 0 : index
    %c0_15 = arith.constant 0 : index
    %18 = vector.load %arg4[%c0_13, %c0_14, %c0_15] : memref<1x128x128xf32, #tpu.memory_space<vmem>>, vector<1x128x128xf32>
    %19 = vector.shape_cast %18 : vector<1x128x128xf32> to vector<128x128xf32>
    %20 = arith.subf %17, %19 : vector<128x128xf32>
    %21 = math.absf %20 : vector<128x128xf32>
    %cst_16 = arith.constant 1.000000e+00 : f32
    %22 = vector.broadcast %cst_16 : f32 to vector<128x128xf32>
    %23 = arith.cmpf olt, %21, %22 : vector<128x128xf32>
    %cst_17 = arith.constant 5.000000e-01 : f32
    %24 = vector.broadcast %cst_17 : f32 to vector<128x128xf32>
    %25 = arith.mulf %24, %20 : vector<128x128xf32>
    %26 = arith.mulf %25, %20 : vector<128x128xf32>
    %cst_18 = arith.constant 5.000000e-01 : f32
    %27 = vector.broadcast %cst_18 : f32 to vector<128x128xf32>
    %28 = arith.subf %21, %27 : vector<128x128xf32>
    %29 = arith.select %23, %26, %28 : vector<128x128xi1>, vector<128x128xf32>
    %c0_19 = arith.constant 0 : index
    %c1 = arith.constant 1 : index
    %c0_20 = arith.constant 0 : index
    %c0_21 = arith.constant 0 : index
    %30 = vector.load %arg1[%c0_19, %c1, %c0_20, %c0_21] : memref<1x3x32x32xf32, #tpu.memory_space<vmem>>, vector<1x1x32x32xf32>
    %31 = vector.shape_cast %30 : vector<1x1x32x32xf32> to vector<32x32xf32>
    %32 = arith.truncf %31 : vector<32x32xf32> to vector<32x32xbf16>
    %cst_22 = arith.constant dense<0.000000e+00> : vector<128x32xf32>
    %33 = tpu.matmul %0, %32, %cst_22 {dimension_numbers = #tpu.dot_dimension_numbers<[1], [0], [0], [1], [0, 0, 1, 1], [], []>} : vector<128x32xbf16>, vector<32x32xbf16>, vector<128x32xf32> -> vector<128x32xf32>
    %34 = arith.truncf %33 : vector<128x32xf32> to vector<128x32xbf16>
    %cst_23 = arith.constant dense<0.000000e+00> : vector<128x128xf32>
    %35 = tpu.matmul %34, %1, %cst_23 {dimension_numbers = #tpu.dot_dimension_numbers<[1], [0], [0], [1], [0, 0, 1, 1], [], []>} : vector<128x32xbf16>, vector<32x128xbf16>, vector<128x128xf32> -> vector<128x128xf32>
    %c0_24 = arith.constant 0 : index
    %c0_25 = arith.constant 0 : index
    %c0_26 = arith.constant 0 : index
    %36 = vector.load %arg5[%c0_24, %c0_25, %c0_26] : memref<1x128x128xf32, #tpu.memory_space<vmem>>, vector<1x128x128xf32>
    %37 = vector.shape_cast %36 : vector<1x128x128xf32> to vector<128x128xf32>
    %38 = arith.subf %35, %37 : vector<128x128xf32>
    %39 = math.absf %38 : vector<128x128xf32>
    %cst_27 = arith.constant 1.000000e+00 : f32
    %40 = vector.broadcast %cst_27 : f32 to vector<128x128xf32>
    %41 = arith.cmpf olt, %39, %40 : vector<128x128xf32>
    %cst_28 = arith.constant 5.000000e-01 : f32
    %42 = vector.broadcast %cst_28 : f32 to vector<128x128xf32>
    %43 = arith.mulf %42, %38 : vector<128x128xf32>
    %44 = arith.mulf %43, %38 : vector<128x128xf32>
    %cst_29 = arith.constant 5.000000e-01 : f32
    %45 = vector.broadcast %cst_29 : f32 to vector<128x128xf32>
    %46 = arith.subf %39, %45 : vector<128x128xf32>
    %47 = arith.select %41, %44, %46 : vector<128x128xi1>, vector<128x128xf32>
    %48 = arith.addf %29, %47 : vector<128x128xf32>
    %c0_30 = arith.constant 0 : index
    %c2 = arith.constant 2 : index
    %c0_31 = arith.constant 0 : index
    %c0_32 = arith.constant 0 : index
    %49 = vector.load %arg1[%c0_30, %c2, %c0_31, %c0_32] : memref<1x3x32x32xf32, #tpu.memory_space<vmem>>, vector<1x1x32x32xf32>
    %50 = vector.shape_cast %49 : vector<1x1x32x32xf32> to vector<32x32xf32>
    %51 = arith.truncf %50 : vector<32x32xf32> to vector<32x32xbf16>
    %cst_33 = arith.constant dense<0.000000e+00> : vector<128x32xf32>
    %52 = tpu.matmul %0, %51, %cst_33 {dimension_numbers = #tpu.dot_dimension_numbers<[1], [0], [0], [1], [0, 0, 1, 1], [], []>} : vector<128x32xbf16>, vector<32x32xbf16>, vector<128x32xf32> -> vector<128x32xf32>
    %53 = arith.truncf %52 : vector<128x32xf32> to vector<128x32xbf16>
    %cst_34 = arith.constant dense<0.000000e+00> : vector<128x128xf32>
    %54 = tpu.matmul %53, %1, %cst_34 {dimension_numbers = #tpu.dot_dimension_numbers<[1], [0], [0], [1], [0, 0, 1, 1], [], []>} : vector<128x32xbf16>, vector<32x128xbf16>, vector<128x128xf32> -> vector<128x128xf32>
    %55 = arith.subf %54, %11 : vector<128x128xf32>
    %56 = math.absf %55 : vector<128x128xf32>
    %cst_35 = arith.constant 1.000000e+00 : f32
    %57 = vector.broadcast %cst_35 : f32 to vector<128x128xf32>
    %58 = arith.cmpf olt, %56, %57 : vector<128x128xf32>
    %cst_36 = arith.constant 5.000000e-01 : f32
    %59 = vector.broadcast %cst_36 : f32 to vector<128x128xf32>
    %60 = arith.mulf %59, %55 : vector<128x128xf32>
    %61 = arith.mulf %60, %55 : vector<128x128xf32>
    %cst_37 = arith.constant 5.000000e-01 : f32
    %62 = vector.broadcast %cst_37 : f32 to vector<128x128xf32>
    %63 = arith.subf %56, %62 : vector<128x128xf32>
    %64 = arith.select %58, %61, %63 : vector<128x128xi1>, vector<128x128xf32>
    %65 = arith.addf %48, %64 : vector<128x128xf32>
    %cst_38 = arith.constant dense<0.000000e+00> : vector<128xf32>
    %66 = vector.multi_reduction <add>, %65, %cst_38 [0] : vector<128x128xf32> to vector<128xf32>
    %67 = vector.shape_cast %66 : vector<128xf32> to vector<1x128xf32>
    %c0_39 = arith.constant 0 : index
    %c0_40 = arith.constant 0 : index
    %c0_41 = arith.constant 0 : index
    %68 = vector.load %arg7[%c0_39, %c0_40, %c0_41] : memref<1x2x128xf32, #tpu.memory_space<vmem>>, vector<1x1x128xf32>
    %69 = vector.shape_cast %68 : vector<1x1x128xf32> to vector<1x128xf32>
    %70 = vector.shape_cast %67 : vector<1x128xf32> to vector<1x1x128xf32>
    tpu.vector_store %arg7[%c0_39, %c0_40, %c0_41], %70 {strides = array<i32>} : memref<1x2x128xf32, #tpu.memory_space<vmem>>, vector<1x1x128xf32>,
    %cst_42 = arith.constant dense<0.000000e+00> : vector<128xf32>
    %71 = vector.multi_reduction <add>, %7, %cst_42 [0] : vector<128x128xf32> to vector<128xf32>
    %72 = vector.shape_cast %71 : vector<128xf32> to vector<1x128xf32>
    %c0_43 = arith.constant 0 : index
    %c1_44 = arith.constant 1 : index
    %c0_45 = arith.constant 0 : index
    %73 = vector.load %arg7[%c0_43, %c1_44, %c0_45] : memref<1x2x128xf32, #tpu.memory_space<vmem>>, vector<1x1x128xf32>
    %74 = vector.shape_cast %73 : vector<1x1x128xf32> to vector<1x128xf32>
    %75 = vector.shape_cast %72 : vector<1x128xf32> to vector<1x1x128xf32>
    tpu.vector_store %arg7[%c0_43, %c1_44, %c0_45], %75 {strides = array<i32>} : memref<1x2x128xf32, #tpu.memory_space<vmem>>, vector<1x1x128xf32>,
    return
  }
  func.func @transform_0(%arg0: i32) -> (i32, i32, i32, i32) {
    %c0_i32 = arith.constant 0 : i32
    %c0_i32_0 = arith.constant 0 : i32
    %c0_i32_1 = arith.constant 0 : i32
    %c0_i32_2 = arith.constant 0 : i32
    return %arg0, %c0_i32, %c0_i32_0, %c0_i32_1 : i32, i32, i32, i32
  }
  func.func @transform_1(%arg0: i32) -> (i32, i32) {
    %c0_i32 = arith.constant 0 : i32
    %c0_i32_0 = arith.constant 0 : i32
    %c0_i32_1 = arith.constant 0 : i32
    return %c0_i32, %c0_i32_0 : i32, i32
  }
  func.func @transform_2(%arg0: i32) -> (i32, i32) {
    %c0_i32 = arith.constant 0 : i32
    %c0_i32_0 = arith.constant 0 : i32
    %c0_i32_1 = arith.constant 0 : i32
    return %c0_i32, %c0_i32_0 : i32, i32
  }
  func.func @transform_3(%arg0: i32) -> (i32, i32, i32) {
    %c0_i32 = arith.constant 0 : i32
    %c0_i32_0 = arith.constant 0 : i32
    %c0_i32_1 = arith.constant 0 : i32
    return %arg0, %c0_i32, %c0_i32_0 : i32, i32, i32
  }
  func.func @transform_4(%arg0: i32) -> (i32, i32, i32) {
    %c0_i32 = arith.constant 0 : i32
    %c0_i32_0 = arith.constant 0 : i32
    %c0_i32_1 = arith.constant 0 : i32
    return %arg0, %c0_i32, %c0_i32_0 : i32, i32, i32
  }
  func.func @transform_5(%arg0: i32) -> (i32, i32, i32) {
    %c0_i32 = arith.constant 0 : i32
    %c0_i32_0 = arith.constant 0 : i32
    %c0_i32_1 = arith.constant 0 : i32
    return %arg0, %c0_i32, %c0_i32_0 : i32, i32, i32
  }
  func.func @transform_6(%arg0: i32) -> (i32, i32, i32) {
    %c0_i32 = arith.constant 0 : i32
    %c0_i32_0 = arith.constant 0 : i32
    %c0_i32_1 = arith.constant 0 : i32
    return %arg0, %c0_i32, %c0_i32_0 : i32, i32, i32
  }
}

</mosaic_0001>

<bundles_post_ra>
// kernel: netwithloss_forward.3
= control target key start
LH: loop header
LB: loop body
LE: loop exit
PB: predicated region body
PF: predicated region fallthrough
CT: control target
= control target key end

     0   :  { %s1709_s21 = smov 0   ;;  %s2149_s0 = inlined_call_operand.vmem [shape: f32[2,3,32,32], index: 0, kind: input, shape index: {}]   ;;  %s2150_s1 = inlined_call_operand.vmem [shape: bf16[128,32], index: 1, kind: input, shape index: {}]   ;;  %s2151_s2 = inlined_call_operand.vmem [shape: bf16[32,128], index: 2, kind: input, shape index: {}]   ;;  %s2152_s3 = inlined_call_operand.vmem [shape: f32[2,128,128], index: 3, kind: input, shape index: {}]   ;;  %s2153_s4 = inlined_call_operand.vmem [shape: f32[2,128,128], index: 4, kind: input, shape index: {}]   ;;  %s2154_s5 = inlined_call_operand.vmem [shape: s32[2,128,128], index: 5, kind: input, shape index: {}]   ;;  %s2155_s6 = inlined_call_operand.vmem [shape: f32[2,2,128], index: 6, kind: output, shape index: {}]  }
   0x1 LB: > { %s1447_s22 = sadd.s32 4294967295, %s1671_s21   ;;  %p1451_p0 = scmp.ge.s32.totalorder %s1671_s21, 1  ;;  %s1671_s21 = sphi %s1709_s21, %s16_s21  }
   0x2   : > { %p242_p1 = scmp.lt.s32.totalorder %s1671_s21, 3 }
   0x4   : > { %p243_p2 = pnand %p1451_p0, %p242_p1 }
   0x5   : > { %p286_p3 = scmp.lt.s32.totalorder (!%p243_p2), %s1447_s22, 1 }
   0x6   : > { %246 = sbr.rel (%p243_p2) target bundleno = 509 (0x1fd), region = 44 }
   0xb   : > { %s2211_s22 = smov (!%p286_p3, %s1447_s22), 1  ;;  %v1641_v12 = vld [vmem:[%s2150_s1] sm:$0xff]  ;;  %vm473_vm0 = vcmask 261120   ;;  %v1642_v20 = vld [vmem:[%s2150_s1 + $0x8] sm:$0xff]  ;;  %v1643_v22 = vld [vmem:[%s2150_s1 + $0x10] sm:$0xff] }
   0xc   : > { %s1655_s23 = smul.u32 96, %s2211_s22  ;;  %v1645_v13 = vld [vmem:[%s2150_s1 + $0x20] sm:$0xff]  ;;  %v1646_v21 = vld [vmem:[%s2150_s1 + $0x28] sm:$0xff]  ;;  %v1647_v23 = vld [vmem:[%s2150_s1 + $0x30] sm:$0xff]  ;;  %s1638_s25 = sshll.u32 %s2211_s22, 7 }
   0xd   : > { %v1644_v24 = vld [vmem:[%s2150_s1 + $0x18] sm:$0xff]  ;;  %v1650_v26 = vld [vmem:[%s2151_s2 + $0x8] sm:$0xff]  ;;  %v1649_v27 = vld [vmem:[%s2151_s2] sm:$0xff]  ;;  %s1828_s28 = scalar_lea.vmem %s2154_s5, %s1638_s25  ;;  %s1844_s7 = scalar_lea.vmem %s2152_s3, %s1638_s25 }
   0xe   : > { %s290_s26 = scalar_lea.vmem %s2149_s0, %s1655_s23  ;;  %v1648_v25 = vld [vmem:[%s2150_s1 + $0x38] sm:$0xff]  ;;  %597 = vmatpush.bf16.msra.mxu1 %v1650_v26  ;;  %1653 = vmatpush.bf16.msra.mxu3 %v1650_v26  ;;  %s1855_s10 = scalar_lea.vmem %s2153_s4, %s1638_s25 }
   0xf   : > { %v429_v0 = vld [vmem:[%s290_s26 + $0x10] sm:$0xff]  ;;  %v430_v1 = vld [vmem:[%s290_s26 + $0x18] sm:$0xff]  ;;  %v427_v2 = vld [vmem:[%s290_s26] sm:$0xff]  ;;  %s1459_s11 = sshll.u32 %s2211_s22, 1 }
  0x10   : > { %v432_v3 = vpack.c.bf16 %v430_v1, %v429_v0  ;;  %v428_v4 = vld [vmem:[%s290_s26 + $0x8] sm:$0xff]  ;;  %v1566_v5 = vld [vmem:[%s290_s26 + $0x30] sm:$0xff]  ;;  %v1567_v6 = vld [vmem:[%s290_s26 + $0x38] sm:$0xff]  ;;  %s2112_s13 = scalar_lea.vmem %s2155_s6, %s1459_s11 }
  0x11   : > { %v1602_v7 = vld [vmem:[%s290_s26 + $0x50] sm:$0xff]  ;;  %v1603_v8 = vld [vmem:[%s290_s26 + $0x58] sm:$0xff]  ;;  %v431_v9 = vpack.c.bf16 %v428_v4, %v427_v2  ;;  %v774_v10 = vpack.c.bf16 %v1567_v6, %v1566_v5  ;;  %v1564_v14 = vld [vmem:[%s290_s26 + $0x20] sm:$0xff] }
  0x12   : > { %504 = vmatpush.bf16.msra.mxu0 %v432_v3  ;;  %1651 = vmatpush.bf16.msra.mxu2 %v432_v3  ;;  %v1055_v11 = vpack.c.bf16 %v1603_v8, %v1602_v7  ;;  %v1565_v15 = vld [vmem:[%s290_s26 + $0x28] sm:$0xff]  ;;  %v1600_v16 = vld [vmem:[%s290_s26 + $0x40] sm:$0xff] }
  0x13   : > { %v773_v17 = vpack.c.bf16 %v1565_v15, %v1564_v14  ;;  %v1601_v18 = vld [vmem:[%s290_s26 + $0x48] sm:$0xff]  ;;  %598 = vmatpush.bf16.msra.mxu1 %v1649_v27  ;;  %1654 = vmatpush.bf16.msra.mxu3 %v1649_v27 }
  0x14   : > { %v1054_v19 = vpack.c.bf16 %v1601_v18, %v1600_v16 }
  0x16   : > { %505 = vmatpush.bf16.msra.mxu0 %v431_v9  ;;  %1652 = vmatpush.bf16.msra.mxu2 %v431_v9 }
  0x17   : > { %862 = vmatpush.bf16.msrb.mxu3 %v1650_v26  ;;  %1143 = vmatpush.bf16.msrb.mxu1 %v1650_v26 }
  0x19   : > { %1524 = vmatmul.msk.bf16.vlgmr.msra.gmra.mxu0 %vm473_vm0, %v1641_v12  ;;  %1528 = vmatmul.msk.bf16.vlgmr.msra.gmra.mxu2 %vm473_vm0, %v1645_v13 }
  0x1a   : > { %781 = vmatpush.bf16.msrb.mxu2 %v774_v10  ;;  %1062 = vmatpush.bf16.msrb.mxu0 %v1055_v11 }
  0x1b   : > { %863 = vmatpush.bf16.msrb.mxu3 %v1649_v27  ;;  %1144 = vmatpush.bf16.msrb.mxu1 %v1649_v27 }
  0x1e   : > { %782 = vmatpush.bf16.msrb.mxu2 %v773_v17  ;;  %1063 = vmatpush.bf16.msrb.mxu0 %v1054_v19 }
  0x29   : > { %1525 = vmatmul.msk.bf16.gmra.mxu0 %vm473_vm0, %v1642_v20  ;;  %1529 = vmatmul.msk.bf16.gmra.mxu2 %vm473_vm0, %v1646_v21 }
  0x39   : > { %1526 = vmatmul.msk.bf16.gmra.mxu0 %vm473_vm0, %v1643_v22  ;;  %1530 = vmatmul.msk.bf16.gmra.mxu2 %vm473_vm0, %v1647_v23 }
  0x49   : > { %1527 = vmatmul.msk.bf16.gmra.mxu0 %vm473_vm0, %v1644_v24  ;;  %1531 = vmatmul.msk.bf16.gmra.mxu2 %vm473_vm0, %v1648_v25 }
  0x59   : > { %1568 = vmatmul.msk.bf16.vlgmr.msrb.gmra.mxu2 %vm473_vm0, %v1641_v12  ;;  %1604 = vmatmul.msk.bf16.vlgmr.msrb.gmra.mxu0 %vm473_vm0, %v1641_v12 }
  0x69   : > { %1569 = vmatmul.msk.bf16.gmra.mxu2 %vm473_vm0, %v1642_v20  ;;  %1605 = vmatmul.msk.bf16.gmra.mxu0 %vm473_vm0, %v1642_v20 }
  0x79   : > { %1570 = vmatmul.msk.bf16.gmra.mxu2 %vm473_vm0, %v1643_v22  ;;  %1606 = vmatmul.msk.bf16.gmra.mxu0 %vm473_vm0, %v1643_v22 }
  0x89   : > { %1571 = vmatmul.msk.bf16.gmra.mxu2 %vm473_vm0, %v1644_v24  ;;  %1607 = vmatmul.msk.bf16.gmra.mxu0 %vm473_vm0, %v1644_v24 }
  0x96   : > { %v507_v28 = vpop.f32.mrf.mxu0 }
  0x99   : > { %1572 = vmatmul.msk.bf16.gmra.mxu2 %vm473_vm0, %v1645_v13  ;;  %1608 = vmatmul.msk.bf16.gmra.mxu0 %vm473_vm0, %v1645_v13 }
  0x9c   : > { %v527_v29 = vpop.f32.mrf.mxu2 }
  0x9e   : > { %v509_v30 = vpop.f32.mrf.mxu0 }
  0x9f   : > { %v547_v31 = vpack.c.bf16 %v509_v30, %v507_v28 }
  0xa1   : > { %1540 = vmatmul.msk.bf16.vlgmr.msra.gmra.mxu1 %vm473_vm0, %v547_v31 }
  0xa4   : > { %v529_v32 = vpop.f32.mrf.mxu2 }
  0xa5   : > { %v551_v33 = vpack.c.bf16 %v529_v32, %v527_v29 }
  0xa6   : > { %v512_v34 = vpop.f32.mrf.mxu0 }
  0xa7   : > { %1544 = vmatmul.msk.bf16.vlgmr.msra.gmra.mxu3 %vm473_vm0, %v551_v33 }
  0xa9   : > { %1573 = vmatmul.msk.bf16.gmra.mxu2 %vm473_vm0, %v1646_v21  ;;  %1609 = vmatmul.msk.bf16.gmra.mxu0 %vm473_vm0, %v1646_v21 }
  0xac   : > { %v532_v35 = vpop.f32.mrf.mxu2 }
  0xae   : > { %v514_v36 = vpop.f32.mrf.mxu0 }
  0xaf   : > { %v548_v37 = vpack.c.bf16 %v514_v36, %v512_v34 }
  0xb1   : > { %1541 = vmatmul.msk.bf16.gmra.mxu1 %vm473_vm0, %v548_v37 }
  0xb4   : > { %v534_v38 = vpop.f32.mrf.mxu2 }
  0xb5   : > { %v552_v39 = vpack.c.bf16 %v534_v38, %v532_v35 }
  0xb6   : > { %v517_v40 = vpop.f32.mrf.mxu0 }
  0xb7   : > { %1545 = vmatmul.msk.bf16.gmra.mxu3 %vm473_vm0, %v552_v39 }
  0xb9   : > { %1574 = vmatmul.msk.bf16.gmra.mxu2 %vm473_vm0, %v1647_v23  ;;  %1610 = vmatmul.msk.bf16.gmra.mxu0 %vm473_vm0, %v1647_v23 }
  0xbc   : > { %v537_v41 = vpop.f32.mrf.mxu2 }
  0xbe   : > { %v519_v42 = vpop.f32.mrf.mxu0 }
  0xbf   : > { %v549_v43 = vpack.c.bf16 %v519_v42, %v517_v40 }
  0xc1   : > { %1542 = vmatmul.msk.bf16.gmra.mxu1 %vm473_vm0, %v549_v43 }
  0xc4   : > { %v539_v44 = vpop.f32.mrf.mxu2 }
  0xc5   : > { %v553_v45 = vpack.c.bf16 %v539_v44, %v537_v41 }
  0xc6   : > { %v522_v46 = vpop.f32.mrf.mxu0 }
  0xc7   : > { %1546 = vmatmul.msk.bf16.gmra.mxu3 %vm473_vm0, %v553_v45 }
  0xc9   : > { %1575 = vmatmul.msk.bf16.gmra.mxu2 %vm473_vm0, %v1648_v25  ;;  %1611 = vmatmul.msk.bf16.gmra.mxu0 %vm473_vm0, %v1648_v25 }
  0xcc   : > { %v542_v47 = vpop.f32.mrf.mxu2 }
  0xce   : > { %v524_v48 = vpop.f32.mrf.mxu0 }
  0xcf   : > { %v550_v49 = vpack.c.bf16 %v524_v48, %v522_v46 }
  0xd1   : > { %1543 = vmatmul.msk.bf16.gmra.mxu1 %vm473_vm0, %v550_v49  ;;  %v331_v49 = vld [vmem:[%s1828_s28] sm:$0xff] }
  0xd2   : > { %vm347_vm1 = vcmp.gt.s32.totalorder %v331_v49, 0 }
  0xd4   : > { %v544_v50 = vpop.f32.mrf.mxu2 }
  0xd5   : > { %v554_v51 = vpack.c.bf16 %v544_v50, %v542_v47 }
  0xd6   : > { %v1065_v52 = vpop.f32.mrf.mxu0 }
  0xd7   : > { %1547 = vmatmul.msk.bf16.gmra.mxu3 %vm473_vm0, %v554_v51 }
  0xdc   : > { %v784_v53 = vpop.f32.mrf.mxu2 }
  0xde   : > { %v1067_v54 = vpop.f32.mrf.mxu0 }
  0xdf   : > { %v1105_v55 = vpack.c.bf16 %v1067_v54, %v1065_v52  ;;  %v1673_v52 = vmov 0.0   ;;  %v332_v54 = vld [vmem:[%s1828_s28 + $0x8] sm:$0xff] }
  0xe0   : > { %vm348_vm2 = vcmp.gt.s32.totalorder %v332_v54, 0 }
  0xe1   : > { %1612 = vmatmul.msk.bf16.vlgmr.msrb.gmra.mxu1 %vm473_vm0, %v1105_v55 }
  0xe4   : > { %v786_v56 = vpop.f32.mrf.mxu2 }
  0xe5   : > { %v824_v57 = vpack.c.bf16 %v786_v56, %v784_v53  ;;  %v1837_v53 = vsel %vm347_vm1, 1.0, %v1673_v52 }
  0xe6   : > { %v1070_v58 = vpop.f32.mrf.mxu0  ;;  %v395_v55 = vmul.f32 2.0, %v1837_v53 }
  0xe7   : > { %1576 = vmatmul.msk.bf16.vlgmr.msrb.gmra.mxu3 %vm473_vm0, %v824_v57  ;;  %v640_v57 = vld [vmem:[%s1844_s7] sm:$0xff] }
  0xec   : > { %v789_v59 = vpop.f32.mrf.mxu2 }
  0xee   : > { %v1072_v60 = vpop.f32.mrf.mxu0 }
  0xef   : > { %v1106_v61 = vpack.c.bf16 %v1072_v60, %v1070_v58  ;;  %v1476_v58 = vadd.f32 -1.0, %v395_v55  ;;  %v1850_v60 = vsel %vm348_vm2, 1.0, %v1673_v52 }
  0xf1   : > { %1613 = vmatmul.msk.bf16.gmra.mxu1 %vm473_vm0, %v1106_v61 }
  0xf4   : > { %v791_v62 = vpop.f32.mrf.mxu2 }
  0xf5   : > { %v825_v63 = vpack.c.bf16 %v791_v62, %v789_v59  ;;  %v333_v62 = vld [vmem:[%s1828_s28 + $0x10] sm:$0xff] }
  0xf6   : > { %v1075_v0 = vpop.f32.mrf.mxu0  ;;  %vm349_vm3 = vcmp.gt.s32.totalorder %v333_v62, 0 }
  0xf7   : > { %1577 = vmatmul.msk.bf16.gmra.mxu3 %vm473_vm0, %v825_v63 }
  0xfc   : > { %v794_v1 = vpop.f32.mrf.mxu2 }
  0xfe   : > { %v1077_v2 = vpop.f32.mrf.mxu0 }
  0xff   : > { %v1107_v3 = vpack.c.bf16 %v1077_v2, %v1075_v0  ;;  %v396_v0 = vmul.f32 2.0, %v1850_v60  ;;  %v905_v2 = vld [vmem:[%s1855_s10] sm:$0xff] }
 0x101   : > { %1614 = vmatmul.msk.bf16.gmra.mxu1 %vm473_vm0, %v1107_v3 }
 0x104   : > { %v796_v4 = vpop.f32.mrf.mxu2 }
 0x105   : > { %v826_v5 = vpack.c.bf16 %v796_v4, %v794_v1 }
 0x106   : > { %v1080_v6 = vpop.f32.mrf.mxu0 }
 0x107   : > { %1578 = vmatmul.msk.bf16.gmra.mxu3 %vm473_vm0, %v826_v5  ;;  %v641_v5 = vld [vmem:[%s1844_s7 + $0x8] sm:$0xff] }
 0x10c   : > { %v799_v7 = vpop.f32.mrf.mxu2 }
 0x10e   : > { %v1082_v8 = vpop.f32.mrf.mxu0 }
 0x10f   : > { %v1108_v9 = vpack.c.bf16 %v1082_v8, %v1080_v6 }
 0x111   : > { %1615 = vmatmul.msk.bf16.gmra.mxu1 %vm473_vm0, %v1108_v9 }
 0x114   : > { %v801_v10 = vpop.f32.mrf.mxu2 }
 0x115   : > { %v827_v11 = vpack.c.bf16 %v801_v10, %v799_v7  ;;  %v1477_v7 = vadd.f32 -1.0, %v396_v0 }
 0x116   : > { %v1085_v12 = vpop.f32.mrf.mxu0 }
 0x117   : > { %1579 = vmatmul.msk.bf16.gmra.mxu3 %vm473_vm0, %v827_v11  ;;  %v1862_v11 = vsel %vm349_vm3, 1.0, %v1673_v52 }
 0x11c   : > { %v804_v13 = vpop.f32.mrf.mxu2 }
 0x11e   : > { %v600_v14 = vpop.f32.mrf.mxu1  ;;  %v1087_v15 = vpop.f32.mrf.mxu0 }
 0x11f   : > { %v1109_v16 = vpack.c.bf16 %v1087_v15, %v1085_v12  ;;  %v656_v61 = vsub.f32 %v600_v14, %v640_v57 }
 0x121   : > { %1616 = vmatmul.msk.bf16.gmra.mxu1 %vm473_vm0, %v1109_v16  ;;  %v672_v3 = vand.u32 2147483647, %v656_v61  ;;  %v704_v4 = vmul.f32 0.5, %v656_v61 }
 0x123   : > { %v1548_v14 = vadd.f32 -0.5, %v672_v3  ;;  %vm1866_vm4 = vcmp.lt.f32.partialorder %v672_v3, 1.0 }
 0x124   : > { %v806_v17 = vpop.f32.mrf.mxu2 }
 0x125   : > { %v828_v18 = vpack.c.bf16 %v806_v17, %v804_v13  ;;  %v720_v13 = vmul.f32 %v704_v4, %v656_v61  ;;  %v334_v17 = vld [vmem:[%s1828_s28 + $0x18] sm:$0xff] }
 0x126   : > { %v1794_v19 = vpop.f32.mrf.mxu1  ;;  %v1090_v20 = vpop.f32.mrf.mxu0  ;;  %vm350_vm7 = vcmp.gt.s32.totalorder %v334_v17, 0 }
 0x127   : > { %1580 = vmatmul.msk.bf16.gmra.mxu3 %vm473_vm0, %v828_v18  ;;  %v657_v12 = vsub.f32 %v1794_v19, %v641_v5  ;;  %v1882_v55 = vsel %vm350_vm7, 1.0, %v1673_v52 }
 0x128   : > { %v398_v5 = vmul.f32 2.0, %v1882_v55 }
 0x12a   : > { %v1797_v21 = vpop.f32.mrf.mxu3 }
 0x12c   : > { %v809_v22 = vpop.f32.mrf.mxu2 }
 0x12e   : > { %v1799_v23 = vpop.f32.mrf.mxu1  ;;  %v1092_v24 = vpop.f32.mrf.mxu0 }
 0x12f   : > { %v1110_v25 = vpack.c.bf16 %v1092_v24, %v1090_v20  ;;  %v397_v24 = vmul.f32 2.0, %v1862_v11 }
 0x131   : > { %1617 = vmatmul.msk.bf16.gmra.mxu1 %vm473_vm0, %v1110_v25 }
 0x132   : > { %v1802_v26 = vpop.f32.mrf.mxu3 }
 0x134   : > { %v811_v27 = vpop.f32.mrf.mxu2 }
 0x135   : > { %v829_v28 = vpack.c.bf16 %v811_v27, %v809_v22 }
 0x136   : > { %v1804_v29 = vpop.f32.mrf.mxu1  ;;  %v1095_v30 = vpop.f32.mrf.mxu0 }
 0x137   : > { %1581 = vmatmul.msk.bf16.gmra.mxu3 %vm473_vm0, %v829_v28 }
 0x13a   : > { %v1807_v31 = vpop.f32.mrf.mxu3 }
 0x13c   : > { %v814_v32 = vpop.f32.mrf.mxu2 }
 0x13e   : > { %v1809_v33 = vpop.f32.mrf.mxu1  ;;  %v1097_v34 = vpop.f32.mrf.mxu0 }
 0x13f   : > { %v1111_v35 = vpack.c.bf16 %v1097_v34, %v1095_v30  ;;  %v673_v30 = vand.u32 2147483647, %v657_v12  ;;  %v906_v34 = vld [vmem:[%s1855_s10 + $0x8] sm:$0xff] }
 0x141   : > { %1618 = vmatmul.msk.bf16.gmra.mxu1 %vm473_vm0, %v1111_v35  ;;  %v752_v35 = vsel %vm1866_vm4, %v720_v13, %v1548_v14  ;;  %vm1885_vm8 = vcmp.lt.f32.partialorder %v673_v30, 1.0  ;;  %v907_v13 = vld [vmem:[%s1855_s10 + $0x10] sm:$0xff] }
 0x142   : > { %v1812_v36 = vpop.f32.mrf.mxu3 }
 0x144   : > { %v816_v37 = vpop.f32.mrf.mxu2 }
 0x145   : > { %v830_v38 = vpack.c.bf16 %v816_v37, %v814_v32  ;;  %v705_v37 = vmul.f32 0.5, %v657_v12 }
 0x146   : > { %v1814_v39 = vpop.f32.mrf.mxu1  ;;  %v1100_v40 = vpop.f32.mrf.mxu0 }
 0x147   : > { %1582 = vmatmul.msk.bf16.gmra.mxu3 %vm473_vm0, %v830_v38  ;;  %v642_v38 = vld [vmem:[%s1844_s7 + $0x10] sm:$0xff]  ;;  %v721_v62 = vmul.f32 %v705_v37, %v657_v12 }
 0x14a   : > { %v1817_v41 = vpop.f32.mrf.mxu3 }
 0x14c   : > { %v819_v42 = vpop.f32.mrf.mxu2 }
 0x14e   : > { %v1819_v43 = vpop.f32.mrf.mxu1  ;;  %v1102_v44 = vpop.f32.mrf.mxu0 }
 0x14f   : > { %v1112_v45 = vpack.c.bf16 %v1102_v44, %v1100_v40 }
 0x151   : > { %1619 = vmatmul.msk.bf16.gmra.mxu1 %vm473_vm0, %v1112_v45  ;;  %v1478_v45 = vadd.f32 -1.0, %v397_v24 }
 0x152   : > { %v1823_v46 = vpop.f32.mrf.mxu3 }
 0x154   : > { %v821_v47 = vpop.f32.mrf.mxu2 }
 0x155   : > { %v831_v48 = vpack.c.bf16 %v821_v47, %v819_v42 }
 0x156   : > { %v1831_v50 = vpop.f32.mrf.mxu1 }
 0x157   : > { %1583 = vmatmul.msk.bf16.gmra.mxu3 %vm473_vm0, %v831_v48 }
 0x15a   : > { %v1834_v51 = vpop.f32.mrf.mxu3 }
 0x15e   : > { %v1146_v56 = vpop.f32.mrf.mxu1 }
 0x15f   : > { %v1186_v63 = vsub.f32 %v1146_v56, %v1476_v58  ;;  %v335_v56 = vld [vmem:[%s1828_s28 + $0x20] sm:$0xff]  ;;  %v658_v58 = vsub.f32 %v1799_v23, %v642_v38 }
 0x160   : > { %vm351_vm9 = vcmp.gt.s32.totalorder %v335_v56, 0 }
 0x161   : > { %v1234_v6 = vmul.f32 0.5, %v1186_v63  ;;  %v1202_v9 = vand.u32 2147483647, %v1186_v63  ;;  %v706_v23 = vmul.f32 0.5, %v658_v58  ;;  %v1902_v24 = vsel %vm351_vm9, 1.0, %v1673_v52 }
 0x162   : > { %v1847_v59 = vpop.f32.mrf.mxu3 }
 0x163   : > { %v1250_v20 = vmul.f32 %v1234_v6, %v1186_v63  ;;  %v1620_v27 = vadd.f32 -0.5, %v1202_v9  ;;  %vm1871_vm6 = vcmp.lt.f32.partialorder %v1202_v9, 1.0  ;;  %v1549_v63 = vadd.f32 -0.5, %v673_v30 }
 0x165   : > { %v1282_v48 = vsel %vm1871_vm6, %v1250_v20, %v1620_v27  ;;  %v753_v14 = vsel %vm1885_vm8, %v721_v62, %v1549_v63  ;;  %v1479_v20 = vadd.f32 -1.0, %v398_v5  ;;  %v908_v63 = vld [vmem:[%s1855_s10 + $0x18] sm:$0xff] }
 0x166   : > { %v1148_v1 = vpop.f32.mrf.mxu1 }
 0x167   : > { %v1187_v22 = vsub.f32 %v1148_v1, %v1477_v7 }
 0x169   : > { %v1235_v42 = vmul.f32 0.5, %v1187_v22  ;;  %v1203_v49 = vand.u32 2147483647, %v1187_v22 }
 0x16a   : > { %v865_v8 = vpop.f32.mrf.mxu3 }
 0x16b   : > { %v921_v10 = vsub.f32 %v865_v8, %v905_v2  ;;  %v643_v2 = vld [vmem:[%s1844_s7 + $0x18] sm:$0xff]  ;;  %v1251_v3 = vmul.f32 %v1235_v42, %v1187_v22  ;;  %v1621_v7 = vadd.f32 -0.5, %v1203_v49  ;;  %vm1892_vm11 = vcmp.lt.f32.partialorder %v1203_v49, 1.0 }
 0x16c   : > { %v399_v42 = vmul.f32 2.0, %v1902_v24 }
 0x16d   : > { %v937_v15 = vand.u32 2147483647, %v921_v10  ;;  %v969_v16 = vmul.f32 0.5, %v921_v10 }
 0x16e   : > { %v1151_v25 = vpop.f32.mrf.mxu1 }
 0x16f   : > { %vm953_vm5 = vcmp.lt.f32.partialorder %v937_v15, 1.0  ;;  %v985_v28 = vmul.f32 %v969_v16, %v921_v10  ;;  %v1584_v19 = vadd.f32 -0.5, %v937_v15  ;;  %v1188_v4 = vsub.f32 %v1151_v25, %v1478_v45 }
 0x170   : > { %v674_v10 = vand.u32 2147483647, %v658_v58  ;;  %v659_v15 = vsub.f32 %v1804_v29, %v643_v2  ;;  %v1283_v25 = vsel %vm1892_vm11, %v1251_v3, %v1621_v7  ;;  %v722_v29 = vmul.f32 %v706_v23, %v658_v58 }
 0x171   : > { %v1017_v40 = vsel %vm953_vm5, %v985_v28, %v1584_v19  ;;  %v1236_v17 = vmul.f32 0.5, %v1188_v4  ;;  %v1204_v27 = vand.u32 2147483647, %v1188_v4  ;;  %v336_v19 = vld [vmem:[%s1828_s28 + $0x28] sm:$0xff]  ;;  %v1480_v3 = vadd.f32 -1.0, %v399_v42 }
 0x172   : > { %v1033_v44 = vadd.f32 %v1017_v40, %v752_v35  ;;  %v867_v47 = vpop.f32.mrf.mxu3  ;;  %vm1907_vm12 = vcmp.lt.f32.partialorder %v674_v10, 1.0  ;;  %v1550_v32 = vadd.f32 -0.5, %v674_v10  ;;  %v675_v37 = vand.u32 2147483647, %v659_v15 }
 0x173   : > { %v922_v54 = vsub.f32 %v867_v47, %v906_v34  ;;  %v644_v34 = vld [vmem:[%s1844_s7 + $0x20] sm:$0xff]  ;;  %vm352_vm13 = vcmp.gt.s32.totalorder %v336_v19, 0  ;;  %v1622_v49 = vadd.f32 -0.5, %v1204_v27  ;;  %v707_v57 = vmul.f32 0.5, %v659_v15 }
 0x174   : > { %v1298_v61 = vadd.f32 %v1282_v48, %v1033_v44  ;;  %v1252_v44 = vmul.f32 %v1236_v17, %v1188_v4  ;;  %v660_v58 = vsub.f32 %v1809_v33, %v644_v34  ;;  %vm1914_vm15 = vcmp.lt.f32.partialorder %v1204_v27, 1.0 }
 0x175   : > { %v938_v0 = vand.u32 2147483647, %v922_v54  ;;  %v970_v1 = vmul.f32 0.5, %v922_v54  ;;  %v1922_v5 = vsel %vm352_vm13, 1.0, %v1673_v52  ;;  %vm1924_vm0 = vcmp.lt.f32.partialorder %v675_v37, 1.0 }
 0x176   : > { %v1153_v6 = vpop.f32.mrf.mxu1  ;;  %v1284_v33 = vsel %vm1914_vm15, %v1252_v44, %v1622_v49  ;;  %v723_v10 = vmul.f32 %v707_v57, %v659_v15  ;;  %v1551_v23 = vadd.f32 -0.5, %v675_v37  ;;  %v676_v12 = vand.u32 2147483647, %v660_v58 }
 0x177   : > { %vm954_vm10 = vcmp.lt.f32.partialorder %v938_v0, 1.0  ;;  %v986_v8 = vmul.f32 %v970_v1, %v922_v54  ;;  %v1585_v9 = vadd.f32 -0.5, %v938_v0  ;;  %v1189_v47 = vsub.f32 %v1153_v6, %v1479_v20 }
 0x178   : > { %v754_v0 = vsel %vm1907_vm12, %v722_v29, %v1550_v32  ;;  %v400_v20 = vmul.f32 2.0, %v1922_v5  ;;  %v708_v29 = vmul.f32 0.5, %v660_v58  ;;  %v755_v34 = vsel %vm1924_vm0, %v723_v10, %v1551_v23  ;;  %v910_v23 = vld [vmem:[%s1855_s10 + $0x28] sm:$0xff] }
 0x179   : > { %v1018_v16 = vsel %vm954_vm10, %v986_v8, %v1585_v9  ;;  %v1237_v1 = vmul.f32 0.5, %v1189_v47  ;;  %v1205_v7 = vand.u32 2147483647, %v1189_v47  ;;  %v337_v9 = vld [vmem:[%s1828_s28 + $0x30] sm:$0xff]  ;;  %vm1948_vm4 = vcmp.lt.f32.partialorder %v676_v12, 1.0 }
 0x17a   : > { %v1034_v18 = vadd.f32 %v1018_v16, %v753_v14  ;;  %v870_v22 = vpop.f32.mrf.mxu3  ;;  %v645_v14 = vld [vmem:[%s1844_s7 + $0x28] sm:$0xff]  ;;  %v1336_v16 = vadd.f32 %v1850_v60, %v1837_v53  ;;  %vm353_vm1 = vcmp.gt.s32.totalorder %v337_v9, 0  ;;  %v909_v60 = vld [vmem:[%s1855_s10 + $0x20] sm:$0xff]  ;;  %v1481_v42 = vadd.f32 -1.0, %v400_v20 }
 0x17b   : > { %v923_v28 = vsub.f32 %v870_v22, %v907_v13  ;;  %v1253_v22 = vmul.f32 %v1237_v1, %v1189_v47  ;;  %v1623_v19 = vadd.f32 -0.5, %v1205_v7  ;;  %v661_v32 = vsub.f32 %v1814_v39, %v645_v14 }
 0x17c   : > { %v1299_v35 = vadd.f32 %v1283_v25, %v1034_v18  ;;  %vm1936_vm3 = vcmp.lt.f32.partialorder %v1205_v7, 1.0 }
 0x17d   : > { %v939_v38 = vand.u32 2147483647, %v923_v28  ;;  %v971_v40 = vmul.f32 0.5, %v923_v28  ;;  %v1285_v47 = vsel %vm1936_vm3, %v1253_v22, %v1623_v19  ;;  %v677_v57 = vand.u32 2147483647, %v661_v32  ;;  %v339_v19 = vld [vmem:[%s1828_s28 + $0x40] sm:$0xff] }
 0x17e   : > { %v1314_v45 = vadd.f32 %v1299_v35, %v1298_v61  ;;  %v1156_v48 = vpop.f32.mrf.mxu1  ;;  %v1337_v35 = vadd.f32 %v1862_v11, %v1336_v16  ;;  %v338_v11 = vld [vmem:[%s1828_s28 + $0x38] sm:$0xff]  ;;  %v709_v9 = vmul.f32 0.5, %v661_v32  ;;  %vm355_vm9 = vcmp.gt.s32.totalorder %v339_v19, 0 }
 0x17f   : > { %vm955_vm14 = vcmp.lt.f32.partialorder %v939_v38, 1.0  ;;  %v987_v54 = vmul.f32 %v971_v40, %v923_v28  ;;  %v1586_v56 = vadd.f32 -0.5, %v939_v38  ;;  %v1190_v27 = vsub.f32 %v1156_v48, %v1480_v3 }
 0x180   : > { %vm354_vm5 = vcmp.gt.s32.totalorder %v338_v11, 0  ;;  %vm1969_vm8 = vcmp.lt.f32.partialorder %v677_v57, 1.0 }
 0x181   : > { %v1019_v61 = vsel %vm955_vm14, %v987_v54, %v1586_v56  ;;  %v1238_v38 = vmul.f32 0.5, %v1190_v27  ;;  %v1206_v48 = vand.u32 2147483647, %v1190_v27  ;;  %v724_v54 = vmul.f32 %v708_v29, %v660_v58 }
 0x182   : > { %v1035_v2 = vadd.f32 %v1019_v61, %v754_v0  ;;  %v872_v4 = vpop.f32.mrf.mxu3  ;;  %v1552_v56 = vadd.f32 -0.5, %v676_v12  ;;  %v1338_v0 = vadd.f32 %v1882_v55, %v1337_v35  ;;  %v1467_v22 = vsel %vm354_vm5, 1.0, %v1673_v52 }
 0x183   : > { %v924_v8 = vsub.f32 %v872_v4, %v908_v63  ;;  %v646_v63 = vld [vmem:[%s1844_s7 + $0x30] sm:$0xff]  ;;  %v1254_v3 = vmul.f32 %v1238_v38, %v1190_v27  ;;  %v1624_v7 = vadd.f32 -0.5, %v1206_v48  ;;  %vm1959_vm7 = vcmp.lt.f32.partialorder %v1206_v48, 1.0 }
 0x184   : > { %v1300_v13 = vadd.f32 %v1284_v33, %v1035_v2  ;;  %v662_v10 = vsub.f32 %v1819_v43, %v646_v63  ;;  %v756_v12 = vsel %vm1948_vm4, %v724_v54, %v1552_v56  ;;  %v402_v35 = vmul.f32 2.0, %v1467_v22  ;;  %v647_v56 = vld [vmem:[%s1844_s7 + $0x38] sm:$0xff] }
 0x185   : > { %v940_v17 = vand.u32 2147483647, %v924_v8  ;;  %v972_v18 = vmul.f32 0.5, %v924_v8 }
 0x186   : > { %v1315_v25 = vadd.f32 %v1314_v45, %v1300_v13  ;;  %v1158_v28 = vpop.f32.mrf.mxu1  ;;  %v1946_v45 = vsel %vm353_vm1, 1.0, %v1673_v52  ;;  %v1339_v13 = vadd.f32 %v1902_v24, %v1338_v0  ;;  %v725_v24 = vmul.f32 %v709_v9, %v661_v32 }
 0x187   : > { %vm956_vm2 = vcmp.lt.f32.partialorder %v940_v17, 1.0  ;;  %v988_v15 = vmul.f32 %v972_v18, %v924_v8  ;;  %v1587_v30 = vadd.f32 -0.5, %v940_v17  ;;  %v401_v2 = vmul.f32 2.0, %v1946_v45 }
 0x188   : > { %v1191_v6 = vsub.f32 %v1158_v28, %v1481_v42  ;;  %v1340_v53 = vadd.f32 %v1922_v5, %v1339_v13  ;;  %v710_v48 = vmul.f32 0.5, %v662_v10  ;;  %v911_v5 = vld [vmem:[%s1855_s10 + $0x30] sm:$0xff] }
 0x189   : > { %v1020_v37 = vsel %vm956_vm2, %v988_v15, %v1587_v30  ;;  %v1482_v18 = vadd.f32 -1.0, %v401_v2  ;;  %v1553_v15 = vadd.f32 -0.5, %v677_v57  ;;  %v678_v30 = vand.u32 2147483647, %v662_v10 }
 0x18a   : > { %v1036_v40 = vadd.f32 %v1020_v37, %v755_v34  ;;  %v875_v44 = vpop.f32.mrf.mxu3  ;;  %v1239_v16 = vmul.f32 0.5, %v1191_v6  ;;  %v1207_v27 = vand.u32 2147483647, %v1191_v6  ;;  %v648_v37 = vld [vmem:[%s1844_s7 + $0x40] sm:$0xff]  ;;  %v1341_v57 = vadd.f32 %v1946_v45, %v1340_v53 }
 0x18b   : > { %v925_v49 = vsub.f32 %v875_v44, %v909_v60  ;;  %v1984_v11 = vsub.f32 %v1797_v21, %v648_v37  ;;  %v757_v54 = vsel %vm1969_vm8, %v725_v24, %v1553_v15  ;;  %v1468_v2 = vsel %vm355_vm9, 1.0, %v1673_v52 }
 0x18c   : > { %v1301_v62 = vadd.f32 %v1285_v47, %v1036_v40  ;;  %v1255_v38 = vmul.f32 %v1239_v16, %v1191_v6  ;;  %v1625_v39 = vadd.f32 -0.5, %v1207_v27  ;;  %vm1978_vm11 = vcmp.lt.f32.partialorder %v1207_v27, 1.0 }
 0x18d   : > { %v941_v61 = vand.u32 2147483647, %v925_v49  ;;  %v973_v1 = vmul.f32 0.5, %v925_v49  ;;  %vm1992_vm12 = vcmp.lt.f32.partialorder %v678_v30, 1.0  ;;  %v1554_v45 = vadd.f32 -0.5, %v678_v30 }
 0x18e   : > { %v1316_v4 = vadd.f32 %v1315_v25, %v1301_v62  ;;  %v1161_v33 = vpop.f32.mrf.mxu1  ;;  %v1286_v25 = vsel %vm1959_vm7, %v1254_v3, %v1624_v7  ;;  %v1287_v21 = vsel %vm1978_vm11, %v1255_v38, %v1625_v39  ;;  %v726_v7 = vmul.f32 %v710_v48, %v662_v10 }
 0x18f   : > { %vm957_vm6 = vcmp.lt.f32.partialorder %v941_v61, 1.0  ;;  %v989_v8 = vmul.f32 %v973_v1, %v925_v49  ;;  %v1588_v58 = vadd.f32 -0.5, %v941_v61  ;;  %v1192_v42 = vsub.f32 %v1161_v33, %v1482_v18  ;;  %v340_v33 = vld [vmem:[%s1828_s28 + $0x48] sm:$0xff] }
 0x190   : > { %v1483_v61 = vadd.f32 -1.0, %v402_v35  ;;  %v1342_v9 = vadd.f32 %v1467_v22, %v1341_v57  ;;  %vm356_vm13 = vcmp.gt.s32.totalorder %v340_v33, 0  ;;  %v912_v22 = vld [vmem:[%s1855_s10 + $0x38] sm:$0xff]  ;;  %v680_v27 = vand.u32 2147483647, %v1984_v11  ;;  %v913_v33 = vld [vmem:[%s1855_s10 + $0x40] sm:$0xff] }
 0x191   : > { %v1021_v14 = vsel %vm957_vm6, %v989_v8, %v1588_v58  ;;  %v1240_v63 = vmul.f32 0.5, %v1192_v42  ;;  %v663_v8 = vsub.f32 %v1831_v50, %v647_v56 }
 0x192   : > { %v1037_v17 = vadd.f32 %v1021_v14, %v756_v12  ;;  %v877_v20 = vpop.f32.mrf.mxu3  ;;  %v403_v12 = vmul.f32 2.0, %v1468_v2  ;;  %v1343_v24 = vadd.f32 %v1468_v2, %v1342_v9  ;;  %v342_v2 = vld [vmem:[%s1828_s28 + $0x58] sm:$0xff]  ;;  %vm2020_vm3 = vcmp.lt.f32.partialorder %v680_v27, 1.0 }
 0x193   : > { %v926_v28 = vsub.f32 %v877_v20, %v910_v23  ;;  %v1256_v13 = vmul.f32 %v1240_v63, %v1192_v42  ;;  %v711_v10 = vmul.f32 0.5, %v663_v8  ;;  %vm358_vm5 = vcmp.gt.s32.totalorder %v342_v2, 0 }
 0x194   : > { %v1302_v29 = vadd.f32 %v1286_v25, %v1037_v17  ;;  %v679_v25 = vand.u32 2147483647, %v663_v8 }
 0x195   : > { %v942_v60 = vand.u32 2147483647, %v926_v28  ;;  %v974_v34 = vmul.f32 0.5, %v926_v28 }
 0x196   : > { %v1317_v40 = vadd.f32 %v1316_v4, %v1302_v29  ;;  %v1163_v44 = vpop.f32.mrf.mxu1  ;;  %v1208_v4 = vand.u32 2147483647, %v1192_v42  ;;  %v1484_v29 = vadd.f32 -1.0, %v403_v12  ;;  %vm2014_vm0 = vcmp.lt.f32.partialorder %v679_v25, 1.0 }
 0x197   : > { %vm958_vm10 = vcmp.lt.f32.partialorder %v942_v60, 1.0  ;;  %v990_v47 = vmul.f32 %v974_v34, %v926_v28  ;;  %v1589_v32 = vadd.f32 -0.5, %v942_v60  ;;  %v1193_v16 = vsub.f32 %v1163_v44, %v1483_v61 }
 0x198   : > { %v1626_v18 = vadd.f32 -0.5, %v1208_v4  ;;  %vm2000_vm15 = vcmp.lt.f32.partialorder %v1208_v4, 1.0  ;;  %v758_v28 = vsel %vm1992_vm12, %v726_v7, %v1554_v45  ;;  %v1469_v60 = vsel %vm356_vm13, 1.0, %v1673_v52 }
 0x199   : > { %v1022_v62 = vsel %vm958_vm10, %v990_v47, %v1589_v32  ;;  %v1241_v15 = vmul.f32 0.5, %v1193_v16  ;;  %v712_v34 = vmul.f32 0.5, %v1984_v11  ;;  %v1209_v37 = vand.u32 2147483647, %v1193_v16  ;;  %v649_v32 = vld [vmem:[%s1844_s7 + $0x48] sm:$0xff] }
 0x19a   : > { %v1038_v0 = vadd.f32 %v1022_v62, %v757_v54  ;;  %v880_v1 = vpop.f32.mrf.mxu3  ;;  %v1288_v35 = vsel %vm2000_vm15, %v1256_v13, %v1626_v18  ;;  %v727_v44 = vmul.f32 %v711_v10, %v663_v8  ;;  %v1555_v39 = vadd.f32 -0.5, %v679_v25  ;;  %v650_v25 = vld [vmem:[%s1844_s7 + $0x50] sm:$0xff] }
 0x19b   : > { %v927_v6 = vsub.f32 %v880_v1, %v911_v5  ;;  %v404_v5 = vmul.f32 2.0, %v1469_v60  ;;  %v1344_v54 = vadd.f32 %v1469_v60, %v1343_v24  ;;  %v1257_v56 = vmul.f32 %v1241_v15, %v1193_v16  ;;  %v343_v16 = vld [vmem:[%s1828_s28 + $0x60] sm:$0xff]  ;;  %v344_v60 = vld [vmem:[%s1828_s28 + $0x68] sm:$0xff] }
 0x19c   : > { %v1303_v58 = vadd.f32 %v1287_v21, %v1038_v0  ;;  %v1627_v0 = vadd.f32 -0.5, %v1209_v37  ;;  %v728_v21 = vmul.f32 %v712_v34, %v1984_v11  ;;  %v665_v4 = vsub.f32 %v1802_v26, %v649_v32 }
 0x19d   : > { %v943_v55 = vand.u32 2147483647, %v927_v6  ;;  %v975_v23 = vmul.f32 0.5, %v927_v6  ;;  %vm2026_vm4 = vcmp.lt.f32.partialorder %v1209_v37, 1.0  ;;  %v759_v7 = vsel %vm2014_vm0, %v727_v44, %v1555_v39 }
 0x19e   : > { %v1318_v14 = vadd.f32 %v1317_v40, %v1303_v58  ;;  %v1166_v17 = vpop.f32.mrf.mxu1  ;;  %v341_v40 = vld [vmem:[%s1828_s28 + $0x50] sm:$0xff]  ;;  %v1485_v8 = vadd.f32 -1.0, %v404_v5  ;;  %v1556_v26 = vadd.f32 -0.5, %v680_v27  ;;  %v1289_v12 = vsel %vm2026_vm4, %v1257_v56, %v1627_v0 }
 0x19f   : > { %vm959_vm14 = vcmp.lt.f32.partialorder %v943_v55, 1.0  ;;  %v991_v20 = vmul.f32 %v975_v23, %v927_v6  ;;  %v1590_v43 = vadd.f32 -0.5, %v943_v55  ;;  %v1194_v62 = vsub.f32 %v1166_v17, %v1484_v29 }
 0x1a0   : > { %vm357_vm1 = vcmp.gt.s32.totalorder %v341_v40, 0  ;;  %v681_v17 = vand.u32 2147483647, %v665_v4  ;;  %v713_v18 = vmul.f32 0.5, %v665_v4  ;;  %vm359_vm6 = vcmp.gt.s32.totalorder %v343_v16, 0 }
 0x1a1   : > { %v1023_v19 = vsel %vm959_vm14, %v991_v20, %v1590_v43  ;;  %v1470_v58 = vsel %vm357_vm1, 1.0, %v1673_v52  ;;  %v1242_v9 = vmul.f32 0.5, %v1194_v62  ;;  %v1210_v13 = vand.u32 2147483647, %v1194_v62 }
 0x1a2   : > { %v1039_v30 = vadd.f32 %v1023_v19, %v758_v28  ;;  %v882_v53 = vpop.f32.mrf.mxu3  ;;  %v1345_v11 = vadd.f32 %v1470_v58, %v1344_v54  ;;  %v405_v43 = vmul.f32 2.0, %v1470_v58  ;;  %v1471_v28 = vsel %vm358_vm5, 1.0, %v1673_v52 }
 0x1a3   : > { %v928_v38 = vsub.f32 %v882_v53, %v912_v22  ;;  %v1258_v19 = vmul.f32 %v1242_v9, %v1194_v62  ;;  %v1628_v15 = vadd.f32 -0.5, %v1210_v13  ;;  %v760_v34 = vsel %vm2020_vm3, %v728_v21, %v1556_v26 }
 0x1a4   : > { %v1304_v47 = vadd.f32 %v1288_v35, %v1039_v30  ;;  %v1346_v24 = vadd.f32 %v1471_v28, %v1345_v11  ;;  %v666_v35 = vsub.f32 %v1807_v31, %v650_v25  ;;  %vm2043_vm8 = vcmp.lt.f32.partialorder %v1210_v13, 1.0 }
 0x1a5   : > { %v944_v48 = vand.u32 2147483647, %v928_v38  ;;  %v976_v49 = vmul.f32 0.5, %v928_v38  ;;  %vm2048_vm9 = vcmp.lt.f32.partialorder %v681_v17, 1.0  ;;  %v1472_v39 = vsel %vm359_vm6, 1.0, %v1673_v52 }
 0x1a6   : > { %v1319_v57 = vadd.f32 %v1318_v14, %v1304_v47  ;;  %v1168_v63 = vpop.f32.mrf.mxu1  ;;  %v1486_v32 = vadd.f32 -1.0, %v405_v43  ;;  %vm360_vm10 = vcmp.gt.s32.totalorder %v344_v60, 0  ;;  %v729_v31 = vmul.f32 %v713_v18, %v665_v4 }
 0x1a7   : > { %vm960_vm2 = vcmp.lt.f32.partialorder %v944_v48, 1.0  ;;  %v992_v61 = vmul.f32 %v976_v49, %v928_v38  ;;  %v1591_v1 = vadd.f32 -0.5, %v944_v48  ;;  %v1195_v10 = vsub.f32 %v1168_v63, %v1485_v8  ;;  %v914_v38 = vld [vmem:[%s1855_s10 + $0x48] sm:$0xff] }
 0x1a8   : > { %v1347_v49 = vadd.f32 %v1472_v39, %v1346_v24  ;;  %v1290_v5 = vsel %vm2043_vm8, %v1258_v19, %v1628_v15  ;;  %v1557_v62 = vadd.f32 -0.5, %v681_v17  ;;  %v682_v63 = vand.u32 2147483647, %v666_v35 }
 0x1a9   : > { %v1024_v45 = vsel %vm960_vm2, %v992_v61, %v1591_v1  ;;  %v1243_v42 = vmul.f32 0.5, %v1195_v10  ;;  %v1211_v54 = vand.u32 2147483647, %v1195_v10  ;;  %v406_v61 = vmul.f32 2.0, %v1471_v28  ;;  %v651_v1 = vld [vmem:[%s1844_s7 + $0x58] sm:$0xff] }
 0x1aa   : > { %v1040_v55 = vadd.f32 %v1024_v45, %v759_v7  ;;  %v885_v23 = vpop.f32.mrf.mxu3  ;;  %v2058_v6 = vsel %vm360_vm10, 1.0, %v1673_v52  ;;  %v667_v11 = vsub.f32 %v1812_v36, %v651_v1  ;;  %v761_v13 = vsel %vm2048_vm9, %v729_v31, %v1557_v62 }
 0x1ab   : > { %v929_v14 = vsub.f32 %v885_v23, %v913_v33  ;;  %v1259_v2 = vmul.f32 %v1243_v42, %v1195_v10  ;;  %v1348_v7 = vadd.f32 %v2058_v6, %v1347_v49  ;;  %v1629_v45 = vadd.f32 -0.5, %v1211_v54  ;;  %v652_v49 = vld [vmem:[%s1844_s7 + $0x60] sm:$0xff] }
 0x1ac   : > { %v1305_v20 = vadd.f32 %v1289_v12, %v1040_v55  ;;  %v346_v55 = vld [vmem:[%s1828_s28 + $0x78] sm:$0xff]  ;;  %v714_v23 = vmul.f32 0.5, %v666_v35  ;;  %vm2063_vm13 = vcmp.lt.f32.partialorder %v1211_v54, 1.0  ;;  %v915_v12 = vld [vmem:[%s1855_s10 + $0x50] sm:$0xff]  ;;  %v1487_v16 = vadd.f32 -1.0, %v406_v61 }
 0x1ad   : > { %v945_v50 = vand.u32 2147483647, %v929_v14  ;;  %v977_v22 = vmul.f32 0.5, %v929_v14  ;;  %vm362_vm14 = vcmp.gt.s32.totalorder %v346_v55, 0  ;;  %vm2074_vm15 = vcmp.lt.f32.partialorder %v682_v63, 1.0 }
 0x1ae   : > { %v1320_v27 = vadd.f32 %v1319_v57, %v1305_v20  ;;  %v1171_v53 = vpop.f32.mrf.mxu1  ;;  %v345_v57 = vld [vmem:[%s1828_s28 + $0x70] sm:$0xff]  ;;  %v1291_v10 = vsel %vm2063_vm13, %v1259_v2, %v1629_v45  ;;  %v730_v28 = vmul.f32 %v714_v23, %v666_v35  ;;  %v1558_v19 = vadd.f32 -0.5, %v682_v63 }
 0x1af   : > { %vm961_vm7 = vcmp.lt.f32.partialorder %v945_v50, 1.0  ;;  %v993_v30 = vmul.f32 %v977_v22, %v929_v14  ;;  %v1592_v29 = vadd.f32 -0.5, %v945_v50  ;;  %v1196_v33 = vsub.f32 %v1171_v53, %v1486_v32 }
 0x1b0   : > { %vm361_vm11 = vcmp.gt.s32.totalorder %v345_v57, 0  ;;  %v2081_v53 = vsel %vm362_vm14, 1.0, %v1673_v52  ;;  %v408_v45 = vmul.f32 2.0, %v2058_v6 }
 0x1b1   : > { %v1025_v44 = vsel %vm961_vm7, %v993_v30, %v1592_v29  ;;  %v2071_v17 = vsel %vm361_vm11, 1.0, %v1673_v52  ;;  %v1244_v18 = vmul.f32 0.5, %v1196_v33  ;;  %v1212_v50 = vand.u32 2147483647, %v1196_v33 }
 0x1b2   : > { %v1041_v47 = vadd.f32 %v1025_v44, %v760_v34  ;;  %v887_v48 = vpop.f32.mrf.mxu3  ;;  %v1349_v25 = vadd.f32 %v2071_v17, %v1348_v7  ;;  %v407_v29 = vmul.f32 2.0, %v1472_v39  ;;  %v916_v39 = vld [vmem:[%s1855_s10 + $0x58] sm:$0xff]  ;;  %v762_v52 = vsel %vm2074_vm15, %v730_v28, %v1558_v19 }
 0x1b3   : > { %v930_v56 = vsub.f32 %v887_v48, %v914_v38  ;;  %v1260_v60 = vmul.f32 %v1244_v18, %v1196_v33  ;;  %v1630_v40 = vadd.f32 -0.5, %v1212_v50  ;;  %vm2084_vm1 = vcmp.lt.f32.partialorder %v1212_v50, 1.0 }
 0x1b4   : > { %v1306_v0 = vadd.f32 %v1290_v5, %v1041_v47  ;;  %v1350_v38 = vadd.f32 %v2081_v53, %v1349_v25  ;;  %v715_v47 = vmul.f32 0.5, %v667_v11  ;;  %v1488_v5 = vadd.f32 -1.0, %v407_v29 }
 0x1b5   : > { %v946_v3 = vand.u32 2147483647, %v930_v56  ;;  %v978_v21 = vmul.f32 0.5, %v930_v56  ;;  %v1292_v61 = vsel %vm2084_vm1, %v1260_v60, %v1630_v40  ;;  %v1489_v50 = vadd.f32 -1.0, %v408_v45 }
 0x1b6   : > { %v1321_v4 = vadd.f32 %v1320_v27, %v1306_v0  ;;  %v1173_v9 = vpop.f32.mrf.mxu1  ;;  %v683_v27 = vand.u32 2147483647, %v667_v11  ;;  %v1351_v48 = vrot.slane %v1350_v38, 4  ;;  %v731_v2 = vmul.f32 %v715_v47, %v667_v11 }
 0x1b7   : > { %vm962_vm12 = vcmp.lt.f32.partialorder %v946_v3, 1.0  ;;  %v994_v8 = vmul.f32 %v978_v21, %v930_v56  ;;  %v1593_v58 = vadd.f32 -0.5, %v946_v3  ;;  %v1197_v37 = vsub.f32 %v1173_v9, %v1487_v16  ;;  %v917_v16 = vld [vmem:[%s1855_s10 + $0x60] sm:$0xff] }
 0x1b8   : > { %v1352_v63 = vadd.f32 %v1351_v48, %v1350_v38  ;;  %vm2092_vm2 = vcmp.lt.f32.partialorder %v683_v27, 1.0  ;;  %v1559_v3 = vadd.f32 -0.5, %v683_v27  ;;  %v668_v21 = vsub.f32 %v1817_v41, %v652_v49 }
 0x1b9   : > { %v1026_v14 = vsel %vm962_vm12, %v994_v8, %v1593_v58  ;;  %v1213_v54 = vand.u32 2147483647, %v1197_v37  ;;  %v1245_v56 = vmul.f32 0.5, %v1197_v37 }
 0x1ba   : > { %v1042_v20 = vadd.f32 %v1026_v14, %v761_v13  ;;  %v890_v43 = vpop.f32.mrf.mxu3  ;;  %v1353_v8 = vrot.slane %v1352_v63, 2  ;;  %v684_v14 = vand.u32 2147483647, %v668_v21  ;;  %v763_v6 = vsel %vm2092_vm2, %v731_v2, %v1559_v3 }
 0x1bb   : > { %v931_v22 = vsub.f32 %v890_v43, %v915_v12  ;;  %v1261_v58 = vmul.f32 %v1245_v56, %v1197_v37  ;;  %v1631_v9 = vadd.f32 -0.5, %v1213_v54  ;;  %vm2101_vm4 = vcmp.lt.f32.partialorder %v1213_v54, 1.0 }
 0x1bc   : > { %v1307_v24 = vadd.f32 %v1291_v10, %v1042_v20  ;;  %v1354_v13 = vadd.f32 %v1353_v8, %v1352_v63  ;;  %v716_v18 = vmul.f32 0.5, %v668_v21  ;;  %v653_v20 = vld [vmem:[%s1844_s7 + $0x68] sm:$0xff]  ;;  %vm2116_vm5 = vcmp.lt.f32.partialorder %v684_v14, 1.0 }
 0x1bd   : > { %v947_v15 = vand.u32 2147483647, %v931_v22  ;;  %v979_v30 = vmul.f32 0.5, %v931_v22  ;;  %v1293_v28 = vsel %vm2101_vm4, %v1261_v58, %v1631_v9 }
 0x1be   : > { %v1322_v34 = vadd.f32 %v1321_v4, %v1307_v24  ;;  %v1176_v44 = vpop.f32.mrf.mxu1  ;;  %v1355_v25 = vrot.slane %v1354_v13, 1  ;;  %v732_v60 = vmul.f32 %v716_v18, %v668_v21 }
 0x1bf   : > { %vm963_vm0 = vcmp.lt.f32.partialorder %v947_v15, 1.0  ;;  %v995_v42 = vmul.f32 %v979_v30, %v931_v22  ;;  %v1594_v35 = vadd.f32 -0.5, %v947_v15  ;;  %v1198_v23 = vsub.f32 %v1176_v44, %v1488_v5  ;;  %v654_v5 = vld [vmem:[%s1844_s7 + $0x70] sm:$0xff] }
 0x1c0   : > { %v1356_v24 = vadd.f32 %v1355_v25, %v1354_v13  ;;  %v669_v30 = vsub.f32 %v1823_v46, %v653_v20  ;;  %v409_v44 = vmul.f32 2.0, %v2071_v17  ;;  %v670_v3 = vsub.f32 %v1834_v51, %v654_v5  ;;  %v919_v13 = vld [vmem:[%s1855_s10 + $0x70] sm:$0xff] }
 0x1c1   : > { %v1027_v31 = vsel %vm963_vm0, %v995_v42, %v1594_v35  ;;  %v1246_v36 = vmul.f32 0.5, %v1198_v23  ;;  %v1214_v19 = vand.u32 2147483647, %v1198_v23 }
 0x1c2   : > { %v1043_v57 = vadd.f32 %v1027_v31, %v762_v52  ;;  %v892_v62 = vpop.f32.mrf.mxu3  ;;  %1357 = vst [vmem:[%s2112_s13 + $0x1] sm:$0x1] %v1356_v24  ;;  %v685_v48 = vand.u32 2147483647, %v669_v30  ;;  %v918_v52 = vld [vmem:[%s1855_s10 + $0x68] sm:$0xff]  ;;  %v717_v31 = vmul.f32 0.5, %v669_v30 }
 0x1c3   : > { %v932_v1 = vsub.f32 %v892_v62, %v916_v39  ;;  %v1262_v40 = vmul.f32 %v1246_v36, %v1198_v23  ;;  %v1632_v47 = vadd.f32 -0.5, %v1214_v19  ;;  %vm2123_vm7 = vcmp.lt.f32.partialorder %v1214_v19, 1.0 }
 0x1c4   : > { %v1308_v4 = vadd.f32 %v1292_v61, %v1043_v57  ;;  %v1490_v17 = vadd.f32 -1.0, %v409_v44  ;;  %vm2133_vm8 = vcmp.lt.f32.partialorder %v685_v48, 1.0 }
 0x1c5   : > { %v948_v33 = vand.u32 2147483647, %v932_v1  ;;  %v980_v7 = vmul.f32 0.5, %v932_v1  ;;  %v1294_v0 = vsel %vm2123_vm7, %v1262_v40, %v1632_v47 }
 0x1c6   : > { %v1323_v55 = vadd.f32 %v1322_v34, %v1308_v4  ;;  %v1178_v11 = vpop.f32.mrf.mxu1  ;;  %v1560_v34 = vadd.f32 -0.5, %v684_v14  ;;  %v733_v4 = vmul.f32 %v717_v31, %v669_v30  ;;  %v686_v14 = vand.u32 2147483647, %v670_v3 }
 0x1c7   : > { %vm964_vm3 = vcmp.lt.f32.partialorder %v948_v33, 1.0  ;;  %v996_v26 = vmul.f32 %v980_v7, %v932_v1  ;;  %v1595_v12 = vadd.f32 -0.5, %v948_v33  ;;  %v1199_v35 = vsub.f32 %v1178_v11, %v1489_v50 }
 0x1c8   : > { %v764_v49 = vsel %vm2116_vm5, %v732_v60, %v1560_v34  ;;  %v1561_v33 = vadd.f32 -0.5, %v685_v48  ;;  %v718_v11 = vmul.f32 0.5, %v670_v3  ;;  %vm702_vm11 = vcmp.lt.f32.partialorder %v686_v14, 1.0 }
 0x1c9   : > { %v1028_v43 = vsel %vm964_vm3, %v996_v26, %v1595_v12  ;;  %v1247_v57 = vmul.f32 0.5, %v1199_v35  ;;  %v1215_v61 = vand.u32 2147483647, %v1199_v35 }
 0x1ca   : > { %v1044_v10 = vadd.f32 %v1028_v43, %v763_v6  ;;  %v895_v22 = vpop.f32.mrf.mxu3  ;;  %v765_v51 = vsel %vm2133_vm8, %v733_v4, %v1561_v33  ;;  %v734_v50 = vmul.f32 %v718_v11, %v670_v3 }
 0x1cb   : > { %v933_v27 = vsub.f32 %v895_v22, %v917_v16  ;;  %v1263_v8 = vmul.f32 %v1247_v57, %v1199_v35  ;;  %v1633_v23 = vadd.f32 -0.5, %v1215_v61  ;;  %vm1231_vm10 = vcmp.lt.f32.partialorder %v1215_v61, 1.0  ;;  %v655_v16 = vld [vmem:[%s1844_s7 + $0x78] sm:$0xff] }
 0x1cc   : > { %v1309_v29 = vadd.f32 %v1293_v28, %v1044_v10  ;;  %v1562_v28 = vadd.f32 -0.5, %v686_v14  ;;  %v671_v19 = vsub.f32 %v1847_v59, %v655_v16 }
 0x1cd   : > { %v949_v37 = vand.u32 2147483647, %v933_v27  ;;  %v981_v38 = vmul.f32 0.5, %v933_v27  ;;  %v1295_v25 = vsel %vm1231_vm10, %v1263_v8, %v1633_v23 }
 0x1ce   : > { %v1324_v42 = vadd.f32 %v1323_v55, %v1309_v29  ;;  %v1181_v56 = vpop.f32.mrf.mxu1  ;;  %v410_v55 = vmul.f32 2.0, %v2081_v53  ;;  %v766_v40 = vsel %vm702_vm11, %v734_v50, %v1562_v28  ;;  %v719_v35 = vmul.f32 0.5, %v671_v19 }
 0x1cf   : > { %vm965_vm6 = vcmp.lt.f32.partialorder %v949_v37, 1.0  ;;  %v997_v32 = vmul.f32 %v981_v38, %v933_v27  ;;  %v1596_v39 = vadd.f32 -0.5, %v949_v37  ;;  %v1200_v9 = vsub.f32 %v1181_v56, %v1490_v17  ;;  %v920_v38 = vld [vmem:[%s1855_s10 + $0x78] sm:$0xff] }
 0x1d0   : > { %v1491_v20 = vadd.f32 -1.0, %v410_v55 }
 0x1d1   : > { %v1029_v54 = vsel %vm965_vm6, %v997_v32, %v1596_v39  ;;  %v1248_v6 = vmul.f32 0.5, %v1200_v9  ;;  %v1216_v36 = vand.u32 2147483647, %v1200_v9 }
 0x1d2   : > { %v1045_v62 = vadd.f32 %v1029_v54, %v764_v49  ;;  %v897_v63 = vpop.f32.mrf.mxu3  ;;  %v735_v49 = vmul.f32 %v719_v35, %v671_v19 }
 0x1d3   : > { %v934_v1 = vsub.f32 %v897_v63, %v918_v52  ;;  %v1264_v15 = vmul.f32 %v1248_v6, %v1200_v9  ;;  %v1634_v60 = vadd.f32 -0.5, %v1216_v36  ;;  %vm1232_vm13 = vcmp.lt.f32.partialorder %v1216_v36, 1.0 }
 0x1d4   : > { %v1310_v21 = vadd.f32 %v1294_v0, %v1045_v62 }
 0x1d5   : > { %v950_v7 = vand.u32 2147483647, %v934_v1  ;;  %v982_v45 = vmul.f32 0.5, %v934_v1  ;;  %v1296_v59 = vsel %vm1232_vm13, %v1264_v15, %v1634_v60 }
 0x1d6   : > { %v1325_v58 = vadd.f32 %v1324_v42, %v1310_v21  ;;  %v1183_v53 = vpop.f32.mrf.mxu1  ;;  %v687_v42 = vand.u32 2147483647, %v671_v19 }
 0x1d7   : > { %vm966_vm9 = vcmp.lt.f32.partialorder %v950_v7, 1.0  ;;  %v998_v26 = vmul.f32 %v982_v45, %v934_v1  ;;  %v1597_v12 = vadd.f32 -0.5, %v950_v7  ;;  %v1201_v29 = vsub.f32 %v1183_v53, %v1491_v20 }
 0x1d8   : > { %v1563_v31 = vadd.f32 -0.5, %v687_v42  ;;  %vm703_vm14 = vcmp.lt.f32.partialorder %v687_v42, 1.0 }
 0x1d9   : > { %v1030_v41 = vsel %vm966_vm9, %v998_v26, %v1597_v12  ;;  %v1249_v47 = vmul.f32 0.5, %v1201_v29  ;;  %v1217_v48 = vand.u32 2147483647, %v1201_v29 }
 0x1da   : > { %v1046_v18 = vadd.f32 %v1030_v41, %v765_v51  ;;  %v900_v43 = vpop.f32.mrf.mxu3  ;;  %v767_v0 = vsel %vm703_vm14, %v735_v49, %v1563_v31 }
 0x1db   : > { %v935_v10 = vsub.f32 %v900_v43, %v919_v13  ;;  %v1265_v56 = vmul.f32 %v1249_v47, %v1201_v29  ;;  %v1635_v62 = vadd.f32 -0.5, %v1217_v48  ;;  %vm1233_vm0 = vcmp.lt.f32.partialorder %v1217_v48, 1.0 }
 0x1dc   : > { %v1311_v22 = vadd.f32 %v1295_v25, %v1046_v18 }
 0x1dd   : > { %v951_v27 = vand.u32 2147483647, %v935_v10  ;;  %v983_v24 = vmul.f32 0.5, %v935_v10  ;;  %v1297_v2 = vsel %vm1233_vm0, %v1265_v56, %v1635_v62 }
 0x1de   : > { %v1326_v30 = vadd.f32 %v1325_v58, %v1311_v22 }
 0x1df   : > { %vm967_vm12 = vcmp.lt.f32.partialorder %v951_v27, 1.0  ;;  %v999_v34 = vmul.f32 %v983_v24, %v935_v10  ;;  %v1598_v37 = vadd.f32 -0.5, %v951_v27 }
 0x1e1   : > { %v1031_v44 = vsel %vm967_vm12, %v999_v34, %v1598_v37 }
 0x1e2   : > { %v1047_v32 = vadd.f32 %v1031_v44, %v766_v40  ;;  %v902_v39 = vpop.f32.mrf.mxu3 }
 0x1e3   : > { %v936_v46 = vsub.f32 %v902_v39, %v920_v38 }
 0x1e4   : > { %v1312_v52 = vadd.f32 %v1296_v59, %v1047_v32 }
 0x1e5   : > { %v952_v5 = vand.u32 2147483647, %v936_v46  ;;  %v984_v54 = vmul.f32 0.5, %v936_v46 }
 0x1e6   : > { %v1327_v57 = vadd.f32 %v1326_v30, %v1312_v52 }
 0x1e7   : > { %vm968_vm15 = vcmp.lt.f32.partialorder %v952_v5, 1.0  ;;  %v1000_v17 = vmul.f32 %v984_v54, %v936_v46  ;;  %v1599_v63 = vadd.f32 -0.5, %v952_v5 }
 0x1e9   : > { %v1032_v61 = vsel %vm968_vm15, %v1000_v17, %v1599_v63 }
 0x1ea   : > { %v1048_v1 = vadd.f32 %v1032_v61, %v767_v0 }
 0x1ec   : > { %v1313_v3 = vadd.f32 %v1297_v2, %v1048_v1 }
 0x1ee   : > { %v1328_v21 = vadd.f32 %v1327_v57, %v1313_v3 }
 0x1f0   : > { %v1329_v4 = vrot.slane %v1328_v21, 4 }
 0x1f2   : > { %v1330_v33 = vadd.f32 %v1329_v4, %v1328_v21 }
 0x1f4   : > { %v1331_v7 = vrot.slane %v1330_v33, 2 }
 0x1f6   : > { %v1332_v45 = vadd.f32 %v1331_v7, %v1330_v33 }
 0x1f8   : > { %v1333_v8 = vrot.slane %v1332_v45, 1 }
 0x1fa   : > { %v1334_v58 = vadd.f32 %v1333_v8, %v1332_v45 }
 0x1fc   : > { %1335 = vst [vmem:[%s2112_s13] sm:$0x1] %v1334_v58 }
 0x1fd PF: > { %s16_s21 = sadd.s32 1, %s1671_s21  }
 0x1fe   : > { %p13_p4 = scmp.ge.s32.totalorder %s16_s21, 4  }
 0x200   :  { %15 = sbr.rel (!%p13_p4) target bundleno = 1 (0x1), region = 85 }

// kernel: netwithloss_forward.2
= control target key start
LH: loop header
LB: loop body
LE: loop exit
PB: predicated region body
PF: predicated region fallthrough
CT: control target
= control target key end

     0   :  { %s7719_s18 = smov 0   ;;  %s15430_s0 = inlined_call_operand.vmem [shape: bf16[2048,8], index: 0, kind: input, shape index: {}]   ;;  %s15431_s1 = inlined_call_operand.vmem [shape: bf16[8,128], index: 1, kind: input, shape index: {}]   ;;  %s15432_s2 = inlined_call_operand.vmem [shape: f32[1,128], index: 2, kind: input, shape index: {}]   ;;  %s15433_s3 = inlined_call_operand.vmem [shape: s32[2048,1], index: 3, kind: input, shape index: {}]   ;;  %s15434_s4 = inlined_call_operand.vmem [shape: f32[2048,3], index: 4, kind: output, shape index: {0}]   ;;  %s15435_s5 = inlined_call_operand.vmem [shape: f32[2,3,128], index: 5, kind: output, shape index: {1}]  }
   0x1 LB: > { %s7725_s19 = sadd.s32 4294967295, %s7684_s18   ;;  %p6233_p0 = scmp.ge.s32.totalorder %s7684_s18, 1  ;;  %s7684_s18 = sphi %s7719_s18, %s16_s18  }
   0x2   : > { %p202_p1 = scmp.lt.s32.totalorder %s7684_s18, 3 }
   0x4   : > { %p203_p2 = pnand %p6233_p0, %p202_p1 }
   0x6   : > { %206 = sbr.rel (%p203_p2) target bundleno = 1165 (0x48d), region = 36 }
   0xb   : > { %v390_v0 = vld [vmem:[%s15431_s1] sm:$0xf]  ;;  %vm908_vm0 = vcmask 1043456   ;;  %s6234_s22 = sshll.u32 %s7725_s19, 7  ;;  %v7686_v1 = vmov 0   ;;  %vm15480_vm1 = vcmask 64512  }
   0xc   : > { %6900 = vset.pattern.permute.xlu2 %v7686_v1  ;;  %6899 = vset.pattern.permute.xlu1 %v7686_v1  ;;  %v910_v2 = vsel %vm908_vm0, %v390_v0, 0  ;;  %p240_p3 = scmp.lt.s32.totalorder %s6234_s22, 255  ;;  %vm1241_vm9 = vcmask 23552   ;;  %p257_p4 = scmp.lt.s32.totalorder %s7725_s19, 1 }
   0xd   : > { %6898 = vset.pattern.permute.xlu0 %v7686_v1  ;;  %919 = vmatpush.bf16.msra.mxu0 %v910_v2 }
   0xe   : > { %6884 = vmatpush.bf16.msra.mxu1 %v910_v2  ;;  %6885 = vmatpush.bf16.msra.mxu2 %v910_v2  ;;  %s16999_s22 = smov (!%p240_p3, %s6234_s22), 255  ;;  %s17001_s19 = smov (!%p257_p4, %s7725_s19), 1 }
   0xf   : > { %6886 = vmatpush.bf16.msra.mxu3 %v910_v2  ;;  %s6237_s23 = sshll.u32 %s16999_s22, 3  ;;  %s6235_s24 = sshll.u32 %s16999_s22, 2 }
  0x10   : > { %s7742_s27 = scalar_lea.vmem %s15433_s3, %s6237_s23  ;;  %s7750_s30 = scalar_lea.vmem %s15430_s0, %s6235_s24 }
  0x11   : > { %v1379_v3 = vld [vmem:[%s7742_s27 + $0x20] sm:$0xff]  ;;  %v1377_v4 = vld [vmem:[%s7742_s27 + $0x10] sm:$0xff]  ;;  %v1380_v9 = vld [vmem:[%s7742_s27 + $0x28] sm:$0xff]  ;;  %s7898_s10 = scalar_lea.vmem %s15434_s4, %s6237_s23  ;;  %s6240_s29 = sshll.u32 %s17001_s19, 2 }
  0x12   : > { %v1375_v5 = vld [vmem:[%s7742_s27] sm:$0xff]  ;;  %1517 = vperm.xlu2 %6900, %v1379_v3   ;;  %1511 = vperm.xlu1 %6899, %v1377_v4   ;;  %v1378_v10 = vld [vmem:[%s7742_s27 + $0x18] sm:$0xff]  ;;  %v1376_v12 = vld [vmem:[%s7742_s27 + $0x8] sm:$0xff]  ;;  %s15180_s6 = scalar_lea.vmem %s15435_s5, %s6240_s29 }
  0x13   : > { %v6820_v6 = vld [vmem:[%s7750_s30] sm:$0xff]  ;;  %1505 = vperm.xlu0 %6898, %v1375_v5   ;;  %v1382_v14 = vld [vmem:[%s7742_s27 + $0x38] sm:$0xff]  ;;  %v1381_v15 = vld [vmem:[%s7742_s27 + $0x30] sm:$0xff] }
  0x14   : > { %v6836_v7 = vld [vmem:[%s7750_s30 + $0x80] sm:$0xff]  ;;  %6497 = vmatmul.msk.bf16.vlgmr.msra.gmra.mxu0 %vm15480_vm1, %v6820_v6  ;;  %v6821_v16 = vld [vmem:[%s7750_s30 + $0x8] sm:$0xff]  ;;  %v1386_v20 = vld [vmem:[%s7742_s27 + $0x58] sm:$0xff] }
  0x15   : > { %v6852_v8 = vld [vmem:[%s7750_s30 + $0x100] sm:$0xff]  ;;  %6513 = vmatmul.msk.bf16.vlgmr.msra.gmra.mxu1 %vm15480_vm1, %v6836_v7  ;;  %v6837_v17 = vld [vmem:[%s7750_s30 + $0x88] sm:$0xff]  ;;  %v1385_v21 = vld [vmem:[%s7742_s27 + $0x50] sm:$0xff] }
  0x16   : > { %6529 = vmatmul.msk.bf16.vlgmr.msra.gmra.mxu2 %vm15480_vm1, %v6852_v8  ;;  %v6868_v11 = vld [vmem:[%s7750_s30 + $0x180] sm:$0xff]  ;;  %v6853_v18 = vld [vmem:[%s7750_s30 + $0x108] sm:$0xff]  ;;  %v1389_v23 = vld [vmem:[%s7742_s27 + $0x70] sm:$0xff] }
  0x17   : > { %6545 = vmatmul.msk.bf16.vlgmr.msra.gmra.mxu3 %vm15480_vm1, %v6868_v11  ;;  %v1383_v13 = vld [vmem:[%s7742_s27 + $0x40] sm:$0xff]  ;;  %v6869_v19 = vld [vmem:[%s7750_s30 + $0x188] sm:$0xff]  ;;  %v6822_v26 = vld [vmem:[%s7750_s30 + $0x10] sm:$0xff] }
  0x18   : > { %v1384_v22 = vld [vmem:[%s7742_s27 + $0x48] sm:$0xff]  ;;  %v1387_v25 = vld [vmem:[%s7742_s27 + $0x60] sm:$0xff]  ;;  %v6838_v27 = vld [vmem:[%s7750_s30 + $0x90] sm:$0xff] }
  0x19   : > { %v1388_v24 = vld [vmem:[%s7742_s27 + $0x68] sm:$0xff]  ;;  %v6854_v28 = vld [vmem:[%s7750_s30 + $0x110] sm:$0xff]  ;;  %v1391_v31 = vld [vmem:[%s7742_s27 + $0x80] sm:$0xff] }
  0x1a   : > { %1520 = vperm.xlu2 %6900, %v1380_v9   ;;  %1514 = vperm.xlu1 %6899, %v1378_v10   ;;  %v6870_v29 = vld [vmem:[%s7750_s30 + $0x190] sm:$0xff]  ;;  %v1392_v30 = vld [vmem:[%s7742_s27 + $0x88] sm:$0xff]  ;;  %v1390_v32 = vld [vmem:[%s7742_s27 + $0x78] sm:$0xff] }
  0x1b   : > { %1508 = vperm.xlu0 %6898, %v1376_v12   ;;  %v1395_v33 = vld [vmem:[%s7742_s27 + $0xa0] sm:$0xff]  ;;  %v1394_v34 = vld [vmem:[%s7742_s27 + $0x98] sm:$0xff]  ;;  %v1393_v35 = vld [vmem:[%s7742_s27 + $0x90] sm:$0xff] }
  0x1c   : > { %v6823_v36 = vld [vmem:[%s7750_s30 + $0x18] sm:$0xff]  ;;  %v1397_v41 = vld [vmem:[%s7742_s27 + $0xb0] sm:$0xff]  ;;  %v1396_v42 = vld [vmem:[%s7742_s27 + $0xa8] sm:$0xff] }
  0x1d   : > { %v6839_v37 = vld [vmem:[%s7750_s30 + $0x98] sm:$0xff]  ;;  %v1401_v43 = vld [vmem:[%s7742_s27 + $0xd0] sm:$0xff]  ;;  %v1400_v44 = vld [vmem:[%s7742_s27 + $0xc8] sm:$0xff] }
  0x1e   : > { %v6855_v38 = vld [vmem:[%s7750_s30 + $0x118] sm:$0xff]  ;;  %v1399_v45 = vld [vmem:[%s7742_s27 + $0xc0] sm:$0xff]  ;;  %v1404_v50 = vld [vmem:[%s7742_s27 + $0xe8] sm:$0xff] }
  0x1f   : > { %v6871_v39 = vld [vmem:[%s7750_s30 + $0x198] sm:$0xff]  ;;  %v6824_v46 = vld [vmem:[%s7750_s30 + $0x20] sm:$0xff]  ;;  %v1405_v55 = vld [vmem:[%s7742_s27 + $0xf0] sm:$0xff] }
  0x20   : > { %v1398_v40 = vld [vmem:[%s7742_s27 + $0xb8] sm:$0xff]  ;;  %v6840_v47 = vld [vmem:[%s7750_s30 + $0xa0] sm:$0xff]  ;;  %v6825_v56 = vld [vmem:[%s7750_s30 + $0x28] sm:$0xff] }
  0x21   : > { %v6856_v48 = vld [vmem:[%s7750_s30 + $0x120] sm:$0xff]  ;;  %v1402_v52 = vld [vmem:[%s7742_s27 + $0xd8] sm:$0xff]  ;;  %v6841_v57 = vld [vmem:[%s7750_s30 + $0xa8] sm:$0xff] }
  0x22   : > { %1529 = vperm.xlu2 %6900, %v1383_v13   ;;  %1526 = vperm.xlu1 %6899, %v1382_v14   ;;  %v6872_v49 = vld [vmem:[%s7750_s30 + $0x1a0] sm:$0xff]  ;;  %v1406_v54 = vld [vmem:[%s7742_s27 + $0xf8] sm:$0xff]  ;;  %v6857_v58 = vld [vmem:[%s7750_s30 + $0x128] sm:$0xff] }
  0x23   : > { %1523 = vperm.xlu0 %6898, %v1381_v15   ;;  %v1403_v51 = vld [vmem:[%s7742_s27 + $0xe0] sm:$0xff]  ;;  %v6873_v59 = vld [vmem:[%s7750_s30 + $0x1a8] sm:$0xff]  ;;  %v1410_v60 = vld [vmem:[%s7742_s27 + $0x118] sm:$0xff]  ;;  %v1370_v15 = vlaneseq }
  0x24   : > { %6498 = vmatmul.msk.bf16.gmra.mxu0 %vm15480_vm1, %v6821_v16  ;;  %v1407_v53 = vld [vmem:[%s7742_s27 + $0x100] sm:$0xff]  ;;  %v1409_v61 = vld [vmem:[%s7742_s27 + $0x110] sm:$0xff]  ;;  %v1408_v62 = vld [vmem:[%s7742_s27 + $0x108] sm:$0xff] }
  0x25   : > { %6514 = vmatmul.msk.bf16.gmra.mxu1 %vm15480_vm1, %v6837_v17  ;;  %v1413_v63 = vld [vmem:[%s7742_s27 + $0x130] sm:$0xff]  ;;  %v1412_v0 = vld [vmem:[%s7742_s27 + $0x128] sm:$0xff]  ;;  %v1411_v1 = vld [vmem:[%s7742_s27 + $0x120] sm:$0xff] }
  0x26   : > { %6530 = vmatmul.msk.bf16.gmra.mxu2 %vm15480_vm1, %v6853_v18  ;;  %v6826_v2 = vld [vmem:[%s7750_s30 + $0x30] sm:$0xff]  ;;  %v1416_v6 = vld [vmem:[%s7742_s27 + $0x148] sm:$0xff]  ;;  %v1415_v7 = vld [vmem:[%s7742_s27 + $0x140] sm:$0xff] }
  0x27   : > { %6546 = vmatmul.msk.bf16.gmra.mxu3 %vm15480_vm1, %v6869_v19  ;;  %v6842_v3 = vld [vmem:[%s7750_s30 + $0xb0] sm:$0xff]  ;;  %v1414_v8 = vld [vmem:[%s7742_s27 + $0x138] sm:$0xff]  ;;  %v1419_v9 = vld [vmem:[%s7742_s27 + $0x160] sm:$0xff]  ;;  %v1371_v19 = vand.u32 127, %v1370_v15 }
  0x28   : > { %v6858_v4 = vld [vmem:[%s7750_s30 + $0x130] sm:$0xff]  ;;  %v1418_v10 = vld [vmem:[%s7742_s27 + $0x158] sm:$0xff]  ;;  %v6845_v15 = vld [vmem:[%s7750_s30 + $0xc8] sm:$0xff] }
  0x29   : > { %v6874_v5 = vld [vmem:[%s7750_s30 + $0x1b0] sm:$0xff]  ;;  %v6827_v12 = vld [vmem:[%s7750_s30 + $0x38] sm:$0xff]  ;;  %vm1372_vm2 = vcmp.ge.s32.totalorder %v1371_v19, 3  ;;  %vm1373_vm3 = vcmp.lt.s32.totalorder %v1371_v19, 83 }
  0x2a   : > { %1538 = vperm.xlu2 %6900, %v1386_v20   ;;  %1535 = vperm.xlu1 %6899, %v1385_v21   ;;  %v1417_v11 = vld [vmem:[%s7742_s27 + $0x150] sm:$0xff]  ;;  %v6843_v13 = vld [vmem:[%s7750_s30 + $0xb8] sm:$0xff]  ;;  %vm7869_vm4 = vmand %vm1372_vm2, %vm1373_vm3 }
  0x2b   : > { %1532 = vperm.xlu0 %6898, %v1384_v22   ;;  %v6859_v14 = vld [vmem:[%s7750_s30 + $0x138] sm:$0xff]  ;;  %v1421_v22 = vld [vmem:[%s7742_s27 + $0x170] sm:$0xff] }
  0x2c   : > { %v6875_v18 = vld [vmem:[%s7750_s30 + $0x1b8] sm:$0xff] }
  0x2d   : > { %v1422_v21 = vld [vmem:[%s7742_s27 + $0x178] sm:$0xff] }
  0x32   : > { %1547 = vperm.xlu2 %6900, %v1389_v23   ;;  %1544 = vperm.xlu1 %6899, %v1388_v24   ;;  %v1420_v23 = vld [vmem:[%s7742_s27 + $0x168] sm:$0xff]  ;;  %v7867_v24 = vadd.s32 4294967294, %v1371_v19 }
  0x33   : > { %1541 = vperm.xlu0 %6898, %v1387_v25  }
  0x34   : > { %6499 = vmatmul.msk.bf16.gmra.mxu0 %vm15480_vm1, %v6822_v26 }
  0x35   : > { %6515 = vmatmul.msk.bf16.gmra.mxu1 %vm15480_vm1, %v6838_v27  ;;  %v7880_v27 = vld [vmem:[%s15432_s2] ss:$0 sm:$0xff] }
  0x36   : > { %6531 = vmatmul.msk.bf16.gmra.mxu2 %vm15480_vm1, %v6854_v28 }
  0x37   : > { %6547 = vmatmul.msk.bf16.gmra.mxu3 %vm15480_vm1, %v6870_v29  ;;  %v1425_v29 = vld [vmem:[%s7742_s27 + $0x190] sm:$0xff] }
  0x3a   : > { %1556 = vperm.xlu2 %6900, %v1392_v30   ;;  %1553 = vperm.xlu1 %6899, %v1391_v31   ;;  %v1424_v30 = vld [vmem:[%s7742_s27 + $0x188] sm:$0xff] }
  0x3b   : > { %1550 = vperm.xlu0 %6898, %v1390_v32   ;;  %v1423_v32 = vld [vmem:[%s7742_s27 + $0x180] sm:$0xff] }
  0x42   : > { %1565 = vperm.xlu2 %6900, %v1395_v33   ;;  %1562 = vperm.xlu1 %6899, %v1394_v34   ;;  %v6828_v33 = vld [vmem:[%s7750_s30 + $0x40] sm:$0xff] }
  0x43   : > { %1559 = vperm.xlu0 %6898, %v1393_v35   ;;  %v6844_v34 = vld [vmem:[%s7750_s30 + $0xc0] sm:$0xff] }
  0x44   : > { %6500 = vmatmul.msk.bf16.gmra.mxu0 %vm15480_vm1, %v6823_v36  ;;  %v6860_v36 = vld [vmem:[%s7750_s30 + $0x140] sm:$0xff] }
  0x45   : > { %6516 = vmatmul.msk.bf16.gmra.mxu1 %vm15480_vm1, %v6839_v37 }
  0x46   : > { %6532 = vmatmul.msk.bf16.gmra.mxu2 %vm15480_vm1, %v6855_v38 }
  0x47   : > { %6548 = vmatmul.msk.bf16.gmra.mxu3 %vm15480_vm1, %v6871_v39 }
  0x4a   : > { %1574 = vperm.xlu2 %6900, %v1398_v40   ;;  %1571 = vperm.xlu1 %6899, %v1397_v41   ;;  %v15457_v40 = vmov 0.0  }
  0x4b   : > { %1568 = vperm.xlu0 %6898, %v1396_v42  }
  0x52   : > { %1583 = vperm.xlu2 %6900, %v1401_v43   ;;  %1580 = vperm.xlu1 %6899, %v1400_v44  }
  0x53   : > { %1577 = vperm.xlu0 %6898, %v1399_v45  }
  0x54   : > { %6501 = vmatmul.msk.bf16.gmra.mxu0 %vm15480_vm1, %v6824_v46 }
  0x55   : > { %6517 = vmatmul.msk.bf16.gmra.mxu1 %vm15480_vm1, %v6840_v47 }
  0x56   : > { %6533 = vmatmul.msk.bf16.gmra.mxu2 %vm15480_vm1, %v6856_v48  ;;  %v1428_v48 = vld [vmem:[%s7742_s27 + $0x1a8] sm:$0xff] }
  0x57   : > { %6549 = vmatmul.msk.bf16.gmra.mxu3 %vm15480_vm1, %v6872_v49  ;;  %v1427_v49 = vld [vmem:[%s7742_s27 + $0x1a0] sm:$0xff] }
  0x5a   : > { %1592 = vperm.xlu2 %6900, %v1404_v50   ;;  %1589 = vperm.xlu1 %6899, %v1403_v51  }
  0x5b   : > { %1586 = vperm.xlu0 %6898, %v1402_v52  }
  0x62   : > { %1601 = vperm.xlu2 %6900, %v1407_v53   ;;  %1598 = vperm.xlu1 %6899, %v1406_v54   ;;  %v1426_v53 = vld [vmem:[%s7742_s27 + $0x198] sm:$0xff] }
  0x63   : > { %1595 = vperm.xlu0 %6898, %v1405_v55  }
  0x64   : > { %6502 = vmatmul.msk.bf16.gmra.mxu0 %vm15480_vm1, %v6825_v56 }
  0x65   : > { %6518 = vmatmul.msk.bf16.gmra.mxu1 %vm15480_vm1, %v6841_v57 }
  0x66   : > { %6534 = vmatmul.msk.bf16.gmra.mxu2 %vm15480_vm1, %v6857_v58 }
  0x67   : > { %6550 = vmatmul.msk.bf16.gmra.mxu3 %vm15480_vm1, %v6873_v59 }
  0x6a   : > { %1610 = vperm.xlu2 %6900, %v1410_v60   ;;  %1607 = vperm.xlu1 %6899, %v1409_v61  }
  0x6b   : > { %1604 = vperm.xlu0 %6898, %v1408_v62  }
  0x6c   : > { %v7861_v20 = vpop.permute.xlu2 %1517 }
  0x6d   : > { %vm1892_vm12 = vcmp.eq.s32.totalorder %v7861_v20, %v7867_v24 }
  0x6e   : > { %vm2020_vm0 = vmand %vm7869_vm4, %vm1892_vm12 }
  0x6f   : > { %v7989_v58 = vsel %vm2020_vm0, 1.0, %v15457_v40 }
  0x72   : > { %1619 = vperm.xlu2 %6900, %v1413_v63   ;;  %1616 = vperm.xlu1 %6899, %v1412_v0  }
  0x73   : > { %1613 = vperm.xlu0 %6898, %v1411_v1  }
  0x74   : > { %6503 = vmatmul.msk.bf16.gmra.mxu0 %vm15480_vm1, %v6826_v2  ;;  %v7886_v31 = vpop.permute.xlu2 %1520 }
  0x75   : > { %6519 = vmatmul.msk.bf16.gmra.mxu1 %vm15480_vm1, %v6842_v3  ;;  %vm1893_vm15 = vcmp.eq.s32.totalorder %v7886_v31, %v7867_v24 }
  0x76   : > { %6535 = vmatmul.msk.bf16.gmra.mxu2 %vm15480_vm1, %v6858_v4  ;;  %vm2021_vm2 = vmand %vm7869_vm4, %vm1893_vm15 }
  0x77   : > { %6551 = vmatmul.msk.bf16.gmra.mxu3 %vm15480_vm1, %v6874_v5  ;;  %v8005_v62 = vsel %vm2021_vm2, 1.0, %v15457_v40  ;;  %v6876_v5 = vld [vmem:[%s7750_s30 + $0x1c0] sm:$0xff] }
  0x7a   : > { %1628 = vperm.xlu2 %6900, %v1416_v6   ;;  %1625 = vperm.xlu1 %6899, %v1415_v7  }
  0x7b   : > { %1622 = vperm.xlu0 %6898, %v1414_v8  }
  0x7c   : > { %v7991_v59 = vpop.permute.xlu2 %1529 }
  0x82   : > { %1637 = vperm.xlu2 %6900, %v1419_v9   ;;  %1634 = vperm.xlu1 %6899, %v1418_v10   ;;  %v1431_v10 = vld [vmem:[%s7742_s27 + $0x1c0] sm:$0xff] }
  0x83   : > { %1631 = vperm.xlu0 %6898, %v1417_v11   ;;  %v1430_v11 = vld [vmem:[%s7742_s27 + $0x1b8] sm:$0xff] }
  0x84   : > { %v7853_v16 = vpop.permute.xlu1 %1511  ;;  %6504 = vmatmul.msk.bf16.gmra.mxu0 %vm15480_vm1, %v6827_v12 }
  0x85   : > { %6520 = vmatmul.msk.bf16.gmra.mxu1 %vm15480_vm1, %v6843_v13  ;;  %v7857_v17 = vpop.permute.xlu0 %1505  ;;  %vm1890_vm6 = vcmp.eq.s32.totalorder %v7853_v16, %v7867_v24  ;;  %v1429_v13 = vld [vmem:[%s7742_s27 + $0x1b0] sm:$0xff] }
  0x86   : > { %6536 = vmatmul.msk.bf16.gmra.mxu2 %vm15480_vm1, %v6859_v14  ;;  %vm1888_vm5 = vcmp.eq.s32.totalorder %v7857_v17, %v7867_v24  ;;  %vm2018_vm11 = vmand %vm7869_vm4, %vm1890_vm6  ;;  %v6829_v14 = vld [vmem:[%s7750_s30 + $0x48] sm:$0xff] }
  0x87   : > { %6552 = vmatmul.msk.bf16.gmra.mxu3 %vm15480_vm1, %v6875_v18  ;;  %vm2016_vm7 = vmand %vm7869_vm4, %vm1888_vm5  ;;  %v7953_v44 = vsel %vm2018_vm11, 1.0, %v15457_v40  ;;  %vm1896_vm11 = vcmp.eq.s32.totalorder %v7991_v59, %v7867_v24 }
  0x88   : > { %v7924_v41 = vsel %vm2016_vm7, 1.0, %v15457_v40  ;;  %vm8035_vm0 = vmand %vm7869_vm4, %vm1896_vm11 }
  0x8a   : > { %1646 = vperm.xlu2 %6900, %v1422_v21   ;;  %1643 = vperm.xlu1 %6899, %v1421_v22   ;;  %v6861_v22 = vld [vmem:[%s7750_s30 + $0x148] sm:$0xff] }
  0x8b   : > { %1640 = vperm.xlu0 %6898, %v1420_v23   ;;  %v8060_v23 = vsel %vm8035_vm0, 1.0, %v15457_v40 }
  0x8c   : > { %v7875_v26 = vpop.permute.xlu1 %1514  ;;  %15646 = vst [vmem:[#allocation2_spill] sm:$0xff] %v8060_v23 }
  0x8d   : > { %v7882_v28 = vpop.permute.xlu0 %1508  ;;  %vm1891_vm8 = vcmp.eq.s32.totalorder %v7875_v26, %v7867_v24 }
  0x8e   : > { %vm1889_vm10 = vcmp.eq.s32.totalorder %v7882_v28, %v7867_v24  ;;  %vm7931_vm13 = vmand %vm7869_vm4, %vm1891_vm8 }
  0x8f   : > { %vm2017_vm14 = vmand %vm7869_vm4, %vm1889_vm10  ;;  %v7972_v50 = vsel %vm7931_vm13, 1.0, %v15457_v40 }
  0x90   : > { %v7956_v45 = vsel %vm2017_vm14, 1.0, %v15457_v40 }
  0x91   : > { %v921_v35 = vpop.f32.mrf.mxu0  ;;  %v5996_v47 = vadd.f32 %v7956_v45, %v7924_v41 }
  0x92   : > { %v7911_v37 = vadd.f32 %v7880_v27, %v921_v35  ;;  %v1001_v38 = vpop.f32.mrf.mxu1  ;;  %1655 = vperm.xlu2 %6900, %v1425_v29   ;;  %1652 = vperm.xlu1 %6899, %v1424_v30   ;;  %v8075_v35 = vpop.permute.xlu2 %1538 }
  0x93   : > { %v7919_v39 = vadd.f32 %v7880_v27, %v1001_v38  ;;  %1649 = vperm.xlu0 %6898, %v1423_v32   ;;  %v5997_v54 = vadd.f32 %v7953_v44, %v5996_v47  ;;  %v1434_v47 = vld [vmem:[%s7742_s27 + $0x1d8] sm:$0xff] }
  0x94   : > { %1242 = vst.msk [vmem:[%s7898_s10] sm:$0xff] %vm1241_vm9, %v7911_v37  ;;  %v2912_v43 = vsub.f32 0.0, %v7911_v37  ;;  %6505 = vmatmul.msk.bf16.gmra.mxu0 %vm15480_vm1, %v6828_v33  ;;  %v7974_v51 = vpop.permute.xlu1 %1526 }
  0x95   : > { %6521 = vmatmul.msk.bf16.gmra.mxu1 %vm15480_vm1, %v6844_v34  ;;  %1274 = vst.msk [vmem:[%s7898_s10 + $0x100] sm:$0xff] %vm1241_vm9, %v7919_v39  ;;  %v7983_v55 = vpop.permute.xlu0 %1523  ;;  %vm15437_vm3 = vcmp.eq.s32.totalorder %v7974_v51, %v7867_v24  ;;  %v5998_v61 = vadd.f32 %v7972_v50, %v5997_v54 }
  0x96   : > { %6537 = vmatmul.msk.bf16.gmra.mxu2 %vm15480_vm1, %v6860_v36  ;;  %v3040_v46 = vmul.f32 1.442695, %v2912_v43  ;;  %vm15436_vm7 = vcmp.eq.s32.totalorder %v7983_v55, %v7867_v24  ;;  %vm2023_vm13 = vmand %vm7869_vm4, %vm15437_vm3 }
  0x97   : > { %v5999_v0 = vadd.f32 %v7989_v58, %v5998_v61  ;;  %vm2022_vm14 = vmand %vm7869_vm4, %vm15436_vm7  ;;  %v8046_v12 = vsel %vm2023_vm13, 1.0, %v15457_v40  ;;  %6553 = vmatmul.msk.bf16.gmra.mxu3 %vm15480_vm1, %v6876_v5  ;;  %v1432_v61 = vld [vmem:[%s7742_s27 + $0x1c8] sm:$0xff] }
  0x98   : > { %6902 = vpow2.f32 %v3040_v46  ;;  %v8041_v9 = vsel %vm2022_vm14, 1.0, %v15457_v40  ;;  %vm1899_vm14 = vcmp.eq.s32.totalorder %v8075_v35, %v7867_v24 }
  0x99   : > { %v1081_v52 = vpop.f32.mrf.mxu2  ;;  %v923_v57 = vpop.f32.mrf.mxu0  ;;  %v6000_v7 = vadd.f32 %v8005_v62, %v5999_v0  ;;  %vm8108_vm3 = vmand %vm7869_vm4, %vm1899_vm14 }
  0x9a   : > { %v7986_v56 = vadd.f32 %v7880_v27, %v1081_v52  ;;  %v7996_v60 = vadd.f32 %v7880_v27, %v923_v57  ;;  %1664 = vperm.xlu2 %6900, %v1428_v48   ;;  %1661 = vperm.xlu1 %6899, %v1427_v49   ;;  %v1003_v1 = vpop.f32.mrf.mxu1  ;;  %v1433_v48 = vld [vmem:[%s7742_s27 + $0x1d0] sm:$0xff]  ;;  %v8182_v28 = vpop.permute.xlu2 %1547 }
  0x9b   : > { %1658 = vperm.xlu0 %6898, %v1426_v53   ;;  %v8027_v4 = vadd.f32 %v7880_v27, %v1003_v1  ;;  %v6001_v18 = vadd.f32 %v8041_v9, %v6000_v7  ;;  %v6846_v52 = vld [vmem:[%s7750_s30 + $0xd0] sm:$0xff] }
  0x9c   : > { %1306 = vst.msk [vmem:[%s7898_s10 + $0x200] sm:$0xff] %vm1241_vm9, %v7986_v56  ;;  %v2913_v63 = vsub.f32 0.0, %v7996_v60  ;;  %v8062_v29 = vpop.permute.xlu1 %1535 }
  0x9d   : > { %1243 = vst.msk [vmem:[%s7898_s10 + $0x8] sm:$0xff] %vm1241_vm9, %v7996_v60  ;;  %v6002_v32 = vadd.f32 %v8046_v12, %v6001_v18  ;;  %vm15439_vm2 = vcmp.eq.s32.totalorder %v8062_v29, %v7867_v24  ;;  %v8070_v33 = vpop.permute.xlu0 %1532 }
  0x9e   : > { %v6903_v2 = vpop.eup %6902  ;;  %v3042_v3 = vmul.f32 1.442695, %v2913_v63  ;;  %1275 = vst.msk [vmem:[%s7898_s10 + $0x108] sm:$0xff] %vm1241_vm9, %v8027_v4  ;;  %vm15438_vm13 = vcmp.eq.s32.totalorder %v8070_v33, %v7867_v24  ;;  %vm2026_vm0 = vmand %vm7869_vm4, %vm15439_vm2 }
  0x9f   : > { %v3296_v8 = vadd.f32 1.0, %v6903_v2  ;;  %v6003_v36 = vadd.f32 %v8060_v23, %v6002_v32  ;;  %vm2025_vm7 = vmand %vm7869_vm4, %vm15438_vm13  ;;  %v8118_v1 = vsel %vm2026_vm0, 1.0, %v15457_v40  ;;  %vm7688_vm13 = vmmov 1   ;;  %v6864_v23 = vld [vmem:[%s7750_s30 + $0x160] sm:$0xff] }
  0xa0   : > { %6904 = vpow2.f32 %v3042_v3  ;;  %v8113_v54 = vsel %vm2025_vm7, 1.0, %v15457_v40  ;;  %15650 = vst [vmem:[#allocation4_spill] sm:$0xff] %v8118_v1  ;;  %vm8125_vm2 = vmxor %vm1888_vm5, %vm7688_vm13 }
  0xa1   : > { %6906 = vrcp.f32 %v3296_v8  ;;  %v1083_v19 = vpop.f32.mrf.mxu2  ;;  %v926_v21 = vpop.f32.mrf.mxu0  ;;  %15649 = vst [vmem:[#allocation3_spill] sm:$0xff] %v8113_v54  ;;  %v6004_v2 = vadd.f32 %v8113_v54, %v6003_v36  ;;  %vm2528_vm5 = vmand %vm7869_vm4, %vm8125_vm2  ;;  %vm15442_vm2 = vcmp.eq.s32.totalorder %v8182_v28, %v7867_v24  ;;  %v6863_v54 = vld [vmem:[%s7750_s30 + $0x158] sm:$0xff] }
  0xa2   : > { %6908 = vlog2.f32 %v3296_v8  ;;  %v8065_v30 = vadd.f32 %v7880_v27, %v1083_v19  ;;  %1673 = vperm.xlu2 %6900, %v1431_v10   ;;  %1670 = vperm.xlu1 %6899, %v1430_v11   ;;  %v8073_v34 = vadd.f32 %v7880_v27, %v926_v21  ;;  %v8135_v8 = vsel %vm8108_vm3, 1.0, %v15457_v40  ;;  %vm8169_vm3 = vmxor %vm1889_vm10, %vm7688_vm13 }
  0xa3   : > { %1667 = vperm.xlu0 %6898, %v1429_v13   ;;  %15653 = vst [vmem:[#allocation5_spill] sm:$0xff] %v8135_v8  ;;  %v6005_v13 = vadd.f32 %v8118_v1, %v6004_v2  ;;  %vm2529_vm10 = vmand %vm7869_vm4, %vm8169_vm3  ;;  %v6847_v1 = vld [vmem:[%s7750_s30 + $0xd8] sm:$0xff] }
  0xa4   : > { %1307 = vst.msk [vmem:[%s7898_s10 + $0x208] sm:$0xff] %vm1241_vm9, %v8065_v30  ;;  %6506 = vmatmul.msk.bf16.gmra.mxu0 %vm15480_vm1, %v6829_v14  ;;  %v2914_v57 = vsub.f32 0.0, %v8073_v34 }
  0xa5   : > { %6522 = vmatmul.msk.bf16.gmra.mxu1 %vm15480_vm1, %v6845_v15  ;;  %1244 = vst.msk [vmem:[%s7898_s10 + $0x10] sm:$0xff] %vm1241_vm9, %v8073_v34  ;;  %v1006_v15 = vpop.f32.mrf.mxu1  ;;  %v8150_v19 = vadd.f32 %v8135_v8, %v6005_v13  ;;  %v8174_v13 = vpop.permute.xlu0 %1541 }
  0xa6   : > { %6538 = vmatmul.msk.bf16.gmra.mxu2 %vm15480_vm1, %v6861_v22  ;;  %v6905_v38 = vpop.eup %6904  ;;  %v3044_v14 = vmul.f32 1.442695, %v2914_v57  ;;  %v8153_v21 = vadd.f32 %v7880_v27, %v1006_v15 }
  0xa7   : > { %v6907_v42 = vpop.eup %6906  ;;  %v3297_v46 = vadd.f32 1.0, %v6905_v38  ;;  %v1437_v38 = vld [vmem:[%s7742_s27 + $0x1f0] sm:$0xff] }
  0xa8   : > { %v6909_v49 = vpop.eup %6908  ;;  %v3552_v53 = vmax.f32 %v6907_v42, 0.0001  ;;  %v1436_v42 = vld [vmem:[%s7742_s27 + $0x1e8] sm:$0xff]  ;;  %1276 = vst.msk [vmem:[%s7898_s10 + $0x110] sm:$0xff] %vm1241_vm9, %v8153_v21 }
  0xa9   : > { %v3809_v0 = vmul.f32 0.6931472, %v6909_v49  ;;  %v928_v3 = vpop.f32.mrf.mxu0  ;;  %6910 = vrcp.f32 %v3297_v46  ;;  %v6830_v49 = vld [vmem:[%s7750_s30 + $0x50] sm:$0xff] }
  0xaa   : > { %v3680_v6 = vmin.f32 %v3552_v53, 0.9999  ;;  %v8130_v7 = vadd.f32 %v7880_v27, %v928_v3  ;;  %1682 = vperm.xlu2 %6900, %v1434_v47   ;;  %1679 = vperm.xlu1 %6899, %v1433_v48   ;;  %6912 = vlog2.f32 %v3297_v46  ;;  %v6690_v47 = vsel %vm2528_vm5, 1.0, %v15457_v40  ;;  %v1435_v48 = vld [vmem:[%s7742_s27 + $0x1e0] sm:$0xff]  ;;  %v6862_v3 = vld [vmem:[%s7750_s30 + $0x150] sm:$0xff] }
  0xab   : > { %v4064_v10 = vsub.f32 0.0, %v3809_v0  ;;  %v4448_v17 = vsub.f32 %v2912_v43, %v3809_v0  ;;  %1676 = vperm.xlu0 %6898, %v1432_v61   ;;  %6914 = vpow2.f32 %v3044_v14  ;;  %vm15440_vm5 = vcmp.eq.s32.totalorder %v8174_v13, %v7867_v24 }
  0xac   : > { %v4832_v11 = vsub.f32 1.0, %v3680_v6  ;;  %1245 = vst.msk [vmem:[%s7898_s10 + $0x18] sm:$0xff] %vm1241_vm9, %v8130_v7  ;;  %v5344_v36 = vmul.f32 %v3680_v6, %v3680_v6  ;;  %vm2028_vm3 = vmand %vm7869_vm4, %vm15440_vm5 }
  0xad   : > { %v4192_v37 = vmax.f32 %v4064_v10, -9.2103405  ;;  %v4576_v43 = vmax.f32 %v4448_v17, -9.2103405 }
  0xae   : > { %v4960_v18 = vmul.f32 %v4832_v11, %v4832_v11 }
  0xaf   : > { %v4320_v22 = vmin.f32 %v4192_v37, -0.000100005  ;;  %v4704_v32 = vmin.f32 %v4576_v43, -0.000100005  ;;  %v6911_v46 = vpop.eup %6910  ;;  %v8178_v43 = vpop.permute.xlu1 %1544 }
  0xb0   : > { %v6913_v53 = vpop.eup %6912  ;;  %v3553_v2 = vmax.f32 %v6911_v46, 0.0001  ;;  %vm15441_vm7 = vcmp.eq.s32.totalorder %v8178_v43, %v7867_v24 }
  0xb1   : > { %v5088_v61 = vmul.f32 %v4960_v18, %v4320_v22  ;;  %v5472_v0 = vmul.f32 %v5344_v36, %v4704_v32  ;;  %v3811_v5 = vmul.f32 0.6931472, %v6913_v53  ;;  %v8193_v46 = vpop.f32.mrf.mxu0  ;;  %vm2029_vm0 = vmand %vm7869_vm4, %vm15441_vm7 }
  0xb2   : > { %1691 = vperm.xlu2 %6900, %v1437_v38   ;;  %1688 = vperm.xlu1 %6899, %v1436_v42   ;;  %v3681_v11 = vmin.f32 %v3553_v2, 0.9999  ;;  %v1086_v42 = vpop.f32.mrf.mxu2  ;;  %v1440_v2 = vld [vmem:[%s7742_s27 + $0x208] sm:$0xff]  ;;  %v8230_v6 = vsel %vm2029_vm0, 1.0, %v15457_v40 }
  0xb3   : > { %v5216_v10 = vmul.f32 %v7924_v41, %v5088_v61  ;;  %v5600_v17 = vmul.f32 %v6690_v47, %v5472_v0  ;;  %1685 = vperm.xlu0 %6898, %v1435_v48   ;;  %v4065_v14 = vsub.f32 0.0, %v3811_v5  ;;  %v4449_v37 = vsub.f32 %v2913_v63, %v3811_v5  ;;  %v6915_v41 = vpop.eup %6914  ;;  %15659 = vst [vmem:[#allocation7_spill] sm:$0xff] %v8230_v6 }
  0xb4   : > { %6507 = vmatmul.msk.bf16.gmra.mxu0 %vm15480_vm1, %v6830_v49  ;;  %v4833_v15 = vsub.f32 1.0, %v3681_v11  ;;  %v3298_v22 = vadd.f32 1.0, %v6915_v41  ;;  %v5345_v38 = vmul.f32 %v3681_v11, %v3681_v11  ;;  %v6691_v47 = vsel %vm2529_vm10, 1.0, %v15457_v40  ;;  %vm8216_vm10 = vmand %vm7869_vm4, %vm15442_vm2  ;;  %v6877_v41 = vld [vmem:[%s7750_s30 + $0x1c8] sm:$0xff] }
  0xb5   : > { %6523 = vmatmul.msk.bf16.gmra.mxu1 %vm15480_vm1, %v6846_v52  ;;  %v4193_v18 = vmax.f32 %v4065_v14, -9.2103405  ;;  %v4577_v60 = vmax.f32 %v4449_v37, -9.2103405  ;;  %v8204_v48 = vadd.f32 %v7880_v27, %v1086_v42  ;;  %v8221_v61 = vsel %vm2028_vm3, 1.0, %v15457_v40  ;;  %v1439_v14 = vld [vmem:[%s7742_s27 + $0x200] sm:$0xff]  ;;  %6554 = vmatmul.msk.bf16.gmra.mxu3 %vm15480_vm1, %v6877_v41 }
  0xb6   : > { %6539 = vmatmul.msk.bf16.gmra.mxu2 %vm15480_vm1, %v6862_v3  ;;  %v4961_v63 = vmul.f32 %v4833_v15, %v4833_v15  ;;  %6916 = vrcp.f32 %v3298_v22  ;;  %15658 = vst [vmem:[#allocation6_spill] sm:$0xff] %v8221_v61  ;;  %v15444_v0 = vsub.f32 0.0, %v8130_v7  ;;  %v6007_v11 = vadd.f32 %v8221_v61, %v8150_v19  ;;  %v1438_v37 = vld [vmem:[%s7742_s27 + $0x1f8] sm:$0xff]  ;;  %v8236_v15 = vpop.permute.xlu0 %1550  ;;  %v1441_v61 = vld [vmem:[%s7742_s27 + $0x210] sm:$0xff] }
  0xb7   : > { %v4321_v32 = vmin.f32 %v4193_v18, -0.000100005  ;;  %v4705_v36 = vmin.f32 %v4577_v60, -0.000100005  ;;  %6918 = vlog2.f32 %v3298_v22  ;;  %1308 = vst.msk [vmem:[%s7898_s10 + $0x210] sm:$0xff] %vm1241_vm9, %v8204_v48  ;;  %v8242_v18 = vsel %vm8216_vm10, 1.0, %v15457_v40  ;;  %v8244_v22 = vpop.permute.xlu1 %1553  ;;  %vm8263_vm10 = vmxor %vm1890_vm6, %vm7688_vm13 }
  0xb8   : > { %15660 = vst [vmem:[#allocation8_spill] sm:$0xff] %v8242_v18  ;;  %vm15443_vm0 = vcmp.eq.s32.totalorder %v8236_v15, %v7867_v24  ;;  %vm15446_vm3 = vcmp.eq.s32.totalorder %v8244_v22, %v7867_v24 }
  0xb9   : > { %v5089_v49 = vmul.f32 %v4961_v63, %v4321_v32  ;;  %v5473_v52 = vmul.f32 %v5345_v38, %v4705_v36  ;;  %v1008_v63 = vpop.f32.mrf.mxu1  ;;  %v8248_v32 = vpop.permute.xlu2 %1556  ;;  %v6008_v36 = vadd.f32 %v8230_v6, %v6007_v11  ;;  %v3046_v38 = vmul.f32 1.442695, %v15444_v0  ;;  %vm2031_vm6 = vmand %vm7869_vm4, %vm15443_vm0  ;;  %v1442_v6 = vld [vmem:[%s7742_s27 + $0x218] sm:$0xff] }
  0xba   : > { %1700 = vperm.xlu2 %6900, %v1440_v2   ;;  %1697 = vperm.xlu1 %6899, %v1439_v14   ;;  %v8254_v42 = vadd.f32 %v7880_v27, %v1008_v63  ;;  %vm1905_vm5 = vcmp.eq.s32.totalorder %v8248_v32, %v7867_v24  ;;  %vm2032_vm7 = vmand %vm7869_vm4, %vm15446_vm3  ;;  %v933_v53 = vpop.f32.mrf.mxu0  ;;  %v8298_v41 = vsel %vm2031_vm6, 1.0, %v15457_v40  ;;  %v15736_v32 = vsub.f32 0.0, %v7919_v39 }
  0xbb   : > { %v5217_v3 = vmul.f32 %v7956_v45, %v5089_v49  ;;  %v5601_v5 = vmul.f32 %v6691_v47, %v5473_v52  ;;  %1694 = vperm.xlu0 %6898, %v1438_v37   ;;  %v6009_v52 = vadd.f32 %v8242_v18, %v6008_v36  ;;  %6920 = vpow2.f32 %v3046_v38  ;;  %vm2033_vm2 = vmand %vm7869_vm4, %vm1905_vm5  ;;  %15664 = vst [vmem:[#allocation10_spill] sm:$0xff] %v8298_v41  ;;  %v1443_v18 = vld [vmem:[%s7742_s27 + $0x220] sm:$0xff] }
  0xbc   : > { %v6917_v19 = vpop.eup %6916  ;;  %1277 = vst.msk [vmem:[%s7898_s10 + $0x118] sm:$0xff] %vm1241_vm9, %v8254_v42  ;;  %vm2530_vm0 = vmand %vm7869_vm4, %vm8263_vm10  ;;  %v8295_v37 = vsel %vm2032_vm7, 1.0, %v15457_v40  ;;  %v8301_v63 = vsel %vm2033_vm2, 1.0, %v15457_v40 }
  0xbd   : > { %v5728_v45 = vadd.f32 %v5217_v3, %v5216_v10  ;;  %v5862_v60 = vadd.f32 %v5601_v5, %v5600_v17  ;;  %v6919_v10 = vpop.eup %6918  ;;  %v3554_v47 = vmax.f32 %v6917_v19, 0.0001  ;;  %15663 = vst [vmem:[#allocation9_spill] sm:$0xff] %v8295_v37  ;;  %v1088_v19 = vpop.f32.mrf.mxu2 }
  0xbe   : > { %v3813_v49 = vmul.f32 0.6931472, %v6919_v10  ;;  %15665 = vst [vmem:[#allocation11_spill] sm:$0xff] %v8301_v63 }
  0xbf   : > { %v3682_v16 = vmin.f32 %v3554_v47, 0.9999  ;;  %v8305_v47 = vadd.f32 %v7880_v27, %v1088_v19 }
  0xc0   : > { %v4066_v2 = vsub.f32 0.0, %v3813_v49  ;;  %v4450_v3 = vsub.f32 %v2914_v57, %v3813_v49  ;;  %v6010_v57 = vadd.f32 %v8298_v41, %v6009_v52  ;;  %v1161_v49 = vpop.f32.mrf.mxu3 }
  0xc1   : > { %v4834_v5 = vsub.f32 1.0, %v3682_v16  ;;  %v6921_v36 = vpop.eup %6920  ;;  %v5346_v17 = vmul.f32 %v3682_v16, %v3682_v16  ;;  %1309 = vst.msk [vmem:[%s7898_s10 + $0x218] sm:$0xff] %vm1241_vm9, %v8305_v47 }
  0xc2   : > { %v4194_v11 = vmax.f32 %v4066_v2, -9.2103405  ;;  %v4578_v14 = vmax.f32 %v4450_v3, -9.2103405  ;;  %v6692_v2 = vsel %vm2530_vm0, 1.0, %v15457_v40  ;;  %v3299_v3 = vadd.f32 1.0, %v6921_v36  ;;  %vm8370_vm0 = vmxor %vm1891_vm8, %vm7688_vm13  ;;  %1709 = vperm.xlu2 %6900, %v1443_v18   ;;  %1706 = vperm.xlu1 %6899, %v1442_v6  }
  0xc3   : > { %v4962_v34 = vmul.f32 %v4834_v5, %v4834_v5  ;;  %v6011_v0 = vadd.f32 %v8295_v37, %v6010_v57  ;;  %v8310_v5 = vadd.f32 %v7880_v27, %v1161_v49  ;;  %v936_v57 = vpop.f32.mrf.mxu0  ;;  %v8326_v36 = vadd.f32 %v7880_v27, %v8193_v46  ;;  %vm2531_vm3 = vmand %vm7869_vm4, %vm8370_vm0  ;;  %1703 = vperm.xlu0 %6898, %v1441_v61  }
  0xc4   : > { %v4322_v38 = vmin.f32 %v4194_v11, -0.000100005  ;;  %v4706_v10 = vmin.f32 %v4578_v14, -0.000100005  ;;  %6922 = vrcp.f32 %v3299_v3 }
  0xc5   : > { %v6012_v16 = vadd.f32 %v8301_v63, %v6011_v0  ;;  %1338 = vst.msk [vmem:[%s7898_s10 + $0x300] sm:$0xff] %vm1241_vm9, %v8310_v5  ;;  %6924 = vlog2.f32 %v3299_v3  ;;  %v8329_v0 = vadd.f32 %v7880_v27, %v933_v53  ;;  %v8359_v3 = vpop.permute.xlu0 %1559  ;;  %v6693_v63 = vsel %vm2531_vm3, 1.0, %v15457_v40  ;;  %6524 = vmatmul.msk.bf16.gmra.mxu1 %vm15480_vm1, %v6847_v1  ;;  %vm8445_vm3 = vmxor %vm1892_vm12, %vm7688_vm13 }
  0xc6   : > { %v5090_v52 = vmul.f32 %v4962_v34, %v4322_v38  ;;  %v5474_v41 = vmul.f32 %v5346_v17, %v4706_v10  ;;  %1246 = vst.msk [vmem:[%s7898_s10 + $0x20] sm:$0xff] %vm1241_vm9, %v8326_v36  ;;  %v8336_v38 = vadd.f32 %v7880_v27, %v936_v57  ;;  %v8346_v10 = vpop.permute.xlu1 %1562  ;;  %vm15475_vm2 = vcmp.eq.s32.totalorder %v8359_v3, %v7867_v24  ;;  %vm2532_vm12 = vmand %vm7869_vm4, %vm8445_vm3 }
  0xc7   : > { %1247 = vst.msk [vmem:[%s7898_s10 + $0x28] sm:$0xff] %vm1241_vm9, %v8329_v0  ;;  %vm15447_vm7 = vcmp.eq.s32.totalorder %v8346_v10, %v7867_v24  ;;  %vm2034_vm8 = vmand %vm7869_vm4, %vm15475_vm2  ;;  %6540 = vmatmul.msk.bf16.gmra.mxu2 %vm15480_vm1, %v6863_v54  ;;  %v15686_v31 = vsub.f32 0.0, %v8329_v0 }
  0xc8   : > { %v5218_v11 = vmul.f32 %v7953_v44, %v5090_v52  ;;  %v5602_v14 = vmul.f32 %v6692_v2, %v5474_v41  ;;  %v15448_v44 = vsub.f32 0.0, %v8326_v36  ;;  %v1011_v41 = vpop.f32.mrf.mxu1  ;;  %1248 = vst.msk [vmem:[%s7898_s10 + $0x30] sm:$0xff] %vm1241_vm9, %v8336_v38  ;;  %vm2035_vm6 = vmand %vm7869_vm4, %vm15447_vm7 }
  0xca   : > { %v8320_v19 = vadd.f32 %v5728_v45, %v5218_v11  ;;  %v8322_v34 = vadd.f32 %v5862_v60, %v5602_v14  ;;  %v8339_v45 = vadd.f32 %v7880_v27, %v1011_v41  ;;  %v1091_v60 = vpop.f32.mrf.mxu2  ;;  %v6923_v46 = vpop.eup %6922  ;;  %v3048_v53 = vmul.f32 1.442695, %v15448_v44 }
  0xcb   : > { %v8349_v17 = vadd.f32 %v7880_v27, %v1091_v60  ;;  %v6925_v49 = vpop.eup %6924  ;;  %v3555_v2 = vmax.f32 %v6923_v46, 0.0001  ;;  %v8374_v14 = vpop.permute.xlu2 %1565  ;;  %v15668_v60 = vsub.f32 0.0, %v8130_v7 }
  0xcc   : > { %1278 = vst.msk [vmem:[%s7898_s10 + $0x120] sm:$0xff] %vm1241_vm9, %v8339_v45  ;;  %v3815_v52 = vmul.f32 0.6931472, %v6925_v49  ;;  %6926 = vpow2.f32 %v3048_v53  ;;  %vm1908_vm10 = vcmp.eq.s32.totalorder %v8374_v14, %v7867_v24 }
  0xcd   : > { %1310 = vst.msk [vmem:[%s7898_s10 + $0x220] sm:$0xff] %vm1241_vm9, %v8349_v17  ;;  %v3683_v57 = vmin.f32 %v3555_v2, 0.9999  ;;  %vm2036_vm7 = vmand %vm7869_vm4, %vm1908_vm10  ;;  %v8400_v2 = vsel %vm2035_vm6, 1.0, %v15457_v40 }
  0xce   : > { %v4067_v41 = vsub.f32 0.0, %v3815_v52  ;;  %v4451_v46 = vsub.f32 %v15668_v60, %v3815_v52  ;;  %15669 = vst [vmem:[#allocation12_spill] sm:$0xff] %v8400_v2  ;;  %v8412_v52 = vsel %vm2036_vm7, 1.0, %v15457_v40 }
  0xcf   : > { %v4835_v26 = vsub.f32 1.0, %v3683_v57  ;;  %15671 = vst [vmem:[#allocation14_spill] sm:$0xff] %v8412_v52 }
  0xd0   : > { %v4195_v7 = vmax.f32 %v4067_v41, -9.2103405  ;;  %v4579_v53 = vmax.f32 %v4451_v46, -9.2103405  ;;  %v5347_v41 = vmul.f32 %v3683_v57, %v3683_v57  ;;  %v8404_v46 = vsel %vm2034_vm8, 1.0, %v15457_v40  ;;  %v6831_v57 = vld [vmem:[%s7750_s30 + $0x58] sm:$0xff] }
  0xd1   : > { %v4963_v49 = vmul.f32 %v4835_v26, %v4835_v26  ;;  %15670 = vst [vmem:[#allocation13_spill] sm:$0xff] %v8404_v46  ;;  %v6013_v26 = vadd.f32 %v8404_v46, %v6012_v16  ;;  %6508 = vmatmul.msk.bf16.gmra.mxu0 %vm15480_vm1, %v6831_v57 }
  0xd2   : > { %v6927_v11 = vpop.eup %6926  ;;  %v4323_v60 = vmin.f32 %v4195_v7, -0.000100005  ;;  %v4707_v44 = vmin.f32 %v4579_v53, -0.000100005  ;;  %v1163_v53 = vpop.f32.mrf.mxu3 }
  0xd3   : > { %v3300_v37 = vadd.f32 1.0, %v6927_v11  ;;  %v6014_v11 = vadd.f32 %v8400_v2, %v6013_v26  ;;  %v8419_v16 = vadd.f32 %v7880_v27, %v1163_v53 }
  0xd4   : > { %v5091_v7 = vmul.f32 %v4963_v49, %v4323_v60  ;;  %v5475_v8 = vmul.f32 %v5347_v41, %v4707_v44  ;;  %v15672_v44 = vsub.f32 0.0, %v8329_v0 }
  0xd5   : > { %6928 = vrcp.f32 %v3300_v37  ;;  %v8427_v6 = vadd.f32 %v8412_v52, %v6014_v11  ;;  %1339 = vst.msk [vmem:[%s7898_s10 + $0x308] sm:$0xff] %vm1241_vm9, %v8419_v16  ;;  %v8459_v11 = vpop.permute.xlu1 %1571 }
  0xd6   : > { %v5219_v40 = vmul.f32 %v7972_v50, %v5091_v7  ;;  %v5603_v46 = vmul.f32 %v6693_v63, %v5475_v8  ;;  %6930 = vlog2.f32 %v3300_v37  ;;  %v3050_v18 = vmul.f32 1.442695, %v15672_v44  ;;  %v1013_v8 = vpop.f32.mrf.mxu1  ;;  %v8451_v7 = vpop.permute.xlu0 %1568  ;;  %15677 = vst [vmem:[#allocation16_spill] sm:$0xff] %v8459_v11 }
  0xd7   : > { %v8436_v37 = vadd.f32 %v7880_v27, %v1013_v8  ;;  %15676 = vst [vmem:[#allocation15_spill] sm:$0xff] %v8451_v7  ;;  %vm15468_vm7 = vcmp.eq.s32.totalorder %v8451_v7, %v7867_v24  ;;  %vm15470_vm0 = vcmp.eq.s32.totalorder %v8459_v11, %v7867_v24  ;;  %6541 = vmatmul.msk.bf16.gmra.mxu2 %vm15480_vm1, %v6864_v23 }
  0xd8   : > { %v5730_v61 = vadd.f32 %v8320_v19, %v5219_v40  ;;  %v5864_v50 = vadd.f32 %v8322_v34, %v5603_v46  ;;  %6932 = vpow2.f32 %v3050_v18  ;;  %v15675_v34 = vsub.f32 0.0, %v8326_v36  ;;  %vm8469_vm6 = vmand %vm7869_vm4, %vm15468_vm7 }
  0xd9   : > { %1279 = vst.msk [vmem:[%s7898_s10 + $0x128] sm:$0xff] %vm1241_vm9, %v8436_v37  ;;  %v15461_v36 = vsub.f32 0.0, %v7919_v39  ;;  %v15460_v40 = vsub.f32 0.0, %v7986_v56  ;;  %vm2038_vm3 = vmand %vm7869_vm4, %vm15470_vm0 }
  0xda   : > { %v1166_v52 = vpop.f32.mrf.mxu3 }
  0xdb   : > { %v6929_v63 = vpop.eup %6928 }
  0xdc   : > { %v6931_v1 = vpop.eup %6930  ;;  %v3556_v49 = vmax.f32 %v6929_v63, 0.0001 }
  0xdd   : > { %v3817_v60 = vmul.f32 0.6931472, %v6931_v1 }
  0xde   : > { %v6933_v41 = vpop.eup %6932  ;;  %v3684_v54 = vmin.f32 %v3556_v49, 0.9999  ;;  %v1446_v49 = vld [vmem:[%s7742_s27 + $0x238] sm:$0xff]  ;;  %v8555_v2 = vpop.permute.xlu0 %1577 }
  0xdf   : > { %v4068_v19 = vsub.f32 0.0, %v3817_v60  ;;  %v4452_v46 = vsub.f32 %v15675_v34, %v3817_v60  ;;  %v3301_v26 = vadd.f32 1.0, %v6933_v41  ;;  %v15680_v60 = vmov 0.0   ;;  %1718 = vperm.xlu2 %6900, %v1446_v49   ;;  %v1444_v34 = vld [vmem:[%s7742_s27 + $0x228] sm:$0xff]  ;;  %15688 = vst [vmem:[#allocation21_spill] sm:$0xff] %v8555_v2 }
  0xe0   : > { %v4836_v53 = vsub.f32 1.0, %v3684_v54  ;;  %v5348_v63 = vmul.f32 %v3684_v54, %v3684_v54  ;;  %v6694_v41 = vsel %vm2532_vm12, 1.0, %v15680_v60  ;;  %v8479_v54 = vpop.permute.xlu2 %1574  ;;  %1712 = vperm.xlu0 %6898, %v1444_v34   ;;  %v8511_v1 = vsel %vm2038_vm3, 1.0, %v15680_v60  ;;  %vm8562_vm3 = vmxor %vm1896_vm11, %vm7688_vm13 }
  0xe1   : > { %v4196_v20 = vmax.f32 %v4068_v19, -9.2103405  ;;  %v4580_v57 = vmax.f32 %v4452_v46, -9.2103405  ;;  %6934 = vrcp.f32 %v3301_v26  ;;  %v1445_v19 = vld [vmem:[%s7742_s27 + $0x230] sm:$0xff]  ;;  %vm15478_vm8 = vcmp.eq.s32.totalorder %v8479_v54, %v7867_v24  ;;  %15682 = vst [vmem:[#allocation18_spill] sm:$0xff] %v8511_v1 }
  0xe2   : > { %v4964_v44 = vmul.f32 %v4836_v53, %v4836_v53  ;;  %6936 = vlog2.f32 %v3301_v26  ;;  %v6878_v46 = vld [vmem:[%s7750_s30 + $0x1d0] sm:$0xff]  ;;  %1715 = vperm.xlu1 %6899, %v1445_v19   ;;  %v3168_v19 = vmul.f32 1.442695, %v15460_v40  ;;  %vm2039_vm12 = vmand %vm7869_vm4, %vm15478_vm8  ;;  %v1093_v40 = vpop.f32.mrf.mxu2 }
  0xe3   : > { %v4324_v18 = vmin.f32 %v4196_v20, -0.000100005  ;;  %v4708_v8 = vmin.f32 %v4580_v57, -0.000100005  ;;  %v3104_v20 = vmul.f32 1.442695, %v15461_v36  ;;  %6555 = vmatmul.msk.bf16.gmra.mxu3 %vm15480_vm1, %v6878_v46 }
  0xe4   : > { %v15464_v57 = vsub.f32 0.0, %v8027_v4 }
  0xe5   : > { %v5092_v26 = vmul.f32 %v4964_v44, %v4324_v18  ;;  %v5476_v53 = vmul.f32 %v5348_v63, %v4708_v8  ;;  %v15465_v44 = vsub.f32 0.0, %v8065_v30  ;;  %v8497_v63 = vsel %vm8469_vm6, 1.0, %v15680_v60  ;;  %vm8519_vm6 = vmxor %vm1893_vm15, %vm7688_vm13 }
  0xe6   : > { %15681 = vst [vmem:[#allocation17_spill] sm:$0xff] %v8497_v63  ;;  %6938 = vpow2.f32 %v3104_v20  ;;  %vm2533_vm15 = vmand %vm7869_vm4, %vm8519_vm6  ;;  %vm15469_vm6 = vcmp.eq.s32.totalorder %v8555_v2, %v7867_v24  ;;  %v1447_v2 = vld [vmem:[%s7742_s27 + $0x240] sm:$0xff] }
  0xe7   : > { %v5220_v18 = vmul.f32 %v7989_v58, %v5092_v26  ;;  %v5604_v8 = vmul.f32 %v6694_v41, %v5476_v53  ;;  %v6935_v49 = vpop.eup %6934  ;;  %v6016_v53 = vadd.f32 %v8497_v63, %v8427_v6  ;;  %v3170_v20 = vmul.f32 1.442695, %v15465_v44  ;;  %v938_v6 = vpop.f32.mrf.mxu0  ;;  %vm2040_vm11 = vmand %vm7869_vm4, %vm15469_vm6 }
  0xe8   : > { %v6937_v34 = vpop.eup %6936  ;;  %v3557_v41 = vmax.f32 %v6935_v49, 0.0001  ;;  %v8531_v49 = vsel %vm2039_vm12, 1.0, %v15680_v60  ;;  %6940 = vpow2.f32 %v3168_v19  ;;  %vm15696_vm6 = vcmp.eq.s32.totalorder %v8182_v28, %v7867_v24  ;;  %1721 = vperm.xlu0 %6898, %v1447_v2  }
  0xe9   : > { %v8506_v46 = vadd.f32 %v5730_v61, %v5220_v18  ;;  %v8508_v58 = vadd.f32 %v5864_v50, %v5604_v8  ;;  %v3819_v26 = vmul.f32 0.6931472, %v6937_v34  ;;  %v3106_v50 = vmul.f32 1.442695, %v15464_v57  ;;  %15685 = vst [vmem:[#allocation19_spill] sm:$0xff] %v8531_v49  ;;  %v8553_v61 = vpop.permute.xlu1 %1580  ;;  %vm8610_vm0 = vmxor %vm15696_vm6, %vm7688_vm13 }
  0xea   : > { %v3685_v18 = vmin.f32 %v3557_v41, 0.9999  ;;  %v8528_v8 = vadd.f32 %v7880_v27, %v1093_v40  ;;  %v6017_v63 = vadd.f32 %v8511_v1, %v6016_v53  ;;  %v8540_v40 = vadd.f32 %v7880_v27, %v1166_v52  ;;  %v8547_v53 = vpop.permute.xlu2 %1583  ;;  %15687 = vst [vmem:[#allocation20_spill] sm:$0xff] %v8553_v61 }
  0xeb   : > { %v4069_v34 = vsub.f32 0.0, %v3819_v26  ;;  %v4453_v36 = vsub.f32 %v15686_v31, %v3819_v26  ;;  %6942 = vpow2.f32 %v3106_v50  ;;  %vm15474_vm12 = vcmp.eq.s32.totalorder %v8553_v61, %v7867_v24  ;;  %v6832_v61 = vld [vmem:[%s7750_s30 + $0x60] sm:$0xff] }
  0xec   : > { %v4837_v57 = vsub.f32 1.0, %v3685_v18  ;;  %1311 = vst.msk [vmem:[%s7898_s10 + $0x228] sm:$0xff] %vm1241_vm9, %v8528_v8  ;;  %v6018_v31 = vadd.f32 %v8531_v49, %v6017_v63  ;;  %v6939_v52 = vpop.eup %6938  ;;  %6944 = vpow2.f32 %v3170_v20  ;;  %v5349_v1 = vmul.f32 %v3685_v18, %v3685_v18  ;;  %6509 = vmatmul.msk.bf16.gmra.mxu0 %vm15480_vm1, %v6832_v61 }
  0xed   : > { %v4197_v0 = vmax.f32 %v4069_v34, -9.2103405  ;;  %v4581_v26 = vmax.f32 %v4453_v36, -9.2103405  ;;  %1340 = vst.msk [vmem:[%s7898_s10 + $0x310] sm:$0xff] %vm1241_vm9, %v8540_v40  ;;  %v6695_v36 = vsel %vm2533_vm15, 1.0, %v15680_v60  ;;  %vm8581_vm15 = vmxor %vm1899_vm14, %vm7688_vm13  ;;  %vm15477_vm7 = vcmp.eq.s32.totalorder %v8547_v53, %v7867_v24 }
  0xee   : > { %v4965_v19 = vmul.f32 %v4837_v57, %v4837_v57  ;;  %v15691_v63 = vsub.f32 0.0, %v8336_v38  ;;  %v6941_v59 = vpop.eup %6940  ;;  %vm8602_vm14 = vmand %vm7869_vm4, %vm15474_vm12  ;;  %v15702_v49 = vsub.f32 0.0, %v8153_v21  ;;  %v15714_v61 = vsub.f32 0.0, %v8204_v48 }
  0xef   : > { %v4325_v44 = vmin.f32 %v4197_v0, -0.000100005  ;;  %v4709_v41 = vmin.f32 %v4581_v26, -0.000100005  ;;  %v8585_v0 = vadd.f32 1.0, %v6939_v52  ;;  %vm8629_vm6 = vmand %vm7869_vm4, %vm15477_vm7  ;;  %vm15707_vm7 = vcmp.eq.s32.totalorder %v7974_v51, %v7867_v24 }
  0xf0   : > { %v3052_v50 = vmul.f32 1.442695, %v15691_v63  ;;  %v8620_v63 = vpop.f32.mrf.mxu0  ;;  %vm2539_vm12 = vmand %vm7869_vm4, %vm8581_vm15  ;;  %v15482_v51 = vsub.f32 0.0, %v8254_v42 }
  0xf1   : > { %v5093_v20 = vmul.f32 %v4965_v19, %v4325_v44  ;;  %v5477_v18 = vmul.f32 %v5349_v1, %v4709_v41  ;;  %v1016_v1 = vpop.f32.mrf.mxu1  ;;  %v8591_v41 = vadd.f32 %v7880_v27, %v938_v6  ;;  %v6943_v6 = vpop.eup %6942  ;;  %v1448_v44 = vld [vmem:[%s7742_s27 + $0x248] sm:$0xff]  ;;  %vm8687_vm8 = vmxor %vm15707_vm7, %vm7688_vm13 }
  0xf2   : > { %v8595_v19 = vadd.f32 %v7880_v27, %v1016_v1  ;;  %6946 = vpow2.f32 %v3052_v50  ;;  %1724 = vperm.xlu1 %6899, %v1448_v44   ;;  %v8675_v44 = vadd.f32 1.0, %v6943_v6  ;;  %v8709_v2 = vpop.permute.xlu2 %1592 }
  0xf3   : > { %v5221_v26 = vmul.f32 %v8005_v62, %v5093_v20  ;;  %v5605_v35 = vmul.f32 %v6695_v36, %v5477_v18  ;;  %v8615_v36 = vsel %vm2040_vm11, 1.0, %v15680_v60  ;;  %1249 = vst.msk [vmem:[%s7898_s10 + $0x38] sm:$0xff] %vm1241_vm9, %v8591_v41  ;;  %v6945_v20 = vpop.eup %6944  ;;  %v8622_v18 = vadd.f32 1.0, %v6941_v59  ;;  %v1449_v59 = vld [vmem:[%s7742_s27 + $0x250] sm:$0xff]  ;;  %vm2536_vm11 = vmand %vm7869_vm4, %vm8562_vm3 }
  0xf4   : > { %15699 = vst [vmem:[#allocation22_spill] sm:$0xff] %v8615_v36  ;;  %6948 = vlog2.f32 %v8585_v0  ;;  %1727 = vperm.xlu2 %6900, %v1449_v59   ;;  %v6019_v52 = vadd.f32 %v8615_v36, %v6018_v31  ;;  %v8691_v7 = vadd.f32 1.0, %v6945_v20  ;;  %v8696_v31 = vsel %vm8629_vm6, 1.0, %v15680_v60  ;;  %vm8791_vm3 = vmxor %vm1908_vm10, %vm7688_vm13 }
  0xf5   : > { %v8634_v50 = vadd.f32 %v8506_v46, %v5221_v26  ;;  %v8637_v1 = vadd.f32 %v8508_v58, %v5605_v35  ;;  %1280 = vst.msk [vmem:[%s7898_s10 + $0x130] sm:$0xff] %vm1241_vm9, %v8595_v19  ;;  %v3108_v46 = vmul.f32 1.442695, %v15702_v49  ;;  %v8655_v26 = vsel %vm8602_vm14, 1.0, %v15680_v60  ;;  %v1096_v35 = vpop.f32.mrf.mxu2  ;;  %vm8671_vm14 = vmxor %vm1905_vm5, %vm7688_vm13  ;;  %v6848_v58 = vld [vmem:[%s7750_s30 + $0xe0] sm:$0xff] }
  0xf6   : > { %15703 = vst [vmem:[#allocation23_spill] sm:$0xff] %v8655_v26  ;;  %v8679_v59 = vadd.f32 %v7880_v27, %v1096_v35  ;;  %vm15711_vm5 = vcmp.eq.s32.totalorder %v7983_v55, %v7867_v24  ;;  %6950 = vlog2.f32 %v8622_v18  ;;  %v6020_v6 = vadd.f32 %v8655_v26, %v6019_v52  ;;  %6525 = vmatmul.msk.bf16.gmra.mxu1 %vm15480_vm1, %v6848_v58  ;;  %v8736_v35 = vpop.permute.xlu1 %1589  ;;  %vm2548_vm15 = vmand %vm7869_vm4, %vm8791_vm3 }
  0xf7   : > { %15710 = vst [vmem:[#allocation25_spill] sm:$0xff] %v8696_v31  ;;  %vm8703_vm2 = vmxor %vm15711_vm5, %vm7688_vm13  ;;  %6952 = vpow2.f32 %v3108_v46  ;;  %v3172_v20 = vmul.f32 1.442695, %v15714_v61  ;;  %vm15483_vm6 = vcmp.eq.s32.totalorder %v8709_v2, %v7867_v24  ;;  %v1168_v46 = vpop.f32.mrf.mxu3  ;;  %v3110_v52 = vmul.f32 1.442695, %v15482_v51  ;;  %v8760_v51 = vpop.permute.xlu0 %1586 }
  0xf8   : > { %15706 = vst [vmem:[#allocation24_spill] sm:$0xff] %v8679_v59  ;;  %v6947_v55 = vpop.eup %6946  ;;  %6954 = vlog2.f32 %v8675_v44  ;;  %v6021_v28 = vadd.f32 %v8696_v31, %v6020_v6  ;;  %vm8745_vm5 = vmand %vm7869_vm4, %vm15483_vm6  ;;  %vm15485_vm1 = vcmp.eq.s32.totalorder %v8736_v35, %v7867_v24  ;;  %vm1915_vm7 = vcmp.eq.s32.totalorder %v8760_v51, %v7867_v24  ;;  %v943_v26 = vpop.f32.mrf.mxu0 }
  0xf9   : > { %1312 = vst.msk [vmem:[%s7898_s10 + $0x230] sm:$0xff] %vm1241_vm9, %v8679_v59  ;;  %v3302_v23 = vadd.f32 1.0, %v6947_v55  ;;  %6956 = vlog2.f32 %v8691_v7  ;;  %v8752_v55 = vld [vmem:[%s15432_s2] ss:$0 sm:$0xff]  ;;  %vm2044_vm6 = vmand %vm7869_vm4, %vm15485_vm1  ;;  %v8775_v31 = vsel %vm2536_vm11, 1.0, %v15680_v60  ;;  %vm15725_vm10 = vcmp.eq.s32.totalorder %v8062_v29, %v7867_v24 }
  0xfa   : > { %v6949_v58 = vpop.eup %6948  ;;  %15715 = vst [vmem:[#allocation26_spill] sm:$0xff] %v8736_v35  ;;  %v8755_v61 = vadd.f32 %v8752_v55, %v1168_v46  ;;  %6958 = vpow2.f32 %v3172_v20  ;;  %vm2043_vm1 = vmand %vm7869_vm4, %vm1915_vm7  ;;  %v8817_v11 = vadd.f32 %v8752_v55, %v943_v26  ;;  %v8825_v29 = vsel %vm2539_vm12, 1.0, %v15680_v60 }
  0xfb   : > { %15719 = vst [vmem:[#allocation28_spill] sm:$0xff] %v8760_v51  ;;  %v8777_v20 = vmul.f32 0.6931472, %v6949_v58  ;;  %6960 = vrcp.f32 %v3302_v23  ;;  %v8796_v58 = vsel %vm2044_vm6, 1.0, %v15680_v60  ;;  %v8799_v35 = vsel %vm2043_vm1, 1.0, %v15680_v60  ;;  %vm8809_vm11 = vmxor %vm15725_vm10, %vm7688_vm13 }
  0xfc   : > { %15718 = vst [vmem:[#allocation27_spill] sm:$0xff] %v8755_v61  ;;  %v6951_v46 = vpop.eup %6950  ;;  %6962 = vlog2.f32 %v3302_v23  ;;  %v8803_v51 = vadd.f32 %v8752_v55, %v8620_v63  ;;  %v15728_v23 = vsub.f32 0.0, %v8591_v41  ;;  %v6022_v59 = vadd.f32 %v8799_v35, %v6021_v28  ;;  %vm15730_vm1 = vmand %vm7869_vm4, %vm8610_vm0 }
  0xfd   : > { %15720 = vst [vmem:[#allocation29_spill] sm:$0xff] %v8775_v31  ;;  %v6953_v36 = vpop.eup %6952  ;;  %6964 = vpow2.f32 %v3110_v52  ;;  %v8833_v52 = vsel %vm15730_vm1, 1.0, %v15680_v60  ;;  %v8839_v28 = vsel %vm8745_vm5, 1.0, %v15680_v60  ;;  %vm15733_vm12 = vmand %vm7869_vm4, %vm8671_vm14  ;;  %v1098_v39 = vpop.f32.mrf.mxu2  ;;  %vm15749_vm5 = vcmp.eq.s32.totalorder %v8479_v54, %v7867_v24 }
  0xfe   : > { %1341 = vst.msk [vmem:[%s7898_s10 + $0x318] sm:$0xff] %vm1241_vm9, %v8755_v61  ;;  %v6955_v61 = vpop.eup %6954  ;;  %v3054_v31 = vmul.f32 1.442695, %v15728_v23  ;;  %v8850_v34 = vsel %vm15733_vm12, 1.0, %v15680_v60  ;;  %vm15735_vm0 = vmand %vm7869_vm4, %vm8687_vm8  ;;  %v8864_v6 = vadd.f32 1.0, %v6953_v36  ;;  %v1018_v23 = vpop.f32.mrf.mxu1  ;;  %v6023_v49 = vadd.f32 %v8796_v58, %v6022_v59 }
  0xff   : > { %15723 = vst [vmem:[#allocation30_spill] sm:$0xff] %v8796_v58  ;;  %v6957_v63 = vpop.eup %6956  ;;  %v8858_v62 = vsel %vm15735_vm0, 1.0, %v15680_v60  ;;  %6966 = vrcp.f32 %v8585_v0  ;;  %vm15737_vm8 = vmand %vm7869_vm4, %vm8703_vm2  ;;  %v8889_v0 = vadd.f32 %v8752_v55, %v1018_v23  ;;  %v8897_v58 = vadd.f32 %v8752_v55, %v1098_v39 }
 0x100   : > { %15724 = vst [vmem:[#allocation31_spill] sm:$0xff] %v8799_v35  ;;  %v6959_v26 = vpop.eup %6958  ;;  %v8874_v35 = vsub.f32 %v15736_v32, %v8777_v20  ;;  %v8882_v36 = vsel %vm15737_vm8, 1.0, %v15680_v60  ;;  %vm2538_vm14 = vmand %vm7869_vm4, %vm8809_vm11  ;;  %v8891_v32 = vmul.f32 0.6931472, %v6951_v46  ;;  %6968 = vpow2.f32 %v3054_v31 }
 0x101   : > { %15729 = vst [vmem:[#allocation32_spill] sm:$0xff] %v8825_v29  ;;  %v6961_v59 = vpop.eup %6960  ;;  %v8894_v27 = vadd.f32 %v8839_v28, %v6023_v49  ;;  %6970 = vrcp.f32 %v8622_v18  ;;  %v8906_v23 = vsel %vm2548_vm15, 1.0, %v15680_v60  ;;  %v15742_v46 = vsub.f32 0.0, %v8305_v47  ;;  %v1451_v29 = vld [vmem:[%s7742_s27 + $0x260] sm:$0xff]  ;;  %vm8947_vm3 = vmxor %vm15749_vm5, %vm7688_vm13 }
 0x102   : > { %15731 = vst [vmem:[#allocation33_spill] sm:$0xff] %v8833_v52  ;;  %v6963_v14 = vpop.eup %6962  ;;  %v8914_v39 = vsel %vm2538_vm14, 1.0, %v15680_v60  ;;  %6972 = vlog2.f32 %v8864_v6  ;;  %vm15744_vm2 = vcmp.eq.s32.totalorder %v8070_v33, %v7867_v24  ;;  %v8934_v18 = vmul.f32 0.6931472, %v6957_v63  ;;  %1733 = vperm.xlu1 %6899, %v1451_v29   ;;  %vm2551_vm12 = vmand %vm7869_vm4, %vm8947_vm3 }
 0x103   : > { %15732 = vst [vmem:[#allocation34_spill] sm:$0xff] %v8839_v28  ;;  %v3174_v31 = vmul.f32 1.442695, %v15742_v46  ;;  %v6965_v49 = vpop.eup %6964  ;;  %v3821_v57 = vmul.f32 0.6931472, %v6963_v14  ;;  %v1452_v28 = vld [vmem:[%s7742_s27 + $0x268] sm:$0xff]  ;;  %6974 = vrcp.f32 %v8675_v44  ;;  %vm8930_vm6 = vmxor %vm15744_vm2, %vm7688_vm13  ;;  %vm15756_vm11 = vcmp.eq.s32.totalorder %v8178_v43, %v7867_v24 }
 0x104   : > { %1250 = vst.msk [vmem:[%s7898_s10 + $0x40] sm:$0xff] %vm1241_vm9, %v8803_v51  ;;  %v4608_v46 = vmax.f32 %v8874_v35, -9.2103405  ;;  %1736 = vperm.xlu2 %6900, %v1452_v28   ;;  %v8936_v52 = vadd.f32 1.0, %v6959_v26  ;;  %v15748_v44 = vsub.f32 0.0, %v8336_v38  ;;  %v8951_v28 = vadd.f32 1.0, %v6965_v49  ;;  %vm2537_vm10 = vmand %vm7869_vm4, %vm8930_vm6 }
 0x105   : > { %15734 = vst [vmem:[#allocation35_spill] sm:$0xff] %v8850_v34  ;;  %v3558_v34 = vmax.f32 %v6961_v59, 0.0001  ;;  %v8924_v59 = vmul.f32 0.6931472, %v6955_v61  ;;  %v4070_v35 = vsub.f32 0.0, %v3821_v57  ;;  %6976 = vpow2.f32 %v3174_v31  ;;  %vm8974_vm1 = vmxor %vm15756_vm11, %vm7688_vm13 }
 0x106   : > { %1251 = vst.msk [vmem:[%s7898_s10 + $0x48] sm:$0xff] %vm1241_vm9, %v8817_v11  ;;  %v4454_v61 = vsub.f32 %v15748_v44, %v3821_v57  ;;  %v1450_v38 = vld [vmem:[%s7742_s27 + $0x258] sm:$0xff]  ;;  %v15752_v57 = vsub.f32 0.0, %v7986_v56  ;;  %v15753_v54 = vsub.f32 0.0, %v8310_v5  ;;  %v15755_v29 = vsub.f32 0.0, %v8027_v4  ;;  %vm2541_vm8 = vmand %vm7869_vm4, %vm8974_vm1 }
 0x107   : > { %15738 = vst [vmem:[#allocation36_spill] sm:$0xff] %v8889_v0  ;;  %v3686_v14 = vmin.f32 %v3558_v34, 0.9999  ;;  %1730 = vperm.xlu0 %6898, %v1450_v38   ;;  %6978 = vrcp.f32 %v8691_v7  ;;  %v8991_v43 = vsel %vm2537_vm10, 1.0, %v15680_v60  ;;  %vm15760_vm0 = vcmp.eq.s32.totalorder %v8174_v13, %v7867_v24 }
 0x108   : > { %15739 = vst [vmem:[#allocation37_spill] sm:$0xff] %v8891_v32  ;;  %v4512_v44 = vsub.f32 %v15752_v57, %v8891_v32  ;;  %v3232_v49 = vmul.f32 1.442695, %v15753_v54  ;;  %v4582_v31 = vmax.f32 %v4454_v61, -9.2103405  ;;  %6980 = vlog2.f32 %v8936_v52  ;;  %vm9000_vm15 = vmxor %vm15760_vm0, %vm7688_vm13 }
 0x109   : > { %15740 = vst [vmem:[#allocation38_spill] sm:$0xff] %v8897_v58  ;;  %v4838_v26 = vsub.f32 1.0, %v3686_v14  ;;  %v5350_v38 = vmul.f32 %v3686_v14, %v3686_v14  ;;  %6982 = vlog2.f32 %v8951_v28  ;;  %v15763_v14 = vsub.f32 0.0, %v8339_v45  ;;  %vm2540_vm6 = vmand %vm7869_vm4, %vm9000_vm15 }
 0x10a   : > { %15741 = vst [vmem:[#allocation39_spill] sm:$0xff] %v8906_v23  ;;  %v4710_v7 = vmin.f32 %v4582_v31, -0.000100005  ;;  %v9007_v31 = vmin.f32 %v4608_v46, -0.000100005  ;;  %6984 = vpow2.f32 %v3232_v49  ;;  %vm15764_vm14 = vcmp.eq.s32.totalorder %v8244_v22, %v7867_v24 }
 0x10b   : > { %1281 = vst.msk [vmem:[%s7898_s10 + $0x138] sm:$0xff] %vm1241_vm9, %v8889_v0  ;;  %v4481_v0 = vsub.f32 %v15755_v29, %v8924_v59  ;;  %v4966_v57 = vmul.f32 %v4838_v26, %v4838_v26  ;;  %v15759_v26 = vsub.f32 0.0, %v8065_v30  ;;  %v3112_v23 = vmul.f32 1.442695, %v15763_v14  ;;  %vm9019_vm2 = vmxor %vm15764_vm14, %vm7688_vm13 }
 0x10c   : > { %15743 = vst [vmem:[#allocation40_spill] sm:$0xff] %v8914_v39  ;;  %v8941_v39 = vpop.eup %6966  ;;  %v5478_v29 = vmul.f32 %v5350_v38, %v4710_v7  ;;  %vm15769_vm5 = vcmp.eq.s32.totalorder %v8547_v53, %v7867_v24  ;;  %vm2544_vm3 = vmand %vm7869_vm4, %vm9019_vm2  ;;  %vm15780_vm1 = vcmp.eq.s32.totalorder %v8236_v15, %v7867_v24  ;;  %vm15788_vm15 = vcmp.eq.s32.totalorder %v8346_v10, %v7867_v24 }
 0x10d   : > { %1313 = vst.msk [vmem:[%s7898_s10 + $0x238] sm:$0xff] %vm1241_vm9, %v8897_v58  ;;  %v6969_v34 = vpop.eup %6968  ;;  %v4198_v58 = vmax.f32 %v4070_v35, -9.2103405  ;;  %v4609_v32 = vmax.f32 %v4481_v0, -9.2103405  ;;  %vm9044_vm10 = vmxor %vm15769_vm5, %vm7688_vm13 }
 0x10e   : > { %15747 = vst [vmem:[#allocation41_spill] sm:$0xff] %v8934_v18  ;;  %v8964_v63 = vpop.eup %6970  ;;  %v3303_v35 = vadd.f32 1.0, %v6969_v34  ;;  %v4513_v34 = vsub.f32 %v15759_v26, %v8934_v18  ;;  %v4640_v26 = vmax.f32 %v4512_v44, -9.2103405  ;;  %v5606_v0 = vmul.f32 %v8882_v36, %v5478_v29  ;;  %vm2554_vm11 = vmand %vm7869_vm4, %vm9044_vm10 }
 0x10f   : > { %15754 = vst [vmem:[#allocation42_spill] sm:$0xff] %v8964_v63  ;;  %v6973_v61 = vpop.eup %6972  ;;  %v4326_v4 = vmin.f32 %v4198_v58, -0.000100005  ;;  %v15503_v44 = vsub.f32 0.0, %v8803_v51  ;;  %v15502_v36 = vsub.f32 0.0, %v8349_v17 }
 0x110   : > { %v8983_v54 = vpop.eup %6974  ;;  %v9013_v63 = vmul.f32 0.6931472, %v6973_v61  ;;  %6986 = vrcp.f32 %v3303_v35  ;;  %v4641_v22 = vmax.f32 %v4513_v34, -9.2103405  ;;  %v9038_v61 = vsel %vm2551_vm12, 1.0, %v15680_v60  ;;  %vm9119_vm12 = vmxor %vm15780_vm1, %vm7688_vm13 }
 0x111   : > { %v5094_v30 = vmul.f32 %v4966_v57, %v4326_v4  ;;  %v6977_v13 = vpop.eup %6976  ;;  %6988 = vlog2.f32 %v3303_v35  ;;  %15768 = vst [vmem:[#allocation44_spill] sm:$0xff] %v9038_v61  ;;  %v1171_v35 = vpop.f32.mrf.mxu3  ;;  %v9059_v53 = vadd.f32 %v8637_v1, %v5606_v0  ;;  %v9064_v14 = vmin.f32 %v4640_v26, -0.000100005  ;;  %vm2543_vm0 = vmand %vm7869_vm4, %vm9119_vm12 }
 0x112   : > { %v9030_v57 = vpop.eup %6978  ;;  %6990 = vpow2.f32 %v3112_v23  ;;  %v9053_v33 = vadd.f32 1.0, %v6977_v13  ;;  %v9062_v38 = vadd.f32 %v8752_v55, %v1171_v35  ;;  %v15773_v23 = vsub.f32 0.0, %v8153_v21 }
 0x113   : > { %v5222_v49 = vmul.f32 %v8041_v9, %v5094_v30  ;;  %15767 = vst [vmem:[#allocation43_spill] sm:$0xff] %v9030_v57  ;;  %v6981_v4 = vpop.eup %6980  ;;  %6992 = vrcp.f32 %v8864_v6  ;;  %v9080_v29 = vmin.f32 %v4609_v32, -0.000100005  ;;  %v9088_v21 = vsel %vm2540_vm6, 1.0, %v15680_v60 }
 0x114   : > { %v6983_v34 = vpop.eup %6982  ;;  %15772 = vst [vmem:[#allocation45_spill] sm:$0xff] %v9064_v14  ;;  %v9070_v30 = vsub.f32 %v15773_v23, %v9013_v63  ;;  %6994 = vrcp.f32 %v8936_v52  ;;  %v3056_v6 = vmul.f32 1.442695, %v15503_v44  ;;  %v9100_v56 = vmin.f32 %v4641_v22, -0.000100005 }
 0x115   : > { %v9056_v7 = vadd.f32 %v8634_v50, %v5222_v49  ;;  %v9078_v50 = vsel %vm2541_vm8, 1.0, %v15680_v60  ;;  %v6985_v1 = vpop.eup %6984  ;;  %15775 = vst [vmem:[#allocation47_spill] sm:$0xff] %v9080_v29  ;;  %6996 = vrcp.f32 %v8951_v28  ;;  %v9109_v52 = vsel %vm2544_vm3, 1.0, %v15680_v60  ;;  %vm9174_vm8 = vmxor %vm15788_vm15, %vm7688_vm13 }
 0x116   : > { %15774 = vst [vmem:[#allocation46_spill] sm:$0xff] %v9078_v50  ;;  %v6987_v32 = vpop.eup %6986  ;;  %v3176_v58 = vmul.f32 1.442695, %v15502_v36  ;;  %v9113_v26 = vmul.f32 0.6931472, %v6981_v4  ;;  %6998 = vlog2.f32 %v9053_v33  ;;  %v9132_v35 = vsel %vm2554_vm11, 1.0, %v15680_v60  ;;  %v1021_v4 = vpop.f32.mrf.mxu1  ;;  %vm2547_vm15 = vmand %vm7869_vm4, %vm9174_vm8 }
 0x117   : > { %15776 = vst [vmem:[#allocation48_spill] sm:$0xff] %v9088_v21  ;;  %v6989_v13 = vpop.eup %6988  ;;  %v3559_v49 = vmax.f32 %v6987_v32, 0.0001  ;;  %v4610_v22 = vmax.f32 %v9070_v30, -9.2103405  ;;  %7000 = vpow2.f32 %v3056_v6  ;;  %v9136_v36 = vadd.f32 1.0, %v6985_v1 }
 0x118   : > { %1342 = vst.msk [vmem:[%s7898_s10 + $0x320] sm:$0xff] %vm1241_vm9, %v9062_v38  ;;  %v6991_v0 = vpop.eup %6990  ;;  %v3823_v15 = vmul.f32 0.6931472, %v6989_v13  ;;  %v9134_v23 = vmul.f32 0.6931472, %v6983_v34  ;;  %v9139_v44 = vadd.f32 %v8752_v55, %v1021_v4  ;;  %7002 = vpow2.f32 %v3176_v58  ;;  %v9164_v58 = vpop.permute.xlu1 %1598 }
 0x119   : > { %15777 = vst [vmem:[#allocation49_spill] sm:$0xff] %v9100_v56  ;;  %v3687_v32 = vmin.f32 %v3559_v49, 0.9999  ;;  %v9141_v30 = vpop.eup %6992  ;;  %v15784_v34 = vsub.f32 0.0, %v8591_v41  ;;  %v15786_v49 = vsub.f32 0.0, %v8204_v48  ;;  %v9157_v46 = vadd.f32 1.0, %v6991_v0  ;;  %v9166_v41 = vpop.permute.xlu0 %1595 }
 0x11a   : > { %15778 = vst [vmem:[#allocation50_spill] sm:$0xff] %v9109_v52  ;;  %v4071_v6 = vsub.f32 0.0, %v3823_v15  ;;  %v9150_v1 = vpop.eup %6994  ;;  %vm1919_vm14 = vcmp.eq.s32.totalorder %v9164_v58, %v7867_v24  ;;  %vm1918_vm2 = vcmp.eq.s32.totalorder %v9166_v41, %v7867_v24  ;;  %v9191_v10 = vsel %vm2543_vm0, 1.0, %v15680_v60 }
 0x11b   : > { %15779 = vst [vmem:[#allocation51_spill] sm:$0xff] %v9113_v26  ;;  %v4455_v13 = vsub.f32 %v15784_v34, %v3823_v15  ;;  %v9155_v4 = vsub.f32 %v15786_v49, %v9113_v26  ;;  %v4839_v14 = vsub.f32 1.0, %v3687_v32  ;;  %v9168_v15 = vpop.eup %6996  ;;  %v15791_v49 = vsub.f32 0.0, %v8254_v42  ;;  %vm9210_vm10 = vmand %vm7869_vm4, %vm1918_vm2 }
 0x11c   : > { %15783 = vst [vmem:[#allocation52_spill] sm:$0xff] %v9132_v35  ;;  %v15787_v35 = vsub.f32 0.0, %v8419_v16  ;;  %v4199_v0 = vmax.f32 %v4071_v6, -9.2103405  ;;  %v6999_v34 = vpop.eup %6998  ;;  %7004 = vlog2.f32 %v9136_v36  ;;  %vm15793_vm6 = vcmp.eq.s32.totalorder %v8709_v2, %v7867_v24  ;;  %vm9223_vm3 = vmand %vm7869_vm4, %vm1919_vm14 }
 0x11d   : > { %15785 = vst [vmem:[#allocation53_spill] sm:$0xff] %v9150_v1  ;;  %v4483_v9 = vsub.f32 %v15791_v49, %v9134_v23  ;;  %vm9198_vm5 = vmxor %vm15793_vm6, %vm7688_vm13  ;;  %v4967_v42 = vmul.f32 %v4839_v14, %v4839_v14  ;;  %v7001_v49 = vpop.eup %7000  ;;  %v15796_v26 = vsub.f32 0.0, %v8436_v37  ;;  %v5351_v18 = vmul.f32 %v3687_v32, %v3687_v32 }
 0x11e   : > { %v3234_v61 = vmul.f32 1.442695, %v15787_v35  ;;  %1282 = vst.msk [vmem:[%s7898_s10 + $0x140] sm:$0xff] %vm1241_vm9, %v9139_v44  ;;  %v4583_v35 = vmax.f32 %v4455_v13, -9.2103405  ;;  %v6879_v13 = vld [vmem:[%s7750_s30 + $0x1d8] sm:$0xff]  ;;  %7006 = vlog2.f32 %v9157_v46  ;;  %v7003_v32 = vpop.eup %7002  ;;  %vm15803_vm1 = vcmp.eq.s32.totalorder %v8359_v3, %v7867_v24  ;;  %vm2557_vm0 = vmand %vm7869_vm4, %vm9198_vm5 }
 0x11f   : > { %15792 = vst [vmem:[#allocation54_spill] sm:$0xff] %v9191_v10  ;;  %v3114_v1 = vmul.f32 1.442695, %v15796_v26  ;;  %v4327_v28 = vmin.f32 %v4199_v0, -0.000100005  ;;  %v3304_v52 = vadd.f32 1.0, %v7001_v49  ;;  %vm9234_vm12 = vmxor %vm15803_vm1, %vm7688_vm13  ;;  %v1101_v49 = vpop.f32.mrf.mxu2 }
 0x120   : > { %v4711_v56 = vmin.f32 %v4583_v35, -0.000100005  ;;  %v9214_v57 = vmin.f32 %v4610_v22, -0.000100005  ;;  %v4642_v14 = vmax.f32 %v9155_v4, -9.2103405  ;;  %7008 = vpow2.f32 %v3234_v61  ;;  %vm2546_vm6 = vmand %vm7869_vm4, %vm9234_vm12 }
 0x121   : > { %vm15801_vm11 = vcmask 64512   ;;  %v9228_v0 = vmul.f32 0.6931472, %v6999_v34  ;;  %v5095_v4 = vmul.f32 %v4967_v42, %v4327_v28  ;;  %v4611_v10 = vmax.f32 %v4483_v9, -9.2103405  ;;  %v1173_v9 = vpop.f32.mrf.mxu3 }
 0x122   : > { %6556 = vmatmul.msk.bf16.gmra.mxu3 %vm15801_vm11, %v6879_v13  ;;  %v5479_v35 = vmul.f32 %v5351_v18, %v4711_v56  ;;  %7010 = vrcp.f32 %v3304_v52  ;;  %v9245_v3 = vsel %vm9210_vm10, 1.0, %v15680_v60  ;;  %v9248_v34 = vadd.f32 %v8752_v55, %v1101_v49  ;;  %v7005_v42 = vpop.eup %7004  ;;  %v1455_v49 = vld [vmem:[%s7742_s27 + $0x280] sm:$0xff]  ;;  %vm15817_vm10 = vmmov %vm15801_vm11 }
 0x123   : > { %15802 = vst [vmem:[#allocation55_spill] sm:$0xff] %v9228_v0  ;;  %7012 = vpow2.f32 %v3114_v1  ;;  %v5223_v18 = vmul.f32 %v8046_v12, %v5095_v4  ;;  %v9259_v56 = vsel %vm9223_vm3, 1.0, %v15680_v60  ;;  %v9265_v13 = vadd.f32 1.0, %v7003_v32  ;;  %1745 = vperm.xlu2 %6900, %v1455_v49   ;;  %vm15818_vm3 = vmmov %vm15817_vm10 }
 0x124   : > { %15806 = vst [vmem:[#allocation56_spill] sm:$0xff] %v9245_v3  ;;  %v5607_v61 = vmul.f32 %v8858_v62, %v5479_v35  ;;  %v6025_v12 = vadd.f32 %v9245_v3, %v8894_v27  ;;  %v9273_v62 = vadd.f32 %v8752_v55, %v1173_v9  ;;  %v15508_v1 = vsub.f32 0.0, %v8817_v11  ;;  %v7007_v27 = vpop.eup %7006  ;;  %vm15821_vm11 = vmmov %vm15818_vm3 }
 0x125   : > { %15807 = vst [vmem:[#allocation57_spill] sm:$0xff] %v9259_v56  ;;  %v15808_v28 = vsub.f32 0.0, %v8305_v47  ;;  %v9282_v26 = vadd.f32 %v9056_v7, %v5223_v18  ;;  %7014 = vlog2.f32 %v3304_v52  ;;  %v9294_v47 = vsel %vm2557_vm0, 1.0, %v15680_v60  ;;  %v1454_v18 = vld [vmem:[%s7742_s27 + $0x278] sm:$0xff] }
 0x126   : > { %1314 = vst.msk [vmem:[%s7898_s10 + $0x240] sm:$0xff] %vm1241_vm9, %v9248_v34  ;;  %v9285_v32 = vadd.f32 %v9059_v53, %v5607_v61  ;;  %7016 = vrcp.f32 %v9053_v33  ;;  %v9302_v7 = vsel %vm2547_vm15, 1.0, %v15680_v60  ;;  %v9304_v53 = vpop.permute.xlu2 %1601  ;;  %v9307_v33 = vadd.f32 %v9259_v56, %v6025_v12  ;;  %v7009_v52 = vpop.eup %7008  ;;  %1742 = vperm.xlu1 %6899, %v1454_v18  }
 0x127   : > { %v9279_v2 = vsub.f32 %v15808_v28, %v9228_v0  ;;  %15809 = vst [vmem:[#allocation58_spill] sm:$0xff] %v9294_v47  ;;  %v9312_v6 = vmin.f32 %v4642_v14, -0.000100005  ;;  %v9314_v4 = vmin.f32 %v4611_v10, -0.000100005  ;;  %v9322_v48 = vsel %vm2546_vm6, 1.0, %v15680_v60  ;;  %v1023_v56 = vpop.f32.mrf.mxu1 }
 0x128   : > { %15810 = vst [vmem:[#allocation59_spill] sm:$0xff] %v9302_v7  ;;  %vm1920_vm8 = vcmp.eq.s32.totalorder %v9304_v53, %v7867_v24  ;;  %v7011_v35 = vpop.eup %7010  ;;  %7018 = vlog2.f32 %v9265_v13  ;;  %v3584_v14 = vmax.f32 %v8941_v39, 0.0001  ;;  %v3058_v22 = vmul.f32 1.442695, %v15508_v1  ;;  %v1453_v39 = vld [vmem:[%s7742_s27 + $0x270] sm:$0xff] }
 0x129   : > { %1343 = vst.msk [vmem:[%s7898_s10 + $0x328] sm:$0xff] %vm1241_vm9, %v9273_v62  ;;  %vm9332_vm5 = vmand %vm7869_vm4, %vm1920_vm8  ;;  %v7013_v61 = vpop.eup %7012  ;;  %v4643_v9 = vmax.f32 %v9279_v2, -9.2103405  ;;  %7020 = vrcp.f32 %v9136_v36  ;;  %v3560_v28 = vmax.f32 %v7011_v35, 0.0001  ;;  %v9348_v1 = vadd.f32 1.0, %v7009_v52  ;;  %1739 = vperm.xlu0 %6898, %v1453_v39  }
 0x12a   : > { %15811 = vst [vmem:[#allocation60_spill] sm:$0xff] %v9312_v6  ;;  %v9345_v3 = vmul.f32 0.6931472, %v7005_v42  ;;  %7022 = vrcp.f32 %v9157_v46  ;;  %v9351_v47 = vadd.f32 %v8752_v55, %v1023_v56  ;;  %v6833_v36 = vld [vmem:[%s7750_s30 + $0x68] sm:$0xff]  ;;  %v9358_v35 = vsel %vm9332_vm5, 1.0, %v15680_v60  ;;  %vm9401_vm1 = vmxor %vm1920_vm8, %vm7688_vm13 }
 0x12b   : > { %15812 = vst [vmem:[#allocation61_spill] sm:$0xff] %v9322_v48  ;;  %v6849_v2 = vld [vmem:[%s7750_s30 + $0xe8] sm:$0xff]  ;;  %v7015_v12 = vpop.eup %7014  ;;  %v4096_v42 = vsub.f32 0.0, %v8777_v20  ;;  %v3688_v46 = vmin.f32 %v3560_v28, 0.9999  ;;  %v9365_v6 = vadd.f32 1.0, %v7013_v61  ;;  %7024 = vpow2.f32 %v3058_v22  ;;  %6510 = vmatmul.msk.bf16.gmra.mxu0 %vm15817_vm10, %v6833_v36  ;;  %vm2560_vm15 = vmand %vm7869_vm4, %vm9401_vm1 }
 0x12c   : > { %15815 = vst [vmem:[#allocation62_spill] sm:$0xff] %v9345_v3  ;;  %v6865_v52 = vld [vmem:[%s7750_s30 + $0x168] sm:$0xff]  ;;  %v9363_v18 = vpop.eup %7016  ;;  %v3712_v56 = vmin.f32 %v3584_v14, 0.9999  ;;  %v3825_v39 = vmul.f32 0.6931472, %v7015_v12  ;;  %6526 = vmatmul.msk.bf16.gmra.mxu1 %vm15818_vm3, %v6849_v2  ;;  %7026 = vlog2.f32 %v9348_v1 }
 0x12d   : > { %15816 = vst [vmem:[#allocation63_spill] sm:$0xff] %v9363_v18  ;;  %v9372_v10 = vmul.f32 0.6931472, %v7007_v27  ;;  %v15820_v28 = vsub.f32 0.0, %v8595_v19  ;;  %v4840_v0 = vsub.f32 1.0, %v3688_v46  ;;  %6542 = vmatmul.msk.bf16.gmra.mxu2 %vm15821_vm11, %v6865_v52  ;;  %v15822_v22 = vsub.f32 0.0, %v8310_v5 }
 0x12e   : > { %1283 = vst.msk [vmem:[%s7898_s10 + $0x148] sm:$0xff] %vm1241_vm9, %v9351_v47  ;;  %v7019_v14 = vpop.eup %7018  ;;  %v4072_v12 = vsub.f32 0.0, %v3825_v39  ;;  %v15823_v36 = vsub.f32 0.0, %v8803_v51  ;;  %7028 = vrcp.f32 %v9265_v13  ;;  %v4224_v20 = vmax.f32 %v4096_v42, -9.2103405 }
 0x12f   : > { %15819 = vst [vmem:[#allocation64_spill] sm:$0xff] %v9372_v10  ;;  %v3116_v49 = vmul.f32 1.442695, %v15820_v28  ;;  %v4544_v61 = vsub.f32 %v15822_v22, %v9345_v3  ;;  %v9384_v2 = vpop.eup %7020  ;;  %v4864_v28 = vsub.f32 1.0, %v3712_v56  ;;  %v15825_v18 = vsub.f32 0.0, %v8528_v8 }
 0x130   : > { %v4456_v27 = vsub.f32 %v15823_v36, %v3825_v39  ;;  %15824 = vst [vmem:[#allocation65_spill] sm:$0xff] %v9384_v2  ;;  %v9389_v7 = vpop.eup %7022  ;;  %7030 = vlog2.f32 %v9365_v6  ;;  %v4200_v5 = vmax.f32 %v4072_v12, -9.2103405  ;;  %v4968_v3 = vmul.f32 %v4840_v0, %v4840_v0  ;;  %v15832_v0 = vld [vmem:[#allocation16_spill] sm:$0xff] }
 0x131   : > { %v3178_v52 = vmul.f32 1.442695, %v15825_v18  ;;  %15826 = vst [vmem:[#allocation66_spill] sm:$0xff] %v9389_v7  ;;  %v15827_v51 = vsub.f32 0.0, %v8339_v45  ;;  %v9395_v36 = vmul.f32 0.6931472, %v7019_v14  ;;  %7032 = vpow2.f32 %v3116_v49  ;;  %v7025_v12 = vpop.eup %7024 }
 0x132   : > { %v4584_v22 = vmax.f32 %v4456_v27, -9.2103405  ;;  %v15831_v42 = vsub.f32 0.0, %v8540_v40  ;;  %vm15833_vm12 = vcmp.eq.s32.totalorder %v15832_v0, %v7867_v24  ;;  %v15836_v14 = vld [vmem:[#allocation24_spill] sm:$0xff]  ;;  %v4328_v53 = vmin.f32 %v4200_v5, -0.000100005  ;;  %v7027_v49 = vpop.eup %7026 }
 0x133   : > { %v4484_v39 = vsub.f32 %v15827_v51, %v9372_v10  ;;  %15828 = vst [vmem:[#allocation67_spill] sm:$0xff] %v9395_v36  ;;  %vm9411_vm0 = vmxor %vm15833_vm12, %vm7688_vm13  ;;  %v15513_v27 = vsub.f32 0.0, %v15836_v14  ;;  %v5352_v2 = vmul.f32 %v3688_v46, %v3688_v46  ;;  %v9416_v48 = vmin.f32 %v4643_v9, -0.000100005  ;;  %v1456_v45 = vld [vmem:[%s7742_s27 + $0x288] sm:$0xff] }
 0x134   : > { %v3236_v18 = vmul.f32 1.442695, %v15831_v42  ;;  %v4712_v51 = vmin.f32 %v4584_v22, -0.000100005  ;;  %v4352_v50 = vmin.f32 %v4224_v20, -0.000100005  ;;  %7034 = vpow2.f32 %v3178_v52  ;;  %v9422_v29 = vpop.eup %7028  ;;  %vm2550_vm6 = vmand %vm7869_vm4, %vm9411_vm0  ;;  %1748 = vperm.xlu0 %6898, %v1456_v45  }
 0x135   : > { %15837 = vst [vmem:[#allocation16_spill] sm:$0xff] %v9416_v48  ;;  %v3305_v42 = vadd.f32 1.0, %v7025_v12  ;;  %v4992_v0 = vmul.f32 %v4864_v28, %v4864_v28  ;;  %v5376_v21 = vmul.f32 %v3712_v56, %v3712_v56  ;;  %v5096_v10 = vmul.f32 %v4968_v3, %v4328_v53  ;;  %v15840_v28 = vld [vmem:[#allocation15_spill] sm:$0xff]  ;;  %v1176_v48 = vpop.f32.mrf.mxu3 }
 0x136   : > { %v5480_v7 = vmul.f32 %v5352_v2, %v4712_v51  ;;  %15838 = vst [vmem:[#allocation24_spill] sm:$0xff] %v9422_v29  ;;  %v4672_v5 = vmax.f32 %v4544_v61, -9.2103405  ;;  %v4612_v22 = vmax.f32 %v4484_v39, -9.2103405  ;;  %v15839_v9 = vsub.f32 0.0, %v8349_v17  ;;  %v7031_v20 = vpop.eup %7030 }
 0x137   : > { %7036 = vpow2.f32 %v3236_v18  ;;  %vm15841_vm8 = vcmp.eq.s32.totalorder %v15840_v28, %v7867_v24  ;;  %v3180_v56 = vmul.f32 1.442695, %v15513_v27  ;;  %v15844_v17 = vld [vmem:[#allocation2_spill] sm:$0xff]  ;;  %v15845_v2 = vld [vmem:[#allocation29_spill] sm:$0xff]  ;;  %v7033_v39 = vpop.eup %7032  ;;  %v9443_v12 = vmul.f32 0.6931472, %v7027_v49  ;;  %v946_v28 = vpop.f32.mrf.mxu0 }
 0x138   : > { %v4516_v46 = vsub.f32 %v15839_v9, %v9395_v36  ;;  %vm9435_vm5 = vmxor %vm15841_vm8, %vm7688_vm13  ;;  %v5224_v61 = vmul.f32 %v15844_v17, %v5096_v10  ;;  %v5608_v52 = vmul.f32 %v15845_v2, %v5480_v7  ;;  %7038 = vrcp.f32 %v3305_v42  ;;  %v15847_v53 = vld [vmem:[#allocation27_spill] sm:$0xff]  ;;  %v1026_v36 = vpop.f32.mrf.mxu1 }
 0x139   : > { %15846 = vst [vmem:[#allocation15_spill] sm:$0xff] %v9443_v12  ;;  %v6722_v18 = vsel %vm2560_vm15, 1.0, %v15680_v60  ;;  %v15512_v51 = vsub.f32 0.0, %v15847_v53  ;;  %7040 = vlog2.f32 %v3305_v42  ;;  %v5120_v9 = vmul.f32 %v4992_v0, %v4352_v50  ;;  %vm2549_vm10 = vmand %vm7869_vm4, %vm9435_vm5  ;;  %v1103_v50 = vpop.f32.mrf.mxu2  ;;  %v1457_v42 = vld [vmem:[%s7742_s27 + $0x290] sm:$0xff] }
 0x13a   : > { %v5504_v10 = vmul.f32 %v5376_v21, %v9007_v31  ;;  %v9454_v7 = vadd.f32 %v9282_v26, %v5224_v61  ;;  %v9457_v49 = vadd.f32 %v9285_v32, %v5608_v52  ;;  %v7035_v17 = vpop.eup %7034  ;;  %v9459_v13 = vmin.f32 %v4672_v5, -0.000100005  ;;  %v1458_v21 = vld [vmem:[%s7742_s27 + $0x298] sm:$0xff]  ;;  %1751 = vperm.xlu1 %6899, %v1457_v42   ;;  %v6880_v42 = vld [vmem:[%s7750_s30 + $0x1e0] sm:$0xff] }
 0x13b   : > { %v9461_v2 = vmin.f32 %v4612_v22, -0.000100005  ;;  %7042 = vrcp.f32 %v9348_v1  ;;  %v9470_v31 = vsel %vm2550_vm6, 1.0, %v15680_v60  ;;  %v4644_v26 = vmax.f32 %v4516_v46, -9.2103405  ;;  %1754 = vperm.xlu2 %6900, %v1458_v21   ;;  %6557 = vmatmul.msk.bf16.gmra.mxu3 %vm15821_vm11, %v6880_v42 }
 0x13c   : > { %15848 = vst [vmem:[#allocation2_spill] sm:$0xff] %v9459_v13  ;;  %v3334_v32 = vadd.f32 1.0, %v7033_v39  ;;  %7044 = vpow2.f32 %v3180_v56  ;;  %v9478_v1 = vadd.f32 %v8752_v55, %v1103_v50  ;;  %v15851_v5 = vsub.f32 0.0, %v8419_v16 }
 0x13d   : > { %15849 = vst [vmem:[#allocation29_spill] sm:$0xff] %v9461_v2  ;;  %v7037_v0 = vpop.eup %7036  ;;  %v9487_v61 = vmul.f32 0.6931472, %v7031_v20  ;;  %v3238_v46 = vmul.f32 1.442695, %v15512_v51  ;;  %v9492_v56 = vadd.f32 %v8752_v55, %v946_v28  ;;  %v9495_v39 = vmul.f32 %v9358_v35, %v5120_v9  ;;  %v6834_v2 = vld [vmem:[%s7750_s30 + $0x70] sm:$0xff] }
 0x13e   : > { %15850 = vst [vmem:[#allocation27_spill] sm:$0xff] %v9470_v31  ;;  %v9485_v22 = vsub.f32 %v15851_v5, %v9443_v12  ;;  %v7039_v52 = vpop.eup %7038  ;;  %v9497_v50 = vmul.f32 %v6722_v18, %v5504_v10  ;;  %v9505_v16 = vsel %vm2549_vm10, 1.0, %v15680_v60  ;;  %v9507_v20 = vadd.f32 1.0, %v7035_v17 }
 0x13f   : > { %15852 = vst [vmem:[#allocation68_spill] sm:$0xff] %v9495_v39  ;;  %v7041_v28 = vpop.eup %7040  ;;  %7046 = vrcp.f32 %v9365_v6  ;;  %v3587_v9 = vmax.f32 %v9168_v15, 0.0001  ;;  %v4099_v18 = vsub.f32 0.0, %v9134_v23  ;;  %v3561_v10 = vmax.f32 %v7039_v52, 0.0001  ;;  %v1611_v23 = vpop.permute.xlu2 %1610 }
 0x140   : > { %15853 = vst [vmem:[#allocation69_spill] sm:$0xff] %v9497_v50  ;;  %v9518_v3 = vmin.f32 %v4644_v26, -0.000100005  ;;  %v9520_v21 = vadd.f32 1.0, %v7037_v0  ;;  %7048 = vlog2.f32 %v3334_v32  ;;  %v3827_v17 = vmul.f32 0.6931472, %v7041_v28 }
 0x141   : > { %15854 = vst [vmem:[#allocation70_spill] sm:$0xff] %v9505_v16  ;;  %v9523_v45 = vpop.eup %7042  ;;  %v15857_v15 = vsub.f32 0.0, %v8436_v37  ;;  %7050 = vpow2.f32 %v3238_v46  ;;  %v3689_v52 = vmin.f32 %v3561_v10, 0.9999  ;;  %vm1923_vm3 = vcmp.eq.s32.totalorder %v1611_v23, %v7867_v24  ;;  %v15859_v37 = vld [vmem:[#allocation36_spill] sm:$0xff]  ;;  %v15860_v46 = vld [vmem:[#allocation38_spill] sm:$0xff] }
 0x142   : > { %1315 = vst.msk [vmem:[%s7898_s10 + $0x248] sm:$0xff] %vm1241_vm9, %v9478_v1  ;;  %v7045_v51 = vpop.eup %7044  ;;  %7052 = vlog2.f32 %v9507_v20  ;;  %v4073_v26 = vsub.f32 0.0, %v3827_v17  ;;  %v15858_v0 = vsub.f32 0.0, %v8817_v11  ;;  %v3715_v27 = vmin.f32 %v3587_v9, 0.9999  ;;  %vm9561_vm0 = vmxor %vm1923_vm3, %vm7688_vm13 }
 0x143   : > { %1252 = vst.msk [vmem:[%s7898_s10 + $0x50] sm:$0xff] %vm1241_vm9, %v9492_v56  ;;  %v9529_v6 = vsub.f32 %v15857_v15, %v9487_v61  ;;  %v9536_v5 = vmax.f32 %v4099_v18, -9.2103405  ;;  %v4841_v13 = vsub.f32 1.0, %v3689_v52  ;;  %7054 = vlog2.f32 %v9520_v21  ;;  %v15861_v18 = vld [vmem:[#allocation20_spill] sm:$0xff]  ;;  %vm2563_vm5 = vmand %vm7869_vm4, %vm9561_vm0 }
 0x144   : > { %15855 = vst [vmem:[#allocation71_spill] sm:$0xff] %v9518_v3  ;;  %v4457_v28 = vsub.f32 %v15858_v0, %v3827_v17  ;;  %v4201_v39 = vmax.f32 %v4073_v26, -9.2103405  ;;  %v4867_v11 = vsub.f32 1.0, %v3715_v27  ;;  %v9544_v17 = vadd.f32 1.0, %v7045_v51  ;;  %vm9610_vm10 = vmand %vm7869_vm4, %vm1923_vm3 }
 0x145   : > { %15856 = vst [vmem:[#allocation72_spill] sm:$0xff] %v9523_v45  ;;  %v9541_v12 = vpop.eup %7046  ;;  %v4613_v45 = vmax.f32 %v9529_v6, -9.2103405  ;;  %v4969_v42 = vmul.f32 %v4841_v13, %v4841_v13  ;;  %7056 = vrcp.f32 %v3334_v32  ;;  %vm15862_vm1 = vcmp.eq.s32.totalorder %v15861_v18, %v7867_v24 }
 0x146   : > { %v4585_v50 = vmax.f32 %v4457_v28, -9.2103405  ;;  %v7049_v9 = vpop.eup %7048  ;;  %vm9550_vm12 = vmxor %vm15862_vm1, %vm7688_vm13  ;;  %v4329_v26 = vmin.f32 %v4201_v39, -0.000100005  ;;  %v5353_v10 = vmul.f32 %v3689_v52, %v3689_v52  ;;  %v4355_v6 = vmin.f32 %v9536_v5, -0.000100005 }
 0x147   : > { %v7051_v15 = vpop.eup %7050  ;;  %v5379_v31 = vmul.f32 %v3715_v27, %v3715_v27  ;;  %v15865_v51 = vsub.f32 0.0, %v15859_v37  ;;  %v15868_v39 = vsub.f32 0.0, %v15860_v46  ;;  %v9568_v52 = vadd.f32 %v8752_v55, %v1176_v48  ;;  %vm2553_vm15 = vmand %vm7869_vm4, %vm9550_vm12 }
 0x148   : > { %v4713_v28 = vmin.f32 %v4585_v50, -0.000100005  ;;  %v7053_v16 = vpop.eup %7052  ;;  %v5097_v5 = vmul.f32 %v4969_v42, %v4329_v26  ;;  %v4995_v32 = vmul.f32 %v4867_v11, %v4867_v11  ;;  %7058 = vlog2.f32 %v9544_v17  ;;  %v15869_v42 = vld [vmem:[#allocation21_spill] sm:$0xff]  ;;  %v15873_v11 = vld [vmem:[#allocation3_spill] sm:$0xff] }
 0x149   : > { %v3118_v13 = vmul.f32 1.442695, %v15865_v51  ;;  %v3182_v50 = vmul.f32 1.442695, %v15868_v39  ;;  %v9570_v51 = vmul.f32 0.6931472, %v7049_v9  ;;  %v7055_v29 = vpop.eup %7054  ;;  %vm15870_vm6 = vcmp.eq.s32.totalorder %v15869_v42, %v7867_v24 }
 0x14a   : > { %v5481_v27 = vmul.f32 %v5353_v10, %v4713_v28  ;;  %v15516_v3 = vsub.f32 0.0, %v9492_v56  ;;  %vm9582_vm8 = vmxor %vm15870_vm6, %vm7688_vm13  ;;  %v9586_v10 = vadd.f32 1.0, %v7051_v15  ;;  %v5225_v9 = vmul.f32 %v15873_v11, %v5097_v5  ;;  %1344 = vst.msk [vmem:[%s7898_s10 + $0x330] sm:$0xff] %vm1241_vm9, %v9568_v52 }
 0x14b   : > { %v9594_v28 = vadd.f32 %v8752_v55, %v1026_v36  ;;  %v9596_v39 = vmul.f32 0.6931472, %v7053_v16  ;;  %7060 = vpow2.f32 %v3118_v13  ;;  %v15875_v15 = vsub.f32 0.0, %v9062_v38  ;;  %v1620_v16 = vpop.permute.xlu2 %1619  ;;  %vm2552_vm3 = vmand %vm7869_vm4, %vm9582_vm8 }
 0x14c   : > { %v5609_v26 = vmul.f32 %v8991_v43, %v5481_v27  ;;  %v3060_v43 = vmul.f32 1.442695, %v15516_v3  ;;  %v7057_v27 = vpop.eup %7056  ;;  %7062 = vpow2.f32 %v3182_v50  ;;  %v15517_v42 = vsub.f32 0.0, %v9139_v44  ;;  %vm9759_vm8 = vmxor %vm1915_vm7, %vm7688_vm13 }
 0x14d   : > { %15874 = vst [vmem:[#allocation36_spill] sm:$0xff] %v9596_v39  ;;  %v3240_v5 = vmul.f32 1.442695, %v15875_v15  ;;  %v9616_v13 = vadd.f32 %v9454_v7, %v5225_v9  ;;  %v15878_v23 = vmax.f32 %v9485_v22, -9.2103405  ;;  %vm1926_vm11 = vcmp.eq.s32.totalorder %v1620_v16, %v7867_v24  ;;  %vm2555_vm7 = vmand %vm7869_vm4, %vm9759_vm8 }
 0x14e   : > { %v9619_v11 = vadd.f32 %v9457_v49, %v5609_v26  ;;  %1284 = vst.msk [vmem:[%s7898_s10 + $0x150] sm:$0xff] %vm1241_vm9, %v9594_v28  ;;  %v9628_v3 = vmul.f32 0.6931472, %v7055_v29  ;;  %7064 = vpow2.f32 %v3060_v43  ;;  %v15881_v7 = vsub.f32 0.0, %v8595_v19  ;;  %vm9649_vm1 = vmxor %vm1926_vm11, %vm7688_vm13  ;;  %v7059_v19 = vpop.eup %7058 }
 0x14f   : > { %v9626_v15 = vmin.f32 %v15878_v23, -0.000100005  ;;  %v6725_v29 = vsel %vm2563_vm5, 1.0, %v15680_v60  ;;  %v5507_v22 = vmul.f32 %v5379_v31, %v9314_v4  ;;  %7066 = vlog2.f32 %v9586_v10  ;;  %vm9675_vm0 = vmand %vm7869_vm4, %vm1926_vm11 }
 0x150   : > { %15880 = vst [vmem:[#allocation20_spill] sm:$0xff] %v9628_v3  ;;  %v4486_v49 = vsub.f32 %v15881_v7, %v9570_v51  ;;  %v15884_v9 = vsub.f32 0.0, %v8528_v8  ;;  %v5123_v43 = vmul.f32 %v4995_v32, %v4355_v6  ;;  %v3590_v18 = vmax.f32 %v7057_v27, 0.0001  ;;  %vm2566_vm12 = vmand %vm7869_vm4, %vm9649_vm1  ;;  %v1106_v27 = vpop.f32.mrf.mxu2 }
 0x151   : > { %15879 = vst [vmem:[#allocation38_spill] sm:$0xff] %v9626_v15  ;;  %7068 = vpow2.f32 %v3240_v5  ;;  %v9656_v23 = vmin.f32 %v4613_v45, -0.000100005  ;;  %v9661_v4 = vsel %vm9610_vm10, 1.0, %v15680_v60  ;;  %v9669_v31 = vsel %vm2553_vm15, 1.0, %v15680_v60  ;;  %v7061_v6 = vpop.eup %7060  ;;  %vm9815_vm10 = vmxor %vm1919_vm14, %vm7688_vm13 }
 0x152   : > { %v4517_v26 = vsub.f32 %v15884_v9, %v9596_v39  ;;  %15886 = vst [vmem:[#allocation3_spill] sm:$0xff] %v9669_v31  ;;  %v3120_v45 = vmul.f32 1.442695, %v15517_v42  ;;  %7070 = vrcp.f32 %v9507_v20  ;;  %v15889_v0 = vsub.f32 0.0, %v8540_v40  ;;  %v7063_v40 = vpop.eup %7062  ;;  %vm9913_vm8 = vmxor %vm1918_vm2, %vm7688_vm13 }
 0x153   : > { %15885 = vst [vmem:[#allocation21_spill] sm:$0xff] %v9656_v23  ;;  %v9693_v5 = vsel %vm2552_vm3, 1.0, %v15680_v60  ;;  %v4102_v20 = vsub.f32 0.0, %v9570_v51  ;;  %7072 = vrcp.f32 %v9520_v21  ;;  %v4614_v36 = vmax.f32 %v4486_v49, -9.2103405  ;;  %vm2558_vm2 = vmand %vm7869_vm4, %vm9913_vm8 }
 0x154   : > { %v9685_v32 = vsub.f32 %v15889_v0, %v9628_v3  ;;  %15890 = vst [vmem:[#allocation73_spill] sm:$0xff] %v9693_v5  ;;  %v9701_v16 = vmul.f32 %v6725_v29, %v5507_v22  ;;  %v9704_v48 = vadd.f32 %v8752_v55, %v1106_v27  ;;  %v7065_v7 = vpop.eup %7064  ;;  %v4645_v9 = vmax.f32 %v4517_v26, -9.2103405 }
 0x155   : > { %v9707_v50 = vmul.f32 %v9661_v4, %v5123_v43  ;;  %v9712_v51 = vsel %vm9675_vm0, 1.0, %v15680_v60  ;;  %v3718_v0 = vmin.f32 %v3590_v18, 0.9999  ;;  %v7067_v42 = vpop.eup %7066  ;;  %v3335_v15 = vadd.f32 1.0, %v7061_v6 }
 0x156   : > { %15891 = vst [vmem:[#allocation74_spill] sm:$0xff] %v9701_v16  ;;  %v9715_v21 = vsel %vm2566_vm12, 1.0, %v15680_v60  ;;  %7074 = vpow2.f32 %v3120_v45  ;;  %v3306_v49 = vadd.f32 1.0, %v7065_v7  ;;  %v4674_v29 = vmax.f32 %v9685_v32, -9.2103405  ;;  %v15896_v32 = vld [vmem:[#allocation26_spill] sm:$0xff]  ;;  %vm2559_vm12 = vmand %vm7869_vm4, %vm9815_vm10 }
 0x157   : > { %15892 = vst [vmem:[#allocation75_spill] sm:$0xff] %v9707_v50  ;;  %v7069_v55 = vpop.eup %7068  ;;  %7076 = vrcp.f32 %v9544_v17  ;;  %v4230_v22 = vmax.f32 %v4102_v20, -9.2103405  ;;  %v4870_v26 = vsub.f32 1.0, %v3718_v0  ;;  %v4742_v43 = vmin.f32 %v4614_v36, -0.000100005  ;;  %v948_v36 = vpop.f32.mrf.mxu0 }
 0x158   : > { %1316 = vst.msk [vmem:[%s7898_s10 + $0x250] sm:$0xff] %vm1241_vm9, %v9704_v48  ;;  %v9722_v8 = vadd.f32 1.0, %v7063_v40  ;;  %7078 = vrcp.f32 %v3306_v49  ;;  %v9725_v6 = vpop.eup %7070  ;;  %v9727_v45 = vmul.f32 0.6931472, %v7059_v19  ;;  %v9730_v27 = vmul.f32 0.6931472, %v7067_v42  ;;  %v1178_v40 = vpop.f32.mrf.mxu3 }
 0x159   : > { %15893 = vst [vmem:[#allocation76_spill] sm:$0xff] %v9725_v6  ;;  %7080 = vrcp.f32 %v9586_v10  ;;  %vm15897_vm15 = vcmp.eq.s32.totalorder %v15896_v32, %v7867_v24  ;;  %v9741_v7 = vpop.eup %7072  ;;  %v5382_v19 = vmul.f32 %v3718_v0, %v3718_v0  ;;  %v9743_v10 = vadd.f32 1.0, %v7069_v55  ;;  %v9748_v42 = vld [vmem:[%s15432_s2] ss:$0 sm:$0xff] }
 0x15a   : > { %15894 = vst [vmem:[#allocation77_spill] sm:$0xff] %v9727_v45  ;;  %vm9736_vm6 = vmxor %vm15897_vm15, %vm7688_vm13  ;;  %7082 = vlog2.f32 %v3335_v15  ;;  %v9751_v32 = vadd.f32 %v9748_v42, %v1178_v40  ;;  %v9753_v20 = vmin.f32 %v4645_v9, -0.000100005  ;;  %v4358_v18 = vmin.f32 %v4230_v22, -0.000100005  ;;  %v1461_v40 = vld [vmem:[%s7742_s27 + $0x2b0] sm:$0xff] }
 0x15b   : > { %15895 = vst [vmem:[#allocation78_spill] sm:$0xff] %v9730_v27  ;;  %v4998_v50 = vmul.f32 %v4870_v26, %v4870_v26  ;;  %7084 = vlog2.f32 %v3306_v49  ;;  %vm2556_vm5 = vmand %vm7869_vm4, %vm9736_vm6  ;;  %v15905_v9 = vsub.f32 0.0, %v9248_v34  ;;  %v9775_v49 = vadd.f32 %v9748_v42, %v948_v36  ;;  %v1028_v26 = vpop.f32.mrf.mxu1  ;;  %1763 = vperm.xlu2 %6900, %v1461_v40   ;;  %v1459_v6 = vld [vmem:[%s7742_s27 + $0x2a0] sm:$0xff] }
 0x15c   : > { %15900 = vst [vmem:[#allocation26_spill] sm:$0xff] %v9741_v7  ;;  %v7075_v55 = vpop.eup %7074  ;;  %7086 = vlog2.f32 %v9722_v8  ;;  %v1460_v7 = vld [vmem:[%s7742_s27 + $0x2a8] sm:$0xff]  ;;  %v15907_v31 = vsub.f32 0.0, %v15836_v14  ;;  %v9790_v36 = vadd.f32 %v9748_v42, %v1028_v26  ;;  %v9795_v14 = vmin.f32 %v4674_v29, -0.000100005  ;;  %1757 = vperm.xlu0 %6898, %v1459_v6  }
 0x15d   : > { %15901 = vst [vmem:[#allocation79_spill] sm:$0xff] %v9753_v20  ;;  %v3184_v22 = vmul.f32 1.442695, %v15905_v9  ;;  %v9779_v3 = vpop.eup %7076  ;;  %v15908_v9 = vsub.f32 0.0, %v15847_v53  ;;  %v15909_v20 = vsub.f32 0.0, %v9351_v47  ;;  %1760 = vperm.xlu1 %6899, %v1460_v7   ;;  %7088 = vlog2.f32 %v9743_v10 }
 0x15e   : > { %1345 = vst.msk [vmem:[%s7898_s10 + $0x338] sm:$0xff] %vm1241_vm9, %v9751_v32  ;;  %v4518_v5 = vsub.f32 %v15907_v31, %v9727_v45  ;;  %v7079_v23 = vpop.eup %7078  ;;  %v5510_v31 = vmul.f32 %v5382_v19, %v4742_v43  ;;  %v15520_v53 = vsub.f32 0.0, %v9775_v49  ;;  %7090 = vrcp.f32 %v3335_v15  ;;  %v1629_v43 = vpop.permute.xlu2 %1628 }
 0x15f   : > { %15906 = vst [vmem:[#allocation28_spill] sm:$0xff] %v9779_v3  ;;  %v4547_v16 = vsub.f32 %v15908_v9, %v9730_v27  ;;  %v3122_v39 = vmul.f32 1.442695, %v15909_v20  ;;  %v6850_v3 = vld [vmem:[%s7750_s30 + $0xf0] sm:$0xff]  ;;  %v9807_v7 = vpop.eup %7080  ;;  %v5126_v29 = vmul.f32 %v4998_v50, %v4358_v18  ;;  %v9809_v26 = vadd.f32 1.0, %v7075_v55 }
 0x160   : > { %15910 = vst [vmem:[#allocation80_spill] sm:$0xff] %v9795_v14  ;;  %v6866_v20 = vld [vmem:[%s7750_s30 + $0x170] sm:$0xff]  ;;  %v3562_v40 = vmax.f32 %v7079_v23, 0.0001  ;;  %vm15914_vm3 = vcmask 64512   ;;  %v7083_v15 = vpop.eup %7082  ;;  %vm1929_vm1 = vcmp.eq.s32.totalorder %v1629_v43, %v7867_v24  ;;  %7092 = vpow2.f32 %v3184_v22 }
 0x161   : > { %1253 = vst.msk [vmem:[%s7898_s10 + $0x58] sm:$0xff] %vm1241_vm9, %v9775_v49  ;;  %6511 = vmatmul.msk.bf16.gmra.mxu0 %vm15914_vm3, %v6834_v2  ;;  %vm15915_vm11 = vmmov %vm15914_vm3  ;;  %v15916_v50 = vsub.f32 0.0, %v9273_v62  ;;  %v3062_v58 = vmul.f32 1.442695, %v15520_v53  ;;  %v7085_v23 = vpop.eup %7084  ;;  %v4646_v6 = vmax.f32 %v4518_v5, -9.2103405  ;;  %7094 = vpow2.f32 %v3122_v39  ;;  %v1608_v2 = vpop.permute.xlu1 %1607 }
 0x162   : > { %15911 = vst [vmem:[#allocation81_spill] sm:$0xff] %v9807_v7  ;;  %6527 = vmatmul.msk.bf16.gmra.mxu1 %vm15915_vm11, %v6850_v3  ;;  %vm15917_vm14 = vmmov %vm15914_vm3  ;;  %v4675_v55 = vmax.f32 %v4547_v16, -9.2103405  ;;  %v3690_v3 = vmin.f32 %v3562_v40, 0.9999  ;;  %v7087_v22 = vpop.eup %7086  ;;  %v9843_v9 = vsel %vm2556_vm5, 1.0, %v15680_v60  ;;  %v9860_v17 = vmul.f32 %v9715_v21, %v5510_v31 }
 0x163   : > { %1285 = vst.msk [vmem:[%s7898_s10 + $0x158] sm:$0xff] %vm1241_vm9, %v9790_v36  ;;  %v3242_v18 = vmul.f32 1.442695, %v15916_v50  ;;  %6543 = vmatmul.msk.bf16.gmra.mxu2 %vm15917_vm14, %v6866_v20  ;;  %vm9833_vm0 = vmxor %vm1929_vm1, %vm7688_vm13  ;;  %v9851_v5 = vsel %vm2555_vm7, 1.0, %v15680_v60  ;;  %v3829_v39 = vmul.f32 0.6931472, %v7085_v23  ;;  %7096 = vpow2.f32 %v3062_v58  ;;  %v7089_v20 = vpop.eup %7088 }
 0x164   : > { %15920 = vst [vmem:[#allocation82_spill] sm:$0xff] %v9843_v9  ;;  %v9857_v16 = vmul.f32 0.6931472, %v7083_v15  ;;  %7098 = vlog2.f32 %v9809_v26  ;;  %vm2057_vm15 = vmand %vm7869_vm4, %vm1929_vm1  ;;  %v4842_v0 = vsub.f32 1.0, %v3690_v3  ;;  %v9868_v40 = vmul.f32 %v9712_v51, %v5126_v29  ;;  %v9876_v50 = vpop.eup %7090 }
 0x165   : > { %15921 = vst [vmem:[#allocation83_spill] sm:$0xff] %v9851_v5  ;;  %vm2569_vm6 = vmand %vm7869_vm4, %vm9833_vm0  ;;  %7100 = vpow2.f32 %v3242_v18  ;;  %v4074_v21 = vsub.f32 0.0, %v3829_v39  ;;  %v15924_v31 = vsub.f32 0.0, %v9492_v56  ;;  %v9878_v43 = vmin.f32 %v4646_v6, -0.000100005 }
 0x166   : > { %15922 = vst [vmem:[#allocation84_spill] sm:$0xff] %v9860_v17  ;;  %v9880_v58 = vmin.f32 %v4675_v55, -0.000100005  ;;  %7102 = vrcp.f32 %v9722_v8  ;;  %v9883_v29 = vmul.f32 0.6931472, %v7087_v22  ;;  %v7093_v23 = vpop.eup %7092  ;;  %v9886_v53 = vsel %vm2057_vm15, 1.0, %v15680_v60 }
 0x167   : > { %15923 = vst [vmem:[#allocation85_spill] sm:$0xff] %v9868_v40  ;;  %v4458_v15 = vsub.f32 %v15924_v31, %v3829_v39  ;;  %v4202_v27 = vmax.f32 %v4074_v21, -9.2103405  ;;  %v4970_v7 = vmul.f32 %v4842_v0, %v4842_v0  ;;  %v7095_v40 = vpop.eup %7094  ;;  %v15928_v56 = vsub.f32 0.0, %v15859_v37 }
 0x168   : > { %15925 = vst [vmem:[#allocation86_spill] sm:$0xff] %v9878_v43  ;;  %v9891_v6 = vmul.f32 0.6931472, %v7089_v20  ;;  %v9899_v8 = vsel %vm2569_vm6, 1.0, %v15680_v60  ;;  %v9907_v55 = vsel %vm2559_vm12, 1.0, %v15680_v60  ;;  %vm1922_vm5 = vcmp.eq.s32.totalorder %v1608_v2, %v7867_v24  ;;  %v1181_v43 = vpop.f32.mrf.mxu3 }
 0x169   : > { %15926 = vst [vmem:[#allocation87_spill] sm:$0xff] %v9880_v58  ;;  %v4586_v18 = vmax.f32 %v4458_v15, -9.2103405  ;;  %v4487_v39 = vsub.f32 %v15928_v56, %v9857_v16  ;;  %v7097_v22 = vpop.eup %7096  ;;  %v4330_v0 = vmin.f32 %v4202_v27, -0.000100005  ;;  %v5354_v21 = vmul.f32 %v3690_v3, %v3690_v3  ;;  %vm9937_vm7 = vmxor %vm1922_vm5, %vm7688_vm13 }
 0x16a   : > { %15927 = vst [vmem:[#allocation88_spill] sm:$0xff] %v9883_v29  ;;  %v7099_v31 = vpop.eup %7098  ;;  %v15933_v19 = vsub.f32 0.0, %v15860_v46  ;;  %7104 = vrcp.f32 %v9743_v10  ;;  %v9922_v56 = vadd.f32 1.0, %v7093_v23  ;;  %v3307_v41 = vadd.f32 1.0, %v7097_v22  ;;  %vm9947_vm3 = vmand %vm7869_vm4, %vm1922_vm5 }
 0x16b   : > { %15929 = vst [vmem:[#allocation89_spill] sm:$0xff] %v9891_v6  ;;  %v4714_v20 = vmin.f32 %v4586_v18, -0.000100005  ;;  %v7101_v58 = vpop.eup %7100  ;;  %v3337_v17 = vadd.f32 1.0, %v7095_v40  ;;  %v3586_v27 = vmax.f32 %v9141_v30, 0.0001  ;;  %v5098_v3 = vmul.f32 %v4970_v7, %v4330_v0  ;;  %vm2562_vm1 = vmand %vm7869_vm4, %vm9937_vm7 }
 0x16c   : > { %15930 = vst [vmem:[#allocation90_spill] sm:$0xff] %v9907_v55  ;;  %v4519_v15 = vsub.f32 %v15933_v19, %v9883_v29  ;;  %v9929_v55 = vpop.eup %7102  ;;  %v4615_v46 = vmax.f32 %v4487_v39, -9.2103405  ;;  %v15935_v10 = vsub.f32 0.0, %v9062_v38  ;;  %v1638_v19 = vpop.permute.xlu2 %1637  ;;  %v4098_v40 = vsub.f32 0.0, %v9013_v63  ;;  %v15940_v30 = vld [vmem:[#allocation4_spill] sm:$0xff] }
 0x16d   : > { %v5482_v18 = vmul.f32 %v5354_v21, %v4714_v20  ;;  %15934 = vst [vmem:[#allocation91_spill] sm:$0xff] %v9929_v55  ;;  %7106 = vrcp.f32 %v3307_v41  ;;  %vm1932_vm10 = vcmp.eq.s32.totalorder %v1638_v19, %v7867_v24  ;;  %v5226_v7 = vmul.f32 %v15940_v30, %v5098_v3  ;;  %v15941_v39 = vld [vmem:[#allocation40_spill] sm:$0xff] }
 0x16e   : > { %v4548_v23 = vsub.f32 %v15935_v10, %v9891_v6  ;;  %7108 = vlog2.f32 %v3307_v41  ;;  %v4647_v20 = vmax.f32 %v4519_v15, -9.2103405  ;;  %v9953_v21 = vmul.f32 0.6931472, %v7099_v31  ;;  %vm9959_vm11 = vmxor %vm1932_vm10, %vm7688_vm13 }
 0x16f   : > { %v5610_v0 = vmul.f32 %v15941_v39, %v5482_v18  ;;  %7110 = vlog2.f32 %v9922_v56  ;;  %v3397_v63 = vadd.f32 1.0, %v7101_v58  ;;  %v3714_v41 = vmin.f32 %v3586_v27, 0.9999  ;;  %vm9989_vm14 = vmand %vm7869_vm4, %vm1932_vm10  ;;  %v1108_v27 = vpop.f32.mrf.mxu2  ;;  %v1463_v39 = vld [vmem:[%s7742_s27 + $0x2c0] sm:$0xff] }
 0x170   : > { %7112 = vrcp.f32 %v3337_v17  ;;  %v9968_v31 = vadd.f32 %v9616_v13, %v5226_v7  ;;  %v9973_v58 = vpop.eup %7104  ;;  %v9975_v3 = vmin.f32 %v4615_v46, -0.000100005  ;;  %v4676_v18 = vmax.f32 %v4548_v23, -9.2103405  ;;  %vm2572_vm0 = vmand %vm7869_vm4, %vm9959_vm11  ;;  %1769 = vperm.xlu1 %6899, %v1463_v39   ;;  %v1462_v13 = vld [vmem:[%s7742_s27 + $0x2b8] sm:$0xff] }
 0x171   : > { %v9971_v15 = vadd.f32 %v9619_v11, %v5610_v0  ;;  %15944 = vst [vmem:[#allocation4_spill] sm:$0xff] %v9973_v58  ;;  %v9983_v10 = vsel %vm2558_vm2, 1.0, %v15680_v60  ;;  %7114 = vlog2.f32 %v3337_v17  ;;  %v9993_v11 = vpop.permute.xlu0 %1604  ;;  %v9997_v37 = vadd.f32 %v9358_v35, %v9307_v33  ;;  %1766 = vperm.xlu0 %6898, %v1462_v13  }
 0x172   : > { %15945 = vst [vmem:[#allocation40_spill] sm:$0xff] %v9983_v10  ;;  %v10003_v17 = vmax.f32 %v4098_v40, -9.2103405  ;;  %v4866_v46 = vsub.f32 1.0, %v3714_v41  ;;  %v10006_v23 = vadd.f32 %v9748_v42, %v1108_v27  ;;  %v10008_v30 = vmin.f32 %v4647_v20, -0.000100005 }
 0x173   : > { %v7107_v19 = vpop.eup %7106  ;;  %v15949_v33 = vsub.f32 0.0, %v9139_v44  ;;  %7116 = vlog2.f32 %v3397_v63  ;;  %v10018_v7 = vsel %vm9947_vm3, 1.0, %v15680_v60  ;;  %v1464_v40 = vld [vmem:[%s7742_s27 + $0x2c8] sm:$0xff]  ;;  %v10025_v20 = vsel %vm9989_vm14, 1.0, %v15680_v60 }
 0x174   : > { %15948 = vst [vmem:[#allocation92_spill] sm:$0xff] %v10008_v30  ;;  %v7109_v0 = vpop.eup %7108  ;;  %v10033_v44 = vsel %vm2562_vm1, 1.0, %v15680_v60  ;;  %vm1921_vm12 = vcmp.eq.s32.totalorder %v9993_v11, %v7867_v24  ;;  %v3563_v38 = vmax.f32 %v7107_v19, 0.0001  ;;  %1772 = vperm.xlu2 %6900, %v1464_v40   ;;  %7118 = vrcp.f32 %v9809_v26  ;;  %v6881_v26 = vld [vmem:[%s7750_s30 + $0x1e8] sm:$0xff] }
 0x175   : > { %v10013_v35 = vsub.f32 %v15949_v33, %v9953_v21  ;;  %1317 = vst.msk [vmem:[%s7898_s10 + $0x258] sm:$0xff] %vm1241_vm9, %v10006_v23  ;;  %v7111_v27 = vpop.eup %7110  ;;  %v10041_v33 = vmin.f32 %v4676_v18, -0.000100005  ;;  %v10050_v22 = vsel %vm2572_vm0, 1.0, %v15680_v60  ;;  %vm10057_vm15 = vmand %vm7869_vm4, %vm1921_vm12  ;;  %v3831_v18 = vmul.f32 0.6931472, %v7109_v0 }
 0x176   : > { %15951 = vst [vmem:[#allocation94_spill] sm:$0xff] %v10050_v22  ;;  %v7113_v40 = vpop.eup %7112  ;;  %7120 = vrcp.f32 %v9922_v56  ;;  %v4354_v2 = vmin.f32 %v10003_v17, -0.000100005  ;;  %v4994_v39 = vmul.f32 %v4866_v46, %v4866_v46  ;;  %v3691_v6 = vmin.f32 %v3563_v38, 0.9999  ;;  %v951_v38 = vpop.f32.mrf.mxu0  ;;  %vm10133_vm8 = vmxor %vm1921_vm12, %vm7688_vm13 }
 0x177   : > { %15950 = vst [vmem:[#allocation93_spill] sm:$0xff] %v10041_v33  ;;  %v7115_v33 = vpop.eup %7114  ;;  %7122 = vrcp.f32 %v3397_v63  ;;  %v4075_v10 = vsub.f32 0.0, %v3831_v18  ;;  %v15954_v14 = vsub.f32 0.0, %v9775_v49  ;;  %vm15955_vm6 = vcmask 64512   ;;  %vm2561_vm2 = vmand %vm7869_vm4, %vm10133_vm8 }
 0x178   : > { %6558 = vmatmul.msk.bf16.gmra.mxu3 %vm15955_vm6, %v6881_v26  ;;  %v10068_v0 = vmul.f32 0.6931472, %v7111_v27  ;;  %v10073_v56 = vsel %vm10057_vm15, 1.0, %v15680_v60  ;;  %v4843_v46 = vsub.f32 1.0, %v3691_v6  ;;  %v5378_v58 = vmul.f32 %v3714_v41, %v3714_v41  ;;  %v1031_v41 = vpop.f32.mrf.mxu1  ;;  %vm15984_vm12 = vmmov %vm15955_vm6 }
 0x179   : > { %v4459_v9 = vsub.f32 %v15954_v14, %v3831_v18  ;;  %v7117_v13 = vpop.eup %7116  ;;  %v3585_v63 = vmax.f32 %v8983_v54, 0.0001  ;;  %v4203_v5 = vmax.f32 %v4075_v10, -9.2103405  ;;  %v3593_v14 = vmax.f32 %v7113_v40, 0.0001  ;;  %vm15985_vm15 = vmmov %vm15955_vm6 }
 0x17a   : > { %15956 = vst [vmem:[#allocation95_spill] sm:$0xff] %v10068_v0  ;;  %v3891_v18 = vmul.f32 0.6931472, %v7115_v33  ;;  %v4971_v26 = vmul.f32 %v4843_v46, %v4843_v46  ;;  %v5355_v27 = vmul.f32 %v3691_v6, %v3691_v6  ;;  %v10077_v45 = vpop.eup %7118  ;;  %v10080_v17 = vadd.f32 %v9748_v42, %v1181_v43  ;;  %vm15988_vm8 = vmmov %vm15984_vm12 }
 0x17b   : > { %v4587_v49 = vmax.f32 %v4459_v9, -9.2103405  ;;  %v4331_v19 = vmin.f32 %v4203_v5, -0.000100005  ;;  %v10083_v29 = vadd.f32 %v9748_v42, %v951_v38  ;;  %v10087_v9 = vmul.f32 0.6931472, %v7117_v13 }
 0x17c   : > { %v10085_v54 = vpop.eup %7120  ;;  %v4097_v6 = vsub.f32 0.0, %v8924_v59  ;;  %v15959_v10 = vsub.f32 0.0, %v9478_v1  ;;  %1346 = vst.msk [vmem:[%s7898_s10 + $0x340] sm:$0xff] %vm1241_vm9, %v10080_v17  ;;  %v10100_v13 = vadd.f32 %v9748_v42, %v1031_v41  ;;  %v4105_v59 = vsub.f32 0.0, %v3891_v18 }
 0x17d   : > { %v4715_v30 = vmin.f32 %v4587_v49, -0.000100005  ;;  %15957 = vst [vmem:[#allocation96_spill] sm:$0xff] %v10085_v54  ;;  %v10093_v40 = vpop.eup %7122  ;;  %v5099_v43 = vmul.f32 %v4971_v26, %v4331_v19  ;;  %v15525_v38 = vsub.f32 0.0, %v10083_v29  ;;  %v3721_v49 = vmin.f32 %v3593_v14, 0.9999 }
 0x17e   : > { %15958 = vst [vmem:[#allocation97_spill] sm:$0xff] %v10087_v9  ;;  %v3186_v33 = vmul.f32 1.442695, %v15959_v10  ;;  %v5122_v54 = vmul.f32 %v4994_v39, %v4354_v2  ;;  %v3713_v55 = vmin.f32 %v3585_v63, 0.9999  ;;  %v15961_v10 = vsub.f32 0.0, %v9351_v47 }
 0x17f   : > { %15960 = vst [vmem:[#allocation98_spill] sm:$0xff] %v10093_v40  ;;  %v5483_v46 = vmul.f32 %v5355_v27, %v4715_v30  ;;  %v15962_v26 = vld [vmem:[#allocation5_spill] sm:$0xff]  ;;  %v15963_v27 = vld [vmem:[#allocation32_spill] sm:$0xff]  ;;  %v3064_v40 = vmul.f32 1.442695, %v15525_v38  ;;  %v15964_v2 = vsub.f32 0.0, %v9248_v34  ;;  %v1647_v38 = vpop.permute.xlu2 %1646 }
 0x180   : > { %1254 = vst.msk [vmem:[%s7898_s10 + $0x60] sm:$0xff] %vm1241_vm9, %v10083_v29  ;;  %v4489_v5 = vsub.f32 %v15961_v10, %v3891_v18  ;;  %v5227_v30 = vmul.f32 %v15962_v26, %v5099_v43  ;;  %v15965_v63 = vsub.f32 0.0, %v9273_v62  ;;  %v4225_v47 = vmax.f32 %v4097_v6, -9.2103405  ;;  %v15978_v34 = vld [vmem:[#allocation47_spill] sm:$0xff] }
 0x181   : > { %v5611_v19 = vmul.f32 %v15963_v27, %v5483_v46  ;;  %1286 = vst.msk [vmem:[%s7898_s10 + $0x160] sm:$0xff] %vm1241_vm9, %v10100_v13  ;;  %v4520_v39 = vsub.f32 %v15964_v2, %v10068_v0  ;;  %v4865_v18 = vsub.f32 1.0, %v3713_v55  ;;  %7124 = vpow2.f32 %v3186_v33  ;;  %v953_v33 = vpop.f32.mrf.mxu0  ;;  %v1111_v2 = vpop.f32.mrf.mxu2 }
 0x182   : > { %v4549_v14 = vsub.f32 %v15965_v63, %v10087_v9  ;;  %v15966_v41 = vsub.f32 0.0, %v9568_v52  ;;  %v10123_v46 = vadd.f32 %v9968_v31, %v5227_v30  ;;  %v5506_v26 = vmul.f32 %v5378_v58, %v9214_v57  ;;  %v1617_v31 = vpop.permute.xlu1 %1616 }
 0x183   : > { %v10126_v10 = vadd.f32 %v9971_v15, %v5611_v19  ;;  %v6028_v62 = vadd.f32 %v10073_v56, %v9997_v37  ;;  %v15526_v6 = vsub.f32 0.0, %v9594_v28  ;;  %7126 = vpow2.f32 %v3064_v40  ;;  %v10151_v40 = vpop.f32.mrf.mxu1 }
 0x184   : > { %v3244_v43 = vmul.f32 1.442695, %v15966_v41  ;;  %v4233_v15 = vmax.f32 %v4105_v59, -9.2103405  ;;  %v4617_v30 = vmax.f32 %v4489_v5, -9.2103405  ;;  %vm1925_vm5 = vcmp.eq.s32.totalorder %v1617_v31, %v7867_v24 }
 0x185   : > { %v4873_v27 = vsub.f32 1.0, %v3721_v49  ;;  %v4648_v57 = vmax.f32 %v4520_v39, -9.2103405  ;;  %v4353_v58 = vmin.f32 %v4225_v47, -0.000100005  ;;  %v4993_v11 = vmul.f32 %v4865_v18, %v4865_v18  ;;  %vm10167_vm7 = vmand %vm7869_vm4, %vm1925_vm5 }
 0x186   : > { %v5377_v19 = vmul.f32 %v3713_v55, %v3713_v55  ;;  %v4677_v63 = vmax.f32 %v4549_v14, -9.2103405  ;;  %7128 = vpow2.f32 %v3244_v43  ;;  %v10146_v37 = vadd.f32 %v9748_v42, %v1111_v2  ;;  %vm10189_vm3 = vmxor %vm1925_vm5, %vm7688_vm13 }
 0x187   : > { %v10149_v5 = vadd.f32 %v9748_v42, %v953_v33  ;;  %v15969_v59 = vmax.f32 %v10013_v35, -9.2103405  ;;  %v10158_v39 = vmul.f32 %v10018_v7, %v5122_v54  ;;  %v6029_v14 = vadd.f32 %v10018_v7, %v6028_v62  ;;  %v7125_v18 = vpop.eup %7124  ;;  %vm2565_vm1 = vmand %vm7869_vm4, %vm10189_vm3 }
 0x188   : > { %v3124_v47 = vmul.f32 1.442695, %v15526_v6  ;;  %v4361_v41 = vmin.f32 %v4233_v15, -0.000100005  ;;  %v4745_v43 = vmin.f32 %v4617_v30, -0.000100005  ;;  %v5001_v33 = vmul.f32 %v4873_v27, %v4873_v27 }
 0x189   : > { %v10155_v55 = vmin.f32 %v15969_v59, -0.000100005  ;;  %15970 = vst [vmem:[#allocation5_spill] sm:$0xff] %v10158_v39  ;;  %v5385_v2 = vmul.f32 %v3721_v49, %v3721_v49  ;;  %v7127_v7 = vpop.eup %7126  ;;  %v10174_v54 = vmin.f32 %v4648_v57, -0.000100005  ;;  %v10177_v62 = vmul.f32 %v10033_v44, %v5506_v26  ;;  %v1467_v57 = vld [vmem:[%s7742_s27 + $0x2e0] sm:$0xff] }
 0x18a   : > { %1318 = vst.msk [vmem:[%s7898_s10 + $0x260] sm:$0xff] %vm1241_vm9, %v10146_v37  ;;  %v6723_v49 = vsel %vm2561_vm2, 1.0, %v15680_v60  ;;  %vm1935_vm10 = vcmp.eq.s32.totalorder %v1647_v38, %v7867_v24  ;;  %v10196_v44 = vmin.f32 %v4677_v63, -0.000100005  ;;  %v5121_v26 = vmul.f32 %v4993_v11, %v4353_v58  ;;  %v1466_v59 = vld [vmem:[%s7742_s27 + $0x2d8] sm:$0xff]  ;;  %v10214_v11 = vpop.permute.xlu0 %1613  ;;  %1781 = vperm.xlu2 %6900, %v1467_v57  }
 0x18b   : > { %15973 = vst [vmem:[#allocation32_spill] sm:$0xff] %v10174_v54  ;;  %v5505_v30 = vmul.f32 %v5377_v19, %v15978_v34  ;;  %vm10202_vm11 = vmxor %vm1935_vm10, %vm7688_vm13  ;;  %v3308_v27 = vadd.f32 1.0, %v7127_v7  ;;  %v10209_v6 = vadd.f32 %v9661_v4, %v6029_v14  ;;  %v10211_v39 = vadd.f32 1.0, %v7125_v18  ;;  %1778 = vperm.xlu1 %6899, %v1466_v59   ;;  %v1465_v19 = vld [vmem:[%s7742_s27 + $0x2d0] sm:$0xff]  ;;  %v6835_v63 = vld [vmem:[%s7750_s30 + $0x78] sm:$0xff] }
 0x18c   : > { %15974 = vst [vmem:[#allocation99_spill] sm:$0xff] %v10177_v62  ;;  %7130 = vpow2.f32 %v3124_v47  ;;  %v4101_v58 = vsub.f32 0.0, %v9487_v61  ;;  %v6851_v34 = vld [vmem:[%s7750_s30 + $0xf8] sm:$0xff]  ;;  %v7129_v62 = vpop.eup %7128  ;;  %v5129_v7 = vmul.f32 %v5001_v33, %v4361_v41  ;;  %vm1924_vm14 = vcmp.eq.s32.totalorder %v10214_v11, %v7867_v24  ;;  %v1183_v61 = vpop.f32.mrf.mxu3  ;;  %1775 = vperm.xlu0 %6898, %v1465_v19   ;;  %vm10232_vm0 = vmand %vm7869_vm4, %vm1935_vm10  ;;  %6512 = vmatmul.msk.bf16.gmra.mxu0 %vm15984_vm12, %v6835_v63 }
 0x18d   : > { %1255 = vst.msk [vmem:[%s7898_s10 + $0x68] sm:$0xff] %vm1241_vm9, %v10149_v5  ;;  %v10219_v9 = vmul.f32 %v6723_v49, %v5505_v30  ;;  %v6867_v4 = vld [vmem:[%s7750_s30 + $0x178] sm:$0xff]  ;;  %v3589_v47 = vmax.f32 %v9541_v12, 0.0001  ;;  %7132 = vrcp.f32 %v3308_v27  ;;  %v10238_v18 = vadd.f32 %v9748_v42, %v1183_v61  ;;  %6528 = vmatmul.msk.bf16.gmra.mxu1 %vm15985_vm15, %v6851_v34  ;;  %vm2575_vm6 = vmand %vm7869_vm4, %vm10202_vm11 }
 0x18e   : > { %15977 = vst [vmem:[#allocation100_spill] sm:$0xff] %v10196_v44  ;;  %v5513_v44 = vmul.f32 %v5385_v2, %v4745_v43  ;;  %v15528_v41 = vsub.f32 0.0, %v10149_v5  ;;  %v10244_v38 = vmul.f32 %v10073_v56, %v5121_v26  ;;  %v10253_v12 = vsel %vm10167_vm7, 1.0, %v15680_v60  ;;  %v15987_v43 = vld [vmem:[#allocation66_spill] sm:$0xff]  ;;  %6544 = vmatmul.msk.bf16.gmra.mxu2 %vm15988_vm8, %v6867_v4  ;;  %vm10267_vm5 = vmand %vm7869_vm4, %vm1924_vm14 }
 0x18f   : > { %15981 = vst [vmem:[#allocation47_spill] sm:$0xff] %v10219_v9  ;;  %v3588_v33 = vmax.f32 %v15987_v43, 0.0001  ;;  %7134 = vlog2.f32 %v3308_v27  ;;  %v10258_v2 = vadd.f32 1.0, %v7129_v62  ;;  %v10260_v56 = vmax.f32 %v4101_v58, -9.2103405  ;;  %v956_v62 = vpop.f32.mrf.mxu0  ;;  %vm10337_vm2 = vmxor %vm1924_vm14, %vm7688_vm13 }
 0x190   : > { %15986 = vst [vmem:[#allocation101_spill] sm:$0xff] %v10244_v38  ;;  %7136 = vlog2.f32 %v10211_v39  ;;  %v10276_v49 = vadd.f32 %v9748_v42, %v10151_v40  ;;  %v10279_v26 = vmul.f32 %v9886_v53, %v5129_v7  ;;  %v10282_v30 = vmul.f32 %v9899_v8, %v5513_v44  ;;  %v1036_v40 = vpop.f32.mrf.mxu1  ;;  %v15994_v44 = vld [vmem:[#allocation64_spill] sm:$0xff]  ;;  %vm2564_vm7 = vmand %vm7869_vm4, %vm10337_vm2 }
 0x191   : > { %1347 = vst.msk [vmem:[%s7898_s10 + $0x348] sm:$0xff] %vm1241_vm9, %v10238_v18  ;;  %v10290_v27 = vsel %vm2565_vm1, 1.0, %v15680_v60  ;;  %v3066_v57 = vmul.f32 1.442695, %v15528_v41  ;;  %v10297_v58 = vsel %vm10232_vm0, 1.0, %v15680_v60  ;;  %v4100_v19 = vsub.f32 0.0, %v15994_v44  ;;  %vm16015_vm14 = vmmov %vm15988_vm8 }
 0x192   : > { %15991 = vst [vmem:[#allocation66_spill] sm:$0xff] %v10279_v26  ;;  %v7131_v59 = vpop.eup %7130  ;;  %v3717_v8 = vmin.f32 %v3589_v47, 0.9999  ;;  %v15529_v63 = vsub.f32 0.0, %v9704_v48  ;;  %v10310_v15 = vsel %vm2575_vm6, 1.0, %v15680_v60  ;;  %v10315_v34 = vsel %vm10267_vm5, 1.0, %v15680_v60 }
 0x193   : > { %15992 = vst [vmem:[#allocation102_spill] sm:$0xff] %v10282_v30  ;;  %v10319_v61 = vadd.f32 %v9748_v42, %v956_v62  ;;  %v7133_v4 = vpop.eup %7132  ;;  %7138 = vlog2.f32 %v10258_v2  ;;  %v4357_v14 = vmin.f32 %v10260_v56, -0.000100005  ;;  %v3716_v31 = vmin.f32 %v3588_v33, 0.9999 }
 0x194   : > { %15993 = vst [vmem:[#allocation103_spill] sm:$0xff] %v10297_v58  ;;  %v10324_v47 = vadd.f32 %v9748_v42, %v1036_v40  ;;  %v10326_v44 = vadd.f32 1.0, %v7131_v59  ;;  %v3564_v41 = vmax.f32 %v7133_v4, 0.0001  ;;  %7140 = vpow2.f32 %v3066_v57 }
 0x195   : > { %1287 = vst.msk [vmem:[%s7898_s10 + $0x168] sm:$0xff] %vm1241_vm9, %v10276_v49  ;;  %v7135_v43 = vpop.eup %7134  ;;  %7142 = vrcp.f32 %v10211_v39  ;;  %v4869_v7 = vsub.f32 1.0, %v3717_v8  ;;  %v3188_v56 = vmul.f32 1.442695, %v15529_v63  ;;  %v5381_v57 = vmul.f32 %v3717_v8, %v3717_v8 }
 0x196   : > { %15995 = vst [vmem:[#allocation64_spill] sm:$0xff] %v10310_v15  ;;  %v7137_v62 = vpop.eup %7136  ;;  %v3833_v40 = vmul.f32 0.6931472, %v7135_v43  ;;  %v4228_v59 = vmax.f32 %v4100_v19, -9.2103405  ;;  %v15998_v39 = vsub.f32 0.0, %v9751_v32  ;;  %v10350_v11 = vadd.f32 %v10315_v34, %v10209_v6 }
 0x197   : > { %1256 = vst.msk [vmem:[%s7898_s10 + $0x70] sm:$0xff] %vm1241_vm9, %v10319_v61  ;;  %v3692_v35 = vmin.f32 %v3564_v41, 0.9999  ;;  %v4868_v26 = vsub.f32 1.0, %v3716_v31  ;;  %v15999_v38 = vsub.f32 0.0, %v10083_v29  ;;  %7144 = vlog2.f32 %v10326_v44 }
 0x198   : > { %1288 = vst.msk [vmem:[%s7898_s10 + $0x170] sm:$0xff] %vm1241_vm9, %v10324_v47  ;;  %v3246_v4 = vmul.f32 1.442695, %v15998_v39  ;;  %v4076_v30 = vsub.f32 0.0, %v3833_v40  ;;  %v10354_v63 = vmul.f32 0.6931472, %v7137_v62  ;;  %v4997_v6 = vmul.f32 %v4869_v7, %v4869_v7 }
 0x199   : > { %v4460_v9 = vsub.f32 %v15999_v38, %v3833_v40  ;;  %v16001_v41 = vsub.f32 0.0, %v9790_v36  ;;  %v4844_v19 = vsub.f32 1.0, %v3692_v35  ;;  %v7139_v43 = vpop.eup %7138  ;;  %7146 = vpow2.f32 %v3188_v56  ;;  %v16002_v38 = vld [vmem:[#allocation21_spill] sm:$0xff] }
 0x19a   : > { %16000 = vst [vmem:[#allocation104_spill] sm:$0xff] %v10354_v63  ;;  %v4204_v39 = vmax.f32 %v4076_v30, -9.2103405  ;;  %v7141_v29 = vpop.eup %7140  ;;  %v5509_v62 = vmul.f32 %v5381_v57, %v16002_v38  ;;  %v5380_v40 = vmul.f32 %v3716_v31, %v3716_v31  ;;  %7148 = vpow2.f32 %v3246_v4 }
 0x19b   : > { %v3126_v8 = vmul.f32 1.442695, %v16001_v41  ;;  %v4588_v54 = vmax.f32 %v4460_v9, -9.2103405  ;;  %v4972_v0 = vmul.f32 %v4844_v19, %v4844_v19  ;;  %v10364_v15 = vpop.eup %7142  ;;  %v6726_v33 = vsel %vm2564_vm7, 1.0, %v15680_v60 }
 0x19c   : > { %16003 = vst [vmem:[#allocation21_spill] sm:$0xff] %v10364_v15  ;;  %v4332_v22 = vmin.f32 %v4204_v39, -0.000100005  ;;  %v5356_v41 = vmul.f32 %v3692_v35, %v3692_v35  ;;  %v16004_v7 = vsub.f32 0.0, %v9478_v1  ;;  %v4356_v9 = vmin.f32 %v4228_v59, -0.000100005  ;;  %v1626_v1 = vpop.permute.xlu1 %1625 }
 0x19d   : > { %v4716_v58 = vmin.f32 %v4588_v54, -0.000100005  ;;  %v4996_v56 = vmul.f32 %v4868_v26, %v4868_v26  ;;  %7150 = vpow2.f32 %v3126_v8  ;;  %v10372_v31 = vmul.f32 0.6931472, %v7139_v43  ;;  %v7145_v38 = vpop.eup %7144  ;;  %v16007_v35 = vld [vmem:[#allocation29_spill] sm:$0xff]  ;;  %v1469_v59 = vld [vmem:[%s7742_s27 + $0x2f0] sm:$0xff]  ;;  %v10382_v8 = vpop.permute.xlu2 %1655 }
 0x19e   : > { %v10370_v30 = vsub.f32 %v16004_v7, %v10354_v63  ;;  %v5100_v57 = vmul.f32 %v4972_v0, %v4332_v22  ;;  %v3309_v19 = vadd.f32 1.0, %v7141_v29  ;;  %v5125_v39 = vmul.f32 %v4997_v6, %v4357_v14  ;;  %v1470_v63 = vld [vmem:[%s7742_s27 + $0x2f8] sm:$0xff]  ;;  %v16008_v22 = vld [vmem:[#allocation6_spill] sm:$0xff]  ;;  %1787 = vperm.xlu1 %6899, %v1469_v59   ;;  %v1468_v14 = vld [vmem:[%s7742_s27 + $0x2e8] sm:$0xff] }
 0x19f   : > { %16005 = vst [vmem:[#allocation105_spill] sm:$0xff] %v10372_v31  ;;  %v5484_v4 = vmul.f32 %v5356_v41, %v4716_v58  ;;  %v10375_v54 = vmul.f32 %v10290_v27, %v5509_v62  ;;  %v5508_v15 = vmul.f32 %v5380_v40, %v16007_v35  ;;  %v3592_v7 = vmax.f32 %v10077_v45, 0.0001  ;;  %v7147_v26 = vpop.eup %7146  ;;  %v16009_v58 = vld [vmem:[#allocation48_spill] sm:$0xff]  ;;  %1790 = vperm.xlu2 %6900, %v1470_v63   ;;  %v1113_v40 = vpop.f32.mrf.mxu2 }
 0x1a0   : > { %7152 = vrcp.f32 %v10258_v2  ;;  %vm1928_vm10 = vcmp.eq.s32.totalorder %v1626_v1, %v7867_v24  ;;  %v5228_v0 = vmul.f32 %v16008_v22, %v5100_v57  ;;  %v7149_v43 = vpop.eup %7148  ;;  %v4649_v45 = vmax.f32 %v10370_v30, -9.2103405  ;;  %1784 = vperm.xlu0 %6898, %v1468_v14   ;;  %v6882_v41 = vld [vmem:[%s7750_s30 + $0x1f0] sm:$0xff]  ;;  %v1186_v57 = vpop.f32.mrf.mxu3 }
 0x1a1   : > { %16006 = vst [vmem:[#allocation106_spill] sm:$0xff] %v10375_v54  ;;  %v5612_v27 = vmul.f32 %v16009_v58, %v5484_v4  ;;  %v5124_v6 = vmul.f32 %v4996_v56, %v4356_v9  ;;  %vm1938_vm3 = vcmp.eq.s32.totalorder %v10382_v8, %v7867_v24  ;;  %7154 = vrcp.f32 %v3309_v19  ;;  %vm10407_vm11 = vmand %vm7869_vm4, %vm1928_vm10  ;;  %6559 = vmatmul.msk.bf16.gmra.mxu3 %vm16015_vm14, %v6882_v41  ;;  %v1038_v8 = vpop.f32.mrf.mxu1 }
 0x1a2   : > { %v16010_v2 = vsub.f32 0.0, %v9568_v52  ;;  %v10395_v62 = vadd.f32 %v10123_v46, %v5228_v0  ;;  %7156 = vlog2.f32 %v3309_v19  ;;  %v10401_v9 = vmul.f32 0.6931472, %v7145_v38  ;;  %vm10419_vm1 = vmxor %vm1928_vm10, %vm7688_vm13 }
 0x1a3   : > { %v10398_v63 = vadd.f32 %v10126_v10, %v5612_v27  ;;  %v7151_v30 = vpop.eup %7150  ;;  %v3370_v56 = vadd.f32 1.0, %v7147_v26  ;;  %v3720_v46 = vmin.f32 %v3592_v7, 0.9999  ;;  %v10412_v10 = vadd.f32 %v9748_v42, %v1113_v40  ;;  %vm2066_vm0 = vmand %vm7869_vm4, %vm1938_vm3 }
 0x1a4   : > { %v4550_v29 = vsub.f32 %v16010_v2, %v10372_v31  ;;  %v10414_v4 = vadd.f32 1.0, %v7149_v43  ;;  %v4104_v38 = vsub.f32 0.0, %v9953_v21  ;;  %v10425_v35 = vadd.f32 %v9748_v42, %v1186_v57  ;;  %vm2568_vm12 = vmand %vm7869_vm4, %vm10419_vm1  ;;  %v16028_v31 = vld [vmem:[#allocation7_spill] sm:$0xff] }
 0x1a5   : > { %v15533_v7 = vsub.f32 0.0, %v10319_v61  ;;  %7158 = vrcp.f32 %v10326_v44  ;;  %v10431_v59 = vmul.f32 %v10253_v12, %v5125_v39  ;;  %v10433_v1 = vmul.f32 %v6726_v33, %v5508_v15  ;;  %1319 = vst.msk [vmem:[%s7898_s10 + $0x268] sm:$0xff] %vm1241_vm9, %v10412_v10  ;;  %vm10550_vm5 = vmxor %vm1938_vm3, %vm7688_vm13 }
 0x1a6   : > { %v6032_v26 = vadd.f32 %v10253_v12, %v10350_v11  ;;  %v10440_v21 = vpop.eup %7152  ;;  %v4678_v22 = vmax.f32 %v4550_v29, -9.2103405  ;;  %v10443_v0 = vmul.f32 %v10315_v34, %v5124_v6  ;;  %v3339_v58 = vadd.f32 1.0, %v7151_v30  ;;  %1348 = vst.msk [vmem:[%s7898_s10 + $0x350] sm:$0xff] %vm1241_vm9, %v10425_v35  ;;  %vm2578_vm7 = vmand %vm7869_vm4, %vm10550_vm5 }
 0x1a7   : > { %16016 = vst [vmem:[#allocation29_spill] sm:$0xff] %v10431_v59  ;;  %v3068_v12 = vmul.f32 1.442695, %v15533_v7  ;;  %v7155_v15 = vpop.eup %7154  ;;  %v10455_v44 = vmin.f32 %v4649_v45, -0.000100005  ;;  %v16021_v34 = vsub.f32 0.0, %v9594_v28  ;;  %7160 = vlog2.f32 %v3370_v56 }
 0x1a8   : > { %16017 = vst [vmem:[#allocation6_spill] sm:$0xff] %v10433_v1  ;;  %v10465_v33 = vsel %vm10407_vm11, 1.0, %v15680_v60  ;;  %v7157_v39 = vpop.eup %7156  ;;  %7162 = vlog2.f32 %v10414_v4  ;;  %v4232_v27 = vmax.f32 %v4104_v38, -9.2103405  ;;  %v4872_v14 = vsub.f32 1.0, %v3720_v46  ;;  %v16029_v59 = vld [vmem:[#allocation46_spill] sm:$0xff] }
 0x1a9   : > { %16018 = vst [vmem:[#allocation48_spill] sm:$0xff] %v10440_v21  ;;  %v10460_v11 = vsub.f32 %v16021_v34, %v10401_v9  ;;  %v3565_v43 = vmax.f32 %v7155_v15, 0.0001  ;;  %v10473_v28 = vsel %vm2066_vm0, 1.0, %v15680_v60  ;;  %v10476_v45 = vadd.f32 %v9712_v51, %v6032_v26  ;;  %v1623_v34 = vpop.permute.xlu0 %1622 }
 0x1aa   : > { %16019 = vst [vmem:[#allocation107_spill] sm:$0xff] %v10443_v0  ;;  %v3835_v6 = vmul.f32 0.6931472, %v7157_v39  ;;  %7164 = vpow2.f32 %v3068_v12  ;;  %v10478_v2 = vmin.f32 %v4678_v22, -0.000100005  ;;  %v10481_v29 = vsel %vm2568_vm12, 1.0, %v15680_v60 }
 0x1ab   : > { %16020 = vst [vmem:[#allocation108_spill] sm:$0xff] %v10455_v44  ;;  %7166 = vlog2.f32 %v3339_v58  ;;  %v3693_v40 = vmin.f32 %v3565_v43, 0.9999  ;;  %v10483_v41 = vpop.eup %7158  ;;  %v16023_v57 = vsub.f32 0.0, %v10149_v5  ;;  %v4360_v51 = vmin.f32 %v4232_v27, -0.000100005 }
 0x1ac   : > { %16022 = vst [vmem:[#allocation109_spill] sm:$0xff] %v10478_v2  ;;  %7168 = vrcp.f32 %v3370_v56  ;;  %v4077_v52 = vsub.f32 0.0, %v3835_v6  ;;  %v5000_v38 = vmul.f32 %v4872_v14, %v4872_v14  ;;  %v3591_v26 = vmax.f32 %v9876_v50, 0.0001  ;;  %v1473_v0 = vld [vmem:[%s7742_s27 + $0x310] sm:$0xff] }
 0x1ad   : > { %v4461_v19 = vsub.f32 %v16023_v57, %v3835_v6  ;;  %v4845_v22 = vsub.f32 1.0, %v3693_v40  ;;  %v7161_v12 = vpop.eup %7160  ;;  %v5384_v15 = vmul.f32 %v3720_v46, %v3720_v46  ;;  %7170 = vrcp.f32 %v3339_v58  ;;  %v1116_v6 = vpop.f32.mrf.mxu2  ;;  %1799 = vperm.xlu2 %6900, %v1473_v0  }
 0x1ae   : > { %v4205_v43 = vmax.f32 %v4077_v52, -9.2103405  ;;  %v7163_v2 = vpop.eup %7162  ;;  %vm1927_vm15 = vcmp.eq.s32.totalorder %v1623_v34, %v7867_v24  ;;  %v4103_v56 = vsub.f32 0.0, %v9857_v16  ;;  %v5357_v57 = vmul.f32 %v3693_v40, %v3693_v40 }
 0x1af   : > { %v4589_v7 = vmax.f32 %v4461_v19, -9.2103405  ;;  %v4973_v5 = vmul.f32 %v4845_v22, %v4845_v22  ;;  %v10493_v46 = vadd.f32 %v9748_v42, %v1116_v6  ;;  %v10495_v39 = vmul.f32 0.6931472, %v7161_v12  ;;  %vm10508_vm6 = vmand %vm7869_vm4, %vm1927_vm15 }
 0x1b0   : > { %v7165_v27 = vpop.eup %7164  ;;  %v4333_v14 = vmin.f32 %v4205_v43, -0.000100005  ;;  %v10497_v52 = vmul.f32 %v5000_v38, %v4360_v51  ;;  %v3719_v58 = vmin.f32 %v3591_v26, 0.9999  ;;  %v10502_v22 = vmul.f32 0.6931472, %v7163_v2  ;;  %vm10537_vm8 = vmxor %vm1927_vm15, %vm7688_vm13 }
 0x1b1   : > { %v4717_v50 = vmin.f32 %v4589_v7, -0.000100005  ;;  %v7167_v30 = vpop.eup %7166  ;;  %v16027_v7 = vsub.f32 0.0, %v10006_v23  ;;  %1320 = vst.msk [vmem:[%s7898_s10 + $0x270] sm:$0xff] %vm1241_vm9, %v10493_v46  ;;  %v4231_v26 = vmax.f32 %v4103_v56, -9.2103405  ;;  %v5512_v19 = vmul.f32 %v5384_v15, %v10155_v55  ;;  %vm2567_vm2 = vmand %vm7869_vm4, %vm10537_vm8 }
 0x1b2   : > { %v10500_v16 = vpop.eup %7168  ;;  %16024 = vst [vmem:[#allocation110_spill] sm:$0xff] %v10502_v22  ;;  %v5101_v51 = vmul.f32 %v4973_v5, %v4333_v14  ;;  %v4871_v2 = vsub.f32 1.0, %v3719_v58  ;;  %v15535_v12 = vsub.f32 0.0, %v10100_v13  ;;  %v3310_v43 = vadd.f32 1.0, %v7165_v27  ;;  %v1471_v5 = vld [vmem:[%s7742_s27 + $0x300] sm:$0xff]  ;;  %v958_v27 = vpop.f32.mrf.mxu0 }
 0x1b3   : > { %v3190_v40 = vmul.f32 1.442695, %v16027_v7  ;;  %v5485_v38 = vmul.f32 %v5357_v57, %v4717_v50  ;;  %v10518_v6 = vmul.f32 0.6931472, %v7167_v30  ;;  %v1472_v7 = vld [vmem:[%s7742_s27 + $0x308] sm:$0xff]  ;;  %v10526_v14 = vpop.eup %7170  ;;  %v16030_v56 = vsub.f32 0.0, %v9704_v48  ;;  %1793 = vperm.xlu0 %6898, %v1471_v5  }
 0x1b4   : > { %v5229_v21 = vmul.f32 %v16028_v31, %v5101_v51  ;;  %v6601_v30 = vsel %vm10508_vm6, 1.0, %v15680_v60  ;;  %v5383_v31 = vmul.f32 %v3719_v58, %v3719_v58  ;;  %1796 = vperm.xlu1 %6899, %v1472_v7   ;;  %v16034_v48 = vsub.f32 0.0, %v9751_v32 }
 0x1b5   : > { %v5613_v54 = vmul.f32 %v16029_v59, %v5485_v38  ;;  %v4522_v50 = vsub.f32 %v16030_v56, %v10495_v39  ;;  %v16033_v59 = vsub.f32 0.0, %v10080_v17  ;;  %7172 = vpow2.f32 %v3190_v40  ;;  %v1188_v38 = vpop.f32.mrf.mxu3 }
 0x1b6   : > { %v4551_v57 = vsub.f32 %v16034_v48, %v10502_v22  ;;  %v10555_v58 = vadd.f32 %v10395_v62, %v5229_v21  ;;  %v4359_v0 = vmin.f32 %v4231_v26, -0.000100005  ;;  %v4999_v51 = vmul.f32 %v4871_v2, %v4871_v2  ;;  %v10586_v2 = vpop.permute.xlu1 %1634 }
 0x1b7   : > { %v3248_v15 = vmul.f32 1.442695, %v16033_v59  ;;  %v10558_v42 = vadd.f32 %v10398_v63, %v5613_v54  ;;  %v3128_v32 = vmul.f32 1.442695, %v15535_v12  ;;  %7174 = vrcp.f32 %v3310_v43  ;;  %v10572_v54 = vld [vmem:[%s15432_s2] ss:$0 sm:$0xff] }
 0x1b8   : > { %v16037_v7 = vsub.f32 0.0, %v9790_v36  ;;  %7176 = vlog2.f32 %v3310_v43  ;;  %v10575_v62 = vadd.f32 %v10572_v54, %v1188_v38  ;;  %v10578_v63 = vadd.f32 %v10572_v54, %v958_v27 }
 0x1b9   : > { %v4650_v36 = vmax.f32 %v4522_v50, -9.2103405  ;;  %v5511_v21 = vmul.f32 %v5383_v31, %v9975_v3  ;;  %v6034_v26 = vadd.f32 %v6601_v30, %v10476_v45  ;;  %7178 = vpow2.f32 %v3248_v15 }
 0x1ba   : > { %v4491_v40 = vsub.f32 %v16037_v7, %v10518_v6  ;;  %v4679_v43 = vmax.f32 %v4551_v57, -9.2103405  ;;  %vm1931_vm10 = vcmp.eq.s32.totalorder %v10586_v2, %v7867_v24  ;;  %1349 = vst.msk [vmem:[%s7898_s10 + $0x358] sm:$0xff] %vm1241_vm9, %v10575_v62  ;;  %v15536_v5 = vsub.f32 0.0, %v10578_v63  ;;  %v16059_v2 = vld [vmem:[#allocation33_spill] sm:$0xff] }
 0x1bb   : > { %v10595_v56 = vadd.f32 %v10572_v54, %v1038_v8  ;;  %v16038_v3 = vmax.f32 %v10460_v11, -9.2103405  ;;  %v6729_v45 = vsel %vm2567_vm2, 1.0, %v15680_v60  ;;  %v5127_v31 = vmul.f32 %v4999_v51, %v4359_v0  ;;  %1257 = vst.msk [vmem:[%s7898_s10 + $0x78] sm:$0xff] %vm1241_vm9, %v10578_v63  ;;  %v7173_v59 = vpop.eup %7172  ;;  %vm2059_vm3 = vmand %vm7869_vm4, %vm1931_vm10 }
 0x1bc   : > { %7180 = vpow2.f32 %v3128_v32  ;;  %v4619_v15 = vmax.f32 %v4491_v40, -9.2103405  ;;  %v10617_v11 = vsel %vm2578_vm7, 1.0, %v15680_v60  ;;  %v3070_v55 = vmul.f32 1.442695, %v15536_v5  ;;  %vm10679_vm14 = vmxor %vm1931_vm10, %vm7688_vm13 }
 0x1bd   : > { %v10599_v50 = vmin.f32 %v16038_v3, -0.000100005  ;;  %7182 = vrcp.f32 %v10414_v4  ;;  %16039 = vst [vmem:[#allocation7_spill] sm:$0xff] %v10617_v11  ;;  %v7175_v27 = vpop.eup %7174  ;;  %v10626_v48 = vmul.f32 %v10465_v33, %v10497_v52  ;;  %v10629_v4 = vmul.f32 %v10481_v29, %v5512_v19  ;;  %vm2571_vm6 = vmand %vm7869_vm4, %vm10679_vm14 }
 0x1be   : > { %1289 = vst.msk [vmem:[%s7898_s10 + $0x178] sm:$0xff] %vm1241_vm9, %v10595_v56  ;;  %v6035_v57 = vadd.f32 %v10465_v33, %v6034_v26  ;;  %v4107_v34 = vsub.f32 0.0, %v10518_v6  ;;  %v7177_v0 = vpop.eup %7176  ;;  %v10638_v51 = vmin.f32 %v4650_v36, -0.000100005  ;;  %v10640_v32 = vmin.f32 %v4679_v43, -0.000100005  ;;  %v1665_v6 = vpop.permute.xlu2 %1664 }
 0x1bf   : > { %16040 = vst [vmem:[#allocation46_spill] sm:$0xff] %v10626_v48  ;;  %v10642_v52 = vmul.f32 %v6729_v45, %v5511_v21  ;;  %v3566_v38 = vmax.f32 %v7175_v27, 0.0001  ;;  %v7179_v29 = vpop.eup %7178  ;;  %v10644_v19 = vmul.f32 %v6601_v30, %v5127_v31  ;;  %v3595_v33 = vmax.f32 %v10526_v14, 0.0001  ;;  %v1118_v27 = vpop.f32.mrf.mxu2 }
 0x1c0   : > { %16041 = vst [vmem:[#allocation111_spill] sm:$0xff] %v10629_v4  ;;  %v3837_v8 = vmul.f32 0.6931472, %v7177_v0  ;;  %7184 = vpow2.f32 %v3070_v55  ;;  %v10647_v7 = vmin.f32 %v4619_v15, -0.000100005  ;;  %v10649_v40 = vadd.f32 1.0, %v7173_v59 }
 0x1c1   : > { %16042 = vst [vmem:[#allocation112_spill] sm:$0xff] %v10638_v51  ;;  %v10652_v36 = vsel %vm2059_vm3, 1.0, %v15680_v60  ;;  %v3694_v26 = vmin.f32 %v3566_v38, 0.9999  ;;  %vm1941_vm11 = vcmp.eq.s32.totalorder %v1665_v6, %v7867_v24  ;;  %v10655_v21 = vmax.f32 %v4107_v34, -9.2103405  ;;  %v1632_v38 = vpop.permute.xlu0 %1631 }
 0x1c2   : > { %16043 = vst [vmem:[#allocation113_spill] sm:$0xff] %v10640_v32  ;;  %v7181_v43 = vpop.eup %7180  ;;  %v4078_v30 = vsub.f32 0.0, %v3837_v8  ;;  %v16046_v3 = vsub.f32 0.0, %v10319_v61  ;;  %v10661_v31 = vadd.f32 1.0, %v7179_v29  ;;  %v3594_v59 = vmax.f32 %v10483_v41, 0.0001  ;;  %vm10699_vm12 = vmand %vm7869_vm4, %vm1941_vm11 }
 0x1c3   : > { %16044 = vst [vmem:[#allocation114_spill] sm:$0xff] %v10642_v52  ;;  %v10659_v45 = vpop.eup %7182  ;;  %v4846_v55 = vsub.f32 1.0, %v3694_v26  ;;  %v3723_v0 = vmin.f32 %v3595_v33, 0.9999  ;;  %v10666_v5 = vadd.f32 %v10572_v54, %v1118_v27  ;;  %7186 = vlog2.f32 %v10649_v40  ;;  %vm10707_vm15 = vmxor %vm1941_vm11, %vm7688_vm13 }
 0x1c4   : > { %16045 = vst [vmem:[#allocation115_spill] sm:$0xff] %v10644_v19  ;;  %v4462_v14 = vsub.f32 %v16046_v3, %v3837_v8  ;;  %v4206_v12 = vmax.f32 %v4078_v30, -9.2103405  ;;  %v3340_v61 = vadd.f32 1.0, %v7181_v43  ;;  %vm1930_vm1 = vcmp.eq.s32.totalorder %v1632_v38, %v7867_v24  ;;  %vm2581_vm5 = vmand %vm7869_vm4, %vm10707_vm15 }
 0x1c5   : > { %16047 = vst [vmem:[#allocation116_spill] sm:$0xff] %v10659_v45  ;;  %v4974_v29 = vmul.f32 %v4846_v55, %v4846_v55  ;;  %v5358_v22 = vmul.f32 %v3694_v26, %v3694_v26  ;;  %7188 = vlog2.f32 %v10661_v31  ;;  %v3722_v43 = vmin.f32 %v3594_v59, 0.9999  ;;  %vm10690_vm0 = vmand %vm7869_vm4, %vm1930_vm1 }
 0x1c6   : > { %v4590_v34 = vmax.f32 %v4462_v14, -9.2103405  ;;  %v7185_v8 = vpop.eup %7184  ;;  %v4334_v3 = vmin.f32 %v4206_v12, -0.000100005  ;;  %1321 = vst.msk [vmem:[%s7898_s10 + $0x278] sm:$0xff] %vm1241_vm9, %v10666_v5  ;;  %v4106_v30 = vsub.f32 0.0, %v10401_v9  ;;  %7190 = vrcp.f32 %v3340_v61  ;;  %vm10727_vm8 = vmxor %vm1930_vm1, %vm7688_vm13 }
 0x1c7   : > { %v16050_v12 = vsub.f32 0.0, %v10146_v37  ;;  %v4875_v59 = vsub.f32 1.0, %v3723_v0  ;;  %v6036_v41 = vadd.f32 %v9886_v53, %v6035_v57  ;;  %7192 = vlog2.f32 %v3340_v61  ;;  %vm2570_vm2 = vmand %vm7869_vm4, %vm10727_vm8 }
 0x1c8   : > { %v4718_v15 = vmin.f32 %v4590_v34, -0.000100005  ;;  %v5102_v55 = vmul.f32 %v4974_v29, %v4334_v3  ;;  %v3311_v34 = vadd.f32 1.0, %v7185_v8  ;;  %v16058_v8 = vld [vmem:[#allocation8_spill] sm:$0xff]  ;;  %v10722_v53 = vsel %vm10690_vm0, 1.0, %v15680_v60 }
 0x1c9   : > { %v3192_v14 = vmul.f32 1.442695, %v16050_v12  ;;  %v5387_v12 = vmul.f32 %v3723_v0, %v3723_v0  ;;  %v7187_v45 = vpop.eup %7186  ;;  %v4234_v57 = vmax.f32 %v4106_v30, -9.2103405  ;;  %v4874_v6 = vsub.f32 1.0, %v3722_v43  ;;  %v961_v0 = vpop.f32.mrf.mxu0 }
 0x1ca   : > { %v5486_v27 = vmul.f32 %v5358_v22, %v4718_v15  ;;  %v16057_v15 = vsub.f32 0.0, %v10238_v18  ;;  %v5230_v3 = vmul.f32 %v16058_v8, %v5102_v55  ;;  %v1191_v8 = vpop.f32.mrf.mxu3  ;;  %v10780_v33 = vsel %vm2581_vm5, 1.0, %v15680_v60 }
 0x1cb   : > { %7194 = vpow2.f32 %v3192_v14  ;;  %v7189_v30 = vpop.eup %7188  ;;  %v4363_v14 = vmin.f32 %v10655_v21, -0.000100005  ;;  %v5515_v38 = vmul.f32 %v5387_v12, %v10647_v7  ;;  %v1041_v21 = vpop.f32.mrf.mxu1  ;;  %v10752_v7 = vmul.f32 0.6931472, %v7187_v45  ;;  %16064 = vst [vmem:[#allocation33_spill] sm:$0xff] %v10780_v33 }
 0x1cc   : > { %v3250_v29 = vmul.f32 1.442695, %v16057_v15  ;;  %v5614_v32 = vmul.f32 %v16059_v2, %v5486_v27  ;;  %v16062_v2 = vsub.f32 0.0, %v10276_v49  ;;  %v10734_v27 = vadd.f32 %v10555_v58, %v5230_v3 }
 0x1cd   : > { %7196 = vrcp.f32 %v3311_v34  ;;  %v5003_v15 = vmul.f32 %v4875_v59, %v4875_v59  ;;  %v6037_v58 = vadd.f32 %v10722_v53, %v6036_v41  ;;  %v7191_v59 = vpop.eup %7190  ;;  %16063 = vst [vmem:[#allocation8_spill] sm:$0xff] %v10752_v7  ;;  %v6733_v41 = vsel %vm2571_vm6, 1.0, %v15680_v60 }
 0x1ce   : > { %v3130_v55 = vmul.f32 1.442695, %v16062_v2  ;;  %v10737_v26 = vadd.f32 %v10558_v42, %v5614_v32  ;;  %7198 = vlog2.f32 %v3311_v34  ;;  %v10747_v42 = vadd.f32 %v10572_v54, %v1191_v8  ;;  %v7193_v12 = vpop.eup %7192 }
 0x1cf   : > { %7200 = vpow2.f32 %v3250_v29  ;;  %v10750_v32 = vadd.f32 %v10572_v54, %v961_v0  ;;  %v10757_v34 = vsel %vm10699_vm12, 1.0, %v15680_v60  ;;  %v5386_v45 = vmul.f32 %v3722_v43, %v3722_v43 }
 0x1d0   : > { %v4362_v29 = vmin.f32 %v4234_v57, -0.000100005  ;;  %v5002_v3 = vmul.f32 %v4874_v6, %v4874_v6  ;;  %7202 = vpow2.f32 %v3130_v55  ;;  %1350 = vst.msk [vmem:[%s7898_s10 + $0x360] sm:$0xff] %vm1241_vm9, %v10747_v42  ;;  %v10782_v43 = vmul.f32 %v5003_v15, %v4363_v14  ;;  %v1476_v6 = vld [vmem:[%s7742_s27 + $0x328] sm:$0xff] }
 0x1d1   : > { %v15538_v9 = vsub.f32 0.0, %v10750_v32  ;;  %v7195_v0 = vpop.eup %7194  ;;  %7204 = vrcp.f32 %v10649_v40  ;;  %1258 = vst.msk [vmem:[%s7898_s10 + $0x80] sm:$0xff] %vm1241_vm9, %v10750_v32  ;;  %v10788_v57 = vadd.f32 %v10572_v54, %v1041_v21  ;;  %v10791_v40 = vmul.f32 %v6733_v41, %v5515_v38  ;;  %1808 = vperm.xlu2 %6900, %v1476_v6   ;;  %v1644_v21 = vpop.permute.xlu1 %1643 }
 0x1d2   : > { %v10799_v22 = vsel %vm2570_vm2, 1.0, %v15680_v60  ;;  %v6038_v55 = vadd.f32 %v10652_v36, %v6037_v58  ;;  %v16066_v38 = vsub.f32 0.0, %v10006_v23  ;;  %7206 = vrcp.f32 %v10661_v31 }
 0x1d3   : > { %v7197_v2 = vpop.eup %7196  ;;  %16065 = vst [vmem:[#allocation117_spill] sm:$0xff] %v10791_v40  ;;  %v3072_v14 = vmul.f32 1.442695, %v15538_v9  ;;  %v10811_v61 = vmul.f32 %v5386_v45, %v10599_v50  ;;  %v10816_v40 = vmul.f32 0.6931472, %v7189_v30  ;;  %v10818_v6 = vmul.f32 %v5002_v3, %v4362_v29  ;;  %v1474_v9 = vld [vmem:[%s7742_s27 + $0x318] sm:$0xff]  ;;  %v10825_v50 = vpop.permute.xlu0 %1640 }
 0x1d4   : > { %v7199_v15 = vpop.eup %7198  ;;  %v10807_v8 = vsub.f32 %v16066_v38, %v10752_v7  ;;  %v3567_v41 = vmax.f32 %v7197_v2, 0.0001  ;;  %1290 = vst.msk [vmem:[%s7898_s10 + $0x180] sm:$0xff] %vm1241_vm9, %v10788_v57  ;;  %vm1934_vm7 = vcmp.eq.s32.totalorder %v1644_v21, %v7867_v24  ;;  %v1475_v38 = vld [vmem:[%s7742_s27 + $0x320] sm:$0xff]  ;;  %v3596_v48 = vmax.f32 %v7191_v59, 0.0001  ;;  %1802 = vperm.xlu0 %6898, %v1474_v9  }
 0x1d5   : > { %v7201_v58 = vpop.eup %7200  ;;  %16067 = vst [vmem:[#allocation118_spill] sm:$0xff] %v10816_v40  ;;  %v3839_v23 = vmul.f32 0.6931472, %v7199_v15  ;;  %v10823_v31 = vadd.f32 1.0, %v7195_v0  ;;  %7208 = vpow2.f32 %v3072_v14  ;;  %1805 = vperm.xlu1 %6899, %v1475_v38   ;;  %v6039_v30 = vadd.f32 %v10025_v20, %v6038_v55  ;;  %v1674_v14 = vpop.permute.xlu2 %1673  ;;  %vm10861_vm1 = vmxor %vm1934_vm7, %vm7688_vm13 }
 0x1d6   : > { %v3695_v45 = vmin.f32 %v3567_v41, 0.9999  ;;  %v7203_v2 = vpop.eup %7202  ;;  %vm1933_vm10 = vcmp.eq.s32.totalorder %v10825_v50, %v7867_v24  ;;  %v16068_v3 = vsub.f32 0.0, %v10578_v63  ;;  %v4651_v59 = vmax.f32 %v10807_v8, -9.2103405  ;;  %vm10875_vm14 = vmand %vm7869_vm4, %vm1934_vm7 }
 0x1d7   : > { %v4079_v29 = vsub.f32 0.0, %v3839_v23  ;;  %v10832_v4 = vpop.eup %7204  ;;  %v3897_v0 = vmul.f32 0.6931472, %v7193_v12  ;;  %v10835_v19 = vadd.f32 1.0, %v7201_v58  ;;  %v16070_v9 = vsub.f32 0.0, %v10080_v17  ;;  %vm10849_vm11 = vmand %vm7869_vm4, %vm1933_vm10 }
 0x1d8   : > { %v4463_v15 = vsub.f32 %v16068_v3, %v3839_v23  ;;  %16069 = vst [vmem:[#allocation119_spill] sm:$0xff] %v10832_v4  ;;  %v4847_v41 = vsub.f32 1.0, %v3695_v45  ;;  %vm1944_vm3 = vcmp.eq.s32.totalorder %v1674_v14, %v7867_v24  ;;  %v10841_v1 = vpop.eup %7206  ;;  %v3724_v63 = vmin.f32 %v3596_v48, 0.9999  ;;  %vm2574_vm0 = vmand %vm7869_vm4, %vm10861_vm1  ;;  %v1479_v14 = vld [vmem:[%s7742_s27 + $0x340] sm:$0xff] }
 0x1d9   : > { %v4552_v55 = vsub.f32 %v16070_v9, %v10816_v40  ;;  %v4207_v38 = vmax.f32 %v4079_v29, -9.2103405  ;;  %16071 = vst [vmem:[#allocation120_spill] sm:$0xff] %v10841_v1  ;;  %7210 = vlog2.f32 %v10823_v31  ;;  %v3341_v23 = vadd.f32 1.0, %v7203_v2  ;;  %vm10912_vm12 = vmxor %vm1944_vm3, %vm7688_vm13  ;;  %1817 = vperm.xlu2 %6900, %v1479_v14  }
 0x1da   : > { %v4591_v52 = vmax.f32 %v4463_v15, -9.2103405  ;;  %v4975_v8 = vmul.f32 %v4847_v41, %v4847_v41  ;;  %v5359_v3 = vmul.f32 %v3695_v45, %v3695_v45  ;;  %v4108_v48 = vsub.f32 0.0, %v3897_v0  ;;  %vm10933_vm15 = vmand %vm7869_vm4, %vm1944_vm3 }
 0x1db   : > { %v4335_v58 = vmin.f32 %v4207_v38, -0.000100005  ;;  %v7209_v15 = vpop.eup %7208  ;;  %v16074_v9 = vsub.f32 0.0, %v10100_v13  ;;  %7212 = vlog2.f32 %v10835_v19  ;;  %v15541_v41 = vsub.f32 0.0, %v10425_v35  ;;  %vm2584_vm6 = vmand %vm7869_vm4, %vm10912_vm12 }
 0x1dc   : > { %v4719_v29 = vmin.f32 %v4591_v52, -0.000100005  ;;  %v3312_v17 = vadd.f32 1.0, %v7209_v15  ;;  %v4680_v1 = vmax.f32 %v4552_v55, -9.2103405  ;;  %v4876_v7 = vsub.f32 1.0, %v3724_v63  ;;  %vm11031_vm7 = vmxor %vm1933_vm10, %vm7688_vm13 }
 0x1dd   : > { %v4492_v2 = vsub.f32 %v16074_v9, %v3897_v0  ;;  %v5103_v52 = vmul.f32 %v4975_v8, %v4335_v58  ;;  %7214 = vrcp.f32 %v3341_v23  ;;  %v10869_v13 = vsel %vm10849_vm11, 1.0, %v15680_v60  ;;  %v16080_v55 = vld [vmem:[#allocation10_spill] sm:$0xff]  ;;  %vm2573_vm10 = vmand %vm7869_vm4, %vm11031_vm7 }
 0x1de   : > { %v5487_v45 = vmul.f32 %v5359_v3, %v4719_v29  ;;  %7216 = vlog2.f32 %v3341_v23  ;;  %v16079_v8 = vsub.f32 0.0, %v10412_v10  ;;  %v16081_v3 = vld [vmem:[#allocation54_spill] sm:$0xff]  ;;  %v4236_v12 = vmax.f32 %v4108_v48, -9.2103405 }
 0x1df   : > { %v5231_v29 = vmul.f32 %v16080_v55, %v5103_v52  ;;  %v7211_v9 = vpop.eup %7210  ;;  %v4620_v38 = vmax.f32 %v4492_v2, -9.2103405  ;;  %v10885_v23 = vmul.f32 %v10652_v36, %v10782_v43  ;;  %v3252_v21 = vmul.f32 1.442695, %v15541_v41 }
 0x1e0   : > { %v3194_v58 = vmul.f32 1.442695, %v16079_v8  ;;  %v5615_v15 = vmul.f32 %v16081_v3, %v5487_v45  ;;  %v16083_v8 = vsub.f32 0.0, %v10324_v47  ;;  %7218 = vrcp.f32 %v3312_v17 }
 0x1e1   : > { %16082 = vst [vmem:[#allocation10_spill] sm:$0xff] %v10885_v23  ;;  %v10896_v45 = vadd.f32 %v10734_v27, %v5231_v29  ;;  %v7213_v36 = vpop.eup %7212  ;;  %v10903_v43 = vmul.f32 %v10722_v53, %v10818_v6  ;;  %v10907_v40 = vmul.f32 %v10799_v22, %v10811_v61  ;;  %v6040_v27 = vadd.f32 %v10869_v13, %v6039_v30  ;;  %v963_v61 = vpop.f32.mrf.mxu0 }
 0x1e2   : > { %v3132_v52 = vmul.f32 1.442695, %v16083_v8  ;;  %v10899_v48 = vadd.f32 %v10737_v26, %v5615_v15  ;;  %7220 = vlog2.f32 %v3312_v17  ;;  %v10917_v26 = vmin.f32 %v4651_v59, -0.000100005  ;;  %v1121_v17 = vpop.f32.mrf.mxu2  ;;  %v1043_v8 = vpop.f32.mrf.mxu1 }
 0x1e3   : > { %16084 = vst [vmem:[#allocation54_spill] sm:$0xff] %v10903_v43  ;;  %v10922_v53 = vsel %vm10875_vm14, 1.0, %v15680_v60  ;;  %v10925_v22 = vsel %vm2574_vm0, 1.0, %v15680_v60  ;;  %7222 = vpow2.f32 %v3194_v58  ;;  %v7215_v6 = vpop.eup %7214  ;;  %v10927_v55 = vmin.f32 %v4680_v1, -0.000100005  ;;  %v11005_v43 = vpop.permute.xlu1 %1652 }
 0x1e4   : > { %16085 = vst [vmem:[#allocation121_spill] sm:$0xff] %v10907_v40  ;;  %v5004_v29 = vmul.f32 %v4876_v7, %v4876_v7  ;;  %v5388_v30 = vmul.f32 %v3724_v63, %v3724_v63  ;;  %7224 = vpow2.f32 %v3252_v21  ;;  %v7217_v0 = vpop.eup %7216  ;;  %v4364_v58 = vmin.f32 %v4236_v12, -0.000100005  ;;  %v1193_v7 = vpop.f32.mrf.mxu3  ;;  %v1478_v63 = vld [vmem:[%s7742_s27 + $0x338] sm:$0xff] }
 0x1e5   : > { %16088 = vst [vmem:[#allocation122_spill] sm:$0xff] %v10917_v26  ;;  %v4748_v3 = vmin.f32 %v4620_v38, -0.000100005  ;;  %7226 = vpow2.f32 %v3132_v52  ;;  %v10942_v1 = vadd.f32 %v10572_v54, %v1121_v17  ;;  %v10946_v15 = vmul.f32 0.6931472, %v7211_v9  ;;  %1814 = vperm.xlu1 %6899, %v1478_v63   ;;  %v1477_v52 = vld [vmem:[%s7742_s27 + $0x330] sm:$0xff]  ;;  %v1683_v63 = vpop.permute.xlu2 %1682 }
 0x1e6   : > { %16089 = vst [vmem:[#allocation123_spill] sm:$0xff] %v10927_v55  ;;  %v6041_v21 = vadd.f32 %v10922_v53, %v6040_v27  ;;  %v10950_v12 = vadd.f32 %v10572_v54, %v1193_v7  ;;  %v10953_v38 = vadd.f32 %v10572_v54, %v963_v61  ;;  %v7219_v17 = vpop.eup %7218  ;;  %7228 = vrcp.f32 %v10823_v31  ;;  %1811 = vperm.xlu0 %6898, %v1477_v52  }
 0x1e7   : > { %16092 = vst [vmem:[#allocation124_spill] sm:$0xff] %v10946_v15  ;;  %v10957_v41 = vmul.f32 0.6931472, %v7213_v36  ;;  %v10962_v9 = vsel %vm10933_vm15, 1.0, %v15680_v60  ;;  %v3597_v27 = vmax.f32 %v7215_v6, 0.0001  ;;  %7230 = vrcp.f32 %v10835_v19 }
 0x1e8   : > { %16094 = vst [vmem:[#allocation126_spill] sm:$0xff] %v10962_v9  ;;  %v7221_v61 = vpop.eup %7220  ;;  %v3899_v7 = vmul.f32 0.6931472, %v7217_v0  ;;  %v10974_v31 = vsel %vm2584_vm6, 1.0, %v15680_v60  ;;  %v3568_v36 = vmax.f32 %v7219_v17, 0.0001  ;;  %v10979_v59 = vmul.f32 %v5004_v29, %v4364_v58  ;;  %v10998_v58 = vpop.permute.xlu0 %1649 }
 0x1e9   : > { %16093 = vst [vmem:[#allocation125_spill] sm:$0xff] %v10957_v41  ;;  %v7223_v6 = vpop.eup %7222  ;;  %v10981_v14 = vmul.f32 %v5388_v30, %v4748_v3  ;;  %v3841_v19 = vmul.f32 0.6931472, %v7221_v61  ;;  %v10987_v2 = vadd.f32 %v10572_v54, %v1043_v8  ;;  %v16096_v52 = vsub.f32 0.0, %v10146_v37  ;;  %v16097_v29 = vld [vmem:[#allocation103_spill] sm:$0xff] }
 0x1ea   : > { %1322 = vst.msk [vmem:[%s7898_s10 + $0x280] sm:$0xff] %vm1241_vm9, %v10942_v1  ;;  %v7225_v0 = vpop.eup %7224  ;;  %vm1947_vm8 = vcmp.eq.s32.totalorder %v1683_v63, %v7867_v24  ;;  %v10996_v30 = vadd.f32 %v16097_v29, %v6041_v21  ;;  %v3696_v3 = vmin.f32 %v3568_v36, 0.9999  ;;  %v16098_v23 = vsub.f32 0.0, %v10238_v18  ;;  %v1046_v44 = vpop.f32.mrf.mxu1 }
 0x1eb   : > { %16095 = vst [vmem:[#allocation127_spill] sm:$0xff] %v10974_v31  ;;  %v10992_v17 = vsub.f32 %v16096_v52, %v10946_v15  ;;  %v7227_v61 = vpop.eup %7226  ;;  %vm1936_vm5 = vcmp.eq.s32.totalorder %v10998_v58, %v7867_v24  ;;  %v4080_v37 = vsub.f32 0.0, %v3841_v19  ;;  %v16099_v52 = vsub.f32 0.0, %v10750_v32  ;;  %vm11049_vm3 = vmxor %vm1947_vm8, %vm7688_vm13 }
 0x1ec   : > { %1351 = vst.msk [vmem:[%s7898_s10 + $0x368] sm:$0xff] %vm1241_vm9, %v10950_v12  ;;  %v11003_v8 = vsub.f32 %v16098_v23, %v10957_v41  ;;  %v16100_v21 = vsub.f32 0.0, %v10276_v49  ;;  %v3725_v55 = vmin.f32 %v3597_v27, 0.9999  ;;  %v11016_v31 = vadd.f32 1.0, %v7223_v6  ;;  %v11020_v23 = vpop.eup %7228  ;;  %vm11062_vm11 = vmand %vm7869_vm4, %vm1936_vm5 }
 0x1ed   : > { %1259 = vst.msk [vmem:[%s7898_s10 + $0x88] sm:$0xff] %vm1241_vm9, %v10953_v38  ;;  %v4464_v40 = vsub.f32 %v16099_v52, %v3841_v19  ;;  %vm1937_vm2 = vcmp.eq.s32.totalorder %v11005_v43, %v7867_v24  ;;  %v4848_v18 = vsub.f32 1.0, %v3696_v3  ;;  %v11022_v41 = vadd.f32 1.0, %v7225_v0  ;;  %v11025_v26 = vpop.eup %7230  ;;  %vm11076_vm1 = vmand %vm7869_vm4, %vm1947_vm8 }
 0x1ee   : > { %1291 = vst.msk [vmem:[%s7898_s10 + $0x188] sm:$0xff] %vm1241_vm9, %v10987_v2  ;;  %v4493_v36 = vsub.f32 %v16100_v21, %v3899_v7  ;;  %v4208_v19 = vmax.f32 %v4080_v37, -9.2103405  ;;  %v4109_v27 = vsub.f32 0.0, %v3899_v7  ;;  %v3342_v6 = vadd.f32 1.0, %v7227_v61  ;;  %vm2587_vm14 = vmand %vm7869_vm4, %vm11049_vm3 }
 0x1ef   : > { %16101 = vst [vmem:[#allocation103_spill] sm:$0xff] %v11020_v23  ;;  %v4592_v52 = vmax.f32 %v4464_v40, -9.2103405  ;;  %v15544_v21 = vsub.f32 0.0, %v10575_v62  ;;  %v4976_v0 = vmul.f32 %v4848_v18, %v4848_v18  ;;  %v5360_v40 = vmul.f32 %v3696_v3, %v3696_v3  ;;  %vm11094_vm0 = vmxor %vm1937_vm2, %vm7688_vm13 }
 0x1f0   : > { %16102 = vst [vmem:[#allocation128_spill] sm:$0xff] %v11025_v26  ;;  %v4336_v32 = vmin.f32 %v4208_v19, -0.000100005  ;;  %v4621_v4 = vmax.f32 %v4493_v36, -9.2103405  ;;  %v4877_v26 = vsub.f32 1.0, %v3725_v55  ;;  %7232 = vlog2.f32 %v11016_v31  ;;  %vm11118_vm12 = vmand %vm7869_vm4, %vm1937_vm2 }
 0x1f1   : > { %v4720_v37 = vmin.f32 %v4592_v52, -0.000100005  ;;  %v15545_v50 = vsub.f32 0.0, %v10953_v38  ;;  %7234 = vlog2.f32 %v11022_v41  ;;  %v16105_v7 = vsub.f32 0.0, %v10493_v46  ;;  %vm11146_vm6 = vmxor %vm1936_vm5, %vm7688_vm13 }
 0x1f2   : > { %v5104_v18 = vmul.f32 %v4976_v0, %v4336_v32  ;;  %v4237_v52 = vmax.f32 %v4109_v27, -9.2103405  ;;  %7236 = vrcp.f32 %v3342_v6  ;;  %v3254_v36 = vmul.f32 1.442695, %v15544_v21  ;;  %vm2577_vm8 = vmand %vm7869_vm4, %vm11094_vm0 }
 0x1f3   : > { %v3196_v61 = vmul.f32 1.442695, %v16105_v7  ;;  %v5488_v19 = vmul.f32 %v5360_v40, %v4720_v37  ;;  %v3074_v15 = vmul.f32 1.442695, %v15545_v50  ;;  %7238 = vlog2.f32 %v3342_v6  ;;  %v16111_v37 = vld [vmem:[#allocation9_spill] sm:$0xff]  ;;  %v16112_v7 = vld [vmem:[#allocation50_spill] sm:$0xff]  ;;  %vm2576_vm2 = vmand %vm7869_vm4, %vm11146_vm6 }
 0x1f4   : > { %v16110_v27 = vsub.f32 0.0, %v10595_v56  ;;  %v5232_v40 = vmul.f32 %v16111_v37, %v5104_v18  ;;  %v4652_v23 = vmax.f32 %v10992_v17, -9.2103405  ;;  %v4681_v6 = vmax.f32 %v11003_v8, -9.2103405 }
 0x1f5   : > { %v5616_v21 = vmul.f32 %v16112_v7, %v5488_v19  ;;  %v5389_v50 = vmul.f32 %v3725_v55, %v3725_v55  ;;  %7240 = vpow2.f32 %v3074_v15  ;;  %v4749_v33 = vmin.f32 %v4621_v4, -0.000100005 }
 0x1f6   : > { %v3134_v0 = vmul.f32 1.442695, %v16110_v27  ;;  %7242 = vpow2.f32 %v3196_v61  ;;  %v11085_v17 = vadd.f32 %v10896_v45, %v5232_v40  ;;  %v7233_v63 = vpop.eup %7232  ;;  %v4365_v8 = vmin.f32 %v4237_v52, -0.000100005  ;;  %v1692_v45 = vpop.permute.xlu2 %1691  ;;  %v16117_v61 = vld [vmem:[#allocation94_spill] sm:$0xff] }
 0x1f7   : > { %v11088_v55 = vadd.f32 %v10899_v48, %v5616_v21  ;;  %v5005_v18 = vmul.f32 %v4877_v26, %v4877_v26  ;;  %v11101_v15 = vsel %vm11062_vm11, 1.0, %v15680_v60  ;;  %7244 = vpow2.f32 %v3254_v36  ;;  %v966_v48 = vpop.f32.mrf.mxu0  ;;  %v7235_v21 = vpop.eup %7234 }
 0x1f8   : > { %v11105_v26 = vmul.f32 %v16117_v61, %v10981_v14  ;;  %v6735_v19 = vsel %vm2573_vm10, 1.0, %v15680_v60  ;;  %7246 = vpow2.f32 %v3134_v0  ;;  %vm1950_vm15 = vcmp.eq.s32.totalorder %v1692_v45, %v7867_v24  ;;  %v7237_v14 = vpop.eup %7236 }
 0x1f9   : > { %v11125_v36 = vmul.f32 %v10025_v20, %v10979_v59  ;;  %v11127_v49 = vmin.f32 %v4652_v23, -0.000100005  ;;  %v11132_v43 = vsel %vm11076_vm1, 1.0, %v15680_v60  ;;  %v11140_v32 = vsel %vm2587_vm14, 1.0, %v15680_v60  ;;  %v1123_v59 = vpop.f32.mrf.mxu2  ;;  %v7239_v23 = vpop.eup %7238  ;;  %vm11173_vm5 = vmxor %vm1950_vm15, %vm7688_vm13 }
 0x1fa   : > { %16118 = vst [vmem:[#allocation9_spill] sm:$0xff] %v11105_v26  ;;  %v5517_v27 = vmul.f32 %v5389_v50, %v4749_v33  ;;  %v6043_v3 = vadd.f32 %v11101_v15, %v10996_v30  ;;  %v11157_v0 = vadd.f32 %v10572_v54, %v1123_v59  ;;  %v11160_v58 = vadd.f32 %v10572_v54, %v966_v48  ;;  %v1662_v50 = vpop.permute.xlu1 %1661  ;;  %vm11203_vm10 = vmand %vm7869_vm4, %vm1950_vm15 }
 0x1fb   : > { %16121 = vst [vmem:[#allocation50_spill] sm:$0xff] %v11125_v36  ;;  %v7241_v37 = vpop.eup %7240  ;;  %v11162_v40 = vmin.f32 %v4681_v6, -0.000100005  ;;  %v5133_v7 = vmul.f32 %v5005_v18, %v4365_v8  ;;  %7248 = vrcp.f32 %v11016_v31  ;;  %v11168_v33 = vsel %vm11118_vm12, 1.0, %v15680_v60  ;;  %vm2590_vm3 = vmand %vm7869_vm4, %vm11173_vm5 }
 0x1fc   : > { %16122 = vst [vmem:[#allocation94_spill] sm:$0xff] %v11127_v49  ;;  %v7243_v48 = vpop.eup %7242  ;;  %v11177_v6 = vmul.f32 0.6931472, %v7233_v63  ;;  %vm1940_vm7 = vcmp.eq.s32.totalorder %v1662_v50, %v7867_v24  ;;  %v3313_v31 = vadd.f32 1.0, %v7241_v37  ;;  %v11188_v8 = vadd.f32 %v10572_v54, %v1046_v44  ;;  %v1196_v44 = vpop.f32.mrf.mxu3 }
 0x1fd   : > { %16123 = vst [vmem:[#allocation129_spill] sm:$0xff] %v11132_v43  ;;  %v7245_v18 = vpop.eup %7244  ;;  %7250 = vrcp.f32 %v11022_v41  ;;  %v3598_v63 = vmax.f32 %v7237_v14, 0.0001  ;;  %v3901_v61 = vmul.f32 0.6931472, %v7239_v23  ;;  %v11197_v52 = vsel %vm2577_vm8, 1.0, %v15680_v60  ;;  %vm11232_vm11 = vmand %vm7869_vm4, %vm1940_vm7 }
 0x1fe   : > { %16124 = vst [vmem:[#allocation130_spill] sm:$0xff] %v11140_v32  ;;  %v7247_v41 = vpop.eup %7246  ;;  %v11210_v14 = vmul.f32 %v6735_v19, %v5517_v27  ;;  %v6044_v4 = vadd.f32 %v11168_v33, %v6043_v3  ;;  %7252 = vrcp.f32 %v3313_v31  ;;  %v11218_v45 = vadd.f32 %v10572_v54, %v1196_v44  ;;  %vm11247_vm1 = vmxor %vm1940_vm7, %vm7688_vm13  ;;  %v1480_v19 = vld [vmem:[%s7742_s27 + $0x348] sm:$0xff] }
 0x1ff   : > { %16127 = vst [vmem:[#allocation131_spill] sm:$0xff] %v11162_v40  ;;  %v11224_v23 = vmul.f32 %v10869_v13, %v5133_v7  ;;  %v11226_v37 = vadd.f32 1.0, %v7243_v48  ;;  %7254 = vlog2.f32 %v3313_v31  ;;  %v16137_v54 = vsub.f32 0.0, %v10412_v10  ;;  %v1481_v40 = vld [vmem:[%s7742_s27 + $0x350] sm:$0xff]  ;;  %vm2580_vm14 = vmand %vm7869_vm4, %vm11247_vm1  ;;  %1820 = vperm.xlu0 %6898, %v1480_v19  }
 0x200   : > { %16130 = vst [vmem:[#allocation132_spill] sm:$0xff] %v11177_v6  ;;  %v11240_v13 = vmul.f32 0.6931472, %v7235_v21  ;;  %v11242_v7 = vadd.f32 1.0, %v7245_v18  ;;  %v15546_v31 = vsub.f32 0.0, %v11160_v58  ;;  %v11263_v21 = vsel %vm2576_vm2, 1.0, %v15680_v60  ;;  %1823 = vperm.xlu1 %6899, %v1481_v40  }
 0x201   : > { %1323 = vst.msk [vmem:[%s7898_s10 + $0x288] sm:$0xff] %vm1241_vm9, %v11157_v0  ;;  %v4525_v3 = vsub.f32 %v16137_v54, %v11177_v6  ;;  %v11255_v10 = vpop.eup %7248  ;;  %v3726_v44 = vmin.f32 %v3598_v63, 0.9999  ;;  %v4110_v54 = vsub.f32 0.0, %v3901_v61  ;;  %v3343_v50 = vadd.f32 1.0, %v7247_v41  ;;  %v1482_v41 = vld [vmem:[%s7742_s27 + $0x358] sm:$0xff] }
 0x202   : > { %1260 = vst.msk [vmem:[%s7898_s10 + $0x90] sm:$0xff] %vm1241_vm9, %v11160_v58  ;;  %v11268_v18 = vsel %vm11203_vm10, 1.0, %v15680_v60  ;;  %v11276_v63 = vsel %vm2590_vm3, 1.0, %v15680_v60  ;;  %v11279_v27 = vadd.f32 %v10473_v28, %v6044_v4  ;;  %v3076_v20 = vmul.f32 1.442695, %v15546_v31  ;;  %v1659_v4 = vpop.permute.xlu0 %1658  ;;  %1826 = vperm.xlu2 %6900, %v1482_v41  }
 0x203   : > { %16133 = vst [vmem:[#allocation133_spill] sm:$0xff] %v11210_v14  ;;  %v11285_v59 = vpop.eup %7250  ;;  %7256 = vlog2.f32 %v11226_v37  ;;  %v11293_v30 = vsel %vm11232_vm11, 1.0, %v15680_v60  ;;  %v16147_v31 = vsub.f32 0.0, %v10788_v57  ;;  %vm1939_vm0 = vcmp.eq.s32.totalorder %v1659_v4, %v7867_v24 }
 0x204   : > { %1292 = vst.msk [vmem:[%s7898_s10 + $0x190] sm:$0xff] %vm1241_vm9, %v11188_v8  ;;  %7258 = vlog2.f32 %v11242_v7  ;;  %v4878_v32 = vsub.f32 1.0, %v3726_v44  ;;  %v15550_v40 = vsub.f32 0.0, %v10666_v5  ;;  %v15551_v41 = vsub.f32 0.0, %v10747_v42  ;;  %vm2067_vm12 = vmand %vm7869_vm4, %vm1939_vm0 }
 0x205   : > { %16134 = vst [vmem:[#allocation134_spill] sm:$0xff] %v11224_v23  ;;  %v16145_v23 = vsub.f32 0.0, %v10324_v47  ;;  %v3136_v36 = vmul.f32 1.442695, %v16147_v31  ;;  %v7253_v47 = vpop.eup %7252  ;;  %7260 = vlog2.f32 %v3343_v50  ;;  %v16151_v19 = vsub.f32 0.0, %v10953_v38  ;;  %vm11342_vm15 = vmxor %vm1939_vm0, %vm7688_vm13 }
 0x206   : > { %16138 = vst [vmem:[#allocation135_spill] sm:$0xff] %v11240_v13  ;;  %v7255_v26 = vpop.eup %7254  ;;  %v3569_v49 = vmax.f32 %v7253_v47, 0.0001  ;;  %7262 = vpow2.f32 %v3076_v20  ;;  %vm2579_vm8 = vmand %vm7869_vm4, %vm11342_vm15  ;;  %vm16179_vm3 = vcmask 64512  }
 0x207   : > { %1352 = vst.msk [vmem:[%s7898_s10 + $0x370] sm:$0xff] %vm1241_vm9, %v11218_v45  ;;  %v4494_v14 = vsub.f32 %v16145_v23, %v3901_v61  ;;  %v4653_v61 = vmax.f32 %v4525_v3, -9.2103405  ;;  %v16148_v23 = vsub.f32 0.0, %v10425_v35  ;;  %v11315_v35 = vsel %vm2580_vm14, 1.0, %v15680_v60 }
 0x208   : > { %16141 = vst [vmem:[#allocation136_spill] sm:$0xff] %v11255_v10  ;;  %v3843_v3 = vmul.f32 0.6931472, %v7255_v26  ;;  %7264 = vpow2.f32 %v3136_v36  ;;  %v5006_v10 = vmul.f32 %v4878_v32, %v4878_v32  ;;  %v3256_v32 = vmul.f32 1.442695, %v15551_v41 }
 0x209   : > { %16142 = vst [vmem:[#allocation137_spill] sm:$0xff] %v11268_v18  ;;  %v4622_v31 = vmax.f32 %v4494_v14, -9.2103405  ;;  %7266 = vrcp.f32 %v3343_v50  ;;  %v7257_v48 = vpop.eup %7256  ;;  %v3198_v14 = vmul.f32 1.442695, %v15550_v40 }
 0x20a   : > { %16143 = vst [vmem:[#allocation138_spill] sm:$0xff] %v11276_v63  ;;  %v4238_v63 = vmax.f32 %v4110_v54, -9.2103405  ;;  %v3697_v54 = vmin.f32 %v3569_v49, 0.9999  ;;  %v4081_v47 = vsub.f32 0.0, %v3843_v3  ;;  %v7259_v36 = vpop.eup %7258  ;;  %v5390_v49 = vmul.f32 %v3726_v44, %v3726_v44 }
 0x20b   : > { %16144 = vst [vmem:[#allocation139_spill] sm:$0xff] %v11285_v59  ;;  %v11304_v59 = vsub.f32 %v16148_v23, %v11240_v13  ;;  %v11319_v23 = vmin.f32 %v4653_v61, -0.000100005  ;;  %v4465_v13 = vsub.f32 %v16151_v19, %v3843_v3  ;;  %v7261_v38 = vpop.eup %7260  ;;  %v4750_v61 = vmin.f32 %v4622_v31, -0.000100005  ;;  %v1701_v19 = vpop.permute.xlu2 %1700 }
 0x20c   : > { %16146 = vst [vmem:[#allocation140_spill] sm:$0xff] %v11293_v30  ;;  %v4849_v26 = vsub.f32 1.0, %v3697_v54  ;;  %v4209_v50 = vmax.f32 %v4081_v47, -9.2103405  ;;  %7268 = vrcp.f32 %v11226_v37  ;;  %v11334_v3 = vsel %vm2067_vm12, 1.0, %v15680_v60 }
 0x20d   : > { %16149 = vst [vmem:[#allocation141_spill] sm:$0xff] %v11315_v35  ;;  %v4682_v6 = vmax.f32 %v11304_v59, -9.2103405  ;;  %v4366_v35 = vmin.f32 %v4238_v63, -0.000100005  ;;  %v7263_v59 = vpop.eup %7262  ;;  %v5361_v18 = vmul.f32 %v3697_v54, %v3697_v54  ;;  %7270 = vrcp.f32 %v11242_v7 }
 0x20e   : > { %16150 = vst [vmem:[#allocation142_spill] sm:$0xff] %v11319_v23  ;;  %v4593_v20 = vmax.f32 %v4465_v13, -9.2103405  ;;  %v4977_v63 = vmul.f32 %v4849_v26, %v4849_v26  ;;  %v4337_v23 = vmin.f32 %v4209_v50, -0.000100005  ;;  %v7265_v51 = vpop.eup %7264  ;;  %vm1953_vm6 = vcmp.eq.s32.totalorder %v1701_v19, %v7867_v24  ;;  %v16157_v50 = vld [vmem:[#allocation11_spill] sm:$0xff] }
 0x20f   : > { %16152 = vst [vmem:[#allocation143_spill] sm:$0xff] %v11334_v3  ;;  %v5134_v40 = vmul.f32 %v5006_v10, %v4366_v35  ;;  %v11336_v47 = vmul.f32 0.6931472, %v7257_v48  ;;  %v7267_v13 = vpop.eup %7266  ;;  %v11347_v31 = vmul.f32 0.6931472, %v7259_v36  ;;  %7272 = vpow2.f32 %v3198_v14  ;;  %v16158_v36 = vld [vmem:[#allocation35_spill] sm:$0xff]  ;;  %vm11367_vm5 = vmxor %vm1953_vm6, %vm7688_vm13 }
 0x210   : > { %v4721_v44 = vmin.f32 %v4593_v20, -0.000100005  ;;  %v5105_v54 = vmul.f32 %v4977_v63, %v4337_v23  ;;  %v5518_v10 = vmul.f32 %v5390_v49, %v4750_v61  ;;  %v6046_v35 = vadd.f32 %v11334_v3, %v11279_v27  ;;  %vm11400_vm2 = vmand %vm7869_vm4, %vm1953_vm6  ;;  %v16172_v19 = vld [vmem:[#allocation41_spill] sm:$0xff] }
 0x211   : > { %16153 = vst [vmem:[#allocation144_spill] sm:$0xff] %v11336_v47  ;;  %7274 = vpow2.f32 %v3256_v32  ;;  %v3314_v7 = vadd.f32 1.0, %v7263_v59  ;;  %v3903_v48 = vmul.f32 0.6931472, %v7261_v38  ;;  %v3344_v4 = vadd.f32 1.0, %v7265_v51  ;;  %vm2593_vm7 = vmand %vm7869_vm4, %vm11367_vm5 }
 0x212   : > { %16156 = vst [vmem:[#allocation145_spill] sm:$0xff] %v11347_v31  ;;  %v5489_v26 = vmul.f32 %v5361_v18, %v4721_v44  ;;  %v5233_v20 = vmul.f32 %v16157_v50, %v5105_v54  ;;  %v11357_v14 = vpop.eup %7268  ;;  %v11359_v18 = vmin.f32 %v4682_v6, -0.000100005  ;;  %v16161_v27 = vsub.f32 0.0, %v10493_v46  ;;  %v1198_v50 = vpop.f32.mrf.mxu3 }
 0x213   : > { %16159 = vst [vmem:[#allocation11_spill] sm:$0xff] %v11357_v14  ;;  %v3599_v49 = vmax.f32 %v7267_v13, 0.0001  ;;  %7276 = vrcp.f32 %v3314_v7  ;;  %v16164_v51 = vsub.f32 0.0, %v10575_v62  ;;  %v11380_v46 = vpop.eup %7270  ;;  %v11383_v63 = vmul.f32 %v10922_v53, %v5134_v40  ;;  %v16171_v53 = vld [vmem:[#allocation43_spill] sm:$0xff]  ;;  %v1126_v13 = vpop.f32.mrf.mxu2 }
 0x214   : > { %v5617_v41 = vmul.f32 %v16158_v36, %v5489_v26  ;;  %16160 = vst [vmem:[#allocation35_spill] sm:$0xff] %v11359_v18  ;;  %v4526_v23 = vsub.f32 %v16161_v27, %v11336_v47  ;;  %v11375_v6 = vadd.f32 %v11085_v17, %v5233_v20  ;;  %7278 = vlog2.f32 %v3314_v7  ;;  %v11416_v7 = vld [vmem:[%s15432_s2] ss:$0 sm:$0xff]  ;;  %v11473_v14 = vpop.permute.xlu0 %1667 }
 0x215   : > { %v4555_v61 = vsub.f32 %v16164_v51, %v11347_v31  ;;  %16165 = vst [vmem:[#allocation146_spill] sm:$0xff] %v11380_v46  ;;  %v11386_v59 = vmul.f32 %v10925_v22, %v5518_v10  ;;  %v11394_v62 = vsel %vm2579_vm8, 1.0, %v15680_v60  ;;  %v968_v22 = vpop.f32.mrf.mxu0  ;;  %v7273_v40 = vpop.eup %7272  ;;  %v11406_v44 = vadd.f32 %v11293_v30, %v6046_v35  ;;  %v6883_v30 = vld [vmem:[%s7750_s30 + $0x1f8] sm:$0xff] }
 0x216   : > { %v11378_v32 = vadd.f32 %v11088_v55, %v5617_v41  ;;  %16166 = vst [vmem:[#allocation147_spill] sm:$0xff] %v11383_v63  ;;  %v3617_v55 = vmax.f32 %v16171_v53, 0.0001  ;;  %v4111_v41 = vsub.f32 0.0, %v3903_v48  ;;  %7280 = vrcp.f32 %v3344_v4  ;;  %v11453_v63 = vpop.permute.xlu1 %1670  ;;  %6560 = vmatmul.msk.bf16.gmra.mxu3 %vm16179_vm3, %v6883_v30 }
 0x217   : > { %16167 = vst [vmem:[#allocation148_spill] sm:$0xff] %v11386_v59  ;;  %v4129_v37 = vsub.f32 0.0, %v16172_v19  ;;  %v7275_v54 = vpop.eup %7274  ;;  %v4654_v26 = vmax.f32 %v4526_v23, -9.2103405  ;;  %v3727_v10 = vmin.f32 %v3599_v49, 0.9999  ;;  %7282 = vlog2.f32 %v3344_v4  ;;  %v1048_v23 = vpop.f32.mrf.mxu1 }
 0x218   : > { %16168 = vst [vmem:[#allocation149_spill] sm:$0xff] %v11394_v62  ;;  %v11419_v35 = vadd.f32 %v11416_v7, %v1126_v13  ;;  %v4683_v20 = vmax.f32 %v4555_v61, -9.2103405  ;;  %v11424_v36 = vsel %vm11400_vm2, 1.0, %v15680_v60  ;;  %v11427_v27 = vadd.f32 %v11416_v7, %v1198_v50 }
 0x219   : > { %v11430_v4 = vadd.f32 %v11416_v7, %v968_v22  ;;  %v7277_v49 = vpop.eup %7276  ;;  %v3375_v51 = vadd.f32 1.0, %v7273_v40  ;;  %v11438_v61 = vsel %vm2593_vm7, 1.0, %v15680_v60  ;;  %v11440_v17 = vmin.f32 %v3617_v55, 0.9999 }
 0x21a   : > { %1324 = vst.msk [vmem:[%s7898_s10 + $0x290] sm:$0xff] %vm1241_vm9, %v11419_v35  ;;  %v7279_v22 = vpop.eup %7278  ;;  %v4239_v19 = vmax.f32 %v4111_v41, -9.2103405  ;;  %v16173_v13 = vsub.f32 0.0, %v10595_v56  ;;  %v3404_v50 = vadd.f32 1.0, %v7275_v54  ;;  %v4879_v55 = vsub.f32 1.0, %v3727_v10 }
 0x21b   : > { %v3570_v18 = vmax.f32 %v7277_v49, 0.0001  ;;  %1353 = vst.msk [vmem:[%s7898_s10 + $0x378] sm:$0xff] %vm1241_vm9, %v11427_v27  ;;  %v11451_v38 = vmin.f32 %v4654_v26, -0.000100005  ;;  %v11459_v41 = vadd.f32 %v11416_v7, %v1048_v23  ;;  %v5391_v54 = vmul.f32 %v3727_v10, %v3727_v10 }
 0x21c   : > { %v4495_v40 = vsub.f32 %v16173_v13, %v3903_v48  ;;  %v3845_v53 = vmul.f32 0.6931472, %v7279_v22  ;;  %1261 = vst.msk [vmem:[%s7898_s10 + $0x98] sm:$0xff] %vm1241_vm9, %v11430_v4  ;;  %v7281_v56 = vpop.eup %7280  ;;  %v11461_v48 = vmin.f32 %v4683_v20, -0.000100005  ;;  %7284 = vlog2.f32 %v3375_v51 }
 0x21d   : > { %16174 = vst [vmem:[#allocation43_spill] sm:$0xff] %v11451_v38  ;;  %v3698_v13 = vmin.f32 %v3570_v18, 0.9999  ;;  %v7283_v26 = vpop.eup %7282  ;;  %v16176_v59 = vsub.f32 0.0, %v10987_v2  ;;  %v16177_v22 = vsub.f32 0.0, %v11160_v58  ;;  %7286 = vlog2.f32 %v3404_v50 }
 0x21e   : > { %16175 = vst [vmem:[#allocation41_spill] sm:$0xff] %v11461_v48  ;;  %v4082_v46 = vsub.f32 0.0, %v3845_v53  ;;  %v4367_v23 = vmin.f32 %v4239_v19, -0.000100005  ;;  %v4623_v20 = vmax.f32 %v4495_v40, -9.2103405  ;;  %vm1943_vm10 = vcmp.eq.s32.totalorder %v11453_v63, %v7867_v24 }
 0x21f   : > { %v3138_v31 = vmul.f32 1.442695, %v16176_v59  ;;  %v4466_v38 = vsub.f32 %v16177_v22, %v3845_v53  ;;  %1293 = vst.msk [vmem:[%s7898_s10 + $0x198] sm:$0xff] %vm1241_vm9, %v11459_v41  ;;  %v4850_v18 = vsub.f32 1.0, %v3698_v13  ;;  %v5007_v10 = vmul.f32 %v4879_v55, %v4879_v55  ;;  %vm11526_vm14 = vmxor %vm1943_vm10, %vm7688_vm13 }
 0x220   : > { %v3600_v49 = vmax.f32 %v7281_v56, 0.0001  ;;  %v4210_v48 = vmax.f32 %v4082_v46, -9.2103405  ;;  %7288 = vrcp.f32 %v3375_v51  ;;  %v3905_v59 = vmul.f32 0.6931472, %v7283_v26  ;;  %vm11543_vm0 = vmand %vm7869_vm4, %vm1943_vm10 }
 0x221   : > { %v4594_v47 = vmax.f32 %v4466_v38, -9.2103405  ;;  %v16178_v58 = vsub.f32 0.0, %v10942_v1  ;;  %v4978_v22 = vmul.f32 %v4850_v18, %v4850_v18  ;;  %7290 = vpow2.f32 %v3138_v31  ;;  %v16182_v18 = vld [vmem:[#allocation61_spill] sm:$0xff]  ;;  %vm2583_vm6 = vmand %vm7869_vm4, %vm11526_vm14 }
 0x222   : > { %v4338_v19 = vmin.f32 %v4210_v48, -0.000100005  ;;  %v5362_v62 = vmul.f32 %v3698_v13, %v3698_v13  ;;  %v4751_v3 = vmin.f32 %v4623_v20, -0.000100005  ;;  %v4257_v11 = vmax.f32 %v4129_v37, -9.2103405  ;;  %v7285_v51 = vpop.eup %7284 }
 0x223   : > { %v3200_v53 = vmul.f32 1.442695, %v16178_v58  ;;  %v4722_v40 = vmin.f32 %v4594_v47, -0.000100005  ;;  %v15556_v55 = vsub.f32 0.0, %v10950_v12  ;;  %v15557_v46 = vsub.f32 0.0, %v11430_v4  ;;  %v7287_v26 = vpop.eup %7286 }
 0x224   : > { %7292 = vrcp.f32 %v3404_v50  ;;  %vm1942_vm11 = vcmp.eq.s32.totalorder %v11473_v14, %v7867_v24  ;;  %v5106_v38 = vmul.f32 %v4978_v22, %v4338_v19  ;;  %v3728_v31 = vmin.f32 %v3600_v49, 0.9999  ;;  %v16181_v20 = vld [vmem:[#allocation13_spill] sm:$0xff] }
 0x225   : > { %v5490_v56 = vmul.f32 %v5362_v62, %v4722_v40  ;;  %v4897_v47 = vsub.f32 1.0, %v11440_v17  ;;  %7294 = vpow2.f32 %v3200_v53  ;;  %v3078_v37 = vmul.f32 1.442695, %v15557_v46  ;;  %vm11499_vm1 = vmand %vm7869_vm4, %vm1942_vm11  ;;  %v16216_v46 = vld [vmem:[#allocation67_spill] sm:$0xff] }
 0x226   : > { %v4112_v48 = vsub.f32 0.0, %v3905_v59  ;;  %v16180_v13 = vsub.f32 0.0, %v10788_v57  ;;  %v5234_v50 = vmul.f32 %v16181_v20, %v5106_v38  ;;  %v11490_v22 = vpop.eup %7288  ;;  %v5135_v62 = vmul.f32 %v5007_v10, %v4367_v23  ;;  %v1710_v23 = vpop.permute.xlu2 %1709  ;;  %v1485_v38 = vld [vmem:[%s7742_s27 + $0x370] sm:$0xff]  ;;  %vm11561_vm15 = vmxor %vm1942_vm11, %vm7688_vm13 }
 0x227   : > { %v5618_v58 = vmul.f32 %v16182_v18, %v5490_v56  ;;  %v11492_v49 = vmul.f32 0.6931472, %v7285_v51  ;;  %v3258_v57 = vmul.f32 1.442695, %v15556_v55  ;;  %7296 = vpow2.f32 %v3078_v37  ;;  %v1484_v56 = vld [vmem:[%s7742_s27 + $0x368] sm:$0xff]  ;;  %1835 = vperm.xlu2 %6900, %v1485_v38   ;;  %v16193_v38 = vld [vmem:[#allocation64_spill] sm:$0xff]  ;;  %vm2582_vm5 = vmand %vm7869_vm4, %vm11561_vm15 }
 0x228   : > { %v4496_v30 = vsub.f32 %v16180_v13, %v3905_v59  ;;  %v7291_v59 = vpop.eup %7290  ;;  %v5519_v19 = vmul.f32 %v5391_v54, %v4751_v3  ;;  %v11505_v40 = vmul.f32 0.6931472, %v7287_v26  ;;  %v11508_v10 = vadd.f32 %v11375_v6, %v5234_v50  ;;  %v1128_v3 = vpop.f32.mrf.mxu2  ;;  %1832 = vperm.xlu1 %6899, %v1484_v56   ;;  %v1483_v54 = vld [vmem:[%s7742_s27 + $0x360] sm:$0xff] }
 0x229   : > { %v11511_v51 = vadd.f32 %v11378_v32, %v5618_v58  ;;  %v4385_v13 = vmin.f32 %v4257_v11, -0.000100005  ;;  %v5025_v20 = vmul.f32 %v4897_v47, %v4897_v47  ;;  %v5409_v18 = vmul.f32 %v11440_v17, %v11440_v17  ;;  %1829 = vperm.xlu0 %6898, %v1483_v54  }
 0x22a   : > { %16185 = vst [vmem:[#allocation13_spill] sm:$0xff] %v11505_v40  ;;  %v6048_v37 = vadd.f32 %v10757_v34, %v11406_v44  ;;  %v11520_v26 = vpop.eup %7292  ;;  %v4240_v6 = vmax.f32 %v4112_v48, -9.2103405  ;;  %v4624_v50 = vmax.f32 %v4496_v30, -9.2103405  ;;  %v4880_v32 = vsub.f32 1.0, %v3728_v31 }
 0x22b   : > { %16186 = vst [vmem:[#allocation61_spill] sm:$0xff] %v11520_v26  ;;  %v11533_v44 = vsel %vm11499_vm1, 1.0, %v15680_v60  ;;  %v7295_v17 = vpop.eup %7294  ;;  %v16189_v47 = vsub.f32 0.0, %v10666_v5  ;;  %7298 = vpow2.f32 %v3258_v57  ;;  %v3345_v58 = vadd.f32 1.0, %v7291_v59  ;;  %v1680_v59 = vpop.permute.xlu1 %1679 }
 0x22c   : > { %vm1956_vm12 = vcmp.eq.s32.totalorder %v1710_v23, %v7867_v24  ;;  %v11549_v53 = vmul.f32 %v16097_v29, %v5135_v62  ;;  %v11552_v56 = vmul.f32 %v16193_v38, %v5519_v19  ;;  %v16195_v5 = vsub.f32 0.0, %v10747_v42  ;;  %v1201_v57 = vpop.f32.mrf.mxu3 }
 0x22d   : > { %v4527_v48 = vsub.f32 %v16189_v47, %v11492_v49  ;;  %v11566_v29 = vadd.f32 %v11416_v7, %v1128_v3  ;;  %v7297_v62 = vpop.eup %7296  ;;  %v5392_v19 = vmul.f32 %v3728_v31, %v3728_v31  ;;  %v5153_v54 = vmul.f32 %v5025_v20, %v4385_v13  ;;  %v16198_v47 = vld [vmem:[#allocation49_spill] sm:$0xff]  ;;  %vm11577_vm8 = vmxor %vm1956_vm12, %vm7688_vm13 }
 0x22e   : > { %16192 = vst [vmem:[#allocation150_spill] sm:$0xff] %v11549_v53  ;;  %v4556_v63 = vsub.f32 %v16195_v5, %v11505_v40  ;;  %v5537_v38 = vmul.f32 %v5409_v18, %v16198_v47  ;;  %v6049_v42 = vadd.f32 %v11533_v44, %v6048_v37  ;;  %v4368_v14 = vmin.f32 %v4240_v6, -0.000100005  ;;  %vm11601_vm7 = vmand %vm7869_vm4, %vm1956_vm12 }
 0x22f   : > { %16194 = vst [vmem:[#allocation64_spill] sm:$0xff] %v11552_v56  ;;  %v4752_v5 = vmin.f32 %v4624_v50, -0.000100005  ;;  %v5008_v55 = vmul.f32 %v4880_v32, %v4880_v32  ;;  %v3315_v31 = vadd.f32 1.0, %v7297_v62  ;;  %v4655_v13 = vmax.f32 %v4527_v48, -9.2103405  ;;  %vm2596_vm10 = vmand %vm7869_vm4, %vm11577_vm8  ;;  %v971_v62 = vpop.f32.mrf.mxu0 }
 0x230   : > { %1325 = vst.msk [vmem:[%s7898_s10 + $0x298] sm:$0xff] %vm1241_vm9, %v11566_v29  ;;  %v3376_v20 = vadd.f32 1.0, %v7295_v17  ;;  %7300 = vrcp.f32 %v3345_v58  ;;  %vm1946_vm2 = vcmp.eq.s32.totalorder %v1680_v59, %v7867_v24  ;;  %v4684_v18 = vmax.f32 %v4556_v63, -9.2103405 }
 0x231   : > { %v11592_v37 = vsel %vm11543_vm0, 1.0, %v15680_v60  ;;  %v11595_v6 = vsel %vm2583_vm6, 1.0, %v15680_v60  ;;  %7302 = vrcp.f32 %v3315_v31  ;;  %v7299_v32 = vpop.eup %7298  ;;  %v11606_v11 = vmul.f32 %v11424_v36, %v5153_v54  ;;  %vm11627_vm3 = vmxor %vm1946_vm2, %vm7688_vm13 }
 0x232   : > { %16201 = vst [vmem:[#allocation49_spill] sm:$0xff] %v11592_v37  ;;  %v11609_v17 = vmul.f32 %v11438_v61, %v5537_v38  ;;  %v15558_v23 = vsub.f32 0.0, %v11188_v8  ;;  %7304 = vlog2.f32 %v3315_v31  ;;  %v5136_v48 = vmul.f32 %v5008_v55, %v4368_v14  ;;  %v1051_v38 = vpop.f32.mrf.mxu1  ;;  %vm11641_vm11 = vmand %vm7869_vm4, %vm1946_vm2 }
 0x233   : > { %16202 = vst [vmem:[#allocation151_spill] sm:$0xff] %v11595_v6  ;;  %v5520_v30 = vmul.f32 %v5392_v19, %v4752_v5  ;;  %v11622_v63 = vsel %vm2582_vm5, 1.0, %v15680_v60  ;;  %7306 = vlog2.f32 %v3345_v58  ;;  %v11631_v54 = vmin.f32 %v4655_v13, -0.000100005  ;;  %v16210_v19 = vld [vmem:[#allocation24_spill] sm:$0xff]  ;;  %vm2586_vm1 = vmand %vm7869_vm4, %vm11627_vm3 }
 0x234   : > { %16205 = vst [vmem:[#allocation152_spill] sm:$0xff] %v11606_v11  ;;  %v6050_v55 = vadd.f32 %v11592_v37, %v6049_v42  ;;  %7308 = vlog2.f32 %v3376_v20  ;;  %v3620_v47 = vmax.f32 %v16210_v19, 0.0001  ;;  %v11635_v14 = vmin.f32 %v4684_v18, -0.000100005 }
 0x235   : > { %16206 = vst [vmem:[#allocation153_spill] sm:$0xff] %v11609_v17  ;;  %v3405_v58 = vadd.f32 1.0, %v7299_v32  ;;  %v11647_v42 = vadd.f32 %v11416_v7, %v1201_v57  ;;  %v11652_v18 = vsel %vm11601_vm7, 1.0, %v15680_v60  ;;  %v11660_v59 = vsel %vm2596_vm10, 1.0, %v15680_v60 }
 0x236   : > { %16209 = vst [vmem:[#allocation154_spill] sm:$0xff] %v11631_v54  ;;  %v7301_v13 = vpop.eup %7300  ;;  %v3140_v32 = vmul.f32 1.442695, %v15558_v23  ;;  %v11669_v50 = vadd.f32 %v11416_v7, %v971_v62  ;;  %v11672_v57 = vmul.f32 %v11101_v15, %v5136_v48  ;;  %v11675_v3 = vmul.f32 %v11263_v21, %v5520_v30  ;;  %v1677_v48 = vpop.permute.xlu0 %1676 }
 0x237   : > { %16211 = vst [vmem:[#allocation24_spill] sm:$0xff] %v11635_v14  ;;  %v7303_v19 = vpop.eup %7302  ;;  %v4132_v31 = vsub.f32 0.0, %v16216_v46  ;;  %v11682_v14 = vadd.f32 %v11416_v7, %v1051_v38  ;;  %7310 = vrcp.f32 %v3376_v20  ;;  %v3748_v62 = vmin.f32 %v3620_v47, 0.9999 }
 0x238   : > { %16214 = vst [vmem:[#allocation155_spill] sm:$0xff] %v11672_v57  ;;  %v7305_v23 = vpop.eup %7304  ;;  %v11687_v15 = vsel %vm11641_vm11, 1.0, %v15680_v60  ;;  %v3571_v21 = vmax.f32 %v7303_v19, 0.0001  ;;  %7312 = vlog2.f32 %v3405_v58  ;;  %v11698_v20 = vsel %vm2586_vm1, 1.0, %v15680_v60 }
 0x239   : > { %16215 = vst [vmem:[#allocation156_spill] sm:$0xff] %v11675_v3  ;;  %v7307_v46 = vpop.eup %7306  ;;  %v16219_v30 = vsub.f32 0.0, %v11157_v0  ;;  %v3847_v38 = vmul.f32 0.6931472, %v7305_v23  ;;  %7314 = vpow2.f32 %v3140_v32  ;;  %v15561_v26 = vsub.f32 0.0, %v11669_v50 }
 0x23a   : > { %1354 = vst.msk [vmem:[%s7898_s10 + $0x380] sm:$0xff] %vm1241_vm9, %v11647_v42  ;;  %v7309_v5 = vpop.eup %7308  ;;  %v3699_v40 = vmin.f32 %v3571_v21, 0.9999  ;;  %v4260_v17 = vmax.f32 %v4132_v31, -9.2103405  ;;  %vm1945_vm14 = vcmp.eq.s32.totalorder %v1677_v48, %v7867_v24  ;;  %v16220_v11 = vsub.f32 0.0, %v11430_v4 }
 0x23b   : > { %16217 = vst [vmem:[#allocation67_spill] sm:$0xff] %v11687_v15  ;;  %v3202_v47 = vmul.f32 1.442695, %v16219_v30  ;;  %v4083_v61 = vsub.f32 0.0, %v3847_v38  ;;  %v3601_v56 = vmax.f32 %v7301_v13, 0.0001  ;;  %vm11719_vm0 = vmand %vm7869_vm4, %vm1945_vm14 }
 0x23c   : > { %1262 = vst.msk [vmem:[%s7898_s10 + $0xa0] sm:$0xff] %vm1241_vm9, %v11669_v50  ;;  %v4467_v3 = vsub.f32 %v16220_v11, %v3847_v38  ;;  %v3907_v30 = vmul.f32 0.6931472, %v7307_v46  ;;  %v4900_v23 = vsub.f32 1.0, %v3748_v62  ;;  %v4851_v57 = vsub.f32 1.0, %v3699_v40  ;;  %vm11730_vm12 = vmxor %vm1945_vm14, %vm7688_vm13  ;;  %v16230_v31 = vld [vmem:[#allocation12_spill] sm:$0xff] }
 0x23d   : > { %16218 = vst [vmem:[#allocation157_spill] sm:$0xff] %v11698_v20  ;;  %v11710_v53 = vmul.f32 0.6931472, %v7309_v5  ;;  %v6051_v20 = vadd.f32 %v10962_v9, %v6050_v55  ;;  %v4211_v19 = vmax.f32 %v4083_v61, -9.2103405  ;;  %v11713_v21 = vpop.eup %7310  ;;  %7316 = vpow2.f32 %v3202_v47  ;;  %vm2585_vm15 = vmand %vm7869_vm4, %vm11730_vm12 }
 0x23e   : > { %1294 = vst.msk [vmem:[%s7898_s10 + $0x1a0] sm:$0xff] %vm1241_vm9, %v11682_v14  ;;  %v4595_v32 = vmax.f32 %v4467_v3, -9.2103405  ;;  %v16223_v4 = vsub.f32 0.0, %v11218_v45  ;;  %v4979_v13 = vmul.f32 %v4851_v57, %v4851_v57  ;;  %v3080_v55 = vmul.f32 1.442695, %v15561_v26  ;;  %v7313_v46 = vpop.eup %7312  ;;  %v1719_v26 = vpop.permute.xlu2 %1718 }
 0x23f   : > { %7318 = vrcp.f32 %v3405_v58  ;;  %v4339_v38 = vmin.f32 %v4211_v19, -0.000100005  ;;  %v5363_v61 = vmul.f32 %v3699_v40, %v3699_v40  ;;  %v7315_v47 = vpop.eup %7314  ;;  %v3729_v9 = vmin.f32 %v3601_v56, 0.9999  ;;  %v16239_v3 = vld [vmem:[#allocation88_spill] sm:$0xff] }
 0x240   : > { %v3260_v11 = vmul.f32 1.442695, %v16223_v4  ;;  %v4723_v5 = vmin.f32 %v4595_v32, -0.000100005  ;;  %v4113_v54 = vsub.f32 0.0, %v3907_v30  ;;  %v5412_v4 = vmul.f32 %v3748_v62, %v3748_v62 }
 0x241   : > { %7320 = vpow2.f32 %v3080_v55  ;;  %v16226_v57 = vsub.f32 0.0, %v10987_v2  ;;  %v11739_v48 = vsel %vm11719_vm0, 1.0, %v15680_v60  ;;  %v5107_v19 = vmul.f32 %v4979_v13, %v4339_v38  ;;  %v1488_v38 = vld [vmem:[%s7742_s27 + $0x388] sm:$0xff] }
 0x242   : > { %16227 = vst [vmem:[#allocation158_spill] sm:$0xff] %v11739_v48  ;;  %v5491_v32 = vmul.f32 %v5363_v61, %v4723_v5  ;;  %v16228_v40 = vsub.f32 0.0, %v10942_v1  ;;  %v4388_v62 = vmin.f32 %v4260_v17, -0.000100005  ;;  %v5028_v6 = vmul.f32 %v4900_v23, %v4900_v23  ;;  %v1487_v5 = vld [vmem:[%s7742_s27 + $0x380] sm:$0xff]  ;;  %v1486_v61 = vld [vmem:[%s7742_s27 + $0x378] sm:$0xff]  ;;  %1844 = vperm.xlu2 %6900, %v1488_v38  }
 0x243   : > { %v4497_v58 = vsub.f32 %v16226_v57, %v3907_v30  ;;  %7322 = vpow2.f32 %v3260_v11  ;;  %v11748_v2 = vmul.f32 0.6931472, %v7313_v46  ;;  %v3346_v30 = vadd.f32 1.0, %v7315_v47  ;;  %v16231_v57 = vld [vmem:[#allocation59_spill] sm:$0xff]  ;;  %v7317_v1 = vpop.eup %7316  ;;  %1841 = vperm.xlu1 %6899, %v1487_v5   ;;  %1838 = vperm.xlu0 %6898, %v1486_v61  }
 0x244   : > { %v4528_v56 = vsub.f32 %v16228_v40, %v11710_v53  ;;  %v5235_v55 = vmul.f32 %v16230_v31, %v5107_v19  ;;  %v5619_v13 = vmul.f32 %v16231_v57, %v5491_v32  ;;  %v4241_v40 = vmax.f32 %v4113_v54, -9.2103405  ;;  %v16233_v47 = vld [vmem:[#allocation91_spill] sm:$0xff] }
 0x245   : > { %16229 = vst [vmem:[#allocation159_spill] sm:$0xff] %v11748_v2  ;;  %v4881_v17 = vsub.f32 1.0, %v3729_v9  ;;  %v6052_v23 = vadd.f32 %v11739_v48, %v6051_v20  ;;  %vm1959_vm6 = vcmp.eq.s32.totalorder %v1719_v26, %v7867_v24  ;;  %v11757_v11 = vpop.eup %7318  ;;  %v4625_v46 = vmax.f32 %v4497_v58, -9.2103405  ;;  %v16234_v20 = vld [vmem:[#allocation71_spill] sm:$0xff] }
 0x246   : > { %16232 = vst [vmem:[#allocation12_spill] sm:$0xff] %v11757_v11  ;;  %v3623_v37 = vmax.f32 %v16233_v47, 0.0001  ;;  %v11761_v19 = vadd.f32 %v11508_v10, %v5235_v55  ;;  %v11764_v32 = vadd.f32 %v11511_v51, %v5619_v13  ;;  %v4656_v31 = vmax.f32 %v4528_v56, -9.2103405  ;;  %vm11781_vm8 = vmxor %vm1959_vm6, %vm7688_vm13  ;;  %v1689_v47 = vpop.permute.xlu1 %1688 }
 0x247   : > { %v7321_v54 = vpop.eup %7320  ;;  %v5156_v57 = vmul.f32 %v5028_v6, %v4388_v62  ;;  %v5540_v48 = vmul.f32 %v5412_v4, %v16234_v20  ;;  %v11773_v58 = vsel %vm2585_vm15, 1.0, %v15680_v60  ;;  %v16236_v10 = vsub.f32 0.0, %v10950_v12  ;;  %vm2087_vm5 = vmand %vm7869_vm4, %vm1959_vm6 }
 0x248   : > { %16235 = vst [vmem:[#allocation59_spill] sm:$0xff] %v11773_v58  ;;  %v3377_v51 = vadd.f32 1.0, %v7317_v1  ;;  %7324 = vrcp.f32 %v3346_v30  ;;  %v3316_v13 = vadd.f32 1.0, %v7321_v54  ;;  %v4369_v56 = vmin.f32 %v4241_v40, -0.000100005  ;;  %vm2599_vm2 = vmand %vm7869_vm4, %vm11781_vm8 }
 0x249   : > { %v4557_v55 = vsub.f32 %v16236_v10, %v11748_v2  ;;  %v7323_v38 = vpop.eup %7322  ;;  %v5009_v6 = vmul.f32 %v4881_v17, %v4881_v17  ;;  %7326 = vlog2.f32 %v3346_v30  ;;  %v4135_v62 = vsub.f32 0.0, %v16239_v3 }
 0x24a   : > { %v4753_v5 = vmin.f32 %v4625_v46, -0.000100005  ;;  %v5393_v61 = vmul.f32 %v3729_v9, %v3729_v9  ;;  %v3751_v12 = vmin.f32 %v3623_v37, 0.9999  ;;  %7328 = vrcp.f32 %v3316_v13 }
 0x24b   : > { %v11787_v1 = vmul.f32 %v11660_v59, %v5540_v48  ;;  %v6053_v40 = vadd.f32 %v11687_v15, %v6052_v23  ;;  %v15565_v30 = vsub.f32 0.0, %v11419_v35  ;;  %7330 = vlog2.f32 %v3316_v13 }
 0x24c   : > { %v4685_v17 = vmax.f32 %v4557_v55, -9.2103405  ;;  %7332 = vlog2.f32 %v3377_v51  ;;  %v3406_v46 = vadd.f32 1.0, %v7323_v38  ;;  %v15566_v9 = vsub.f32 0.0, %v11459_v41 }
 0x24d   : > { %16240 = vst [vmem:[#allocation91_spill] sm:$0xff] %v11787_v1  ;;  %v5137_v37 = vmul.f32 %v5009_v6, %v4369_v56  ;;  %v11801_v59 = vmul.f32 %v11652_v18, %v5156_v57  ;;  %v4263_v26 = vmax.f32 %v4135_v62, -9.2103405  ;;  %vm1949_vm7 = vcmp.eq.s32.totalorder %v1689_v47, %v7867_v24  ;;  %v16250_v47 = vld [vmem:[#allocation92_spill] sm:$0xff] }
 0x24e   : > { %v7325_v48 = vpop.eup %7324  ;;  %v11804_v23 = vmin.f32 %v4656_v31, -0.000100005  ;;  %v5521_v54 = vmul.f32 %v5393_v61, %v4753_v5  ;;  %v11807_v20 = vsel %vm2087_vm5, 1.0, %v15680_v60  ;;  %v4903_v10 = vsub.f32 1.0, %v3751_v12  ;;  %v1686_v5 = vpop.permute.xlu0 %1685  ;;  %vm2077_vm10 = vmand %vm7869_vm4, %vm1949_vm7 }
 0x24f   : > { %16241 = vst [vmem:[#allocation71_spill] sm:$0xff] %v11801_v59  ;;  %v7327_v55 = vpop.eup %7326  ;;  %7334 = vrcp.f32 %v3377_v51  ;;  %v6761_v13 = vsel %vm2599_vm2, 1.0, %v15680_v60  ;;  %v11811_v38 = vadd.f32 %v11132_v43, %v6053_v40  ;;  %v3204_v57 = vmul.f32 1.442695, %v15565_v30  ;;  %vm11832_vm3 = vmxor %vm1949_vm7, %vm7688_vm13  ;;  %v1203_v59 = vpop.f32.mrf.mxu3  ;;  %v16294_v43 = vld [vmem:[#allocation45_spill] sm:$0xff] }
 0x250   : > { %v7329_v56 = vpop.eup %7328  ;;  %v11815_v6 = vmin.f32 %v4685_v17, -0.000100005  ;;  %7336 = vlog2.f32 %v3406_v46  ;;  %v5415_v31 = vmul.f32 %v3751_v12, %v3751_v12  ;;  %v3142_v4 = vmul.f32 1.442695, %v15566_v9  ;;  %vm2589_vm1 = vmand %vm7869_vm4, %vm11832_vm3 }
 0x251   : > { %v7331_v3 = vpop.eup %7330  ;;  %v11820_v62 = vmul.f32 %v11168_v33, %v5137_v37  ;;  %7338 = vrcp.f32 %v3406_v46  ;;  %v4391_v51 = vmin.f32 %v4263_v26, -0.000100005  ;;  %v3572_v61 = vmax.f32 %v7329_v56, 0.0001 }
 0x252   : > { %16242 = vst [vmem:[#allocation88_spill] sm:$0xff] %v11815_v6  ;;  %v7333_v40 = vpop.eup %7332  ;;  %v11823_v2 = vmul.f32 %v11197_v52, %v5521_v54  ;;  %v3602_v30 = vmax.f32 %v7325_v48, 0.0001  ;;  %v5031_v17 = vmul.f32 %v4903_v10, %v4903_v10  ;;  %v3849_v12 = vmul.f32 0.6931472, %v7331_v3 }
 0x253   : > { %16243 = vst [vmem:[#allocation160_spill] sm:$0xff] %v11820_v62  ;;  %v3909_v9 = vmul.f32 0.6931472, %v7327_v55  ;;  %7340 = vpow2.f32 %v3204_v57  ;;  %v3700_v46 = vmin.f32 %v3572_v61, 0.9999  ;;  %vm1948_vm11 = vcmp.eq.s32.totalorder %v1686_v5, %v7867_v24 }
 0x254   : > { %16244 = vst [vmem:[#allocation161_spill] sm:$0xff] %v11823_v2  ;;  %7342 = vpow2.f32 %v3142_v4  ;;  %v4084_v37 = vsub.f32 0.0, %v3849_v12  ;;  %v16247_v26 = vsub.f32 0.0, %v11669_v50  ;;  %v11842_v10 = vmul.f32 0.6931472, %v7333_v40  ;;  %vm11860_vm14 = vmand %vm7869_vm4, %vm1948_vm11 }
 0x255   : > { %v11840_v54 = vpop.eup %7334  ;;  %v5543_v55 = vmul.f32 %v5415_v31, %v16250_v47  ;;  %v11846_v56 = vsel %vm2077_vm10, 1.0, %v15680_v60  ;;  %v4852_v57 = vsub.f32 1.0, %v3700_v46  ;;  %v11848_v52 = vmin.f32 %v3602_v30, 0.9999  ;;  %vm11907_vm0 = vmxor %vm1948_vm11, %vm7688_vm13 }
 0x256   : > { %v4468_v48 = vsub.f32 %v16247_v26, %v3849_v12  ;;  %16248 = vst [vmem:[#allocation162_spill] sm:$0xff] %v11840_v54  ;;  %v7337_v3 = vpop.eup %7336  ;;  %v5159_v61 = vmul.f32 %v5031_v17, %v4391_v51  ;;  %v4212_v50 = vmax.f32 %v4084_v37, -9.2103405  ;;  %v1131_v12 = vpop.f32.mrf.mxu2  ;;  %v4114_v31 = vsub.f32 0.0, %v3909_v9  ;;  %vm2588_vm15 = vmand %vm7869_vm4, %vm11907_vm0 }
 0x257   : > { %16249 = vst [vmem:[#allocation163_spill] sm:$0xff] %v11842_v10  ;;  %v11854_v40 = vpop.eup %7338  ;;  %v16255_v51 = vsub.f32 0.0, %v11427_v27  ;;  %v4980_v26 = vmul.f32 %v4852_v57, %v4852_v57  ;;  %v11867_v37 = vadd.f32 %v11416_v7, %v1131_v12  ;;  %v5364_v1 = vmul.f32 %v3700_v46, %v3700_v46 }
 0x258   : > { %16251 = vst [vmem:[#allocation92_spill] sm:$0xff] %v11846_v56  ;;  %v4596_v4 = vmax.f32 %v4468_v48, -9.2103405  ;;  %v16256_v48 = vsub.f32 0.0, %v11188_v8  ;;  %v4340_v6 = vmin.f32 %v4212_v50, -0.000100005  ;;  %v11887_v8 = vadd.f32 %v11416_v7, %v1203_v59  ;;  %v973_v50 = vpop.f32.mrf.mxu0 }
 0x259   : > { %16252 = vst [vmem:[#allocation164_spill] sm:$0xff] %v11854_v40  ;;  %v3262_v17 = vmul.f32 1.442695, %v16255_v51  ;;  %v7341_v2 = vpop.eup %7340  ;;  %v11871_v62 = vmul.f32 0.6931472, %v7337_v3  ;;  %v11873_v40 = vmul.f32 %v6761_v13, %v5543_v55  ;;  %v11881_v57 = vsel %vm2589_vm1, 1.0, %v15680_v60 }
 0x25a   : > { %v4498_v47 = vsub.f32 %v16256_v48, %v3909_v9  ;;  %v4724_v11 = vmin.f32 %v4596_v4, -0.000100005  ;;  %16259 = vst [vmem:[#allocation167_spill] sm:$0xff] %v11881_v57  ;;  %v7343_v9 = vpop.eup %7342  ;;  %v16260_v46 = vsub.f32 0.0, %v11157_v0  ;;  %v11895_v55 = vsel %vm11860_vm14, 1.0, %v15680_v60  ;;  %v1728_v0 = vpop.permute.xlu2 %1727  ;;  %v16266_v51 = vld [vmem:[#allocation39_spill] sm:$0xff] }
 0x25b   : > { %16257 = vst [vmem:[#allocation165_spill] sm:$0xff] %v11871_v62  ;;  %v5108_v33 = vmul.f32 %v4980_v26, %v4340_v6  ;;  %v4242_v4 = vmax.f32 %v4114_v31, -9.2103405  ;;  %v4882_v12 = vsub.f32 1.0, %v11848_v52  ;;  %v11899_v59 = vmul.f32 %v11807_v20, %v5159_v61  ;;  %v16265_v6 = vld [vmem:[#allocation14_spill] sm:$0xff]  ;;  %v1053_v26 = vpop.f32.mrf.mxu1 }
 0x25c   : > { %16258 = vst [vmem:[#allocation166_spill] sm:$0xff] %v11873_v40  ;;  %v4529_v13 = vsub.f32 %v16260_v46, %v11842_v10  ;;  %v5492_v3 = vmul.f32 %v5364_v1, %v4724_v11  ;;  %7344 = vpow2.f32 %v3262_v17  ;;  %v4626_v30 = vmax.f32 %v4498_v47, -9.2103405  ;;  %v1491_v40 = vld [vmem:[%s7742_s27 + $0x3a0] sm:$0xff] }
 0x25d   : > { %1326 = vst.msk [vmem:[%s7898_s10 + $0x2a0] sm:$0xff] %vm1241_vm9, %v11867_v37  ;;  %v3378_v1 = vadd.f32 1.0, %v7341_v2  ;;  %v5236_v31 = vmul.f32 %v16265_v6, %v5108_v33  ;;  %v16267_v17 = vsub.f32 0.0, %v11218_v45  ;;  %v6055_v47 = vadd.f32 %v11895_v55, %v11811_v38  ;;  %v1489_v2 = vld [vmem:[%s7742_s27 + $0x390] sm:$0xff]  ;;  %1853 = vperm.xlu2 %6900, %v1491_v40  }
 0x25e   : > { %16261 = vst [vmem:[#allocation168_spill] sm:$0xff] %v11895_v55  ;;  %v5620_v61 = vmul.f32 %v16266_v51, %v5492_v3  ;;  %v3347_v46 = vadd.f32 1.0, %v7343_v9  ;;  %v11919_v5 = vadd.f32 %v11416_v7, %v973_v50  ;;  %vm1962_vm12 = vcmp.eq.s32.totalorder %v1728_v0, %v7867_v24  ;;  %v1698_v50 = vpop.permute.xlu1 %1697  ;;  %1847 = vperm.xlu0 %6898, %v1489_v2   ;;  %v16273_v51 = vld [vmem:[#allocation42_spill] sm:$0xff] }
 0x25f   : > { %16262 = vst [vmem:[#allocation169_spill] sm:$0xff] %v11899_v59  ;;  %v4558_v48 = vsub.f32 %v16267_v17, %v11871_v62  ;;  %v1490_v59 = vld [vmem:[%s7742_s27 + $0x398] sm:$0xff]  ;;  %v3626_v33 = vmax.f32 %v10500_v16, 0.0001  ;;  %v11927_v3 = vadd.f32 %v11761_v19, %v5236_v31  ;;  %v4657_v38 = vmax.f32 %v4529_v13, -9.2103405  ;;  %vm11948_vm6 = vmxor %vm1962_vm12, %vm7688_vm13 }
 0x260   : > { %1355 = vst.msk [vmem:[%s7898_s10 + $0x388] sm:$0xff] %vm1241_vm9, %v11887_v8  ;;  %v11930_v45 = vadd.f32 %v11764_v32, %v5620_v61  ;;  %1850 = vperm.xlu1 %6899, %v1490_v59   ;;  %v5394_v9 = vmul.f32 %v11848_v52, %v11848_v52  ;;  %v15567_v6 = vsub.f32 0.0, %v11919_v5  ;;  %v11939_v16 = vadd.f32 %v11416_v7, %v1053_v26  ;;  %vm11967_vm5 = vmand %vm7869_vm4, %vm1962_vm12  ;;  %v1695_v26 = vpop.permute.xlu0 %1694 }
 0x261   : > { %1263 = vst.msk [vmem:[%s7898_s10 + $0xa8] sm:$0xff] %vm1241_vm9, %v11919_v5  ;;  %v4370_v19 = vmin.f32 %v4242_v4, -0.000100005  ;;  %v4754_v32 = vmin.f32 %v4626_v30, -0.000100005  ;;  %v5010_v31 = vmul.f32 %v4882_v12, %v4882_v12  ;;  %7346 = vlog2.f32 %v3378_v1  ;;  %vm2602_vm2 = vmand %vm7869_vm4, %vm11948_vm6 }
 0x262   : > { %v7345_v52 = vpop.eup %7344  ;;  %7348 = vrcp.f32 %v3347_v46  ;;  %v4138_v13 = vsub.f32 0.0, %v10495_v39  ;;  %v15568_v4 = vsub.f32 0.0, %v11566_v29  ;;  %v3082_v12 = vmul.f32 1.442695, %v15567_v6  ;;  %1295 = vst.msk [vmem:[%s7898_s10 + $0x1a8] sm:$0xff] %vm1241_vm9, %v11939_v16 }
 0x263   : > { %v4686_v59 = vmax.f32 %v4558_v48, -9.2103405  ;;  %7350 = vlog2.f32 %v3347_v46  ;;  %v3754_v30 = vmin.f32 %v3626_v33, 0.9999  ;;  %vm1952_vm8 = vcmp.eq.s32.totalorder %v1698_v50, %v7867_v24 }
 0x264   : > { %v11961_v11 = vsel %vm2588_vm15, 1.0, %v15680_v60  ;;  %v3616_v61 = vmax.f32 %v16273_v51, 0.0001  ;;  %v15569_v17 = vsub.f32 0.0, %v11647_v42  ;;  %7352 = vpow2.f32 %v3082_v12  ;;  %vm11983_vm7 = vmxor %vm1952_vm8, %vm7688_vm13 }
 0x265   : > { %16270 = vst [vmem:[#allocation14_spill] sm:$0xff] %v11961_v11  ;;  %v11973_v48 = vmin.f32 %v4657_v38, -0.000100005  ;;  %v5138_v46 = vmul.f32 %v5010_v31, %v4370_v19  ;;  %v5522_v2 = vmul.f32 %v5394_v9, %v4754_v32  ;;  %v3407_v33 = vadd.f32 1.0, %v7345_v52  ;;  %v16277_v38 = vld [vmem:[#allocation37_spill] sm:$0xff]  ;;  %vm12002_vm3 = vmand %vm7869_vm4, %vm1952_vm8 }
 0x266   : > { %v6056_v0 = vadd.f32 %v11846_v56, %v6055_v47  ;;  %v4266_v6 = vmax.f32 %v4138_v13, -9.2103405  ;;  %v4128_v12 = vsub.f32 0.0, %v16277_v38  ;;  %v3206_v9 = vmul.f32 1.442695, %v15568_v4  ;;  %vm2592_vm11 = vmand %vm7869_vm4, %vm11983_vm7 }
 0x267   : > { %16274 = vst [vmem:[#allocation39_spill] sm:$0xff] %v11973_v48  ;;  %v7347_v19 = vpop.eup %7346  ;;  %v11990_v32 = vmin.f32 %v4686_v59, -0.000100005  ;;  %v4906_v31 = vsub.f32 1.0, %v3754_v30  ;;  %v5418_v52 = vmul.f32 %v3754_v30, %v3754_v30  ;;  %vm1951_vm10 = vcmp.eq.s32.totalorder %v1695_v26, %v7867_v24 }
 0x268   : > { %v7349_v47 = vpop.eup %7348  ;;  %7354 = vrcp.f32 %v3378_v1  ;;  %v11996_v13 = vsel %vm11967_vm5, 1.0, %v15680_v60  ;;  %v3744_v59 = vmin.f32 %v3616_v61, 0.9999  ;;  %v3264_v30 = vmul.f32 1.442695, %v15569_v17  ;;  %vm12028_vm1 = vmand %vm7869_vm4, %vm1951_vm10 }
 0x269   : > { %16278 = vst [vmem:[#allocation42_spill] sm:$0xff] %v11990_v32  ;;  %v7351_v4 = vpop.eup %7350  ;;  %v12009_v1 = vmul.f32 %v10473_v28, %v5138_v46  ;;  %v16282_v32 = vld [vmem:[#allocation7_spill] sm:$0xff]  ;;  %7356 = vlog2.f32 %v3407_v33  ;;  %v6764_v50 = vsel %vm2602_vm2, 1.0, %v15680_v60  ;;  %v4394_v17 = vmin.f32 %v4266_v6, -0.000100005  ;;  %vm12037_vm14 = vmxor %vm1951_vm10, %vm7688_vm13 }
 0x26a   : > { %v12012_v39 = vmul.f32 %v16282_v32, %v5522_v2  ;;  %v7353_v61 = vpop.eup %7352  ;;  %v4256_v28 = vmax.f32 %v4128_v12, -9.2103405  ;;  %7358 = vpow2.f32 %v3206_v9  ;;  %v15575_v40 = vsub.f32 0.0, %v11682_v14  ;;  %v16286_v32 = vld [vmem:[#allocation112_spill] sm:$0xff]  ;;  %vm2591_vm0 = vmand %vm7869_vm4, %vm12037_vm14 }
 0x26b   : > { %16281 = vst [vmem:[#allocation37_spill] sm:$0xff] %v12009_v1  ;;  %v5034_v2 = vmul.f32 %v4906_v31, %v4906_v31  ;;  %v4896_v1 = vsub.f32 1.0, %v3744_v59  ;;  %v3317_v12 = vadd.f32 1.0, %v7353_v61  ;;  %v12041_v62 = vmul.f32 0.6931472, %v7347_v19  ;;  %v16290_v19 = vld [vmem:[#allocation137_spill] sm:$0xff] }
 0x26c   : > { %16283 = vst [vmem:[#allocation7_spill] sm:$0xff] %v12012_v39  ;;  %v5546_v39 = vmul.f32 %v5418_v52, %v16286_v32  ;;  %v3603_v57 = vmax.f32 %v7349_v47, 0.0001  ;;  %v5408_v56 = vmul.f32 %v3744_v59, %v3744_v59  ;;  %7360 = vpow2.f32 %v3264_v30 }
 0x26d   : > { %16289 = vst [vmem:[#allocation112_spill] sm:$0xff] %v12041_v62  ;;  %v3911_v9 = vmul.f32 0.6931472, %v7351_v4  ;;  %v12046_v31 = vsel %vm12002_vm3, 1.0, %v15680_v60  ;;  %v6754_v26 = vsel %vm2592_vm11, 1.0, %v15680_v60  ;;  %7362 = vrcp.f32 %v3317_v12 }
 0x26e   : > { %v12054_v52 = vpop.eup %7354  ;;  %v6057_v47 = vadd.f32 %v16290_v19, %v6056_v0  ;;  %v12060_v4 = vsel %vm12028_vm1, 1.0, %v15680_v60  ;;  %v3144_v51 = vmul.f32 1.442695, %v15575_v40  ;;  %7364 = vlog2.f32 %v3317_v12  ;;  %v976_v0 = vpop.f32.mrf.mxu0 }
 0x26f   : > { %16291 = vst [vmem:[#allocation170_spill] sm:$0xff] %v12060_v4  ;;  %v7357_v38 = vpop.eup %7356  ;;  %7366 = vrcp.f32 %v3407_v33  ;;  %v5162_v59 = vmul.f32 %v5034_v2, %v4394_v17  ;;  %v4384_v30 = vmin.f32 %v4256_v28, -0.000100005  ;;  %v5024_v61 = vmul.f32 %v4896_v1, %v4896_v1  ;;  %v1133_v40 = vpop.f32.mrf.mxu2 }
 0x270   : > { %v7359_v32 = vpop.eup %7358  ;;  %v16292_v46 = vsub.f32 0.0, %v11419_v35  ;;  %v12073_v11 = vmin.f32 %v3603_v57, 0.9999  ;;  %v12075_v55 = vmul.f32 %v6764_v50, %v5546_v39  ;;  %v5536_v15 = vmul.f32 %v5408_v56, %v16294_v43  ;;  %v1206_v33 = vpop.f32.mrf.mxu3 }
 0x271   : > { %v4115_v12 = vsub.f32 0.0, %v3911_v9  ;;  %v12084_v17 = vsel %vm2591_vm0, 1.0, %v15680_v60  ;;  %v6058_v35 = vadd.f32 %v12060_v4, %v6057_v47  ;;  %v12088_v57 = vadd.f32 %v11416_v7, %v1133_v40  ;;  %v1056_v50 = vpop.f32.mrf.mxu1  ;;  %v1707_v4 = vpop.permute.xlu1 %1706 }
 0x272   : > { %v12071_v19 = vsub.f32 %v16292_v46, %v12041_v62  ;;  %16293 = vst [vmem:[#allocation171_spill] sm:$0xff] %v12075_v55  ;;  %v7361_v1 = vpop.eup %7360  ;;  %v12090_v39 = vmul.f32 0.6931472, %v7357_v38  ;;  %7368 = vpow2.f32 %v3144_v51  ;;  %v12093_v43 = vadd.f32 %v11416_v7, %v1206_v33  ;;  %v1737_v55 = vpop.permute.xlu2 %1736 }
 0x273   : > { %16295 = vst [vmem:[#allocation45_spill] sm:$0xff] %v12084_v17  ;;  %v12096_v56 = vadd.f32 %v11416_v7, %v976_v0  ;;  %v7363_v28 = vpop.eup %7362  ;;  %v12099_v2 = vmul.f32 %v11996_v13, %v5162_v59  ;;  %v5152_v40 = vmul.f32 %v5024_v61, %v4384_v30  ;;  %v12101_v6 = vmul.f32 %v6754_v26, %v5536_v15 }
 0x274   : > { %16296 = vst [vmem:[#allocation172_spill] sm:$0xff] %v12090_v39  ;;  %v12103_v47 = vadd.f32 1.0, %v7359_v32  ;;  %v7365_v51 = vpop.eup %7364  ;;  %v16299_v0 = vsub.f32 0.0, %v11459_v41  ;;  %v4883_v33 = vsub.f32 1.0, %v12073_v11  ;;  %v3573_v59 = vmax.f32 %v7363_v28, 0.0001 }
 0x275   : > { %16297 = vst [vmem:[#allocation173_spill] sm:$0xff] %v12099_v2  ;;  %v12115_v15 = vpop.eup %7366  ;;  %v4243_v26 = vmax.f32 %v4115_v12, -9.2103405  ;;  %v12117_v30 = vadd.f32 1.0, %v7361_v1  ;;  %v3851_v61 = vmul.f32 0.6931472, %v7365_v51  ;;  %v12123_v41 = vadd.f32 %v11416_v7, %v1056_v50 }
 0x276   : > { %16298 = vst [vmem:[#allocation174_spill] sm:$0xff] %v12101_v6  ;;  %v4499_v46 = vsub.f32 %v16299_v0, %v3911_v9  ;;  %v16301_v9 = vsub.f32 0.0, %v11427_v27  ;;  %v12131_v28 = vadd.f32 %v12046_v31, %v6058_v35  ;;  %v16302_v0 = vld [vmem:[#allocation136_spill] sm:$0xff]  ;;  %v3701_v12 = vmin.f32 %v3573_v59, 0.9999 }
 0x277   : > { %1327 = vst.msk [vmem:[%s7898_s10 + $0x2a8] sm:$0xff] %vm1241_vm9, %v12088_v57  ;;  %v3629_v38 = vmax.f32 %v16302_v0, 0.0001  ;;  %7370 = vlog2.f32 %v12103_v47  ;;  %vm1965_vm12 = vcmp.eq.s32.totalorder %v1737_v55, %v7867_v24  ;;  %v4085_v1 = vsub.f32 0.0, %v3851_v61  ;;  %v16304_v6 = vld [vmem:[#allocation132_spill] sm:$0xff] }
 0x278   : > { %1356 = vst.msk [vmem:[%s7898_s10 + $0x390] sm:$0xff] %vm1241_vm9, %v12093_v43  ;;  %v12128_v32 = vsub.f32 %v16301_v9, %v12090_v39  ;;  %v16303_v51 = vsub.f32 0.0, %v11919_v5  ;;  %v7369_v27 = vpop.eup %7368  ;;  %v4627_v50 = vmax.f32 %v4499_v46, -9.2103405  ;;  %v5011_v9 = vmul.f32 %v4883_v33, %v4883_v33  ;;  %v16305_v5 = vld [vmem:[#allocation63_spill] sm:$0xff]  ;;  %vm12160_vm6 = vmxor %vm1965_vm12, %vm7688_vm13 }
 0x279   : > { %16300 = vst [vmem:[#allocation175_spill] sm:$0xff] %v12115_v15  ;;  %v4853_v39 = vsub.f32 1.0, %v3701_v12  ;;  %v4371_v15 = vmin.f32 %v4243_v26, -0.000100005  ;;  %7372 = vlog2.f32 %v12117_v30  ;;  %v4213_v59 = vmax.f32 %v4085_v1, -9.2103405  ;;  %vm12169_vm8 = vmand %vm7869_vm4, %vm1965_vm12 }
 0x27a   : > { %1264 = vst.msk [vmem:[%s7898_s10 + $0xb0] sm:$0xff] %vm1241_vm9, %v12096_v56  ;;  %v4469_v7 = vsub.f32 %v16303_v51, %v3851_v61  ;;  %v3757_v2 = vmin.f32 %v3629_v38, 0.9999  ;;  %v4141_v17 = vsub.f32 0.0, %v16304_v6  ;;  %v3619_v61 = vmax.f32 %v16305_v5, 0.0001  ;;  %vm2605_vm2 = vmand %vm7869_vm4, %vm12160_vm6 }
 0x27b   : > { %1296 = vst.msk [vmem:[%s7898_s10 + $0x1b0] sm:$0xff] %vm1241_vm9, %v12123_v41  ;;  %v4981_v51 = vmul.f32 %v4853_v39, %v4853_v39  ;;  %v3348_v58 = vadd.f32 1.0, %v7369_v27  ;;  %v4341_v46 = vmin.f32 %v4213_v59, -0.000100005  ;;  %v5365_v48 = vmul.f32 %v3701_v12, %v3701_v12  ;;  %v16307_v1 = vld [vmem:[#allocation55_spill] sm:$0xff]  ;;  %v1494_v12 = vld [vmem:[%s7742_s27 + $0x3b8] sm:$0xff] }
 0x27c   : > { %v4597_v0 = vmax.f32 %v4469_v7, -9.2103405  ;;  %v4687_v35 = vmax.f32 %v12128_v32, -9.2103405  ;;  %v12147_v26 = vmul.f32 %v12046_v31, %v5152_v40  ;;  %v4131_v7 = vsub.f32 0.0, %v16307_v1  ;;  %v1493_v59 = vld [vmem:[%s7742_s27 + $0x3b0] sm:$0xff]  ;;  %1862 = vperm.xlu2 %6900, %v1494_v12  }
 0x27d   : > { %v16308_v38 = vsub.f32 0.0, %v12096_v56  ;;  %v7371_v10 = vpop.eup %7370  ;;  %v5395_v5 = vmul.f32 %v12073_v11, %v12073_v11  ;;  %vm1955_vm15 = vcmp.eq.s32.totalorder %v1707_v4, %v7867_v24  ;;  %v5109_v39 = vmul.f32 %v4981_v51, %v4341_v46  ;;  %1859 = vperm.xlu1 %6899, %v1493_v59   ;;  %v1492_v11 = vld [vmem:[%s7742_s27 + $0x3a8] sm:$0xff]  ;;  %v16314_v46 = vld [vmem:[#allocation70_spill] sm:$0xff] }
 0x27e   : > { %v4725_v33 = vmin.f32 %v4597_v0, -0.000100005  ;;  %16306 = vst [vmem:[#allocation136_spill] sm:$0xff] %v12147_v26  ;;  %v4755_v32 = vmin.f32 %v4627_v50, -0.000100005  ;;  %v5139_v0 = vmul.f32 %v5011_v9, %v4371_v15  ;;  %v4909_v1 = vsub.f32 1.0, %v3757_v2  ;;  %v1704_v50 = vpop.permute.xlu0 %1703  ;;  %1856 = vperm.xlu0 %6898, %v1492_v11   ;;  %vm12180_vm5 = vmxor %vm1955_vm15, %vm7688_vm13 }
 0x27f   : > { %v3084_v6 = vmul.f32 1.442695, %v16308_v38  ;;  %v4269_v40 = vmax.f32 %v4141_v17, -9.2103405  ;;  %v7373_v38 = vpop.eup %7372  ;;  %7374 = vrcp.f32 %v3348_v58  ;;  %v3747_v15 = vmin.f32 %v3619_v61, 0.9999  ;;  %vm12204_vm7 = vmand %vm7869_vm4, %vm1955_vm15 }
 0x280   : > { %v5493_v27 = vmul.f32 %v5365_v48, %v4725_v33  ;;  %v16313_v9 = vld [vmem:[#allocation17_spill] sm:$0xff]  ;;  %v12175_v33 = vmul.f32 0.6931472, %v7371_v10  ;;  %v5421_v12 = vmul.f32 %v3757_v2, %v3757_v2  ;;  %v4259_v59 = vmax.f32 %v4131_v7, -9.2103405  ;;  %vm2595_vm3 = vmand %vm7869_vm4, %vm12180_vm5 }
 0x281   : > { %v5237_v51 = vmul.f32 %v16313_v9, %v5109_v39  ;;  %7376 = vpow2.f32 %v3084_v6  ;;  %v4899_v61 = vsub.f32 1.0, %v3747_v15  ;;  %v16317_v39 = vmax.f32 %v12071_v19, -9.2103405  ;;  %v16327_v9 = vld [vmem:[#allocation149_spill] sm:$0xff] }
 0x282   : > { %v5621_v17 = vmul.f32 %v16314_v46, %v5493_v27  ;;  %7378 = vlog2.f32 %v3348_v58  ;;  %v12198_v11 = vmin.f32 %v4687_v35, -0.000100005  ;;  %v5523_v7 = vmul.f32 %v5395_v5, %v4755_v32  ;;  %v16324_v32 = vld [vmem:[#allocation143_spill] sm:$0xff] }
 0x283   : > { %v12189_v10 = vadd.f32 %v11927_v3, %v5237_v51  ;;  %v12196_v27 = vmin.f32 %v16317_v39, -0.000100005  ;;  %vm1954_vm10 = vcmp.eq.s32.totalorder %v1704_v50, %v7867_v24  ;;  %7380 = vrcp.f32 %v12103_v47  ;;  %v16332_v39 = vld [vmem:[#allocation53_spill] sm:$0xff] }
 0x284   : > { %v12192_v2 = vadd.f32 %v11930_v45, %v5621_v17  ;;  %16319 = vst [vmem:[#allocation63_spill] sm:$0xff] %v12198_v11  ;;  %v12210_v3 = vmul.f32 0.6931472, %v7373_v38  ;;  %v4397_v45 = vmin.f32 %v4269_v40, -0.000100005  ;;  %v5037_v19 = vmul.f32 %v4909_v1, %v4909_v1  ;;  %vm2082_vm11 = vmand %vm7869_vm4, %vm1954_vm10 }
 0x285   : > { %16318 = vst [vmem:[#allocation132_spill] sm:$0xff] %v12196_v27  ;;  %v16323_v4 = vsub.f32 0.0, %v11566_v29  ;;  %7382 = vrcp.f32 %v12117_v30  ;;  %v12223_v6 = vsel %vm12169_vm8, 1.0, %v15680_v60  ;;  %v6767_v47 = vsel %vm2605_vm2, 1.0, %v15680_v60  ;;  %v7375_v5 = vpop.eup %7374  ;;  %v16326_v29 = vld [vmem:[#allocation142_spill] sm:$0xff]  ;;  %vm12251_vm1 = vmxor %vm1954_vm10, %vm7688_vm13  ;;  %v16345_v27 = vld [vmem:[#allocation28_spill] sm:$0xff] }
 0x286   : > { %16322 = vst [vmem:[#allocation55_spill] sm:$0xff] %v12210_v3  ;;  %v12232_v40 = vmul.f32 %v16324_v32, %v5139_v0  ;;  %v5549_v1 = vmul.f32 %v5421_v12, %v16326_v29  ;;  %v4387_v38 = vmin.f32 %v4259_v59, -0.000100005  ;;  %v5027_v30 = vmul.f32 %v4899_v61, %v4899_v61  ;;  %vm2594_vm14 = vmand %vm7869_vm4, %vm12251_vm1  ;;  %v1713_v62 = vpop.permute.xlu0 %1712 }
 0x287   : > { %v4531_v35 = vsub.f32 %v16323_v4, %v12175_v33  ;;  %v7377_v48 = vpop.eup %7376  ;;  %v12240_v51 = vmul.f32 %v16327_v9, %v5523_v7  ;;  %v12245_v31 = vsel %vm12204_vm7, 1.0, %v15680_v60  ;;  %v6757_v0 = vsel %vm2595_vm3, 1.0, %v15680_v60 }
 0x288   : > { %16325 = vst [vmem:[#allocation17_spill] sm:$0xff] %v12232_v40  ;;  %v5411_v46 = vmul.f32 %v3747_v15, %v3747_v15  ;;  %v7379_v12 = vpop.eup %7378  ;;  %v16331_v55 = vsub.f32 0.0, %v11647_v42  ;;  %v5165_v61 = vmul.f32 %v5037_v19, %v4397_v45  ;;  %v3618_v7 = vmax.f32 %v16332_v39, 0.0001  ;;  %v16334_v42 = vld [vmem:[#allocation51_spill] sm:$0xff] }
 0x289   : > { %16328 = vst [vmem:[#allocation70_spill] sm:$0xff] %v12240_v51  ;;  %v3318_v58 = vadd.f32 1.0, %v7377_v48  ;;  %v4659_v4 = vmax.f32 %v4531_v35, -9.2103405  ;;  %v6060_v15 = vadd.f32 %v11424_v36, %v12131_v28  ;;  %v12262_v32 = vsel %vm2082_vm11, 1.0, %v15680_v60  ;;  %v12265_v29 = vpop.eup %7380  ;;  %v1136_v48 = vpop.f32.mrf.mxu2 }
 0x28a   : > { %v4560_v59 = vsub.f32 %v16331_v55, %v12210_v3  ;;  %v15579_v50 = vsub.f32 0.0, %v11867_v37  ;;  %v12267_v9 = vmul.f32 %v6767_v47, %v5549_v1  ;;  %v5155_v11 = vmul.f32 %v5027_v30, %v4387_v38  ;;  %v16337_v1 = vld [vmem:[#allocation16_spill] sm:$0xff] }
 0x28b   : > { %v4130_v45 = vsub.f32 0.0, %v16334_v42  ;;  %7384 = vrcp.f32 %v3318_v58  ;;  %v12274_v19 = vpop.eup %7382  ;;  %v3604_v36 = vmax.f32 %v7375_v5, 0.0001  ;;  %v3913_v28 = vmul.f32 0.6931472, %v7379_v12 }
 0x28c   : > { %16333 = vst [vmem:[#allocation143_spill] sm:$0xff] %v12267_v9  ;;  %v15581_v35 = vsub.f32 0.0, %v11887_v8  ;;  %7386 = vlog2.f32 %v3318_v58  ;;  %v4688_v55 = vmax.f32 %v4560_v59, -9.2103405  ;;  %v12278_v47 = vmul.f32 %v12223_v6, %v5165_v61  ;;  %v978_v58 = vpop.f32.mrf.mxu0 }
 0x28d   : > { %16335 = vst [vmem:[#allocation142_spill] sm:$0xff] %v12274_v19  ;;  %v5539_v38 = vmul.f32 %v5411_v46, %v16337_v1  ;;  %v3746_v30 = vmin.f32 %v3618_v7, 0.9999  ;;  %v12281_v17 = vmin.f32 %v4659_v4, -0.000100005  ;;  %v12284_v39 = vsel %vm2594_vm14, 1.0, %v15680_v60  ;;  %v1208_v4 = vpop.f32.mrf.mxu3 }
 0x28e   : > { %16336 = vst [vmem:[#allocation149_spill] sm:$0xff] %v12278_v47  ;;  %v3208_v5 = vmul.f32 1.442695, %v15579_v50  ;;  %v12290_v59 = vmul.f32 %v12245_v31, %v5155_v11  ;;  %v4258_v61 = vmax.f32 %v4130_v45, -9.2103405  ;;  %v4116_v50 = vsub.f32 0.0, %v3913_v28 }
 0x28f   : > { %v4898_v42 = vsub.f32 1.0, %v3746_v30  ;;  %v12295_v46 = vld [vmem:[%s15432_s2] ss:$0 sm:$0xff]  ;;  %v3732_v1 = vmin.f32 %v3604_v36, 0.9999  ;;  %v5410_v19 = vmul.f32 %v3746_v30, %v3746_v30  ;;  %v6061_v9 = vadd.f32 %v12262_v32, %v6060_v15 }
 0x290   : > { %16338 = vst [vmem:[#allocation53_spill] sm:$0xff] %v12290_v59  ;;  %v12298_v7 = vadd.f32 %v12295_v46, %v1136_v48  ;;  %v3266_v12 = vmul.f32 1.442695, %v15581_v35  ;;  %v12303_v11 = vadd.f32 %v12295_v46, %v1208_v4  ;;  %v12305_v3 = vmin.f32 %v4688_v55, -0.000100005 }
 0x291   : > { %v7385_v45 = vpop.eup %7384  ;;  %v12312_v48 = vadd.f32 %v12295_v46, %v978_v58  ;;  %v16340_v47 = vsub.f32 0.0, %v11682_v14  ;;  %7388 = vpow2.f32 %v3208_v5  ;;  %v16341_v4 = vsub.f32 0.0, %v11939_v16 }
 0x292   : > { %16339 = vst [vmem:[#allocation51_spill] sm:$0xff] %v12305_v3  ;;  %v7387_v36 = vpop.eup %7386  ;;  %v3574_v26 = vmax.f32 %v7385_v45, 0.0001  ;;  %v12321_v55 = vmul.f32 %v6757_v0, %v5539_v38  ;;  %v4386_v15 = vmin.f32 %v4258_v61, -0.000100005  ;;  %v5026_v30 = vmul.f32 %v4898_v42, %v4898_v42  ;;  %v1746_v45 = vpop.permute.xlu2 %1745 }
 0x293   : > { %1328 = vst.msk [vmem:[%s7898_s10 + $0x2b0] sm:$0xff] %vm1241_vm9, %v12298_v7  ;;  %v4500_v35 = vsub.f32 %v16340_v47, %v3913_v28  ;;  %v3146_v59 = vmul.f32 1.442695, %v16341_v4  ;;  %v3853_v3 = vmul.f32 0.6931472, %v7387_v36  ;;  %v4884_v51 = vsub.f32 1.0, %v3732_v1 }
 0x294   : > { %1357 = vst.msk [vmem:[%s7898_s10 + $0x398] sm:$0xff] %vm1241_vm9, %v12303_v11  ;;  %v4244_v58 = vmax.f32 %v4116_v50, -9.2103405  ;;  %7390 = vpow2.f32 %v3266_v12  ;;  %v3702_v14 = vmin.f32 %v3574_v26, 0.9999  ;;  %v16343_v28 = vld [vmem:[#allocation60_spill] sm:$0xff]  ;;  %v12328_v5 = vadd.f32 %v12245_v31, %v6061_v9  ;;  %v1716_v9 = vpop.permute.xlu1 %1715 }
 0x295   : > { %16342 = vst [vmem:[#allocation16_spill] sm:$0xff] %v12321_v55  ;;  %v5538_v47 = vmul.f32 %v5410_v19, %v16343_v28  ;;  %v4086_v4 = vsub.f32 0.0, %v3853_v3  ;;  %v16344_v0 = vsub.f32 0.0, %v12096_v56  ;;  %v4628_v61 = vmax.f32 %v4500_v35, -9.2103405 }
 0x296   : > { %1265 = vst.msk [vmem:[%s7898_s10 + $0xb8] sm:$0xff] %vm1241_vm9, %v12312_v48  ;;  %7392 = vpow2.f32 %v3146_v59  ;;  %v3632_v42 = vmax.f32 %v11713_v21, 0.0001  ;;  %v4854_v36 = vsub.f32 1.0, %v3702_v14  ;;  %v5154_v55 = vmul.f32 %v5026_v30, %v4386_v15 }
 0x297   : > { %v4470_v38 = vsub.f32 %v16344_v0, %v3853_v3  ;;  %v4214_v50 = vmax.f32 %v4086_v4, -9.2103405  ;;  %v7389_v12 = vpop.eup %7388  ;;  %v4372_v19 = vmin.f32 %v4244_v58, -0.000100005  ;;  %v5012_v28 = vmul.f32 %v4884_v51, %v4884_v51  ;;  %v1058_v0 = vpop.f32.mrf.mxu1 }
 0x298   : > { %vm1968_vm0 = vcmp.eq.s32.totalorder %v1746_v45, %v7867_v24  ;;  %v4982_v31 = vmul.f32 %v4854_v36, %v4854_v36  ;;  %v3622_v56 = vmax.f32 %v16345_v27, 0.0001  ;;  %v5366_v59 = vmul.f32 %v3702_v14, %v3702_v14 }
 0x299   : > { %v4598_v40 = vmax.f32 %v4470_v38, -9.2103405  ;;  %v4342_v3 = vmin.f32 %v4214_v50, -0.000100005  ;;  %v4756_v15 = vmin.f32 %v4628_v61, -0.000100005  ;;  %v5396_v30 = vmul.f32 %v3732_v1, %v3732_v1  ;;  %vm12342_vm12 = vmxor %vm1968_vm0, %vm7688_vm13 }
 0x29a   : > { %v7391_v21 = vpop.eup %7390  ;;  %v3760_v4 = vmin.f32 %v3632_v42, 0.9999  ;;  %v4144_v38 = vsub.f32 0.0, %v11710_v53  ;;  %v3380_v58 = vadd.f32 1.0, %v7389_v12  ;;  %v16346_v36 = vsub.f32 0.0, %v12312_v48  ;;  %v16349_v1 = vld [vmem:[#allocation77_spill] sm:$0xff]  ;;  %vm12362_vm6 = vmand %vm7869_vm4, %vm1968_vm0 }
 0x29b   : > { %v4726_v35 = vmin.f32 %v4598_v40, -0.000100005  ;;  %v5110_v51 = vmul.f32 %v4982_v31, %v4342_v3  ;;  %v5140_v50 = vmul.f32 %v5012_v28, %v4372_v19  ;;  %vm1958_vm15 = vcmp.eq.s32.totalorder %v1716_v9, %v7867_v24  ;;  %v1497_v61 = vld [vmem:[%s7742_s27 + $0x3d0] sm:$0xff]  ;;  %v1496_v42 = vld [vmem:[%s7742_s27 + $0x3c8] sm:$0xff]  ;;  %v16350_v28 = vld [vmem:[#allocation18_spill] sm:$0xff] }
 0x29c   : > { %v3086_v54 = vmul.f32 1.442695, %v16346_v36  ;;  %v7393_v27 = vpop.eup %7392  ;;  %v4134_v53 = vsub.f32 0.0, %v16349_v1  ;;  %v12349_v14 = vadd.f32 %v12295_v46, %v1058_v0  ;;  %v12353_v12 = vadd.f32 1.0, %v7391_v21  ;;  %v16351_v3 = vld [vmem:[#allocation27_spill] sm:$0xff]  ;;  %1871 = vperm.xlu2 %6900, %v1497_v61   ;;  %1868 = vperm.xlu1 %6899, %v1496_v42   ;;  %vm2608_vm8 = vmand %vm7869_vm4, %vm12342_vm12  ;;  %v16365_v40 = vld [vmem:[#allocation36_spill] sm:$0xff] }
 0x29d   : > { %v5494_v26 = vmul.f32 %v5366_v59, %v4726_v35  ;;  %v3750_v19 = vmin.f32 %v3622_v56, 0.9999  ;;  %v5238_v31 = vmul.f32 %v16350_v28, %v5110_v51  ;;  %v1495_v59 = vld [vmem:[%s7742_s27 + $0x3c0] sm:$0xff]  ;;  %v5524_v36 = vmul.f32 %v5396_v30, %v4756_v15  ;;  %vm12388_vm5 = vmxor %vm1958_vm15, %vm7688_vm13  ;;  %v16358_v51 = vld [vmem:[#allocation76_spill] sm:$0xff] }
 0x29e   : > { %v4272_v1 = vmax.f32 %v4144_v38, -9.2103405  ;;  %v4912_v21 = vsub.f32 1.0, %v3760_v4  ;;  %7394 = vpow2.f32 %v3086_v54  ;;  %1297 = vst.msk [vmem:[%s7898_s10 + $0x1b8] sm:$0xff] %vm1241_vm9, %v12349_v14  ;;  %1865 = vperm.xlu0 %6898, %v1495_v59   ;;  %v12380_v15 = vmul.f32 %v12262_v32, %v5154_v55  ;;  %v16359_v32 = vld [vmem:[#allocation140_spill] sm:$0xff]  ;;  %vm12410_vm7 = vmand %vm7869_vm4, %vm1958_vm15  ;;  %v1138_v38 = vpop.f32.mrf.mxu2 }
 0x29f   : > { %v5622_v35 = vmul.f32 %v16351_v3, %v5494_v26  ;;  %7396 = vlog2.f32 %v3380_v58  ;;  %v3349_v26 = vadd.f32 1.0, %v7393_v27  ;;  %v12374_v45 = vadd.f32 %v12189_v10, %v5238_v31  ;;  %vm2598_vm10 = vmand %vm7869_vm4, %vm12388_vm5 }
 0x2a0   : > { %16354 = vst [vmem:[#allocation60_spill] sm:$0xff] %v12380_v15  ;;  %v12383_v54 = vmul.f32 %v12284_v39, %v5538_v47  ;;  %v5424_v30 = vmul.f32 %v3760_v4, %v3760_v4  ;;  %v3621_v10 = vmax.f32 %v16358_v51, 0.0001  ;;  %7398 = vlog2.f32 %v12353_v12  ;;  %v16361_v39 = vld [vmem:[#allocation141_spill] sm:$0xff] }
 0x2a1   : > { %v12377_v56 = vadd.f32 %v12192_v2, %v5622_v35  ;;  %v4262_v2 = vmax.f32 %v4134_v53, -9.2103405  ;;  %v4902_v27 = vsub.f32 1.0, %v3750_v19  ;;  %vm1957_vm2 = vcmp.eq.s32.totalorder %v1713_v62, %v7867_v24 }
 0x2a2   : > { %16355 = vst [vmem:[#allocation28_spill] sm:$0xff] %v12383_v54  ;;  %v12396_v55 = vmul.f32 %v16359_v32, %v5140_v50  ;;  %v12399_v47 = vmul.f32 %v16361_v39, %v5524_v36  ;;  %v12404_v4 = vsel %vm12362_vm6, 1.0, %v15680_v60  ;;  %v15584_v61 = vsub.f32 0.0, %v12088_v57  ;;  %vm2085_vm3 = vmand %vm7869_vm4, %vm1957_vm2 }
 0x2a3   : > { %7400 = vrcp.f32 %v3349_v26  ;;  %v6770_v50 = vsel %vm2608_vm8, 1.0, %v15680_v60  ;;  %v4400_v42 = vmin.f32 %v4272_v1, -0.000100005  ;;  %v5040_v28 = vmul.f32 %v4912_v21, %v4912_v21  ;;  %vm12450_vm11 = vmxor %vm1957_vm2, %vm7688_vm13 }
 0x2a4   : > { %16360 = vst [vmem:[#allocation77_spill] sm:$0xff] %v12396_v55  ;;  %v7395_v9 = vpop.eup %7394  ;;  %7402 = vlog2.f32 %v3349_v26  ;;  %v5552_v31 = vmul.f32 %v5424_v30, %v11804_v23  ;;  %v3749_v3 = vmin.f32 %v3621_v10, 0.9999  ;;  %v4133_v35 = vsub.f32 0.0, %v16365_v40  ;;  %vm2597_vm1 = vmand %vm7869_vm4, %vm12450_vm11 }
 0x2a5   : > { %16362 = vst [vmem:[#allocation18_spill] sm:$0xff] %v12399_v47  ;;  %v7397_v59 = vpop.eup %7396  ;;  %v4390_v36 = vmin.f32 %v4262_v2, -0.000100005  ;;  %v5030_v0 = vmul.f32 %v4902_v27, %v4902_v27  ;;  %v5414_v1 = vmul.f32 %v3750_v19, %v3750_v19  ;;  %v3319_v21 = vadd.f32 1.0, %v7395_v9 }
 0x2a6   : > { %7404 = vrcp.f32 %v3380_v58  ;;  %v6632_v26 = vsel %vm12410_vm7, 1.0, %v15680_v60  ;;  %v6063_v23 = vadd.f32 %v11652_v18, %v12328_v5  ;;  %v3210_v30 = vmul.f32 1.442695, %v15584_v61  ;;  %v7399_v51 = vpop.eup %7398  ;;  %v981_v18 = vpop.f32.mrf.mxu0 }
 0x2a7   : > { %v5168_v10 = vmul.f32 %v5040_v28, %v4400_v42  ;;  %v6760_v19 = vsel %vm2598_vm10, 1.0, %v15680_v60  ;;  %v12445_v58 = vsel %vm2085_vm3, 1.0, %v15680_v60  ;;  %v15583_v5 = vsub.f32 0.0, %v12123_v41  ;;  %v16369_v28 = vld [vmem:[#allocation86_spill] sm:$0xff] }
 0x2a8   : > { %v12455_v2 = vmul.f32 0.6931472, %v7397_v59  ;;  %v4261_v27 = vmax.f32 %v4133_v35, -9.2103405  ;;  %v4901_v32 = vsub.f32 1.0, %v3749_v3  ;;  %7406 = vrcp.f32 %v3319_v21 }
 0x2a9   : > { %v7401_v39 = vpop.eup %7400  ;;  %v12457_v53 = vmul.f32 %v6770_v50, %v5552_v31  ;;  %v5158_v42 = vmul.f32 %v5030_v0, %v4390_v36  ;;  %v5542_v9 = vmul.f32 %v5414_v1, %v16369_v28  ;;  %7408 = vlog2.f32 %v3319_v21 }
 0x2aa   : > { %v7403_v62 = vpop.eup %7402  ;;  %v12460_v40 = vmul.f32 0.6931472, %v7399_v51  ;;  %v5413_v59 = vmul.f32 %v3749_v3, %v3749_v3  ;;  %7410 = vpow2.f32 %v3210_v30  ;;  %v15585_v35 = vsub.f32 0.0, %v12093_v43 }
 0x2ab   : > { %16368 = vst [vmem:[#allocation27_spill] sm:$0xff] %v12457_v53  ;;  %7412 = vrcp.f32 %v12353_v12  ;;  %v6064_v50 = vadd.f32 %v12445_v58, %v6063_v23  ;;  %v3148_v31 = vmul.f32 1.442695, %v15583_v5  ;;  %v12472_v36 = vadd.f32 %v12295_v46, %v1138_v38 }
 0x2ac   : > { %16370 = vst [vmem:[#allocation76_spill] sm:$0xff] %v12460_v40  ;;  %v12474_v0 = vpop.eup %7404  ;;  %v16371_v1 = vsub.f32 0.0, %v11867_v37  ;;  %v3605_v21 = vmax.f32 %v7401_v39, 0.0001  ;;  %v4389_v30 = vmin.f32 %v4261_v27, -0.000100005  ;;  %v5029_v51 = vmul.f32 %v4901_v32, %v4901_v32 }
 0x2ad   : > { %v3915_v28 = vmul.f32 0.6931472, %v7403_v62  ;;  %v12482_v12 = vmul.f32 %v12404_v4, %v5168_v10  ;;  %v12484_v23 = vmul.f32 %v6760_v19, %v5542_v9  ;;  %v6759_v38 = vsel %vm2597_vm1, 1.0, %v15680_v60  ;;  %1329 = vst.msk [vmem:[%s7898_s10 + $0x2b8] sm:$0xff] %vm1241_vm9, %v12472_v36  ;;  %v16376_v19 = vld [vmem:[#allocation79_spill] sm:$0xff]  ;;  %v1211_v62 = vpop.f32.mrf.mxu3 }
 0x2ae   : > { %v12479_v3 = vsub.f32 %v16371_v1, %v12455_v2  ;;  %v7407_v37 = vpop.eup %7406  ;;  %v16374_v27 = vsub.f32 0.0, %v11887_v8  ;;  %v12500_v10 = vmul.f32 %v6632_v26, %v5158_v42  ;;  %v5541_v39 = vmul.f32 %v5413_v59, %v16376_v19  ;;  %v1500_v42 = vld [vmem:[%s7742_s27 + $0x3e8] sm:$0xff] }
 0x2af   : > { %16372 = vst [vmem:[#allocation140_spill] sm:$0xff] %v12482_v12  ;;  %v3268_v9 = vmul.f32 1.442695, %v15585_v35  ;;  %v7409_v1 = vpop.eup %7408  ;;  %v12505_v5 = vadd.f32 %v6632_v26, %v6064_v50  ;;  %7414 = vpow2.f32 %v3148_v31  ;;  %v3575_v61 = vmax.f32 %v7407_v37, 0.0001  ;;  %v1755_v31 = vpop.permute.xlu2 %1754  ;;  %1880 = vperm.xlu2 %6900, %v1500_v42  }
 0x2b0   : > { %16373 = vst [vmem:[#allocation141_spill] sm:$0xff] %v12484_v23  ;;  %v12498_v32 = vsub.f32 %v16374_v27, %v12460_v40  ;;  %v12508_v53 = vadd.f32 %v12295_v46, %v1211_v62  ;;  %v7411_v8 = vpop.eup %7410  ;;  %v3733_v59 = vmin.f32 %v3605_v21, 0.9999  ;;  %v12511_v27 = vmul.f32 %v5029_v51, %v4389_v30  ;;  %v1499_v23 = vld [vmem:[%s7742_s27 + $0x3e0] sm:$0xff]  ;;  %v1725_v21 = vpop.permute.xlu1 %1724 }
 0x2b1   : > { %16375 = vst [vmem:[#allocation36_spill] sm:$0xff] %v12500_v10  ;;  %v3855_v19 = vmul.f32 0.6931472, %v7409_v1  ;;  %v12513_v35 = vpop.eup %7412  ;;  %v4117_v12 = vsub.f32 0.0, %v3915_v28  ;;  %v16378_v26 = vsub.f32 0.0, %v11939_v16  ;;  %v12521_v62 = vadd.f32 %v12295_v46, %v981_v18  ;;  %v1498_v16 = vld [vmem:[%s7742_s27 + $0x3d8] sm:$0xff]  ;;  %v1061_v18 = vpop.f32.mrf.mxu1  ;;  %1877 = vperm.xlu1 %6899, %v1499_v23  }
 0x2b2   : > { %16377 = vst [vmem:[#allocation86_spill] sm:$0xff] %v12513_v35  ;;  %v3703_v37 = vmin.f32 %v3575_v61, 0.9999  ;;  %7416 = vpow2.f32 %v3268_v9  ;;  %v16379_v51 = vsub.f32 0.0, %v12312_v48  ;;  %v3635_v61 = vmax.f32 %v12265_v29, 0.0001  ;;  %1874 = vperm.xlu0 %6898, %v1498_v16  }
 0x2b3   : > { %v4501_v50 = vsub.f32 %v16378_v26, %v3915_v28  ;;  %1358 = vst.msk [vmem:[%s7898_s10 + $0x3a0] sm:$0xff] %vm1241_vm9, %v12508_v53  ;;  %v4087_v30 = vsub.f32 0.0, %v3855_v19  ;;  %v12529_v28 = vmul.f32 %v6759_v38, %v5541_v39  ;;  %v12531_v26 = vadd.f32 1.0, %v7411_v8 }
 0x2b4   : > { %v4471_v1 = vsub.f32 %v16379_v51, %v3855_v19  ;;  %v4855_v54 = vsub.f32 1.0, %v3703_v37  ;;  %1266 = vst.msk [vmem:[%s7898_s10 + $0xc0] sm:$0xff] %vm1241_vm9, %v12521_v62  ;;  %v4885_v9 = vsub.f32 1.0, %v3733_v59  ;;  %vm1971_vm14 = vcmp.eq.s32.totalorder %v1755_v31, %v7867_v24 }
 0x2b5   : > { %16380 = vst [vmem:[#allocation79_spill] sm:$0xff] %v12529_v28  ;;  %v4215_v48 = vmax.f32 %v4087_v30, -9.2103405  ;;  %v7415_v51 = vpop.eup %7414  ;;  %v4245_v38 = vmax.f32 %v4117_v12, -9.2103405  ;;  %v4147_v8 = vsub.f32 0.0, %v12175_v33  ;;  %v5367_v15 = vmul.f32 %v3703_v37, %v3703_v37  ;;  %vm12552_vm12 = vmxor %vm1971_vm14, %vm7688_vm13 }
 0x2b6   : > { %v4599_v19 = vmax.f32 %v4471_v1, -9.2103405  ;;  %v4629_v39 = vmax.f32 %v4501_v50, -9.2103405  ;;  %v4983_v29 = vmul.f32 %v4855_v54, %v4855_v54  ;;  %v12540_v42 = vadd.f32 %v12295_v46, %v1061_v18  ;;  %v16381_v30 = vld [vmem:[#allocation21_spill] sm:$0xff]  ;;  %vm12569_vm15 = vmand %vm7869_vm4, %vm1971_vm14 }
 0x2b7   : > { %v4343_v28 = vmin.f32 %v4215_v48, -0.000100005  ;;  %7418 = vlog2.f32 %v12531_v26  ;;  %v3763_v23 = vmin.f32 %v3635_v61, 0.9999  ;;  %v3625_v1 = vmax.f32 %v16381_v30, 0.0001  ;;  %vm2611_vm6 = vmand %vm7869_vm4, %vm12552_vm12 }
 0x2b8   : > { %v4727_v10 = vmin.f32 %v4599_v19, -0.000100005  ;;  %v15588_v16 = vsub.f32 0.0, %v12521_v62  ;;  %v7417_v12 = vpop.eup %7416  ;;  %v5397_v50 = vmul.f32 %v3733_v59, %v3733_v59  ;;  %v3350_v47 = vadd.f32 1.0, %v7415_v51  ;;  %1298 = vst.msk [vmem:[%s7898_s10 + $0x1c0] sm:$0xff] %vm1241_vm9, %v12540_v42  ;;  %v16384_v59 = vld [vmem:[#allocation19_spill] sm:$0xff]  ;;  %v1734_v35 = vpop.permute.xlu1 %1733 }
 0x2b9   : > { %v5111_v33 = vmul.f32 %v4983_v29, %v4343_v28  ;;  %v4373_v54 = vmin.f32 %v4245_v38, -0.000100005  ;;  %v4757_v37 = vmin.f32 %v4629_v39, -0.000100005  ;;  %v5013_v48 = vmul.f32 %v4885_v9, %v4885_v9  ;;  %v16385_v28 = vld [vmem:[#allocation44_spill] sm:$0xff] }
 0x2ba   : > { %v5495_v40 = vmul.f32 %v5367_v15, %v4727_v10  ;;  %vm1961_vm0 = vcmp.eq.s32.totalorder %v1725_v21, %v7867_v24  ;;  %v4275_v18 = vmax.f32 %v4147_v8, -9.2103405  ;;  %v3088_v10 = vmul.f32 1.442695, %v15588_v16  ;;  %v16386_v39 = vld [vmem:[#allocation104_spill] sm:$0xff] }
 0x2bb   : > { %v5239_v19 = vmul.f32 %v16384_v59, %v5111_v33  ;;  %v3410_v51 = vadd.f32 1.0, %v7417_v12  ;;  %v4915_v38 = vsub.f32 1.0, %v3763_v23  ;;  %v3753_v9 = vmin.f32 %v3625_v1, 0.9999  ;;  %v1722_v59 = vpop.permute.xlu0 %1721  ;;  %vm12594_vm8 = vmxor %vm1961_vm0, %vm7688_vm13 }
 0x2bc   : > { %v5623_v15 = vmul.f32 %v16385_v28, %v5495_v40  ;;  %v4137_v29 = vsub.f32 0.0, %v16386_v39  ;;  %v16387_v30 = vmax.f32 %v12479_v3, -9.2103405  ;;  %7420 = vrcp.f32 %v3350_v47  ;;  %vm2089_vm5 = vmand %vm7869_vm4, %vm1961_vm0 }
 0x2bd   : > { %v12574_v40 = vadd.f32 %v12374_v45, %v5239_v19  ;;  %v7419_v12 = vpop.eup %7418  ;;  %v5525_v33 = vmul.f32 %v5397_v50, %v4757_v37  ;;  %v12581_v3 = vmul.f32 %v12445_v58, %v12511_v27  ;;  %7422 = vlog2.f32 %v3350_v47  ;;  %v1141_v37 = vpop.f32.mrf.mxu2  ;;  %vm2601_vm7 = vmand %vm7869_vm4, %vm12594_vm8 }
 0x2be   : > { %v12563_v55 = vmin.f32 %v16387_v30, -0.000100005  ;;  %v12577_v1 = vadd.f32 %v12377_v56, %v5623_v15  ;;  %v5427_v31 = vmul.f32 %v3763_v23, %v3763_v23  ;;  %v16392_v45 = vmax.f32 %v12498_v32, -9.2103405 }
 0x2bf   : > { %16391 = vst [vmem:[#allocation19_spill] sm:$0xff] %v12581_v3  ;;  %v5141_v56 = vmul.f32 %v5013_v48, %v4373_v54  ;;  %v4403_v28 = vmin.f32 %v4275_v18, -0.000100005  ;;  %7424 = vpow2.f32 %v3088_v10  ;;  %v5043_v47 = vmul.f32 %v4915_v38, %v4915_v38  ;;  %v16396_v48 = vld [vmem:[#allocation33_spill] sm:$0xff] }
 0x2c0   : > { %16388 = vst [vmem:[#allocation21_spill] sm:$0xff] %v12563_v55  ;;  %v12589_v19 = vmin.f32 %v16392_v45, -0.000100005  ;;  %7426 = vlog2.f32 %v3410_v51  ;;  %v4265_v32 = vmax.f32 %v4137_v29, -9.2103405  ;;  %v4905_v27 = vsub.f32 1.0, %v3753_v9 }
 0x2c1   : > { %v12602_v23 = vmul.f32 0.6931472, %v7419_v12  ;;  %v12607_v50 = vsel %vm12569_vm15, 1.0, %v15680_v60  ;;  %v6773_v54 = vsel %vm2611_vm6, 1.0, %v15680_v60  ;;  %vm1960_vm2 = vcmp.eq.s32.totalorder %v1722_v59, %v7867_v24  ;;  %v16399_v29 = vld [vmem:[#allocation96_spill] sm:$0xff] }
 0x2c2   : > { %16393 = vst [vmem:[#allocation44_spill] sm:$0xff] %v12589_v19  ;;  %v12612_v61 = vmul.f32 %v16396_v48, %v5525_v33  ;;  %7428 = vrcp.f32 %v12531_v26  ;;  %v5555_v21 = vmul.f32 %v5427_v31, %v12281_v17  ;;  %v15587_v18 = vsub.f32 0.0, %v12298_v7  ;;  %v7421_v15 = vpop.eup %7420  ;;  %vm12630_vm10 = vmand %vm7869_vm4, %vm1960_vm2 }
 0x2c3   : > { %v12622_v10 = vmul.f32 %v10757_v34, %v5141_v56  ;;  %v6635_v38 = vsel %vm2089_vm5, 1.0, %v15680_v60  ;;  %v5417_v39 = vmul.f32 %v3753_v9, %v3753_v9  ;;  %v3624_v30 = vmax.f32 %v16399_v29, 0.0001  ;;  %v7423_v8 = vpop.eup %7422  ;;  %vm12651_vm3 = vmxor %vm1960_vm2, %vm7688_vm13 }
 0x2c4   : > { %16397 = vst [vmem:[#allocation104_spill] sm:$0xff] %v12612_v61  ;;  %v5171_v26 = vmul.f32 %v5043_v47, %v4403_v28  ;;  %v4393_v17 = vmin.f32 %v4265_v32, -0.000100005  ;;  %v5033_v12 = vmul.f32 %v4905_v27, %v4905_v27  ;;  %v12635_v34 = vadd.f32 %v12295_v46, %v1141_v37  ;;  %vm2600_vm11 = vmand %vm7869_vm4, %vm12651_vm3 }
 0x2c5   : > { %16398 = vst [vmem:[#allocation33_spill] sm:$0xff] %v12622_v10  ;;  %v7425_v31 = vpop.eup %7424  ;;  %v16402_v9 = vsub.f32 0.0, %v12088_v57  ;;  %7430 = vrcp.f32 %v3410_v51  ;;  %v6763_v56 = vsel %vm2601_vm7, 1.0, %v15680_v60  ;;  %v6066_v28 = vadd.f32 %v11807_v20, %v12505_v5  ;;  %v16406_v51 = vld [vmem:[#allocation95_spill] sm:$0xff]  ;;  %v16407_v5 = vld [vmem:[#allocation108_spill] sm:$0xff] }
 0x2c6   : > { %v7427_v57 = vpop.eup %7426  ;;  %v12655_v32 = vmul.f32 %v6773_v54, %v5555_v21  ;;  %v4136_v27 = vsub.f32 0.0, %v16406_v51  ;;  %v3212_v58 = vmul.f32 1.442695, %v15587_v18  ;;  %v3320_v37 = vadd.f32 1.0, %v7425_v31  ;;  %1330 = vst.msk [vmem:[%s7898_s10 + $0x2c0] sm:$0xff] %vm1241_vm9, %v12635_v34  ;;  %v1501_v10 = vld [vmem:[%s7742_s27 + $0x3f0] sm:$0xff] }
 0x2c7   : > { %v4533_v45 = vsub.f32 %v16402_v9, %v12602_v23  ;;  %v3917_v20 = vmul.f32 0.6931472, %v7423_v8  ;;  %v5545_v48 = vmul.f32 %v5417_v39, %v16407_v5  ;;  %v12667_v59 = vsel %vm12630_vm10, 1.0, %v15680_v60  ;;  %1883 = vperm.xlu0 %6898, %v1501_v10  }
 0x2c8   : > { %16405 = vst [vmem:[#allocation96_spill] sm:$0xff] %v12655_v32  ;;  %v3752_v29 = vmin.f32 %v3624_v30, 0.9999  ;;  %v12669_v54 = vpop.eup %7428  ;;  %v3606_v21 = vmax.f32 %v7421_v15, 0.0001  ;;  %v12672_v9 = vmul.f32 %v12607_v50, %v5171_v26  ;;  %v5161_v51 = vmul.f32 %v5033_v12, %v4393_v17  ;;  %v983_v26 = vpop.f32.mrf.mxu0 }
 0x2c9   : > { %7432 = vrcp.f32 %v3320_v37  ;;  %v4661_v39 = vmax.f32 %v4533_v45, -9.2103405  ;;  %v12678_v8 = vmul.f32 0.6931472, %v7427_v57  ;;  %v15589_v33 = vsub.f32 0.0, %v12303_v11  ;;  %v1213_v57 = vpop.f32.mrf.mxu3 }
 0x2ca   : > { %16408 = vst [vmem:[#allocation95_spill] sm:$0xff] %v12672_v9  ;;  %7434 = vlog2.f32 %v3320_v37  ;;  %v4264_v30 = vmax.f32 %v4136_v27, -9.2103405  ;;  %v6067_v31 = vadd.f32 %v12667_v59, %v6066_v28  ;;  %v4118_v12 = vsub.f32 0.0, %v3917_v20 }
 0x2cb   : > { %16409 = vst [vmem:[#allocation108_spill] sm:$0xff] %v12678_v8  ;;  %7436 = vpow2.f32 %v3212_v58  ;;  %v12683_v17 = vpop.eup %7430  ;;  %v12685_v47 = vmul.f32 %v6763_v56, %v5545_v48  ;;  %v12688_v5 = vsel %vm2600_vm11, 1.0, %v15680_v60  ;;  %v4904_v45 = vsub.f32 1.0, %v3752_v29 }
 0x2cc   : > { %16410 = vst [vmem:[#allocation176_spill] sm:$0xff] %v12683_v17  ;;  %v3734_v18 = vmin.f32 %v3606_v21, 0.9999  ;;  %v12690_v37 = vmul.f32 %v6635_v38, %v5161_v51  ;;  %v5416_v27 = vmul.f32 %v3752_v29, %v3752_v29  ;;  %v12693_v28 = vadd.f32 %v12295_v46, %v1213_v57  ;;  %v1063_v21 = vpop.f32.mrf.mxu1 }
 0x2cd   : > { %16411 = vst [vmem:[#allocation177_spill] sm:$0xff] %v12685_v47  ;;  %v12695_v58 = vmin.f32 %v4661_v39, -0.000100005  ;;  %v16413_v56 = vsub.f32 0.0, %v12093_v43  ;;  %v3270_v16 = vmul.f32 1.442695, %v15589_v33  ;;  %v12703_v15 = vadd.f32 %v12295_v46, %v983_v26 }
 0x2ce   : > { %16412 = vst [vmem:[#allocation178_spill] sm:$0xff] %v12690_v37  ;;  %v16414_v29 = vsub.f32 0.0, %v12123_v41  ;;  %v4392_v57 = vmin.f32 %v4264_v30, -0.000100005  ;;  %v12707_v32 = vadd.f32 %v6635_v38, %v6067_v31  ;;  %v16415_v39 = vsub.f32 0.0, %v12349_v14  ;;  %v16416_v38 = vld [vmem:[#allocation32_spill] sm:$0xff] }
 0x2cf   : > { %v4562_v48 = vsub.f32 %v16413_v56, %v12678_v8  ;;  %v7433_v51 = vpop.eup %7432  ;;  %1359 = vst.msk [vmem:[%s7898_s10 + $0x3a8] sm:$0xff] %vm1241_vm9, %v12693_v28  ;;  %v4246_v56 = vmax.f32 %v4118_v12, -9.2103405  ;;  %v5032_v33 = vmul.f32 %v4904_v45, %v4904_v45  ;;  %v15591_v41 = vsub.f32 0.0, %v12703_v15 }
 0x2d0   : > { %v4502_v17 = vsub.f32 %v16414_v29, %v3917_v20  ;;  %v3150_v9 = vmul.f32 1.442695, %v16415_v39  ;;  %v7435_v43 = vpop.eup %7434  ;;  %v3576_v8 = vmax.f32 %v7433_v51, 0.0001  ;;  %1267 = vst.msk [vmem:[%s7898_s10 + $0xc8] sm:$0xff] %vm1241_vm9, %v12703_v15  ;;  %v4886_v30 = vsub.f32 1.0, %v3734_v18  ;;  %v1764_v51 = vpop.permute.xlu2 %1763 }
 0x2d1   : > { %v7437_v20 = vpop.eup %7436  ;;  %v5544_v31 = vmul.f32 %v5416_v27, %v16416_v38  ;;  %v3857_v26 = vmul.f32 0.6931472, %v7435_v43  ;;  %v12720_v29 = vadd.f32 %v12295_v46, %v1063_v21  ;;  %v4690_v39 = vmax.f32 %v4562_v48, -9.2103405 }
 0x2d2   : > { %7438 = vpow2.f32 %v3270_v16  ;;  %v3704_v47 = vmin.f32 %v3576_v8, 0.9999  ;;  %v3090_v12 = vmul.f32 1.442695, %v15591_v41  ;;  %v4630_v45 = vmax.f32 %v4502_v17, -9.2103405  ;;  %v1143_v16 = vpop.f32.mrf.mxu2 }
 0x2d3   : > { %7440 = vpow2.f32 %v3150_v9  ;;  %v4088_v37 = vsub.f32 0.0, %v3857_v26  ;;  %v16417_v3 = vsub.f32 0.0, %v12521_v62  ;;  %1299 = vst.msk [vmem:[%s7898_s10 + $0x1c8] sm:$0xff] %vm1241_vm9, %v12720_v29  ;;  %v4374_v27 = vmin.f32 %v4246_v56, -0.000100005  ;;  %v1502_v17 = vld [vmem:[%s7742_s27 + $0x3f8] sm:$0xff] }
 0x2d4   : > { %v3382_v21 = vadd.f32 1.0, %v7437_v20  ;;  %v4856_v48 = vsub.f32 1.0, %v3704_v47  ;;  %7442 = vpow2.f32 %v3090_v12  ;;  %v5014_v8 = vmul.f32 %v4886_v30, %v4886_v30  ;;  %v16418_v9 = vld [vmem:[#allocation103_spill] sm:$0xff]  ;;  %1886 = vperm.xlu1 %6899, %v1502_v17   ;;  %v16427_v17 = vld [vmem:[#allocation8_spill] sm:$0xff] }
 0x2d5   : > { %v4472_v19 = vsub.f32 %v16417_v3, %v3857_v26  ;;  %v5160_v43 = vmul.f32 %v5032_v33, %v4392_v57  ;;  %v4216_v38 = vmax.f32 %v4088_v37, -9.2103405  ;;  %vm1974_vm1 = vcmp.eq.s32.totalorder %v1764_v51, %v7867_v24  ;;  %v16419_v62 = vld [vmem:[#allocation119_spill] sm:$0xff] }
 0x2d6   : > { %v3628_v61 = vmax.f32 %v16418_v9, 0.0001  ;;  %v3627_v3 = vmax.f32 %v16419_v62, 0.0001  ;;  %v4984_v26 = vmul.f32 %v4856_v48, %v4856_v48  ;;  %v5368_v12 = vmul.f32 %v3704_v47, %v3704_v47  ;;  %vm12745_vm14 = vmxor %vm1974_vm1, %vm7688_vm13 }
 0x2d7   : > { %v4600_v41 = vmax.f32 %v4472_v19, -9.2103405  ;;  %v4344_v56 = vmin.f32 %v4216_v38, -0.000100005  ;;  %v12735_v30 = vadd.f32 %v12295_v46, %v1143_v16  ;;  %v12737_v33 = vmin.f32 %v4690_v39, -0.000100005  ;;  %vm12758_vm12 = vmand %vm7869_vm4, %vm1974_vm1 }
 0x2d8   : > { %v7439_v19 = vpop.eup %7438  ;;  %v4758_v37 = vmin.f32 %v4630_v45, -0.000100005  ;;  %v5398_v57 = vmul.f32 %v3734_v18, %v3734_v18  ;;  %7444 = vrcp.f32 %v3382_v21  ;;  %v12740_v48 = vmul.f32 %v12688_v5, %v5544_v31  ;;  %v16424_v31 = vld [vmem:[#allocation124_spill] sm:$0xff]  ;;  %vm2614_vm15 = vmand %vm7869_vm4, %vm12745_vm14 }
 0x2d9   : > { %v4728_v20 = vmin.f32 %v4600_v41, -0.000100005  ;;  %16420 = vst [vmem:[#allocation32_spill] sm:$0xff] %v12737_v33  ;;  %v7441_v9 = vpop.eup %7440  ;;  %7446 = vlog2.f32 %v3382_v21  ;;  %v1731_v41 = vpop.permute.xlu0 %1730  ;;  %v5112_v10 = vmul.f32 %v4984_v26, %v4344_v56  ;;  %v5142_v39 = vmul.f32 %v5014_v8, %v4374_v27  ;;  %v16428_v26 = vld [vmem:[#allocation22_spill] sm:$0xff] }
 0x2da   : > { %16421 = vst [vmem:[#allocation103_spill] sm:$0xff] %v12740_v48  ;;  %v7443_v18 = vpop.eup %7442  ;;  %vm1964_vm0 = vcmp.eq.s32.totalorder %v1734_v35, %v7867_v24  ;;  %v3756_v5 = vmin.f32 %v3628_v61, 0.9999  ;;  %v4140_v45 = vsub.f32 0.0, %v16424_v31  ;;  %v3755_v38 = vmin.f32 %v3627_v3, 0.9999 }
 0x2db   : > { %v5496_v16 = vmul.f32 %v5368_v12, %v4728_v20  ;;  %1331 = vst.msk [vmem:[%s7898_s10 + $0x2c8] sm:$0xff] %vm1241_vm9, %v12735_v30  ;;  %v4139_v62 = vsub.f32 0.0, %v16427_v17  ;;  %v5240_v56 = vmul.f32 %v16428_v26, %v5112_v10  ;;  %v16429_v20 = vld [vmem:[#allocation73_spill] sm:$0xff]  ;;  %v5526_v8 = vmul.f32 %v5398_v57, %v4758_v37  ;;  %vm12776_vm8 = vmxor %vm1964_vm0, %vm7688_vm13 }
 0x2dc   : > { %v3411_v12 = vadd.f32 1.0, %v7439_v19  ;;  %vm1963_vm6 = vcmp.eq.s32.totalorder %v1731_v41, %v7867_v24  ;;  %v3321_v61 = vadd.f32 1.0, %v7443_v18  ;;  %v12771_v51 = vmul.f32 %v12667_v59, %v5160_v43  ;;  %vm12795_vm5 = vmand %vm7869_vm4, %vm1964_vm0 }
 0x2dd   : > { %v5624_v27 = vmul.f32 %v16429_v20, %v5496_v16  ;;  %v3351_v3 = vadd.f32 1.0, %v7441_v9  ;;  %v12781_v19 = vadd.f32 %v12574_v40, %v5240_v56  ;;  %v12789_v59 = vsel %vm12758_vm12, 1.0, %v15680_v60  ;;  %vm12802_vm2 = vmxor %vm1963_vm6, %vm7688_vm13 }
 0x2de   : > { %16430 = vst [vmem:[#allocation119_spill] sm:$0xff] %v12771_v51  ;;  %v7445_v57 = vpop.eup %7444  ;;  %v4268_v9 = vmax.f32 %v4140_v45, -9.2103405  ;;  %v4908_v40 = vsub.f32 1.0, %v3756_v5  ;;  %7448 = vrcp.f32 %v3321_v61  ;;  %v4267_v31 = vmax.f32 %v4139_v62, -9.2103405  ;;  %vm2604_vm7 = vmand %vm7869_vm4, %vm12776_vm8 }
 0x2df   : > { %v12784_v37 = vadd.f32 %v12577_v1, %v5624_v27  ;;  %v7447_v16 = vpop.eup %7446  ;;  %v5420_v1 = vmul.f32 %v3756_v5, %v3756_v5  ;;  %v4907_v35 = vsub.f32 1.0, %v3755_v38  ;;  %7450 = vlog2.f32 %v3321_v61  ;;  %vm2091_vm10 = vmand %vm7869_vm4, %vm1963_vm6 }
 0x2e0   : > { %v12807_v21 = vmul.f32 %v11533_v44, %v5142_v39  ;;  %v12810_v17 = vmul.f32 %v11622_v63, %v5526_v8  ;;  %7452 = vlog2.f32 %v3411_v12  ;;  %v15592_v5 = vsub.f32 0.0, %v12472_v36  ;;  %vm2603_vm3 = vmand %vm7869_vm4, %vm12802_vm2 }
 0x2e1   : > { %7454 = vrcp.f32 %v3351_v3  ;;  %v12823_v44 = vsel %vm2614_vm15, 1.0, %v15680_v60  ;;  %v3638_v39 = vmax.f32 %v7445_v57, 0.0001  ;;  %v6069_v63 = vadd.f32 %v11996_v13, %v12707_v32  ;;  %v16439_v13 = vld [vmem:[#allocation94_spill] sm:$0xff] }
 0x2e2   : > { %16437 = vst [vmem:[#allocation124_spill] sm:$0xff] %v12807_v21  ;;  %v3981_v45 = vmul.f32 0.6931472, %v7447_v16  ;;  %7456 = vlog2.f32 %v3351_v3  ;;  %v4396_v62 = vmin.f32 %v4268_v9, -0.000100005  ;;  %v5036_v26 = vmul.f32 %v4908_v40, %v4908_v40 }
 0x2e3   : > { %16438 = vst [vmem:[#allocation8_spill] sm:$0xff] %v12810_v17  ;;  %v12838_v47 = vsel %vm12795_vm5, 1.0, %v15680_v60  ;;  %v5548_v32 = vmul.f32 %v5420_v1, %v16439_v13  ;;  %v4395_v41 = vmin.f32 %v4267_v31, -0.000100005  ;;  %v5035_v56 = vmul.f32 %v4907_v35, %v4907_v35 }
 0x2e4   : > { %v7449_v20 = vpop.eup %7448  ;;  %7458 = vrcp.f32 %v3411_v12  ;;  %v6766_v27 = vsel %vm2604_vm7, 1.0, %v15680_v60  ;;  %v12848_v8 = vsel %vm2091_vm10, 1.0, %v15680_v60  ;;  %v3214_v61 = vmul.f32 1.442695, %v15592_v5 }
 0x2e5   : > { %v7451_v3 = vpop.eup %7450  ;;  %v3766_v57 = vmin.f32 %v3638_v39, 0.9999  ;;  %v12853_v43 = vsel %vm2603_vm3, 1.0, %v15680_v60  ;;  %v3577_v9 = vmax.f32 %v7449_v20, 0.0001  ;;  %v16440_v16 = vsub.f32 0.0, %v12298_v7 }
 0x2e6   : > { %v7453_v40 = vpop.eup %7452  ;;  %v5164_v1 = vmul.f32 %v5036_v26, %v4396_v62  ;;  %v5419_v18 = vmul.f32 %v3755_v38, %v3755_v38  ;;  %v3859_v31 = vmul.f32 0.6931472, %v7451_v3  ;;  %v4150_v13 = vsub.f32 0.0, %v3981_v45 }
 0x2e7   : > { %v4534_v10 = vsub.f32 %v16440_v16, %v3981_v45  ;;  %v7455_v35 = vpop.eup %7454  ;;  %v12858_v33 = vmul.f32 %v6766_v27, %v5548_v32  ;;  %v5163_v5 = vmul.f32 %v5035_v56, %v4395_v41  ;;  %v3705_v48 = vmin.f32 %v3577_v9, 0.9999  ;;  %v16446_v41 = vld [vmem:[#allocation122_spill] sm:$0xff] }
 0x2e8   : > { %v7457_v39 = vpop.eup %7456  ;;  %7460 = vpow2.f32 %v3214_v61  ;;  %v4089_v17 = vsub.f32 0.0, %v3859_v31  ;;  %v16442_v20 = vsub.f32 0.0, %v12703_v15  ;;  %v12863_v21 = vmul.f32 0.6931472, %v7453_v40 }
 0x2e9   : > { %16441 = vst [vmem:[#allocation22_spill] sm:$0xff] %v12858_v33  ;;  %v4918_v7 = vsub.f32 1.0, %v3766_v57  ;;  %v16444_v38 = vsub.f32 0.0, %v12540_v42  ;;  %v4857_v26 = vsub.f32 1.0, %v3705_v48  ;;  %v4662_v32 = vmax.f32 %v4534_v10, -9.2103405 }
 0x2ea   : > { %v4473_v12 = vsub.f32 %v16442_v20, %v3859_v31  ;;  %16443 = vst [vmem:[#allocation73_spill] sm:$0xff] %v12863_v21  ;;  %v12867_v45 = vpop.eup %7458  ;;  %v5547_v56 = vmul.f32 %v5419_v18, %v16446_v41  ;;  %v4217_v27 = vmax.f32 %v4089_v17, -9.2103405  ;;  %v3607_v3 = vmax.f32 %v7455_v35, 0.0001  ;;  %v986_v17 = vpop.f32.mrf.mxu0 }
 0x2eb   : > { %v3152_v62 = vmul.f32 1.442695, %v16444_v38  ;;  %16445 = vst [vmem:[#allocation94_spill] sm:$0xff] %v12867_v45  ;;  %v3919_v9 = vmul.f32 0.6931472, %v7457_v39  ;;  %v4985_v51 = vmul.f32 %v4857_v26, %v4857_v26  ;;  %v16447_v15 = vsub.f32 0.0, %v12508_v53  ;;  %v1216_v26 = vpop.f32.mrf.mxu3  ;;  %v1066_v41 = vpop.f32.mrf.mxu1 }
 0x2ec   : > { %v4601_v61 = vmax.f32 %v4473_v12, -9.2103405  ;;  %v4278_v16 = vmax.f32 %v4150_v13, -9.2103405  ;;  %v4345_v31 = vmin.f32 %v4217_v27, -0.000100005  ;;  %v5369_v33 = vmul.f32 %v3705_v48, %v3705_v48 }
 0x2ed   : > { %v3272_v40 = vmul.f32 1.442695, %v16447_v15  ;;  %v16448_v38 = vsub.f32 0.0, %v12303_v11  ;;  %v5430_v45 = vmul.f32 %v3766_v57, %v3766_v57  ;;  %v6070_v10 = vadd.f32 %v12848_v8, %v6069_v63  ;;  %v16449_v57 = vld [vmem:[#allocation23_spill] sm:$0xff] }
 0x2ee   : > { %v4729_v20 = vmin.f32 %v4601_v61, -0.000100005  ;;  %7462 = vpow2.f32 %v3152_v62  ;;  %v7461_v12 = vpop.eup %7460  ;;  %v4790_v18 = vmin.f32 %v4662_v32, -0.000100005  ;;  %v5046_v35 = vmul.f32 %v4918_v7, %v4918_v7  ;;  %v16450_v62 = vld [vmem:[#allocation3_spill] sm:$0xff] }
 0x2ef   : > { %v4563_v55 = vsub.f32 %v16448_v38, %v12863_v21  ;;  %v5113_v13 = vmul.f32 %v4985_v51, %v4345_v31  ;;  %v3735_v27 = vmin.f32 %v3607_v3, 0.9999  ;;  %v4119_v48 = vsub.f32 0.0, %v3919_v9 }
 0x2f0   : > { %v5497_v39 = vmul.f32 %v5369_v33, %v4729_v20  ;;  %v4406_v61 = vmin.f32 %v4278_v16, -0.000100005  ;;  %v12877_v11 = vadd.f32 %v12295_v46, %v1216_v26  ;;  %7464 = vpow2.f32 %v3272_v40 }
 0x2f1   : > { %v5241_v63 = vmul.f32 %v16449_v57, %v5113_v13  ;;  %v12882_v32 = vadd.f32 %v12295_v46, %v986_v17  ;;  %v4691_v51 = vmax.f32 %v4563_v55, -9.2103405  ;;  %v16451_v33 = vsub.f32 0.0, %v12349_v14 }
 0x2f2   : > { %v5625_v15 = vmul.f32 %v16450_v62, %v5497_v39  ;;  %v3383_v3 = vadd.f32 1.0, %v7461_v12  ;;  %1360 = vst.msk [vmem:[%s7898_s10 + $0x3b0] sm:$0xff] %vm1241_vm9, %v12877_v11  ;;  %v12890_v16 = vadd.f32 %v12295_v46, %v1066_v41  ;;  %v12893_v40 = vmul.f32 %v12838_v47, %v5164_v1  ;;  %v1773_v12 = vpop.permute.xlu2 %1772 }
 0x2f3   : > { %v4503_v7 = vsub.f32 %v16451_v33, %v3919_v9  ;;  %v12896_v31 = vadd.f32 %v12781_v19, %v5241_v63  ;;  %1268 = vst.msk [vmem:[%s7898_s10 + $0xd0] sm:$0xff] %vm1241_vm9, %v12882_v32  ;;  %v15596_v14 = vsub.f32 0.0, %v12882_v32  ;;  %v5174_v9 = vmul.f32 %v5046_v35, %v4406_v61  ;;  %v16458_v61 = vld [vmem:[#allocation11_spill] sm:$0xff]  ;;  %v1146_v63 = vpop.f32.mrf.mxu2 }
 0x2f4   : > { %16452 = vst [vmem:[#allocation122_spill] sm:$0xff] %v12893_v40  ;;  %v12899_v20 = vadd.f32 %v12784_v37, %v5625_v15  ;;  %v7463_v55 = vpop.eup %7462  ;;  %v12906_v38 = vmul.f32 %v12848_v8, %v5163_v5  ;;  %v12909_v46 = vmul.f32 %v12853_v43, %v5547_v56  ;;  %v3631_v1 = vmax.f32 %v11490_v22, 0.0001  ;;  %v1743_v22 = vpop.permute.xlu1 %1742 }
 0x2f5   : > { %1300 = vst.msk [vmem:[%s7898_s10 + $0x1d0] sm:$0xff] %vm1241_vm9, %v12890_v16  ;;  %v4247_v19 = vmax.f32 %v4119_v48, -9.2103405  ;;  %v4887_v37 = vsub.f32 1.0, %v3735_v27  ;;  %v5558_v17 = vmul.f32 %v5430_v45, %v4790_v18  ;;  %v3092_v13 = vmul.f32 1.442695, %v15596_v14 }
 0x2f6   : > { %16453 = vst [vmem:[#allocation23_spill] sm:$0xff] %v12906_v38  ;;  %v12917_v39 = vmin.f32 %v4691_v51, -0.000100005  ;;  %v4631_v35 = vmax.f32 %v4503_v7, -9.2103405  ;;  %v12920_v5 = vadd.f32 %v12838_v47, %v6070_v10  ;;  %7466 = vlog2.f32 %v3383_v3  ;;  %v7465_v8 = vpop.eup %7464 }
 0x2f7   : > { %16454 = vst [vmem:[#allocation3_spill] sm:$0xff] %v12909_v46  ;;  %v3352_v43 = vadd.f32 1.0, %v7463_v55  ;;  %v4143_v56 = vsub.f32 0.0, %v11492_v49  ;;  %v15595_v26 = vsub.f32 0.0, %v12635_v34  ;;  %7468 = vpow2.f32 %v3092_v13 }
 0x2f8   : > { %16455 = vst [vmem:[#allocation179_spill] sm:$0xff] %v12917_v39  ;;  %v12925_v45 = vmul.f32 %v12789_v59, %v5174_v9  ;;  %vm1977_vm11 = vcmp.eq.s32.totalorder %v1773_v12, %v7867_v24  ;;  %v3759_v18 = vmin.f32 %v3631_v1, 0.9999  ;;  %v15593_v41 = vsub.f32 0.0, %v12693_v28 }
 0x2f9   : > { %v4375_v48 = vmin.f32 %v4247_v19, -0.000100005  ;;  %v5015_v47 = vmul.f32 %v4887_v37, %v4887_v37  ;;  %v12930_v10 = vmul.f32 %v12823_v44, %v5558_v17  ;;  %v3630_v57 = vmax.f32 %v16458_v61, 0.0001  ;;  %vm12939_vm14 = vmxor %vm1977_vm11, %vm7688_vm13  ;;  %v1740_v44 = vpop.permute.xlu0 %1739  ;;  %v12959_v37 = vld [vmem:[%s15432_s2] ss:$0 sm:$0xff] }
 0x2fa   : > { %16456 = vst [vmem:[#allocation180_spill] sm:$0xff] %v12925_v45  ;;  %v4759_v49 = vmin.f32 %v4631_v35, -0.000100005  ;;  %v5399_v62 = vmul.f32 %v3735_v27, %v3735_v27  ;;  %v12933_v15 = vadd.f32 1.0, %v7465_v8  ;;  %vm1967_vm1 = vcmp.eq.s32.totalorder %v1743_v22, %v7867_v24  ;;  %vm12950_vm0 = vmand %vm7869_vm4, %vm1977_vm11 }
 0x2fb   : > { %16457 = vst [vmem:[#allocation181_spill] sm:$0xff] %v12930_v10  ;;  %7470 = vrcp.f32 %v3352_v43  ;;  %v4271_v33 = vmax.f32 %v4143_v56, -9.2103405  ;;  %v3216_v7 = vmul.f32 1.442695, %v15595_v26  ;;  %v15594_v55 = vsub.f32 0.0, %v12720_v29  ;;  %vm12967_vm12 = vmxor %vm1967_vm1, %vm7688_vm13 }
 0x2fc   : > { %v7467_v27 = vpop.eup %7466  ;;  %7472 = vlog2.f32 %v3352_v43  ;;  %v4911_v1 = vsub.f32 1.0, %v3759_v18  ;;  %v3274_v19 = vmul.f32 1.442695, %v15593_v41  ;;  %v12962_v17 = vadd.f32 %v12959_v37, %v1146_v63  ;;  %v16465_v43 = vld [vmem:[#allocation144_spill] sm:$0xff]  ;;  %vm2617_vm15 = vmand %vm7869_vm4, %vm12939_vm14 }
 0x2fd   : > { %v7469_v12 = vpop.eup %7468  ;;  %v5143_v13 = vmul.f32 %v5015_v47, %v4375_v48  ;;  %7474 = vrcp.f32 %v3383_v3  ;;  %v3758_v8 = vmin.f32 %v3630_v57, 0.9999  ;;  %v4142_v56 = vsub.f32 0.0, %v16465_v43  ;;  %vm12987_vm8 = vmand %vm7869_vm4, %vm1967_vm1 }
 0x2fe   : > { %v5527_v61 = vmul.f32 %v5399_v62, %v4759_v49  ;;  %7476 = vlog2.f32 %v12933_v15  ;;  %vm1966_vm6 = vcmp.eq.s32.totalorder %v1740_v44, %v7867_v24  ;;  %v3322_v3 = vadd.f32 1.0, %v7469_v12  ;;  %1332 = vst.msk [vmem:[%s7898_s10 + $0x2d0] sm:$0xff] %vm1241_vm9, %v12962_v17  ;;  %vm2607_vm5 = vmand %vm7869_vm4, %vm12967_vm12  ;;  %v16468_v12 = vld [vmem:[#allocation49_spill] sm:$0xff] }
 0x2ff   : > { %v12981_v48 = vmul.f32 0.6931472, %v7467_v27  ;;  %v5423_v57 = vmul.f32 %v3759_v18, %v3759_v18  ;;  %7478 = vpow2.f32 %v3216_v7  ;;  %v3154_v63 = vmul.f32 1.442695, %v15594_v55  ;;  %vm13008_vm2 = vmxor %vm1966_vm6, %vm7688_vm13  ;;  %v16472_v55 = vld [vmem:[#allocation151_spill] sm:$0xff] }
 0x300   : > { %v12996_v49 = vsel %vm12950_vm0, 1.0, %v15680_v60  ;;  %v4399_v22 = vmin.f32 %v4271_v33, -0.000100005  ;;  %v5039_v62 = vmul.f32 %v4911_v1, %v4911_v1  ;;  %7480 = vpow2.f32 %v3274_v19  ;;  %v988_v19 = vpop.f32.mrf.mxu0  ;;  %vm13046_vm7 = vmand %vm7869_vm4, %vm1966_vm6 }
 0x301   : > { %v7471_v27 = vpop.eup %7470  ;;  %v13003_v18 = vmul.f32 %v16468_v12, %v5143_v13  ;;  %v4270_v9 = vmax.f32 %v4142_v56, -9.2103405  ;;  %v4910_v43 = vsub.f32 1.0, %v3758_v8  ;;  %7482 = vrcp.f32 %v3322_v3  ;;  %v1068_v12 = vpop.f32.mrf.mxu1  ;;  %vm2606_vm10 = vmand %vm7869_vm4, %vm13008_vm2 }
 0x302   : > { %v7473_v41 = vpop.eup %7472  ;;  %v13013_v26 = vmul.f32 %v16472_v55, %v5527_v61  ;;  %v13021_v33 = vsel %vm2617_vm15, 1.0, %v15680_v60  ;;  %v13026_v1 = vsel %vm12987_vm8, 1.0, %v15680_v60  ;;  %7484 = vlog2.f32 %v3322_v3  ;;  %v16475_v61 = vld [vmem:[#allocation154_spill] sm:$0xff] }
 0x303   : > { %16469 = vst [vmem:[#allocation11_spill] sm:$0xff] %v13003_v18  ;;  %v13028_v13 = vpop.eup %7474  ;;  %v16474_v55 = vsub.f32 0.0, %v12472_v36  ;;  %v6769_v51 = vsel %vm2607_vm5, 1.0, %v15680_v60  ;;  %v5551_v47 = vmul.f32 %v5423_v57, %v16475_v61  ;;  %7486 = vpow2.f32 %v3154_v63  ;;  %v1218_v36 = vpop.f32.mrf.mxu3 }
 0x304   : > { %16473 = vst [vmem:[#allocation144_spill] sm:$0xff] %v13013_v26  ;;  %v3608_v14 = vmax.f32 %v7471_v27, 0.0001  ;;  %v5167_v39 = vmul.f32 %v5039_v62, %v4399_v22  ;;  %v5422_v35 = vmul.f32 %v3758_v8, %v3758_v8  ;;  %v13055_v44 = vadd.f32 %v12959_v37, %v1218_v36 }
 0x305   : > { %v13033_v56 = vsub.f32 %v16474_v55, %v12981_v48  ;;  %v7477_v55 = vpop.eup %7476  ;;  %v3921_v61 = vmul.f32 0.6931472, %v7473_v41  ;;  %v4398_v21 = vmin.f32 %v4270_v9, -0.000100005  ;;  %v5038_v63 = vmul.f32 %v4910_v43, %v4910_v43 }
 0x306   : > { %v7479_v57 = vpop.eup %7478  ;;  %v13058_v10 = vadd.f32 %v12959_v37, %v988_v19  ;;  %7488 = vrcp.f32 %v12933_v15  ;;  %v6072_v22 = vadd.f32 %v12223_v6, %v12920_v5  ;;  %v13066_v8 = vsel %vm13046_vm7, 1.0, %v15680_v60  ;;  %1361 = vst.msk [vmem:[%s7898_s10 + $0x3b8] sm:$0xff] %vm1241_vm9, %v13055_v44 }
 0x307   : > { %v7481_v45 = vpop.eup %7480  ;;  %v13072_v41 = vadd.f32 %v12959_v37, %v1068_v12  ;;  %v4663_v27 = vmax.f32 %v13033_v56, -9.2103405  ;;  %v13075_v9 = vmul.f32 0.6931472, %v7477_v55  ;;  %v13077_v15 = vmul.f32 %v6769_v51, %v5551_v47  ;;  %v16481_v56 = vld [vmem:[#allocation43_spill] sm:$0xff] }
 0x308   : > { %v7483_v62 = vpop.eup %7482  ;;  %v6768_v6 = vsel %vm2606_vm10, 1.0, %v15680_v60  ;;  %1269 = vst.msk [vmem:[%s7898_s10 + $0xd8] sm:$0xff] %vm1241_vm9, %v13058_v10  ;;  %v3736_v43 = vmin.f32 %v3608_v14, 0.9999  ;;  %v13089_v19 = vmul.f32 %v13026_v1, %v5167_v39  ;;  %v5550_v3 = vmul.f32 %v5422_v35, %v16481_v56  ;;  %v1782_v39 = vpop.permute.xlu2 %1781 }
 0x309   : > { %16478 = vst [vmem:[#allocation49_spill] sm:$0xff] %v13075_v9  ;;  %v7485_v5 = vpop.eup %7484  ;;  %v3578_v36 = vmax.f32 %v7483_v62, 0.0001  ;;  %v4120_v47 = vsub.f32 0.0, %v3921_v61  ;;  %v13095_v12 = vmul.f32 %v5038_v63, %v4398_v21  ;;  %v6073_v7 = vadd.f32 %v13066_v8, %v6072_v22 }
 0x30a   : > { %16479 = vst [vmem:[#allocation151_spill] sm:$0xff] %v13077_v15  ;;  %v7487_v51 = vpop.eup %7486  ;;  %v3861_v55 = vmul.f32 0.6931472, %v7485_v5  ;;  %v16482_v15 = vsub.f32 0.0, %v12540_v42  ;;  %v13100_v14 = vadd.f32 1.0, %v7479_v57  ;;  %v16483_v62 = vsub.f32 0.0, %v12508_v53 }
 0x30b   : > { %16480 = vst [vmem:[#allocation154_spill] sm:$0xff] %v13089_v19  ;;  %v3706_v19 = vmin.f32 %v3578_v36, 0.9999  ;;  %v13106_v40 = vadd.f32 1.0, %v7481_v45  ;;  %v16484_v63 = vsub.f32 0.0, %v12882_v32  ;;  %v4888_v42 = vsub.f32 1.0, %v3736_v43 }
 0x30c   : > { %1301 = vst.msk [vmem:[%s7898_s10 + $0x1d8] sm:$0xff] %vm1241_vm9, %v13072_v41  ;;  %v4504_v46 = vsub.f32 %v16482_v15, %v3921_v61  ;;  %v4564_v56 = vsub.f32 %v16483_v62, %v13075_v9  ;;  %v4090_v21 = vsub.f32 0.0, %v3861_v55  ;;  %v13110_v5 = vpop.eup %7488  ;;  %v3353_v61 = vadd.f32 1.0, %v7487_v51 }
 0x30d   : > { %v4474_v22 = vsub.f32 %v16484_v63, %v3861_v55  ;;  %16485 = vst [vmem:[#allocation43_spill] sm:$0xff] %v13110_v5  ;;  %v3634_v57 = vmax.f32 %v12054_v52, 0.0001  ;;  %v4858_v15 = vsub.f32 1.0, %v3706_v19  ;;  %v4248_v36 = vmax.f32 %v4120_v47, -9.2103405  ;;  %v1752_v55 = vpop.permute.xlu1 %1751 }
 0x30e   : > { %vm1980_vm3 = vcmp.eq.s32.totalorder %v1782_v39, %v7867_v24  ;;  %v4218_v35 = vmax.f32 %v4090_v21, -9.2103405  ;;  %v4632_v53 = vmax.f32 %v4504_v46, -9.2103405  ;;  %7490 = vlog2.f32 %v13100_v14  ;;  %v16494_v39 = vld [vmem:[#allocation112_spill] sm:$0xff] }
 0x30f   : > { %v4602_v38 = vmax.f32 %v4474_v22, -9.2103405  ;;  %v4986_v45 = vmul.f32 %v4858_v15, %v4858_v15  ;;  %v16486_v62 = vsub.f32 0.0, %v13058_v10  ;;  %7492 = vlog2.f32 %v13106_v40  ;;  %vm13122_vm11 = vmxor %vm1980_vm3, %vm7688_vm13  ;;  %v1749_v22 = vpop.permute.xlu0 %1748 }
 0x310   : > { %v4346_v63 = vmin.f32 %v4218_v35, -0.000100005  ;;  %v5370_v9 = vmul.f32 %v3706_v19, %v3706_v19  ;;  %v4692_v52 = vmax.f32 %v4564_v56, -9.2103405  ;;  %v5016_v5 = vmul.f32 %v4888_v42, %v4888_v42  ;;  %vm13131_vm14 = vmand %vm7869_vm4, %vm1980_vm3  ;;  %v16491_v56 = vld [vmem:[#allocation25_spill] sm:$0xff] }
 0x311   : > { %v3094_v32 = vmul.f32 1.442695, %v16486_v62  ;;  %v4730_v51 = vmin.f32 %v4602_v38, -0.000100005  ;;  %v6074_v47 = vadd.f32 %v13026_v1, %v6073_v7  ;;  %7494 = vrcp.f32 %v3353_v61  ;;  %vm2620_vm0 = vmand %vm7869_vm4, %vm13122_vm11 }
 0x312   : > { %v4376_v21 = vmin.f32 %v4248_v36, -0.000100005  ;;  %7496 = vlog2.f32 %v3353_v61  ;;  %v5114_v15 = vmul.f32 %v4986_v45, %v4346_v63  ;;  %v4760_v35 = vmin.f32 %v4632_v53, -0.000100005  ;;  %v16492_v61 = vld [vmem:[#allocation52_spill] sm:$0xff] }
 0x313   : > { %v5498_v62 = vmul.f32 %v5370_v9, %v4730_v51  ;;  %v5400_v38 = vmul.f32 %v3736_v43, %v3736_v43  ;;  %vm1970_vm1 = vcmp.eq.s32.totalorder %v1752_v55, %v7867_v24  ;;  %7498 = vpow2.f32 %v3094_v32  ;;  %v16502_v55 = vld [vmem:[#allocation163_spill] sm:$0xff] }
 0x314   : > { %v3762_v19 = vmin.f32 %v3634_v57, 0.9999  ;;  %v15599_v7 = vsub.f32 0.0, %v12735_v30  ;;  %v5242_v42 = vmul.f32 %v16491_v56, %v5114_v15  ;;  %v7491_v36 = vpop.eup %7490  ;;  %v13138_v43 = vmin.f32 %v4663_v27, -0.000100005  ;;  %vm13152_vm15 = vmand %vm7869_vm4, %vm1970_vm1 }
 0x315   : > { %v5626_v9 = vmul.f32 %v16492_v61, %v5498_v62  ;;  %v13140_v53 = vmul.f32 %v6768_v6, %v5550_v3  ;;  %v4146_v45 = vsub.f32 0.0, %v16494_v39  ;;  %vm1969_vm12 = vcmp.eq.s32.totalorder %v1749_v22, %v7867_v24  ;;  %v7493_v57 = vpop.eup %7492  ;;  %v16497_v6 = vld [vmem:[#allocation162_spill] sm:$0xff]  ;;  %vm13172_vm6 = vmxor %vm1970_vm1, %vm7688_vm13  ;;  %v16505_v61 = vld [vmem:[#allocation127_spill] sm:$0xff] }
 0x316   : > { %v5144_v32 = vmul.f32 %v5016_v5, %v4376_v21  ;;  %v3633_v3 = vmax.f32 %v16497_v6, 0.0001  ;;  %v13158_v63 = vadd.f32 %v12896_v31, %v5242_v42  ;;  %v13163_v62 = vmin.f32 %v4692_v52, -0.000100005  ;;  %vm2097_vm8 = vmand %vm7869_vm4, %vm1969_vm12 }
 0x317   : > { %16493 = vst [vmem:[#allocation25_spill] sm:$0xff] %v13140_v53  ;;  %v13161_v51 = vadd.f32 %v12899_v20, %v5626_v9  ;;  %v7495_v15 = vpop.eup %7494  ;;  %v5528_v5 = vmul.f32 %v5400_v38, %v4760_v35  ;;  %v13167_v21 = vmul.f32 %v13066_v8, %v13095_v12  ;;  %v6075_v31 = vadd.f32 %v12404_v4, %v6074_v47  ;;  %v16503_v35 = vld [vmem:[#allocation126_spill] sm:$0xff]  ;;  %vm2610_vm5 = vmand %vm7869_vm4, %vm13172_vm6 }
 0x318   : > { %16498 = vst [vmem:[#allocation52_spill] sm:$0xff] %v13163_v62  ;;  %v7497_v42 = vpop.eup %7496  ;;  %7500 = vrcp.f32 %v13100_v14  ;;  %v13181_v20 = vsel %vm13131_vm14, 1.0, %v15680_v60  ;;  %v4914_v52 = vsub.f32 1.0, %v3762_v19  ;;  %v3218_v8 = vmul.f32 1.442695, %v15599_v7  ;;  %vm13220_vm2 = vmxor %vm1969_vm12, %vm7688_vm13  ;;  %v16513_v62 = vld [vmem:[#allocation132_spill] sm:$0xff] }
 0x319   : > { %16499 = vst [vmem:[#allocation112_spill] sm:$0xff] %v13167_v21  ;;  %v7499_v12 = vpop.eup %7498  ;;  %7502 = vrcp.f32 %v13106_v40  ;;  %v13196_v4 = vsel %vm2620_vm0, 1.0, %v15680_v60  ;;  %v4274_v14 = vmax.f32 %v4146_v45, -9.2103405  ;;  %v4145_v47 = vsub.f32 0.0, %v16502_v55  ;;  %vm2609_vm7 = vmand %vm7869_vm4, %vm13220_vm2 }
 0x31a   : > { %v13200_v38 = vmul.f32 %v16503_v35, %v5144_v32  ;;  %v6644_v1 = vsel %vm13152_vm15, 1.0, %v15680_v60  ;;  %v3761_v40 = vmin.f32 %v3633_v3, 0.9999  ;;  %v3323_v46 = vadd.f32 1.0, %v7499_v12 }
 0x31b   : > { %v13210_v9 = vmul.f32 %v16505_v61, %v5528_v5  ;;  %v13212_v39 = vmul.f32 0.6931472, %v7491_v36  ;;  %v3923_v45 = vmul.f32 0.6931472, %v7497_v42  ;;  %v13215_v32 = vsel %vm2097_vm8, 1.0, %v15680_v60  ;;  %v1148_v42 = vpop.f32.mrf.mxu2  ;;  %v991_v61 = vpop.f32.mrf.mxu0 }
 0x31c   : > { %16504 = vst [vmem:[#allocation162_spill] sm:$0xff] %v13200_v38  ;;  %v3609_v6 = vmax.f32 %v7495_v15, 0.0001  ;;  %v5042_v55 = vmul.f32 %v4914_v52, %v4914_v52  ;;  %v5426_v3 = vmul.f32 %v3762_v19, %v3762_v19  ;;  %7504 = vpow2.f32 %v3218_v8 }
 0x31d   : > { %16506 = vst [vmem:[#allocation163_spill] sm:$0xff] %v13210_v9  ;;  %v13224_v12 = vmul.f32 0.6931472, %v7493_v57  ;;  %v4402_v5 = vmin.f32 %v4274_v14, -0.000100005  ;;  %7506 = vrcp.f32 %v3323_v46  ;;  %v6772_v22 = vsel %vm2610_vm5, 1.0, %v15680_v60 }
 0x31e   : > { %v4273_v36 = vmax.f32 %v4145_v47, -9.2103405  ;;  %v13226_v35 = vpop.eup %7500  ;;  %v4913_v19 = vsub.f32 1.0, %v3761_v40  ;;  %7508 = vlog2.f32 %v3323_v46  ;;  %v16511_v52 = vsub.f32 0.0, %v12635_v34 }
 0x31f   : > { %16509 = vst [vmem:[#allocation126_spill] sm:$0xff] %v13224_v12  ;;  %v13239_v15 = vpop.eup %7502  ;;  %v4121_v14 = vsub.f32 0.0, %v3923_v45  ;;  %v6076_v56 = vadd.f32 %v13215_v32, %v6075_v31  ;;  %v15601_v47 = vsub.f32 0.0, %v12877_v11  ;;  %v3737_v7 = vmin.f32 %v3609_v6, 0.9999 }
 0x320   : > { %16510 = vst [vmem:[#allocation127_spill] sm:$0xff] %v13239_v15  ;;  %v4536_v8 = vsub.f32 %v16511_v52, %v13212_v39  ;;  %v16512_v53 = vsub.f32 0.0, %v12720_v29  ;;  %v5554_v57 = vmul.f32 %v5426_v3, %v16513_v62  ;;  %v13250_v46 = vadd.f32 %v12959_v37, %v1148_v42 }
 0x321   : > { %v16514_v34 = vsub.f32 0.0, %v12693_v28  ;;  %v5170_v15 = vmul.f32 %v5042_v55, %v4402_v5  ;;  %v13261_v31 = vsel %vm2609_vm7, 1.0, %v15680_v60  ;;  %v4401_v29 = vmin.f32 %v4273_v36, -0.000100005 }
 0x322   : > { %v4505_v21 = vsub.f32 %v16512_v53, %v3923_v45  ;;  %v1221_v53 = vpop.f32.mrf.mxu3  ;;  %v7505_v45 = vpop.eup %7504  ;;  %v5041_v62 = vmul.f32 %v4913_v19, %v4913_v19  ;;  %v16515_v6 = vsub.f32 0.0, %v12890_v16  ;;  %1333 = vst.msk [vmem:[%s7898_s10 + $0x2d8] sm:$0xff] %vm1241_vm9, %v13250_v46  ;;  %v13272_v55 = vadd.f32 %v12959_v37, %v991_v61 }
 0x323   : > { %v4565_v52 = vsub.f32 %v16514_v34, %v13224_v12  ;;  %v13269_v28 = vadd.f32 %v12959_v37, %v1221_v53  ;;  %v7507_v27 = vpop.eup %7506  ;;  %v4664_v5 = vmax.f32 %v4536_v8, -9.2103405  ;;  %v4249_v36 = vmax.f32 %v4121_v14, -9.2103405 }
 0x324   : > { %v3156_v3 = vmul.f32 1.442695, %v16515_v6  ;;  %v13274_v42 = vadd.f32 %v6644_v1, %v6076_v56  ;;  %v3276_v19 = vmul.f32 1.442695, %v15601_v47  ;;  %v7509_v34 = vpop.eup %7508  ;;  %v4633_v6 = vmax.f32 %v4505_v21, -9.2103405 }
 0x325   : > { %v4889_v12 = vsub.f32 1.0, %v3737_v7  ;;  %v13278_v9 = vmul.f32 %v6772_v22, %v5554_v57  ;;  %v3579_v26 = vmax.f32 %v7507_v27, 0.0001  ;;  %1362 = vst.msk [vmem:[%s7898_s10 + $0x3c0] sm:$0xff] %vm1241_vm9, %v13269_v28  ;;  %v13283_v61 = vmul.f32 %v6644_v1, %v5170_v15  ;;  %v1791_v15 = vpop.permute.xlu2 %1790 }
 0x326   : > { %v5425_v53 = vmul.f32 %v3761_v40, %v3761_v40  ;;  %v3385_v38 = vadd.f32 1.0, %v7505_v45  ;;  %v3863_v8 = vmul.f32 0.6931472, %v7509_v34  ;;  %1270 = vst.msk [vmem:[%s7898_s10 + $0xe0] sm:$0xff] %vm1241_vm9, %v13272_v55  ;;  %v4693_v14 = vmax.f32 %v4565_v52, -9.2103405 }
 0x327   : > { %16516 = vst [vmem:[#allocation132_spill] sm:$0xff] %v13278_v9  ;;  %v5169_v56 = vmul.f32 %v5041_v62, %v4401_v29  ;;  %7510 = vpow2.f32 %v3156_v3  ;;  %v3707_v47 = vmin.f32 %v3579_v26, 0.9999  ;;  %v5401_v21 = vmul.f32 %v3737_v7, %v3737_v7  ;;  %v1761_v26 = vpop.permute.xlu1 %1760 }
 0x328   : > { %16517 = vst [vmem:[#allocation182_spill] sm:$0xff] %v13283_v61  ;;  %7512 = vpow2.f32 %v3276_v19  ;;  %v4091_v22 = vsub.f32 0.0, %v3863_v8  ;;  %v16518_v57 = vsub.f32 0.0, %v13058_v10  ;;  %v4377_v9 = vmin.f32 %v4249_v36, -0.000100005 }
 0x329   : > { %v4761_v18 = vmin.f32 %v4633_v6, -0.000100005  ;;  %v5017_v1 = vmul.f32 %v4889_v12, %v4889_v12  ;;  %v4859_v40 = vsub.f32 1.0, %v3707_v47  ;;  %v13290_v45 = vmin.f32 %v4664_v5, -0.000100005  ;;  %v1071_v12 = vpop.f32.mrf.mxu1 }
 0x32a   : > { %v4475_v27 = vsub.f32 %v16518_v57, %v3863_v8  ;;  %7514 = vrcp.f32 %v3385_v38  ;;  %v4219_v34 = vmax.f32 %v4091_v22, -9.2103405  ;;  %v13292_v52 = vmin.f32 %v4693_v14, -0.000100005  ;;  %v16521_v8 = vld [vmem:[#allocation39_spill] sm:$0xff]  ;;  %v1758_v22 = vpop.permute.xlu0 %1757 }
 0x32b   : > { %7516 = vlog2.f32 %v3385_v38  ;;  %v3637_v7 = vmax.f32 %v12669_v54, 0.0001  ;;  %v4987_v29 = vmul.f32 %v4859_v40, %v4859_v40  ;;  %vm1983_vm10 = vcmp.eq.s32.totalorder %v1791_v15, %v7867_v24 }
 0x32c   : > { %v4603_v61 = vmax.f32 %v4475_v27, -9.2103405  ;;  %16519 = vst [vmem:[#allocation183_spill] sm:$0xff] %v13292_v52  ;;  %v4347_v10 = vmin.f32 %v4219_v34, -0.000100005  ;;  %v5371_v3 = vmul.f32 %v3707_v47, %v3707_v47  ;;  %v5145_v19 = vmul.f32 %v5017_v1, %v4377_v9  ;;  %vm13305_vm11 = vmxor %vm1983_vm10, %vm7688_vm13 }
 0x32d   : > { %v7511_v36 = vpop.eup %7510  ;;  %v5529_v5 = vmul.f32 %v5401_v21, %v4761_v18  ;;  %v13297_v6 = vmul.f32 %v13215_v32, %v5169_v56  ;;  %v5553_v14 = vmul.f32 %v5425_v53, %v16521_v8  ;;  %vm1973_vm3 = vcmp.eq.s32.totalorder %v1761_v26, %v7867_v24  ;;  %vm13318_vm1 = vmand %vm7869_vm4, %vm1983_vm10  ;;  %v16526_v21 = vld [vmem:[#allocation31_spill] sm:$0xff] }
 0x32e   : > { %v4731_v62 = vmin.f32 %v4603_v61, -0.000100005  ;;  %v7513_v38 = vpop.eup %7512  ;;  %v3636_v54 = vmax.f32 %v12474_v0, 0.0001  ;;  %v5115_v57 = vmul.f32 %v4987_v29, %v4347_v10  ;;  %v3765_v18 = vmin.f32 %v3637_v7, 0.9999  ;;  %vm13333_vm0 = vmxor %vm1973_vm3, %vm7688_vm13 }
 0x32f   : > { %16520 = vst [vmem:[#allocation184_spill] sm:$0xff] %v13297_v6  ;;  %v4149_v9 = vsub.f32 0.0, %v12602_v23  ;;  %v15603_v32 = vsub.f32 0.0, %v13272_v55  ;;  %v13312_v61 = vadd.f32 %v12959_v37, %v1071_v12  ;;  %v3354_v0 = vadd.f32 1.0, %v7511_v36  ;;  %v16527_v23 = vld [vmem:[#allocation83_spill] sm:$0xff]  ;;  %vm2623_vm12 = vmand %vm7869_vm4, %vm13305_vm11 }
 0x330   : > { %v5499_v27 = vmul.f32 %v5371_v3, %v4731_v62  ;;  %v7515_v53 = vpop.eup %7514  ;;  %vm1972_vm14 = vcmp.eq.s32.totalorder %v1758_v22, %v7867_v24  ;;  %v5243_v1 = vmul.f32 %v16526_v21, %v5115_v57  ;;  %v13326_v7 = vmul.f32 %v13261_v31, %v5553_v14  ;;  %v16531_v57 = vld [vmem:[#allocation158_spill] sm:$0xff]  ;;  %vm2613_vm6 = vmand %vm7869_vm4, %vm13333_vm0 }
 0x331   : > { %v7517_v34 = vpop.eup %7516  ;;  %v13328_v29 = vadd.f32 1.0, %v7513_v38  ;;  %v15602_v10 = vsub.f32 0.0, %v12962_v17  ;;  %v3096_v62 = vmul.f32 1.442695, %v15603_v32  ;;  %1302 = vst.msk [vmem:[%s7898_s10 + $0x1e0] sm:$0xff] %vm1241_vm9, %v13312_v61  ;;  %v4148_v3 = vsub.f32 0.0, %v12455_v2  ;;  %vm2100_vm15 = vmand %vm7869_vm4, %vm1972_vm14 }
 0x332   : > { %v5627_v40 = vmul.f32 %v16527_v23, %v5499_v27  ;;  %16528 = vst [vmem:[#allocation39_spill] sm:$0xff] %v13326_v7  ;;  %v3764_v31 = vmin.f32 %v3636_v54, 0.9999  ;;  %v13349_v12 = vadd.f32 %v13158_v63, %v5243_v1  ;;  %v3641_v8 = vmax.f32 %v7515_v53, 0.0001  ;;  %v16532_v54 = vld [vmem:[#allocation59_spill] sm:$0xff]  ;;  %vm13377_vm8 = vmxor %vm1972_vm14, %vm7688_vm13 }
 0x333   : > { %v4277_v14 = vmax.f32 %v4149_v9, -9.2103405  ;;  %v4917_v38 = vsub.f32 1.0, %v3765_v18  ;;  %7518 = vpow2.f32 %v3096_v62  ;;  %v13359_v27 = vmul.f32 %v16531_v57, %v5145_v19  ;;  %vm13388_vm5 = vmand %vm7869_vm4, %vm1973_vm3 }
 0x334   : > { %v13352_v36 = vadd.f32 %v13161_v51, %v5627_v40  ;;  %v13362_v2 = vmul.f32 %v16532_v54, %v5529_v5  ;;  %v3987_v63 = vmul.f32 0.6931472, %v7517_v34  ;;  %7520 = vlog2.f32 %v3354_v0  ;;  %vm2612_vm2 = vmand %vm7869_vm4, %vm13377_vm8 }
 0x335   : > { %7522 = vlog2.f32 %v13328_v29  ;;  %v13372_v51 = vsel %vm13318_vm1, 1.0, %v15680_v60  ;;  %v5429_v9 = vmul.f32 %v3765_v18, %v3765_v18  ;;  %v3220_v5 = vmul.f32 1.442695, %v15602_v10 }
 0x336   : > { %7524 = vrcp.f32 %v3354_v0  ;;  %v6646_v53 = vsel %vm2100_vm15, 1.0, %v15680_v60  ;;  %v4276_v21 = vmax.f32 %v4148_v3, -9.2103405  ;;  %v4916_v1 = vsub.f32 1.0, %v3764_v31 }
 0x337   : > { %v3769_v23 = vmin.f32 %v3641_v8, 0.9999  ;;  %v4405_v22 = vmin.f32 %v4277_v14, -0.000100005  ;;  %v5045_v56 = vmul.f32 %v4917_v38, %v4917_v38  ;;  %v6078_v40 = vadd.f32 %v12607_v50, %v13274_v42 }
 0x338   : > { %v4153_v34 = vsub.f32 0.0, %v3987_v63  ;;  %v13400_v0 = vsel %vm2623_vm12, 1.0, %v15680_v60  ;;  %v6775_v26 = vsel %vm2613_vm6, 1.0, %v15680_v60  ;;  %v16538_v47 = vsub.f32 0.0, %v12735_v30 }
 0x339   : > { %16537 = vst [vmem:[#allocation31_spill] sm:$0xff] %v13400_v0  ;;  %v7519_v42 = vpop.eup %7518  ;;  %v5557_v3 = vmul.f32 %v5429_v9, %v12695_v58  ;;  %v6079_v8 = vadd.f32 %v6646_v53, %v6078_v40  ;;  %7526 = vpow2.f32 %v3220_v5  ;;  %v4404_v38 = vmin.f32 %v4276_v21, -0.000100005  ;;  %v16542_v40 = vld [vmem:[#allocation21_spill] sm:$0xff] }
 0x33a   : > { %v4537_v62 = vsub.f32 %v16538_v47, %v3987_v63  ;;  %v7521_v14 = vpop.eup %7520  ;;  %v5044_v15 = vmul.f32 %v4916_v1, %v4916_v1  ;;  %v5428_v57 = vmul.f32 %v3764_v31, %v3764_v31  ;;  %v3324_v54 = vadd.f32 1.0, %v7519_v42  ;;  %v1151_v47 = vpop.f32.mrf.mxu2 }
 0x33b   : > { %v7523_v10 = vpop.eup %7522  ;;  %v4921_v32 = vsub.f32 1.0, %v3769_v23  ;;  %v6647_v52 = vsel %vm13388_vm5, 1.0, %v15680_v60  ;;  %v5173_v50 = vmul.f32 %v5045_v56, %v4405_v22  ;;  %v6774_v58 = vsel %vm2612_vm2, 1.0, %v15680_v60 }
 0x33c   : > { %v7525_v30 = vpop.eup %7524  ;;  %v4281_v63 = vmax.f32 %v4153_v34, -9.2103405  ;;  %v16539_v31 = vsub.f32 0.0, %v13072_v41  ;;  %7528 = vrcp.f32 %v3324_v54  ;;  %v4665_v21 = vmax.f32 %v4537_v62, -9.2103405  ;;  %v993_v34 = vpop.f32.mrf.mxu0 }
 0x33d   : > { %v3925_v1 = vmul.f32 0.6931472, %v7521_v14  ;;  %v13428_v18 = vmul.f32 %v6775_v26, %v5557_v3  ;;  %7530 = vlog2.f32 %v3324_v54  ;;  %v13430_v22 = vmul.f32 0.6931472, %v7523_v10  ;;  %v13440_v14 = vpop.permute.xlu2 %1799 }
 0x33e   : > { %v3158_v5 = vmul.f32 1.442695, %v16539_v31  ;;  %v5172_v56 = vmul.f32 %v5044_v15, %v4404_v38  ;;  %v5556_v19 = vmul.f32 %v5428_v57, %v16542_v40  ;;  %v13433_v42 = vadd.f32 %v6647_v52, %v6079_v8  ;;  %v1223_v40 = vpop.f32.mrf.mxu3 }
 0x33f   : > { %16540 = vst [vmem:[#allocation83_spill] sm:$0xff] %v13428_v18  ;;  %v7527_v7 = vpop.eup %7526  ;;  %v5433_v9 = vmul.f32 %v3769_v23, %v3769_v23  ;;  %7532 = vrcp.f32 %v13328_v29  ;;  %v3610_v31 = vmax.f32 %v7525_v30, 0.0001  ;;  %v13436_v6 = vmul.f32 %v6647_v52, %v5173_v50 }
 0x340   : > { %16541 = vst [vmem:[#allocation158_spill] sm:$0xff] %v13430_v22  ;;  %v4409_v62 = vmin.f32 %v4281_v63, -0.000100005  ;;  %v5049_v26 = vmul.f32 %v4921_v32, %v4921_v32  ;;  %v16544_v3 = vsub.f32 0.0, %v13055_v44  ;;  %7534 = vpow2.f32 %v3158_v5 }
 0x341   : > { %16543 = vst [vmem:[#allocation59_spill] sm:$0xff] %v13436_v6  ;;  %v4793_v8 = vmin.f32 %v4665_v21, -0.000100005  ;;  %v16545_v38 = vsub.f32 0.0, %v12890_v16  ;;  %v13445_v23 = vadd.f32 %v12959_v37, %v1151_v47  ;;  %v13448_v29 = vadd.f32 %v12959_v37, %v993_v34 }
 0x342   : > { %v3278_v10 = vmul.f32 1.442695, %v16544_v3  ;;  %v7529_v52 = vpop.eup %7528  ;;  %v16546_v32 = vsub.f32 0.0, %v12877_v11  ;;  %v13455_v57 = vmul.f32 %v6646_v53, %v5172_v56  ;;  %v13457_v54 = vmul.f32 %v6774_v58, %v5556_v19  ;;  %v16550_v56 = vld [vmem:[#allocation20_spill] sm:$0xff] }
 0x343   : > { %v4506_v15 = vsub.f32 %v16545_v38, %v3925_v1  ;;  %v3386_v30 = vadd.f32 1.0, %v7527_v7  ;;  %v7531_v16 = vpop.eup %7530  ;;  %v3738_v63 = vmin.f32 %v3610_v31, 0.9999  ;;  %v4122_v5 = vsub.f32 0.0, %v3925_v1  ;;  %1334 = vst.msk [vmem:[%s7898_s10 + $0x2e0] sm:$0xff] %vm1241_vm9, %v13445_v23 }
 0x344   : > { %v13453_v50 = vsub.f32 %v16546_v32, %v13430_v22  ;;  %16547 = vst [vmem:[#allocation21_spill] sm:$0xff] %v13455_v57  ;;  %vm1986_vm7 = vcmp.eq.s32.totalorder %v13440_v14, %v7867_v24  ;;  %v3580_v21 = vmax.f32 %v7529_v52, 0.0001  ;;  %v5177_v11 = vmul.f32 %v5049_v26, %v4409_v62  ;;  %v16552_v32 = vld [vmem:[#allocation26_spill] sm:$0xff] }
 0x345   : > { %16548 = vst [vmem:[#allocation185_spill] sm:$0xff] %v13457_v54  ;;  %7536 = vpow2.f32 %v3278_v10  ;;  %v3865_v47 = vmul.f32 0.6931472, %v7531_v16  ;;  %v13465_v53 = vadd.f32 %v12959_v37, %v1223_v40  ;;  %v13470_v7 = vpop.eup %7532  ;;  %v5561_v58 = vmul.f32 %v5433_v9, %v4793_v8  ;;  %v1073_v8 = vpop.f32.mrf.mxu1  ;;  %vm13498_vm10 = vmxor %vm1986_vm7, %vm7688_vm13 }
 0x346   : > { %1271 = vst.msk [vmem:[%s7898_s10 + $0xe8] sm:$0xff] %vm1241_vm9, %v13448_v29  ;;  %v4634_v1 = vmax.f32 %v4506_v15, -9.2103405  ;;  %v4162_v19 = vsub.f32 0.0, %v16550_v56  ;;  %v3708_v34 = vmin.f32 %v3580_v21, 0.9999  ;;  %v7535_v31 = vpop.eup %7534  ;;  %7538 = vlog2.f32 %v3386_v30  ;;  %vm13514_vm11 = vmand %vm7869_vm4, %vm1986_vm7 }
 0x347   : > { %16549 = vst [vmem:[#allocation186_spill] sm:$0xff] %v13470_v7  ;;  %v4694_v3 = vmax.f32 %v13453_v50, -9.2103405  ;;  %v4092_v62 = vsub.f32 0.0, %v3865_v47  ;;  %v16551_v26 = vsub.f32 0.0, %v13272_v55  ;;  %v4890_v52 = vsub.f32 1.0, %v3738_v63  ;;  %vm2626_vm1 = vmand %vm7869_vm4, %vm13498_vm10 }
 0x348   : > { %1363 = vst.msk [vmem:[%s7898_s10 + $0x3c8] sm:$0xff] %vm1241_vm9, %v13465_v53  ;;  %v4250_v38 = vmax.f32 %v4122_v5, -9.2103405  ;;  %v3650_v16 = vmax.f32 %v16552_v32, 0.0001  ;;  %v4860_v9 = vsub.f32 1.0, %v3708_v34  ;;  %v13481_v15 = vmul.f32 %v12996_v49, %v5177_v11 }
 0x349   : > { %v4476_v10 = vsub.f32 %v16551_v26, %v3865_v47  ;;  %v3640_v21 = vmax.f32 %v13226_v35, 0.0001  ;;  %v4220_v50 = vmax.f32 %v4092_v62, -9.2103405  ;;  %v4762_v56 = vmin.f32 %v4634_v1, -0.000100005 }
 0x34a   : > { %16553 = vst [vmem:[#allocation20_spill] sm:$0xff] %v13481_v15  ;;  %v5402_v22 = vmul.f32 %v3738_v63, %v3738_v63  ;;  %v3355_v55 = vadd.f32 1.0, %v7535_v31  ;;  %v4988_v47 = vmul.f32 %v4860_v9, %v4860_v9  ;;  %v5372_v18 = vmul.f32 %v3708_v34, %v3708_v34  ;;  %v1770_v15 = vpop.permute.xlu1 %1769 }
 0x34b   : > { %v4604_v40 = vmax.f32 %v4476_v10, -9.2103405  ;;  %v7537_v26 = vpop.eup %7536  ;;  %v4348_v7 = vmin.f32 %v4220_v50, -0.000100005  ;;  %v13485_v32 = vadd.f32 %v12959_v37, %v1073_v8  ;;  %v4378_v54 = vmin.f32 %v4250_v38, -0.000100005 }
 0x34c   : > { %7540 = vrcp.f32 %v3386_v30  ;;  %v3778_v11 = vmin.f32 %v3650_v16, 0.9999  ;;  %v15606_v35 = vsub.f32 0.0, %v13448_v29  ;;  %v7539_v62 = vpop.eup %7538  ;;  %v3768_v10 = vmin.f32 %v3640_v21, 0.9999 }
 0x34d   : > { %v4732_v5 = vmin.f32 %v4604_v40, -0.000100005  ;;  %v4152_v63 = vsub.f32 0.0, %v13212_v39  ;;  %v5116_v1 = vmul.f32 %v4988_v47, %v4348_v7  ;;  %1303 = vst.msk [vmem:[%s7898_s10 + $0x1e8] sm:$0xff] %vm1241_vm9, %v13485_v32  ;;  %v5018_v9 = vmul.f32 %v4890_v52, %v4890_v52  ;;  %v16557_v52 = vld [vmem:[#allocation82_spill] sm:$0xff] }
 0x34e   : > { %v13492_v34 = vadd.f32 1.0, %v7537_v26  ;;  %v4290_v38 = vmax.f32 %v4162_v19, -9.2103405  ;;  %v3098_v39 = vmul.f32 1.442695, %v15606_v35  ;;  %7542 = vlog2.f32 %v3355_v55 }
 0x34f   : > { %v5500_v31 = vmul.f32 %v5372_v18, %v4732_v5  ;;  %vm1976_vm3 = vcmp.eq.s32.totalorder %v1770_v15, %v7867_v24  ;;  %v16556_v18 = vld [vmem:[#allocation30_spill] sm:$0xff]  ;;  %v13507_v8 = vmul.f32 0.6931472, %v7539_v62  ;;  %v4930_v19 = vsub.f32 1.0, %v3778_v11  ;;  %v1226_v15 = vpop.f32.mrf.mxu3 }
 0x350   : > { %v5244_v7 = vmul.f32 %v16556_v18, %v5116_v1  ;;  %v15605_v50 = vsub.f32 0.0, %v13250_v46  ;;  %7544 = vpow2.f32 %v3098_v39  ;;  %v4280_v40 = vmax.f32 %v4152_v63, -9.2103405  ;;  %v1153_v39 = vpop.f32.mrf.mxu2  ;;  %vm13546_vm14 = vmand %vm7869_vm4, %vm1976_vm3 }
 0x351   : > { %v5628_v16 = vmul.f32 %v16557_v52, %v5500_v31  ;;  %v4920_v47 = vsub.f32 1.0, %v3768_v10  ;;  %v13532_v62 = vmul.f32 %v13021_v33, %v5561_v58  ;;  %v13534_v1 = vmin.f32 %v4694_v3, -0.000100005  ;;  %vm13559_vm0 = vmxor %vm1976_vm3, %vm7688_vm13 }
 0x352   : > { %v13524_v26 = vadd.f32 %v13349_v12, %v5244_v7  ;;  %v13529_v5 = vpop.eup %7540  ;;  %v5530_v31 = vmul.f32 %v5402_v22, %v4762_v56  ;;  %7546 = vlog2.f32 %v13492_v34  ;;  %v5146_v18 = vmul.f32 %v5018_v9, %v4378_v54  ;;  %vm2616_vm12 = vmand %vm7869_vm4, %vm13559_vm0 }
 0x353   : > { %v13527_v14 = vadd.f32 %v13352_v36, %v5628_v16  ;;  %16560 = vst [vmem:[#allocation26_spill] sm:$0xff] %v13532_v62  ;;  %7548 = vrcp.f32 %v3355_v55  ;;  %v13540_v12 = vsel %vm13514_vm11, 1.0, %v15680_v60  ;;  %v5442_v36 = vmul.f32 %v3778_v11, %v3778_v11  ;;  %v16567_v16 = vld [vmem:[#allocation157_spill] sm:$0xff]  ;;  %v1809_v62 = vpop.permute.xlu2 %1808 }
 0x354   : > { %16561 = vst [vmem:[#allocation30_spill] sm:$0xff] %v13534_v1  ;;  %v6788_v22 = vsel %vm2626_vm1, 1.0, %v15680_v60  ;;  %v4418_v54 = vmin.f32 %v4290_v38, -0.000100005  ;;  %v5058_v58 = vmul.f32 %v4930_v19, %v4930_v19  ;;  %v3222_v56 = vmul.f32 1.442695, %v15605_v50  ;;  %v7543_v55 = vpop.eup %7542  ;;  %v13568_v38 = vpop.permute.xlu0 %1766 }
 0x355   : > { %v16566_v11 = vsub.f32 0.0, %v12962_v17  ;;  %v4408_v9 = vmin.f32 %v4280_v40, -0.000100005  ;;  %v5048_v30 = vmul.f32 %v4920_v47, %v4920_v47  ;;  %v13571_v7 = vadd.f32 %v12959_v37, %v1153_v39  ;;  %v16568_v40 = vld [vmem:[#allocation67_spill] sm:$0xff] }
 0x356   : > { %v7545_v52 = vpop.eup %7544  ;;  %v13574_v21 = vmul.f32 %v16567_v16, %v5530_v31  ;;  %v3639_v19 = vmax.f32 %v13028_v13, 0.0001  ;;  %v4151_v50 = vsub.f32 0.0, %v12981_v48  ;;  %v13579_v17 = vadd.f32 %v12959_v37, %v1226_v15 }
 0x357   : > { %v4538_v63 = vsub.f32 %v16566_v11, %v13507_v8  ;;  %v13582_v47 = vmul.f32 %v16568_v40, %v5146_v18  ;;  %v16569_v11 = vld [vmem:[#allocation80_spill] sm:$0xff]  ;;  %v13588_v39 = vsel %vm13546_vm14, 1.0, %v15680_v60  ;;  %v3325_v13 = vadd.f32 1.0, %v7545_v52  ;;  %1335 = vst.msk [vmem:[%s7898_s10 + $0x2e8] sm:$0xff] %vm1241_vm9, %v13571_v7 }
 0x358   : > { %v5570_v35 = vmul.f32 %v5442_v36, %v16569_v11  ;;  %v7547_v48 = vpop.eup %7546  ;;  %v5186_v31 = vmul.f32 %v5058_v58, %v4418_v54  ;;  %v5432_v18 = vmul.f32 %v3768_v10, %v3768_v10  ;;  %vm1975_vm15 = vcmp.eq.s32.totalorder %v13568_v38, %v7867_v24  ;;  %1364 = vst.msk [vmem:[%s7898_s10 + $0x3d0] sm:$0xff] %vm1241_vm9, %v13579_v17 }
 0x359   : > { %7550 = vpow2.f32 %v3222_v56  ;;  %v7549_v36 = vpop.eup %7548  ;;  %v4666_v33 = vmax.f32 %v4538_v63, -9.2103405  ;;  %v3927_v3 = vmul.f32 0.6931472, %v7543_v55  ;;  %v5176_v15 = vmul.f32 %v5048_v30, %v4408_v9  ;;  %vm2103_vm6 = vmand %vm7869_vm4, %vm1975_vm15  ;;  %v996_v56 = vpop.f32.mrf.mxu0 }
 0x35a   : > { %7552 = vrcp.f32 %v3325_v13  ;;  %v6778_v52 = vsel %vm2616_vm12, 1.0, %v15680_v60  ;;  %v3767_v16 = vmin.f32 %v3639_v19, 0.9999  ;;  %v13603_v40 = vmax.f32 %v4151_v50, -9.2103405  ;;  %v1076_v9 = vpop.f32.mrf.mxu1  ;;  %vm13659_vm8 = vmxor %vm1975_vm15, %vm7688_vm13 }
 0x35b   : > { %7554 = vlog2.f32 %v3325_v13  ;;  %v13606_v10 = vmul.f32 0.6931472, %v7547_v48  ;;  %v15607_v54 = vsub.f32 0.0, %v13269_v28  ;;  %v15608_v58 = vsub.f32 0.0, %v13312_v61  ;;  %vm2615_vm5 = vmand %vm7869_vm4, %vm13659_vm8 }
 0x35c   : > { %7556 = vrcp.f32 %v13492_v34  ;;  %v3611_v55 = vmax.f32 %v7549_v36, 0.0001  ;;  %v13616_v50 = vmul.f32 %v13540_v12, %v5186_v31  ;;  %v13618_v63 = vmul.f32 %v6788_v22, %v5570_v35 }
 0x35d   : > { %16570 = vst [vmem:[#allocation82_spill] sm:$0xff] %v13606_v10  ;;  %v5560_v34 = vmul.f32 %v5432_v18, %v13290_v45  ;;  %v13621_v30 = vmin.f32 %v4666_v33, -0.000100005  ;;  %v16573_v19 = vsub.f32 0.0, %v13072_v41  ;;  %v13626_v13 = vmul.f32 %v13588_v39, %v5176_v15 }
 0x35e   : > { %16571 = vst [vmem:[#allocation157_spill] sm:$0xff] %v13616_v50  ;;  %v6081_v48 = vadd.f32 %v12789_v59, %v13433_v42  ;;  %v13631_v31 = vsel %vm2103_vm6, 1.0, %v15680_v60  ;;  %v4407_v35 = vmin.f32 %v13603_v40, -0.000100005  ;;  %v4919_v45 = vsub.f32 1.0, %v3767_v16 }
 0x35f   : > { %16572 = vst [vmem:[#allocation67_spill] sm:$0xff] %v13618_v63  ;;  %v4507_v11 = vsub.f32 %v16573_v19, %v3927_v3  ;;  %v7551_v36 = vpop.eup %7550  ;;  %v13635_v22 = vadd.f32 %v12959_v37, %v996_v56  ;;  %v16575_v41 = vsub.f32 0.0, %v13055_v44  ;;  %v3280_v15 = vmul.f32 1.442695, %v15607_v54 }
 0x360   : > { %16574 = vst [vmem:[#allocation80_spill] sm:$0xff] %v13626_v13  ;;  %v7553_v18 = vpop.eup %7552  ;;  %v3160_v59 = vmul.f32 1.442695, %v15608_v58  ;;  %v13645_v42 = vadd.f32 %v12959_v37, %v1076_v9  ;;  %v3739_v19 = vmin.f32 %v3611_v55, 0.9999  ;;  %v13647_v1 = vmul.f32 %v6778_v52, %v5560_v34 }
 0x361   : > { %v4567_v33 = vsub.f32 %v16575_v41, %v13606_v10  ;;  %v7555_v40 = vpop.eup %7554  ;;  %v3581_v56 = vmax.f32 %v7553_v18, 0.0001  ;;  %1272 = vst.msk [vmem:[%s7898_s10 + $0xf0] sm:$0xff] %vm1241_vm9, %v13635_v22  ;;  %v15609_v44 = vsub.f32 0.0, %v13635_v22  ;;  %v4123_v63 = vsub.f32 0.0, %v3927_v3 }
 0x362   : > { %16576 = vst [vmem:[#allocation187_spill] sm:$0xff] %v13647_v1  ;;  %v13653_v41 = vpop.eup %7556  ;;  %v4635_v54 = vmax.f32 %v4507_v11, -9.2103405  ;;  %v6082_v52 = vadd.f32 %v13631_v31, %v6081_v48  ;;  %v3867_v55 = vmul.f32 0.6931472, %v7555_v40  ;;  %v5431_v34 = vmul.f32 %v3767_v16, %v3767_v16 }
 0x363   : > { %16577 = vst [vmem:[#allocation188_spill] sm:$0xff] %v13653_v41  ;;  %v3387_v9 = vadd.f32 1.0, %v7551_v36  ;;  %v3709_v18 = vmin.f32 %v3581_v56, 0.9999  ;;  %v3100_v3 = vmul.f32 1.442695, %v15609_v44  ;;  %v5047_v58 = vmul.f32 %v4919_v45, %v4919_v45 }
 0x364   : > { %1304 = vst.msk [vmem:[%s7898_s10 + $0x1f0] sm:$0xff] %vm1241_vm9, %v13645_v42  ;;  %v4695_v11 = vmax.f32 %v4567_v33, -9.2103405  ;;  %7558 = vpow2.f32 %v3160_v59  ;;  %v4093_v38 = vsub.f32 0.0, %v3867_v55  ;;  %v4891_v50 = vsub.f32 1.0, %v3739_v19 }
 0x365   : > { %7560 = vpow2.f32 %v3280_v15  ;;  %v16580_v48 = vsub.f32 0.0, %v13448_v29  ;;  %v4861_v16 = vsub.f32 1.0, %v3709_v18  ;;  %v4251_v36 = vmax.f32 %v4123_v63, -9.2103405  ;;  %v1779_v29 = vpop.permute.xlu1 %1778 }
 0x366   : > { %v5403_v56 = vmul.f32 %v3739_v19, %v3739_v19  ;;  %v4221_v1 = vmax.f32 %v4093_v38, -9.2103405  ;;  %7562 = vpow2.f32 %v3100_v3  ;;  %v4763_v33 = vmin.f32 %v4635_v54, -0.000100005 }
 0x367   : > { %v4477_v40 = vsub.f32 %v16580_v48, %v3867_v55  ;;  %7564 = vlog2.f32 %v3387_v9  ;;  %v4989_v59 = vmul.f32 %v4861_v16, %v4861_v16  ;;  %v6777_v44 = vsel %vm2615_vm5, 1.0, %v15680_v60 }
 0x368   : > { %v5175_v37 = vmul.f32 %v5047_v58, %v4407_v35  ;;  %7566 = vrcp.f32 %v3387_v9  ;;  %v4349_v13 = vmin.f32 %v4221_v1, -0.000100005  ;;  %v6083_v15 = vadd.f32 %v13588_v39, %v6082_v52  ;;  %v16582_v58 = vld [vmem:[#allocation98_spill] sm:$0xff] }
 0x369   : > { %v4605_v45 = vmax.f32 %v4477_v40, -9.2103405  ;;  %vm1989_vm2 = vcmp.eq.s32.totalorder %v1809_v62, %v7867_v24  ;;  %v5373_v63 = vmul.f32 %v3709_v18, %v3709_v18  ;;  %v4379_v48 = vmin.f32 %v4251_v36, -0.000100005  ;;  %v13695_v36 = vpop.permute.xlu0 %1775 }
 0x36a   : > { %v7559_v19 = vpop.eup %7558  ;;  %v5019_v38 = vmul.f32 %v4891_v50, %v4891_v50  ;;  %v5559_v54 = vmul.f32 %v5431_v34, %v13138_v43  ;;  %v5117_v3 = vmul.f32 %v4989_v59, %v4349_v13  ;;  %v13679_v16 = vmin.f32 %v4695_v11, -0.000100005  ;;  %vm13688_vm7 = vmxor %vm1989_vm2, %vm7688_vm13  ;;  %v16586_v43 = vld [vmem:[#allocation97_spill] sm:$0xff]  ;;  %v16587_v13 = vld [vmem:[#allocation34_spill] sm:$0xff] }
 0x36b   : > { %v4733_v55 = vmin.f32 %v4605_v45, -0.000100005  ;;  %v7561_v40 = vpop.eup %7560  ;;  %v5531_v6 = vmul.f32 %v5403_v56, %v4763_v33  ;;  %v3653_v35 = vmax.f32 %v16582_v58, 0.0001  ;;  %v13683_v39 = vmul.f32 %v13631_v31, %v5175_v37  ;;  %v16588_v56 = vld [vmem:[#allocation58_spill] sm:$0xff]  ;;  %vm13705_vm3 = vmand %vm7869_vm4, %vm1989_vm2 }
 0x36c   : > { %16581 = vst [vmem:[#allocation189_spill] sm:$0xff] %v13679_v16  ;;  %v7563_v9 = vpop.eup %7562  ;;  %v4165_v50 = vsub.f32 0.0, %v16586_v43  ;;  %vm1979_vm10 = vcmp.eq.s32.totalorder %v1779_v29, %v7867_v24  ;;  %v5245_v34 = vmul.f32 %v16587_v13, %v5117_v3  ;;  %v3356_v11 = vadd.f32 1.0, %v7559_v19  ;;  %v16592_v58 = vld [vmem:[#allocation130_spill] sm:$0xff]  ;;  %vm2629_vm11 = vmand %vm7869_vm4, %vm13688_vm7 }
 0x36d   : > { %v5501_v1 = vmul.f32 %v5373_v63, %v4733_v55  ;;  %16583 = vst [vmem:[#allocation98_spill] sm:$0xff] %v13683_v39  ;;  %v7565_v18 = vpop.eup %7564  ;;  %v15610_v31 = vsub.f32 0.0, %v13445_v23  ;;  %v3326_v45 = vadd.f32 1.0, %v7563_v9  ;;  %v5147_v37 = vmul.f32 %v5019_v38, %v4379_v48  ;;  %vm13725_vm1 = vmxor %vm1979_vm10, %vm7688_vm13 }
 0x36e   : > { %v7567_v59 = vpop.eup %7566  ;;  %v13699_v55 = vmul.f32 %v6777_v44, %v5559_v54  ;;  %v3416_v63 = vadd.f32 1.0, %v7561_v40  ;;  %v13710_v19 = vadd.f32 %v13524_v26, %v5245_v34  ;;  %v13713_v43 = vmul.f32 %v16592_v58, %v5531_v6  ;;  %v16595_v40 = vld [vmem:[#allocation129_spill] sm:$0xff]  ;;  %vm13746_vm0 = vmand %vm7869_vm4, %vm1979_vm10 }
 0x36f   : > { %v5629_v33 = vmul.f32 %v16588_v56, %v5501_v1  ;;  %v3781_v44 = vmin.f32 %v3653_v35, 0.9999  ;;  %7568 = vrcp.f32 %v3326_v45  ;;  %v3991_v48 = vmul.f32 0.6931472, %v7565_v18  ;;  %vm2619_vm12 = vmand %vm7869_vm4, %vm13725_vm1 }
 0x370   : > { %16589 = vst [vmem:[#allocation97_spill] sm:$0xff] %v13699_v55  ;;  %vm1978_vm14 = vcmp.eq.s32.totalorder %v13695_v36, %v7867_v24  ;;  %v3642_v6 = vmax.f32 %v13529_v5, 0.0001  ;;  %7570 = vlog2.f32 %v3326_v45  ;;  %v4293_v38 = vmax.f32 %v4165_v50, -9.2103405 }
 0x371   : > { %v13720_v62 = vadd.f32 %v13527_v14, %v5629_v33  ;;  %7572 = vrcp.f32 %v3356_v11  ;;  %v3643_v54 = vmax.f32 %v7567_v59, 0.0001  ;;  %v3224_v14 = vmul.f32 1.442695, %v15610_v31  ;;  %vm2106_vm15 = vmand %vm7869_vm4, %vm1978_vm14 }
 0x372   : > { %v13735_v35 = vmul.f32 %v16595_v40, %v5147_v37  ;;  %7574 = vlog2.f32 %v3416_v63  ;;  %v13740_v1 = vsel %vm13705_vm3, 1.0, %v15680_v60  ;;  %v15611_v9 = vsub.f32 0.0, %v13485_v32  ;;  %vm13803_vm6 = vmxor %vm1978_vm14, %vm7688_vm13 }
 0x373   : > { %7576 = vlog2.f32 %v3356_v11  ;;  %v13757_v50 = vsel %vm2629_vm11, 1.0, %v15680_v60  ;;  %v4933_v13 = vsub.f32 1.0, %v3781_v44  ;;  %v13764_v29 = vadd.f32 %v12996_v49, %v6083_v15  ;;  %vm2618_vm8 = vmand %vm7869_vm4, %vm13803_vm6 }
 0x374   : > { %v16598_v34 = vsub.f32 0.0, %v13250_v46  ;;  %7578 = vrcp.f32 %v3416_v63  ;;  %v5445_v11 = vmul.f32 %v3781_v44, %v3781_v44  ;;  %v4154_v52 = vsub.f32 0.0, %v13507_v8 }
 0x375   : > { %v7569_v56 = vpop.eup %7568  ;;  %v4421_v33 = vmin.f32 %v4293_v38, -0.000100005  ;;  %v3771_v45 = vmin.f32 %v3643_v54, 0.9999  ;;  %v3770_v59 = vmin.f32 %v3642_v6, 0.9999  ;;  %7580 = vpow2.f32 %v3224_v14 }
 0x376   : > { %v4539_v18 = vsub.f32 %v16598_v34, %v3991_v48  ;;  %v7571_v49 = vpop.eup %7570  ;;  %v13777_v46 = vsel %vm13746_vm0, 1.0, %v15680_v60  ;;  %v13780_v15 = vsel %vm2619_vm12, 1.0, %v15680_v60  ;;  %v3162_v37 = vmul.f32 1.442695, %v15611_v9  ;;  %v16599_v54 = vld [vmem:[#allocation100_spill] sm:$0xff] }
 0x377   : > { %v3582_v63 = vmax.f32 %v7569_v56, 0.0001  ;;  %v7573_v3 = vpop.eup %7572  ;;  %v5061_v8 = vmul.f32 %v4933_v13, %v4933_v13  ;;  %v4155_v58 = vsub.f32 0.0, %v3991_v48  ;;  %v13785_v44 = vsel %vm2106_vm15, 1.0, %v15680_v60 }
 0x378   : > { %v3869_v26 = vmul.f32 0.6931472, %v7571_v49  ;;  %v7575_v6 = vpop.eup %7574  ;;  %v4667_v38 = vmax.f32 %v4539_v18, -9.2103405  ;;  %v5573_v14 = vmul.f32 %v5445_v11, %v16599_v54  ;;  %v13788_v40 = vmax.f32 %v4154_v52, -9.2103405 }
 0x379   : > { %v3710_v5 = vmin.f32 %v3582_v63, 0.9999  ;;  %v7577_v34 = vpop.eup %7576  ;;  %v4923_v31 = vsub.f32 1.0, %v3771_v45  ;;  %v16600_v56 = vsub.f32 0.0, %v13635_v22  ;;  %v3612_v39 = vmax.f32 %v7573_v3, 0.0001 }
 0x37a   : > { %v4094_v9 = vsub.f32 0.0, %v3869_v26  ;;  %v13793_v48 = vpop.eup %7578  ;;  %v5435_v16 = vmul.f32 %v3771_v45, %v3771_v45  ;;  %7582 = vpow2.f32 %v3162_v37  ;;  %v5189_v57 = vmul.f32 %v5061_v8, %v4421_v33 }
 0x37b   : > { %v4478_v13 = vsub.f32 %v16600_v56, %v3869_v26  ;;  %16601 = vst [vmem:[#allocation34_spill] sm:$0xff] %v13793_v48  ;;  %v4862_v49 = vsub.f32 1.0, %v3710_v5  ;;  %v7581_v18 = vpop.eup %7580  ;;  %v4283_v11 = vmax.f32 %v4155_v58, -9.2103405  ;;  %v4795_v63 = vmin.f32 %v4667_v38, -0.000100005 }
 0x37c   : > { %v4222_v52 = vmax.f32 %v4094_v9, -9.2103405  ;;  %v13795_v10 = vmul.f32 0.6931472, %v7575_v6  ;;  %v3929_v41 = vmul.f32 0.6931472, %v7577_v34  ;;  %v5374_v48 = vmul.f32 %v3710_v5, %v3710_v5 }
 0x37d   : > { %v4606_v54 = vmax.f32 %v4478_v13, -9.2103405  ;;  %v4990_v55 = vmul.f32 %v4862_v49, %v4862_v49  ;;  %v16603_v0 = vsub.f32 0.0, %v13465_v53  ;;  %v3740_v3 = vmin.f32 %v3612_v39, 0.9999  ;;  %v16609_v49 = vld [vmem:[#allocation40_spill] sm:$0xff] }
 0x37e   : > { %16602 = vst [vmem:[#allocation58_spill] sm:$0xff] %v13795_v10  ;;  %v4350_v26 = vmin.f32 %v4222_v52, -0.000100005  ;;  %v5051_v45 = vmul.f32 %v4923_v31, %v4923_v31  ;;  %v4922_v33 = vsub.f32 1.0, %v3770_v59  ;;  %v3388_v37 = vadd.f32 1.0, %v7581_v18 }
 0x37f   : > { %v3282_v22 = vmul.f32 1.442695, %v16603_v0  ;;  %v4734_v56 = vmin.f32 %v4606_v54, -0.000100005  ;;  %v4411_v8 = vmin.f32 %v4283_v11, -0.000100005  ;;  %v5563_v13 = vmul.f32 %v5435_v16, %v4795_v63  ;;  %v1156_v54 = vpop.f32.mrf.mxu2 }
 0x380   : > { %v4410_v58 = vmin.f32 %v13788_v40, -0.000100005  ;;  %v5118_v6 = vmul.f32 %v4990_v55, %v4350_v26  ;;  %v7583_v38 = vpop.eup %7582  ;;  %v16606_v39 = vsub.f32 0.0, %v13269_v28  ;;  %v4124_v5 = vsub.f32 0.0, %v3929_v41  ;;  %v16608_v40 = vld [vmem:[#allocation56_spill] sm:$0xff] }
 0x381   : > { %v5502_v0 = vmul.f32 %v5374_v48, %v4734_v56  ;;  %v16607_v36 = vsub.f32 0.0, %v13312_v61  ;;  %7584 = vpow2.f32 %v3282_v22  ;;  %v15614_v55 = vsub.f32 0.0, %v13571_v7  ;;  %v13852_v9 = vld [vmem:[%s15432_s2] ss:$0 sm:$0xff] }
 0x382   : > { %v13811_v31 = vsub.f32 %v16606_v39, %v13795_v10  ;;  %v5246_v48 = vmul.f32 %v16608_v40, %v5118_v6  ;;  %v4892_v28 = vsub.f32 1.0, %v3740_v3  ;;  %v5050_v11 = vmul.f32 %v4922_v33, %v4922_v33  ;;  %v1228_v39 = vpop.f32.mrf.mxu3 }
 0x383   : > { %v4508_v34 = vsub.f32 %v16607_v36, %v3929_v41  ;;  %v5630_v18 = vmul.f32 %v16609_v49, %v5502_v0  ;;  %v5434_v52 = vmul.f32 %v3770_v59, %v3770_v59  ;;  %7586 = vrcp.f32 %v3388_v37 }
 0x384   : > { %7588 = vlog2.f32 %v3388_v37  ;;  %v3357_v61 = vadd.f32 1.0, %v7583_v38  ;;  %v13823_v41 = vadd.f32 %v13710_v19, %v5246_v48  ;;  %v4252_v63 = vmax.f32 %v4124_v5, -9.2103405  ;;  %v16613_v37 = vld [vmem:[#allocation120_spill] sm:$0xff] }
 0x385   : > { %v13826_v16 = vadd.f32 %v13720_v62, %v5630_v18  ;;  %v13829_v22 = vmul.f32 %v13740_v1, %v5189_v57  ;;  %v13832_v26 = vmul.f32 %v13757_v50, %v5573_v14  ;;  %v6780_v59 = vsel %vm2618_vm8, 1.0, %v15680_v60  ;;  %v1818_v14 = vpop.permute.xlu2 %1817 }
 0x386   : > { %v4636_v19 = vmax.f32 %v4508_v34, -9.2103405  ;;  %v5179_v56 = vmul.f32 %v5051_v45, %v4411_v8  ;;  %v6085_v62 = vadd.f32 %v13785_v44, %v13764_v29  ;;  %v3226_v33 = vmul.f32 1.442695, %v15614_v55 }
 0x387   : > { %16610 = vst [vmem:[#allocation130_spill] sm:$0xff] %v13829_v22  ;;  %v4696_v57 = vmax.f32 %v13811_v31, -9.2103405  ;;  %v13846_v50 = vmul.f32 %v13780_v15, %v5563_v13  ;;  %v3656_v6 = vmax.f32 %v16613_v37, 0.0001  ;;  %v13855_v45 = vadd.f32 %v13852_v9, %v1156_v54  ;;  %v7585_v29 = vpop.eup %7584  ;;  %v998_v15 = vpop.f32.mrf.mxu0 }
 0x388   : > { %16611 = vst [vmem:[#allocation129_spill] sm:$0xff] %v13832_v26  ;;  %v5020_v8 = vmul.f32 %v4892_v28, %v4892_v28  ;;  %v5178_v0 = vmul.f32 %v5050_v11, %v4410_v58  ;;  %v5562_v38 = vmul.f32 %v5434_v52, %v13621_v30  ;;  %7590 = vrcp.f32 %v3357_v61  ;;  %v16615_v52 = vld [vmem:[#allocation118_spill] sm:$0xff] }
 0x389   : > { %16612 = vst [vmem:[#allocation100_spill] sm:$0xff] %v13846_v50  ;;  %v7587_v31 = vpop.eup %7586  ;;  %v4380_v5 = vmin.f32 %v4252_v63, -0.000100005  ;;  %7592 = vlog2.f32 %v3357_v61  ;;  %v13862_v36 = vadd.f32 %v13852_v9, %v1228_v39  ;;  %v13865_v34 = vadd.f32 %v13852_v9, %v998_v15 }
 0x38a   : > { %1336 = vst.msk [vmem:[%s7898_s10 + $0x2f0] sm:$0xff] %vm1241_vm9, %v13855_v45  ;;  %v7589_v58 = vpop.eup %7588  ;;  %v4764_v13 = vmin.f32 %v4636_v19, -0.000100005  ;;  %v5404_v30 = vmul.f32 %v3740_v3, %v3740_v3  ;;  %vm1992_vm5 = vcmp.eq.s32.totalorder %v1818_v14, %v7867_v24  ;;  %7594 = vpow2.f32 %v3226_v33  ;;  %v1788_v3 = vpop.permute.xlu1 %1787  ;;  %v16621_v14 = vld [vmem:[#allocation168_spill] sm:$0xff] }
 0x38b   : > { %v3417_v40 = vadd.f32 1.0, %v7585_v29  ;;  %v3784_v48 = vmin.f32 %v3656_v6, 0.9999  ;;  %v15613_v49 = vsub.f32 0.0, %v13579_v17  ;;  %1365 = vst.msk [vmem:[%s7898_s10 + $0x3d8] sm:$0xff] %vm1241_vm9, %v13862_v36  ;;  %v15616_v18 = vsub.f32 0.0, %v13865_v34  ;;  %vm13885_vm2 = vmxor %vm1992_vm5, %vm7688_vm13 }
 0x38c   : > { %v13874_v28 = vmul.f32 %v13777_v46, %v5179_v56  ;;  %v6086_v11 = vadd.f32 %v13777_v46, %v6085_v62  ;;  %v4168_v61 = vsub.f32 0.0, %v16615_v52  ;;  %v15615_v54 = vsub.f32 0.0, %v13645_v42  ;;  %1273 = vst.msk [vmem:[%s7898_s10 + $0xf8] sm:$0xff] %vm1241_vm9, %v13865_v34  ;;  %v1785_v56 = vpop.permute.xlu0 %1784  ;;  %vm2120_vm7 = vmand %vm7869_vm4, %vm1992_vm5 }
 0x38d   : > { %v5148_v63 = vmul.f32 %v5020_v8, %v4380_v5  ;;  %v3644_v19 = vmax.f32 %v7587_v31, 0.0001  ;;  %v3993_v33 = vmul.f32 0.6931472, %v7589_v58  ;;  %v3102_v46 = vmul.f32 1.442695, %v15616_v18  ;;  %vm2632_vm3 = vmand %vm7869_vm4, %vm13885_vm2 }
 0x38e   : > { %16614 = vst [vmem:[#allocation56_spill] sm:$0xff] %v13874_v28  ;;  %v7591_v62 = vpop.eup %7590  ;;  %v13891_v6 = vmin.f32 %v4696_v57, -0.000100005  ;;  %v5532_v29 = vmul.f32 %v5404_v30, %v4764_v13  ;;  %v13894_v39 = vmul.f32 %v13785_v44, %v5178_v0  ;;  %v13896_v8 = vmul.f32 %v6780_v59, %v5562_v38  ;;  %v16622_v30 = vld [vmem:[#allocation14_spill] sm:$0xff] }
 0x38f   : > { %v7593_v15 = vpop.eup %7592  ;;  %7596 = vlog2.f32 %v3417_v40  ;;  %v4936_v31 = vsub.f32 1.0, %v3784_v48  ;;  %vm1982_vm10 = vcmp.eq.s32.totalorder %v1788_v3, %v7867_v24  ;;  %v3284_v57 = vmul.f32 1.442695, %v15613_v49 }
 0x390   : > { %16618 = vst [vmem:[#allocation40_spill] sm:$0xff] %v13891_v6  ;;  %v7595_v5 = vpop.eup %7594  ;;  %v4296_v44 = vmax.f32 %v4168_v61, -9.2103405  ;;  %vm1981_vm11 = vcmp.eq.s32.totalorder %v1785_v56, %v7867_v24  ;;  %v3164_v59 = vmul.f32 1.442695, %v15615_v54  ;;  %7598 = vpow2.f32 %v3102_v46  ;;  %vm2110_vm1 = vmand %vm7869_vm4, %vm1982_vm10  ;;  %v16626_v6 = vld [vmem:[#allocation123_spill] sm:$0xff] }
 0x391   : > { %16619 = vst [vmem:[#allocation120_spill] sm:$0xff] %v13894_v39  ;;  %v13913_v0 = vmul.f32 %v16621_v14, %v5148_v63  ;;  %v3772_v38 = vmin.f32 %v3644_v19, 0.9999  ;;  %v4156_v58 = vsub.f32 0.0, %v3993_v33  ;;  %v13916_v13 = vsel %vm2120_vm7, 1.0, %v15680_v60  ;;  %vm13932_vm14 = vmand %vm7869_vm4, %vm1981_vm11 }
 0x392   : > { %16620 = vst [vmem:[#allocation118_spill] sm:$0xff] %v13896_v8  ;;  %v13919_v52 = vmul.f32 %v16622_v30, %v5532_v29  ;;  %v16623_v37 = vsub.f32 0.0, %v13445_v23  ;;  %v3613_v49 = vmax.f32 %v7591_v62, 0.0001  ;;  %v5448_v55 = vmul.f32 %v3784_v48, %v3784_v48  ;;  %vm13944_vm0 = vmxor %vm1982_vm10, %vm7688_vm13 }
 0x393   : > { %v3931_v63 = vmul.f32 0.6931472, %v7593_v15  ;;  %v6794_v19 = vsel %vm2632_vm3, 1.0, %v15680_v60  ;;  %v3389_v23 = vadd.f32 1.0, %v7595_v5  ;;  %7600 = vpow2.f32 %v3284_v57  ;;  %vm13958_vm12 = vmxor %vm1981_vm11, %vm7688_vm13 }
 0x394   : > { %v4540_v61 = vsub.f32 %v16623_v37, %v3993_v33  ;;  %v4424_v33 = vmin.f32 %v4296_v44, -0.000100005  ;;  %v5064_v48 = vmul.f32 %v4936_v31, %v4936_v31  ;;  %v6087_v62 = vadd.f32 %v13181_v20, %v6086_v11  ;;  %vm2622_vm15 = vmand %vm7869_vm4, %vm13944_vm0 }
 0x395   : > { %7602 = vpow2.f32 %v3164_v59  ;;  %v7597_v29 = vpop.eup %7596  ;;  %v4284_v14 = vmax.f32 %v4156_v58, -9.2103405  ;;  %v4924_v15 = vsub.f32 1.0, %v3772_v38  ;;  %v13938_v30 = vsel %vm2110_vm1, 1.0, %v15680_v60  ;;  %vm2621_vm6 = vmand %vm7869_vm4, %vm13958_vm12 }
 0x396   : > { %7604 = vrcp.f32 %v3417_v40  ;;  %v7599_v37 = vpop.eup %7598  ;;  %v4668_v54 = vmax.f32 %v4540_v61, -9.2103405  ;;  %v3741_v18 = vmin.f32 %v3613_v49, 0.9999  ;;  %v5576_v10 = vmul.f32 %v5448_v55, %v16626_v6  ;;  %v1827_v49 = vpop.permute.xlu2 %1826 }
 0x397   : > { %v13951_v11 = vsel %vm13932_vm14, 1.0, %v15680_v60  ;;  %v4125_v40 = vsub.f32 0.0, %v3931_v63  ;;  %v16629_v57 = vsub.f32 0.0, %v13485_v32  ;;  %7606 = vrcp.f32 %v3389_v23  ;;  %v1078_v6 = vpop.f32.mrf.mxu1 }
 0x398   : > { %v3327_v3 = vadd.f32 1.0, %v7599_v37  ;;  %v13962_v44 = vmul.f32 0.6931472, %v7597_v29  ;;  %v5192_v59 = vmul.f32 %v5064_v48, %v4424_v33  ;;  %7608 = vlog2.f32 %v3389_v23  ;;  %v16633_v23 = vld [vmem:[#allocation146_spill] sm:$0xff] }
 0x399   : > { %v4509_v5 = vsub.f32 %v16629_v57, %v3931_v63  ;;  %v13965_v58 = vadd.f32 %v13852_v9, %v1078_v6  ;;  %v7601_v32 = vpop.eup %7600  ;;  %v4412_v61 = vmin.f32 %v4284_v14, -0.000100005  ;;  %v5052_v63 = vmul.f32 %v4924_v15, %v4924_v15 }
 0x39a   : > { %16632 = vst [vmem:[#allocation168_spill] sm:$0xff] %v13962_v44  ;;  %v5436_v56 = vmul.f32 %v3772_v38, %v3772_v38  ;;  %v6088_v46 = vadd.f32 %v13951_v11, %v6087_v62  ;;  %v4796_v29 = vmin.f32 %v4668_v54, -0.000100005  ;;  %vm1995_vm8 = vcmp.eq.s32.totalorder %v1827_v49, %v7867_v24 }
 0x39b   : > { %v7603_v37 = vpop.eup %7602  ;;  %v3659_v33 = vmax.f32 %v16633_v23, 0.0001  ;;  %7610 = vrcp.f32 %v3327_v3  ;;  %1305 = vst.msk [vmem:[%s7898_s10 + $0x1f8] sm:$0xff] %vm1241_vm9, %v13965_v58  ;;  %v4253_v48 = vmax.f32 %v4125_v40, -9.2103405  ;;  %v4893_v62 = vsub.f32 1.0, %v3741_v18  ;;  %vm2123_vm5 = vmand %vm7869_vm4, %vm1995_vm8 }
 0x39c   : > { %v13981_v38 = vpop.eup %7604  ;;  %v4637_v14 = vmax.f32 %v4509_v5, -9.2103405  ;;  %7612 = vlog2.f32 %v3327_v3  ;;  %v16635_v54 = vsub.f32 0.0, %v13465_v53  ;;  %v13986_v57 = vmul.f32 %v6794_v19, %v5576_v10  ;;  %vm14017_vm2 = vmxor %vm1995_vm8, %vm7688_vm13 }
 0x39d   : > { %16634 = vst [vmem:[#allocation14_spill] sm:$0xff] %v13981_v38  ;;  %v13994_v6 = vsel %vm2622_vm15, 1.0, %v15680_v60  ;;  %v3418_v23 = vadd.f32 1.0, %v7601_v32  ;;  %v7607_v38 = vpop.eup %7606  ;;  %v5180_v40 = vmul.f32 %v5052_v63, %v4412_v61  ;;  %v13997_v5 = vmul.f32 %v13916_v13, %v5192_v59  ;;  %v16640_v32 = vld [vmem:[#allocation145_spill] sm:$0xff]  ;;  %vm2635_vm7 = vmand %vm7869_vm4, %vm14017_vm2 }
 0x39e   : > { %v4569_v15 = vsub.f32 %v16635_v54, %v13962_v44  ;;  %16636 = vst [vmem:[#allocation123_spill] sm:$0xff] %v13986_v57  ;;  %v14005_v53 = vsel %vm2621_vm6, 1.0, %v15680_v60  ;;  %v3358_v10 = vadd.f32 1.0, %v7603_v37  ;;  %v7609_v19 = vpop.eup %7608  ;;  %v5564_v31 = vmul.f32 %v5436_v56, %v4796_v29 }
 0x39f   : > { %16637 = vst [vmem:[#allocation146_spill] sm:$0xff] %v13997_v5  ;;  %v14012_v3 = vadd.f32 %v13938_v30, %v6088_v46  ;;  %v3787_v55 = vmin.f32 %v3659_v33, 0.9999  ;;  %v4171_v61 = vsub.f32 0.0, %v16640_v32  ;;  %v4381_v63 = vmin.f32 %v4253_v48, -0.000100005 }
 0x3a0   : > { %v4765_v37 = vmin.f32 %v4637_v14, -0.000100005  ;;  %v5021_v54 = vmul.f32 %v4893_v62, %v4893_v62  ;;  %v5405_v44 = vmul.f32 %v3741_v18, %v3741_v18  ;;  %v4697_v26 = vmax.f32 %v4569_v15, -9.2103405 }
 0x3a1   : > { %v7611_v57 = vpop.eup %7610  ;;  %v3645_v56 = vmax.f32 %v7607_v38, 0.0001  ;;  %7614 = vlog2.f32 %v3418_v23  ;;  %v14023_v46 = vsel %vm2123_vm5, 1.0, %v15680_v60  ;;  %v14026_v49 = vmul.f32 %v13181_v20, %v5180_v40 }
 0x3a2   : > { %v7613_v29 = vpop.eup %7612  ;;  %v3995_v5 = vmul.f32 0.6931472, %v7609_v19  ;;  %7616 = vrcp.f32 %v3358_v10  ;;  %v3583_v33 = vmax.f32 %v7611_v57, 0.0001  ;;  %v4299_v18 = vmax.f32 %v4171_v61, -9.2103405 }
 0x3a3   : > { %16641 = vst [vmem:[#allocation145_spill] sm:$0xff] %v14026_v49  ;;  %7618 = vlog2.f32 %v3358_v10  ;;  %v4939_v48 = vsub.f32 1.0, %v3787_v55  ;;  %v3871_v38 = vmul.f32 0.6931472, %v7613_v29  ;;  %v14033_v14 = vmul.f32 %v13196_v4, %v5564_v31  ;;  %v16651_v49 = vld [vmem:[#allocation72_spill] sm:$0xff] }
 0x3a4   : > { %v5149_v62 = vmul.f32 %v5021_v54, %v4381_v63  ;;  %v5533_v15 = vmul.f32 %v5405_v44, %v4765_v37  ;;  %v3711_v32 = vmin.f32 %v3583_v33, 0.9999  ;;  %v14035_v20 = vmin.f32 %v4697_v26, -0.000100005  ;;  %v1797_v44 = vpop.permute.xlu1 %1796  ;;  %v16646_v37 = vld [vmem:[#allocation92_spill] sm:$0xff] }
 0x3a5   : > { %16642 = vst [vmem:[#allocation190_spill] sm:$0xff] %v14033_v14  ;;  %v3773_v40 = vmin.f32 %v3645_v56, 0.9999  ;;  %v6797_v19 = vsel %vm2635_vm7, 1.0, %v15680_v60  ;;  %v16644_v59 = vsub.f32 0.0, %v13865_v34  ;;  %v4157_v50 = vsub.f32 0.0, %v3995_v5  ;;  %v1158_v14 = vpop.f32.mrf.mxu2 }
 0x3a6   : > { %16643 = vst [vmem:[#allocation191_spill] sm:$0xff] %v14035_v20  ;;  %v16645_v57 = vsub.f32 0.0, %v13571_v7  ;;  %v4095_v61 = vsub.f32 0.0, %v3871_v38  ;;  %v4863_v29 = vsub.f32 1.0, %v3711_v32  ;;  %7620 = vrcp.f32 %v3418_v23  ;;  %v16647_v56 = vld [vmem:[#allocation167_spill] sm:$0xff] }
 0x3a7   : > { %v4479_v22 = vsub.f32 %v16644_v59, %v3871_v38  ;;  %v7615_v8 = vpop.eup %7614  ;;  %v4427_v4 = vmin.f32 %v4299_v18, -0.000100005  ;;  %v5067_v31 = vmul.f32 %v4939_v48, %v4939_v48  ;;  %v14043_v54 = vmul.f32 %v16646_v37, %v5149_v62 }
 0x3a8   : > { %v4541_v10 = vsub.f32 %v16645_v57, %v3995_v5  ;;  %v7617_v26 = vpop.eup %7616  ;;  %v14046_v33 = vmul.f32 %v16647_v56, %v5533_v15  ;;  %v4223_v34 = vmax.f32 %v4095_v61, -9.2103405  ;;  %v4991_v59 = vmul.f32 %v4863_v29, %v4863_v29 }
 0x3a9   : > { %v4607_v63 = vmax.f32 %v4479_v22, -9.2103405  ;;  %v7619_v20 = vpop.eup %7618  ;;  %v4925_v7 = vsub.f32 1.0, %v3773_v40  ;;  %v5451_v5 = vmul.f32 %v3787_v55, %v3787_v55  ;;  %v5375_v57 = vmul.f32 %v3711_v32, %v3711_v32 }
 0x3aa   : > { %v4285_v23 = vmax.f32 %v4157_v50, -9.2103405  ;;  %v4669_v18 = vmax.f32 %v4541_v10, -9.2103405  ;;  %vm1985_vm10 = vcmp.eq.s32.totalorder %v1797_v44, %v7867_v24  ;;  %v4351_v22 = vmin.f32 %v4223_v34, -0.000100005 }
 0x3ab   : > { %v4735_v38 = vmin.f32 %v4607_v63, -0.000100005  ;;  %v14049_v48 = vmul.f32 0.6931472, %v7615_v8  ;;  %v5195_v62 = vmul.f32 %v5067_v31, %v4427_v4  ;;  %v3614_v61 = vmax.f32 %v7617_v26, 0.0001  ;;  %vm14064_vm3 = vmand %vm7869_vm4, %vm1985_vm10 }
 0x3ac   : > { %v3933_v29 = vmul.f32 0.6931472, %v7619_v20  ;;  %v5119_v56 = vmul.f32 %v4991_v59, %v4351_v22  ;;  %v14053_v55 = vadd.f32 %v13852_v9, %v1158_v14  ;;  %v14055_v32 = vpop.eup %7620  ;;  %v5437_v50 = vmul.f32 %v3773_v40, %v3773_v40  ;;  %v16650_v10 = vld [vmem:[#allocation41_spill] sm:$0xff]  ;;  %v16652_v8 = vld [vmem:[#allocation90_spill] sm:$0xff]  ;;  %vm14078_vm11 = vmxor %vm1985_vm10, %vm7688_vm13 }
 0x3ad   : > { %16648 = vst [vmem:[#allocation92_spill] sm:$0xff] %v14049_v48  ;;  %v5503_v15 = vmul.f32 %v5375_v57, %v4735_v38  ;;  %v5579_v63 = vmul.f32 %v5451_v5, %v16650_v10  ;;  %v3649_v34 = vmax.f32 %v16651_v49, 0.0001  ;;  %v4413_v4 = vmin.f32 %v4285_v23, -0.000100005  ;;  %v16655_v14 = vld [vmem:[#allocation57_spill] sm:$0xff]  ;;  %vm2625_vm1 = vmand %vm7869_vm4, %vm14078_vm11 }
 0x3ae   : > { %16649 = vst [vmem:[#allocation167_spill] sm:$0xff] %v14055_v32  ;;  %v4797_v31 = vmin.f32 %v4669_v18, -0.000100005  ;;  %v5053_v37 = vmul.f32 %v4925_v7, %v4925_v7  ;;  %v5247_v26 = vmul.f32 %v16655_v14, %v5119_v56  ;;  %v16656_v49 = vsub.f32 0.0, %v13579_v17  ;;  %v16659_v7 = vld [vmem:[#allocation15_spill] sm:$0xff]  ;;  %v16664_v14 = vld [vmem:[#allocation69_spill] sm:$0xff] }
 0x3af   : > { %v5631_v28 = vmul.f32 %v16652_v8, %v5503_v15  ;;  %1337 = vst.msk [vmem:[%s7898_s10 + $0x2f8] sm:$0xff] %vm1241_vm9, %v14053_v55  ;;  %v4161_v5 = vsub.f32 0.0, %v16659_v7  ;;  %v16660_v38 = vsub.f32 0.0, %v13855_v45  ;;  %v3742_v18 = vmin.f32 %v3614_v61, 0.9999  ;;  %v14095_v7 = vpop.f32.mrf.mxu3 }
 0x3b0   : > { %v4570_v40 = vsub.f32 %v16656_v49, %v14049_v48  ;;  %v4126_v22 = vsub.f32 0.0, %v3933_v29  ;;  %v14087_v15 = vmul.f32 %v14023_v46, %v5195_v62  ;;  %v5758_v17 = vadd.f32 %v13823_v41, %v5247_v26  ;;  %v16666_v62 = vld [vmem:[#allocation47_spill] sm:$0xff] }
 0x3b1   : > { %v3228_v57 = vmul.f32 1.442695, %v16660_v38  ;;  %v5892_v23 = vadd.f32 %v13826_v16, %v5631_v28  ;;  %v16662_v44 = vsub.f32 0.0, %v13645_v42  ;;  %v14092_v10 = vmul.f32 %v6797_v19, %v5579_v63  ;;  %v16665_v42 = vld [vmem:[#allocation68_spill] sm:$0xff]  ;;  %v16667_v63 = vld [vmem:[#allocation101_spill] sm:$0xff]  ;;  %v16668_v26 = vld [vmem:[#allocation99_spill] sm:$0xff] }
 0x3b2   : > { %16661 = vst [vmem:[#allocation41_spill] sm:$0xff] %v14087_v15  ;;  %v3777_v8 = vmin.f32 %v3649_v34, 0.9999  ;;  %v5181_v38 = vmul.f32 %v5053_v37, %v4413_v4  ;;  %v5565_v39 = vmul.f32 %v5437_v50, %v4797_v31  ;;  %v14100_v16 = vsel %vm14064_vm3, 1.0, %v15680_v60 }
 0x3b3   : > { %v4510_v56 = vsub.f32 %v16662_v44, %v3933_v29  ;;  %16663 = vst [vmem:[#allocation72_spill] sm:$0xff] %v14092_v10  ;;  %v5893_v49 = vadd.f32 %v5892_v23, %v16664_v14  ;;  %v5759_v41 = vadd.f32 %v5758_v17, %v16665_v42  ;;  %v4289_v28 = vmax.f32 %v4161_v5, -9.2103405  ;;  %v1794_v17 = vpop.permute.xlu0 %1793 }
 0x3b4   : > { %v4929_v19 = vsub.f32 1.0, %v3777_v8  ;;  %7622 = vpow2.f32 %v3228_v57  ;;  %v4254_v29 = vmax.f32 %v4126_v22, -9.2103405  ;;  %v4894_v37 = vsub.f32 1.0, %v3742_v18  ;;  %v16671_v22 = vld [vmem:[#allocation5_spill] sm:$0xff] }
 0x3b5   : > { %v5894_v61 = vadd.f32 %v5893_v49, %v16666_v62  ;;  %v15619_v50 = vsub.f32 0.0, %v13862_v36  ;;  %v5760_v34 = vadd.f32 %v5759_v41, %v16667_v63  ;;  %v4698_v4 = vmax.f32 %v4570_v40, -9.2103405  ;;  %v16672_v41 = vld [vmem:[#allocation74_spill] sm:$0xff]  ;;  %v16673_v63 = vld [vmem:[#allocation75_spill] sm:$0xff] }
 0x3b6   : > { %v4638_v31 = vmax.f32 %v4510_v56, -9.2103405  ;;  %v6787_v20 = vsel %vm2625_vm1, 1.0, %v15680_v60  ;;  %v14113_v23 = vmul.f32 %v13951_v11, %v5181_v38  ;;  %v14116_v5 = vmul.f32 %v14005_v53, %v5565_v39  ;;  %v16674_v39 = vld [vmem:[#allocation65_spill] sm:$0xff] }
 0x3b7   : > { %v5895_v59 = vadd.f32 %v5894_v61, %v16668_v26  ;;  %v5406_v57 = vmul.f32 %v3742_v18, %v3742_v18  ;;  %v5761_v44 = vadd.f32 %v5760_v34, %v16671_v22  ;;  %v4417_v14 = vmin.f32 %v4289_v28, -0.000100005  ;;  %v16675_v18 = vld [vmem:[#allocation6_spill] sm:$0xff]  ;;  %v1233_v10 = vpop.f32.mrf.mxu3 }
 0x3b8   : > { %16669 = vst [vmem:[#allocation90_spill] sm:$0xff] %v14113_v23  ;;  %v5057_v49 = vmul.f32 %v4929_v19, %v4929_v19  ;;  %v5441_v42 = vmul.f32 %v3777_v8, %v3777_v8  ;;  %v4382_v56 = vmin.f32 %v4254_v29, -0.000100005  ;;  %v5022_v62 = vmul.f32 %v4894_v37, %v4894_v37  ;;  %v16677_v19 = vld [vmem:[#allocation107_spill] sm:$0xff]  ;;  %v16678_v22 = vld [vmem:[#allocation38_spill] sm:$0xff] }
 0x3b9   : > { %16670 = vst [vmem:[#allocation57_spill] sm:$0xff] %v14116_v5  ;;  %v5896_v40 = vadd.f32 %v5895_v59, %v16672_v41  ;;  %v3286_v61 = vmul.f32 1.442695, %v15619_v50  ;;  %v5762_v11 = vadd.f32 %v5761_v44, %v16673_v63  ;;  %v4766_v26 = vmin.f32 %v4638_v31, -0.000100005  ;;  %v16679_v41 = vld [vmem:[#allocation62_spill] sm:$0xff] }
 0x3ba   : > { %v7623_v38 = vpop.eup %7622  ;;  %vm1984_vm14 = vcmp.eq.s32.totalorder %v1794_v17, %v7867_v24  ;;  %v3648_v53 = vmax.f32 %v16674_v39, 0.0001  ;;  %v14126_v28 = vmin.f32 %v4698_v4, -0.000100005  ;;  %v6090_v8 = vadd.f32 %v13372_v51, %v14012_v3  ;;  %v16680_v63 = vld [vmem:[#allocation106_spill] sm:$0xff]  ;;  %v16681_v3 = vld [vmem:[#allocation29_spill] sm:$0xff] }
 0x3bb   : > { %v5897_v34 = vadd.f32 %v5896_v40, %v16675_v18  ;;  %v5763_v29 = vadd.f32 %v5762_v11, %v16677_v19  ;;  %v15620_v37 = vsub.f32 0.0, %v13965_v58  ;;  %v5185_v59 = vmul.f32 %v5057_v49, %v4417_v14  ;;  %vm2112_vm0 = vmand %vm7869_vm4, %vm1984_vm14 }
 0x3bc   : > { %16676 = vst [vmem:[#allocation15_spill] sm:$0xff] %v14126_v28  ;;  %v5569_v44 = vmul.f32 %v5441_v42, %v16678_v22  ;;  %v4160_v31 = vsub.f32 0.0, %v16679_v41  ;;  %v5150_v39 = vmul.f32 %v5022_v62, %v4382_v56  ;;  %v3390_v4 = vadd.f32 1.0, %v7623_v38  ;;  %v16683_v42 = vld [vmem:[#allocation84_spill] sm:$0xff]  ;;  %vm14147_vm12 = vmxor %vm1984_vm14, %vm7688_vm13  ;;  %v16686_v62 = vld [vmem:[#allocation85_spill] sm:$0xff] }
 0x3bd   : > { %v5898_v50 = vadd.f32 %v5897_v34, %v16680_v63  ;;  %7624 = vpow2.f32 %v3286_v61  ;;  %v5764_v40 = vadd.f32 %v5763_v29, %v16681_v3  ;;  %v5534_v11 = vmul.f32 %v5406_v57, %v4766_v26  ;;  %v16687_v57 = vld [vmem:[#allocation4_spill] sm:$0xff]  ;;  %v16688_v29 = vld [vmem:[#allocation114_spill] sm:$0xff]  ;;  %v16690_v22 = vld [vmem:[#allocation115_spill] sm:$0xff] }
 0x3be   : > { %v14141_v14 = vmul.f32 %v14100_v16, %v5185_v59  ;;  %v3776_v49 = vmin.f32 %v3648_v53, 0.9999  ;;  %v3166_v61 = vmul.f32 1.442695, %v15620_v37  ;;  %v3652_v26 = vmax.f32 %v16687_v57, 0.0001  ;;  %vm2624_vm15 = vmand %vm7869_vm4, %vm14147_vm12 }
 0x3bf   : > { %v5899_v18 = vadd.f32 %v5898_v50, %v16683_v42  ;;  %v5765_v38 = vadd.f32 %v5764_v40, %v16686_v62  ;;  %v14156_v34 = vadd.f32 %v13852_v9, %v1233_v10  ;;  %v6658_v53 = vsel %vm2112_vm0, 1.0, %v15680_v60  ;;  %v16693_v42 = vld [vmem:[#allocation46_spill] sm:$0xff] }
 0x3c0   : > { %16682 = vst [vmem:[#allocation69_spill] sm:$0xff] %v14141_v14  ;;  %v4288_v50 = vmax.f32 %v4160_v31, -9.2103405  ;;  %v4928_v19 = vsub.f32 1.0, %v3776_v49  ;;  %v14160_v59 = vmul.f32 %v6787_v20, %v5569_v44  ;;  %7626 = vrcp.f32 %v3390_v4  ;;  %v16691_v31 = vld [vmem:[#allocation111_spill] sm:$0xff]  ;;  %v16692_v44 = vld [vmem:[#allocation81_spill] sm:$0xff] }
 0x3c1   : > { %v5900_v17 = vadd.f32 %v5899_v18, %v16688_v29  ;;  %v5766_v41 = vadd.f32 %v5765_v38, %v16690_v22  ;;  %v14165_v63 = vadd.f32 %v13852_v9, %v14095_v7  ;;  %1367 = vst.msk [vmem:[%s7898_s10 + $0x3e8] sm:$0xff] %vm1241_vm9, %v14156_v34  ;;  %v5440_v10 = vmul.f32 %v3776_v49, %v3776_v49  ;;  %v16694_v7 = vld [vmem:[#allocation78_spill] sm:$0xff]  ;;  %v16696_v22 = vld [vmem:[#allocation137_spill] sm:$0xff] }
 0x3c2   : > { %16689 = vst [vmem:[#allocation68_spill] sm:$0xff] %v14160_v59  ;;  %7628 = vlog2.f32 %v3390_v4  ;;  %v3651_v3 = vmax.f32 %v16692_v44, 0.0001  ;;  %v14177_v9 = vmin.f32 %v3652_v26, 0.9999  ;;  %v4163_v62 = vsub.f32 0.0, %v16694_v7 }
 0x3c3   : > { %v5901_v20 = vadd.f32 %v5900_v17, %v16691_v31  ;;  %v7625_v40 = vpop.eup %7624  ;;  %v5767_v18 = vadd.f32 %v5766_v41, %v16693_v42  ;;  %7630 = vpow2.f32 %v3166_v61  ;;  %1366 = vst.msk [vmem:[%s7898_s10 + $0x3e0] sm:$0xff] %vm1241_vm9, %v14165_v63  ;;  %v4416_v38 = vmin.f32 %v4288_v50, -0.000100005  ;;  %v16695_v49 = vld [vmem:[#allocation102_spill] sm:$0xff]  ;;  %v16698_v31 = vld [vmem:[#allocation164_spill] sm:$0xff] }
 0x3c4   : > { %v5056_v57 = vmul.f32 %v4928_v19, %v4928_v19  ;;  %v6091_v29 = vadd.f32 %v6658_v53, %v6090_v8  ;;  %v14185_v17 = vmul.f32 %v16696_v22, %v5150_v39  ;;  %v6786_v61 = vsel %vm2624_vm15, 1.0, %v15680_v60  ;;  %v16697_v26 = vld [vmem:[#allocation66_spill] sm:$0xff]  ;;  %v16700_v8 = vld [vmem:[#allocation121_spill] sm:$0xff] }
 0x3c5   : > { %v5902_v4 = vadd.f32 %v5901_v20, %v16695_v49  ;;  %v5768_v41 = vadd.f32 %v5767_v18, %v16697_v26  ;;  %v3662_v44 = vmax.f32 %v16698_v31, 0.0001  ;;  %v16699_v42 = vld [vmem:[#allocation2_spill] sm:$0xff]  ;;  %v14196_v19 = vadd.f32 1.0, %v7625_v40  ;;  %v16704_v40 = vld [vmem:[#allocation117_spill] sm:$0xff] }
 0x3c6   : > { %v5568_v50 = vmul.f32 %v5440_v10, %v16699_v42  ;;  %v3779_v7 = vmin.f32 %v3651_v3, 0.9999  ;;  %v7627_v39 = vpop.eup %7626  ;;  %v16701_v49 = vld [vmem:[#allocation138_spill] sm:$0xff]  ;;  %v5444_v56 = vmul.f32 %v14177_v9, %v14177_v9  ;;  %v4291_v59 = vmax.f32 %v4163_v62, -9.2103405  ;;  %v16708_v62 = vld [vmem:[#allocation9_spill] sm:$0xff] }
 0x3c7   : > { %v5903_v20 = vadd.f32 %v5902_v4, %v16700_v8  ;;  %v14200_v22 = vmul.f32 %v16701_v49, %v5534_v11  ;;  %v16702_v37 = vld [vmem:[#allocation54_spill] sm:$0xff]  ;;  %v5184_v26 = vmul.f32 %v5056_v57, %v4416_v38  ;;  %v14208_v10 = vadd.f32 %v14100_v16, %v6091_v29  ;;  %v16706_v49 = vld [vmem:[#allocation165_spill] sm:$0xff]  ;;  %v1836_v16 = vpop.permute.xlu2 %1835 }
 0x3c8   : > { %v5769_v15 = vadd.f32 %v5768_v41, %v16702_v37  ;;  %v7629_v18 = vpop.eup %7628  ;;  %v14205_v31 = vmul.f32 %v6786_v61, %v5568_v50  ;;  %v16705_v42 = vld [vmem:[#allocation10_spill] sm:$0xff]  ;;  %v3790_v11 = vmin.f32 %v3662_v44, 0.9999  ;;  %v4174_v5 = vsub.f32 0.0, %v16706_v49  ;;  %v16710_v29 = vld [vmem:[#allocation93_spill] sm:$0xff] }
 0x3c9   : > { %v5904_v4 = vadd.f32 %v5903_v20, %v16704_v40  ;;  %v7631_v3 = vpop.eup %7630  ;;  %v4931_v37 = vsub.f32 1.0, %v3779_v7  ;;  %v14213_v41 = vmul.f32 %v6658_v53, %v5184_v26  ;;  %7632 = vlog2.f32 %v14196_v19  ;;  %v16709_v61 = vld [vmem:[#allocation50_spill] sm:$0xff]  ;;  %v16711_v40 = vld [vmem:[#allocation116_spill] sm:$0xff]  ;;  %v16712_v49 = vld [vmem:[#allocation133_spill] sm:$0xff] }
 0x3ca   : > { %16703 = vst [vmem:[#allocation47_spill] sm:$0xff] %v14205_v31  ;;  %v5770_v8 = vadd.f32 %v5769_v15, %v16705_v42  ;;  %v5443_v57 = vmul.f32 %v3779_v7, %v3779_v7  ;;  %v14219_v31 = vmul.f32 %v5444_v56, %v16710_v29  ;;  %v4419_v20 = vmin.f32 %v4291_v59, -0.000100005  ;;  %v16713_v26 = vld [vmem:[#allocation134_spill] sm:$0xff]  ;;  %v16714_v7 = vld [vmem:[#allocation148_spill] sm:$0xff]  ;;  %v16715_v56 = vld [vmem:[#allocation89_spill] sm:$0xff] }
 0x3cb   : > { %16707 = vst [vmem:[#allocation101_spill] sm:$0xff] %v14213_v41  ;;  %v5905_v38 = vadd.f32 %v5904_v4, %v16708_v62  ;;  %v3655_v15 = vmax.f32 %v16711_v40, 0.0001  ;;  %v3646_v44 = vmax.f32 %v7627_v39, 0.0001  ;;  %v3359_v53 = vadd.f32 1.0, %v7631_v3 }
 0x3cc   : > { %v5771_v50 = vadd.f32 %v5770_v8, %v16709_v61  ;;  %v3997_v42 = vmul.f32 0.6931472, %v7629_v18  ;;  %v4302_v41 = vmax.f32 %v4174_v5, -9.2103405  ;;  %v4942_v23 = vsub.f32 1.0, %v3790_v11  ;;  %v16716_v59 = vld [vmem:[#allocation87_spill] sm:$0xff] }
 0x3cd   : > { %v5906_v14 = vadd.f32 %v5905_v38, %v16712_v49  ;;  %v5059_v4 = vmul.f32 %v4931_v37, %v4931_v37  ;;  %vm1998_vm6 = vcmp.eq.s32.totalorder %v1836_v16, %v7867_v24  ;;  %v4164_v8 = vsub.f32 0.0, %v16715_v56  ;;  %v16717_v39 = vld [vmem:[#allocation147_spill] sm:$0xff] }
 0x3ce   : > { %v5772_v28 = vadd.f32 %v5771_v50, %v16713_v26  ;;  %v14230_v61 = vmul.f32 %v5443_v57, %v16716_v59  ;;  %v4932_v38 = vsub.f32 1.0, %v14177_v9  ;;  %v14234_v3 = vmin.f32 %v3655_v15, 0.9999  ;;  %v16718_v50 = vld [vmem:[#allocation48_spill] sm:$0xff]  ;;  %v1806_v26 = vpop.permute.xlu1 %1805  ;;  %vm14243_vm8 = vmxor %vm1998_vm6, %vm7688_vm13 }
 0x3cf   : > { %v14225_v62 = vadd.f32 %v5906_v14, %v16714_v7  ;;  %v3654_v5 = vmax.f32 %v16718_v50, 0.0001  ;;  %v7633_v29 = vpop.eup %7632  ;;  %v3774_v37 = vmin.f32 %v3646_v44, 0.9999  ;;  %v4158_v40 = vsub.f32 0.0, %v3997_v42  ;;  %v16720_v7 = vld [vmem:[#allocation150_spill] sm:$0xff]  ;;  %vm2126_vm5 = vmand %vm7869_vm4, %vm1998_vm6 }
 0x3d0   : > { %v5773_v18 = vadd.f32 %v5772_v28, %v16717_v39  ;;  %v16719_v14 = vsub.f32 0.0, %v13855_v45  ;;  %7634 = vrcp.f32 %v3359_v53  ;;  %v4430_v9 = vmin.f32 %v4302_v41, -0.000100005  ;;  %vm2638_vm7 = vmand %vm7869_vm4, %vm14243_vm8 }
 0x3d1   : > { %7636 = vlog2.f32 %v3359_v53  ;;  %v5070_v15 = vmul.f32 %v4942_v23, %v4942_v23  ;;  %v5454_v56 = vmul.f32 %v3790_v11, %v3790_v11  ;;  %v4292_v44 = vmax.f32 %v4164_v8, -9.2103405  ;;  %v16724_v53 = vld [vmem:[#allocation155_spill] sm:$0xff] }
 0x3d2   : > { %v4542_v49 = vsub.f32 %v16719_v14, %v3997_v42  ;;  %v5774_v57 = vadd.f32 %v5773_v18, %v16720_v7  ;;  %v14247_v59 = vmul.f32 %v5059_v4, %v4419_v20  ;;  %v15622_v45 = vsub.f32 0.0, %v14053_v55  ;;  %v1803_v20 = vpop.permute.xlu0 %1802  ;;  %v16725_v4 = vld [vmem:[#allocation160_spill] sm:$0xff]  ;;  %v16726_v14 = vld [vmem:[#allocation42_spill] sm:$0xff] }
 0x3d3   : > { %v14250_v42 = vmul.f32 0.6931472, %v7633_v29  ;;  %vm1988_vm2 = vcmp.eq.s32.totalorder %v1806_v26, %v7867_v24  ;;  %v14258_v18 = vmin.f32 %v3654_v5, 0.9999  ;;  %v4286_v23 = vmax.f32 %v4158_v40, -9.2103405 }
 0x3d4   : > { %v5775_v39 = vadd.f32 %v5774_v57, %v16724_v53  ;;  %v4670_v11 = vmax.f32 %v4542_v49, -9.2103405  ;;  %v4926_v41 = vsub.f32 1.0, %v3774_v37  ;;  %7638 = vrcp.f32 %v14196_v19  ;;  %vm14275_vm10 = vmxor %vm1988_vm2, %vm7688_vm13  ;;  %v16735_v26 = vld [vmem:[#allocation113_spill] sm:$0xff] }
 0x3d5   : > { %16723 = vst [vmem:[#allocation99_spill] sm:$0xff] %v14250_v42  ;;  %v5198_v8 = vmul.f32 %v5070_v15, %v4430_v9  ;;  %v5060_v50 = vmul.f32 %v4932_v38, %v4932_v38  ;;  %v5447_v29 = vmul.f32 %v14234_v3, %v14234_v3  ;;  %v14269_v40 = vsel %vm2126_vm5, 1.0, %v15680_v60  ;;  %v16730_v15 = vld [vmem:[#allocation37_spill] sm:$0xff]  ;;  %vm14291_vm11 = vmand %vm7869_vm4, %vm1988_vm2 }
 0x3d6   : > { %v5776_v16 = vadd.f32 %v5775_v39, %v16725_v4  ;;  %v7635_v5 = vpop.eup %7634  ;;  %v5582_v49 = vmul.f32 %v5454_v56, %v16726_v14  ;;  %v4420_v7 = vmin.f32 %v4292_v44, -0.000100005  ;;  %v3230_v38 = vmul.f32 1.442695, %v15622_v45  ;;  %vm2628_vm1 = vmand %vm7869_vm4, %vm14275_vm10  ;;  %v16738_v45 = vld [vmem:[#allocation77_spill] sm:$0xff]  ;;  %v16748_v44 = vld [vmem:[#allocation124_spill] sm:$0xff] }
 0x3d7   : > { %v7637_v57 = vpop.eup %7636  ;;  %v16729_v28 = vsub.f32 0.0, %v13862_v36  ;;  %v6800_v56 = vsel %vm2638_vm7, 1.0, %v15680_v60  ;;  %vm1987_vm3 = vcmp.eq.s32.totalorder %v1803_v20, %v7867_v24  ;;  %v4414_v39 = vmin.f32 %v4286_v23, -0.000100005  ;;  %v16733_v36 = vld [vmem:[#allocation17_spill] sm:$0xff] }
 0x3d8   : > { %v5777_v53 = vadd.f32 %v5776_v16, %v16730_v15  ;;  %v4798_v4 = vmin.f32 %v4670_v11, -0.000100005  ;;  %v5054_v14 = vmul.f32 %v4926_v41, %v4926_v41  ;;  %v5438_v48 = vmul.f32 %v3774_v37, %v3774_v37  ;;  %vm2115_vm14 = vmand %vm7869_vm4, %vm1987_vm3 }
 0x3d9   : > { %v4571_v9 = vsub.f32 %v16729_v28, %v14250_v42  ;;  %v14297_v16 = vmul.f32 %v14269_v40, %v5198_v8  ;;  %v6093_v37 = vadd.f32 %v13540_v12, %v14208_v10  ;;  %v14306_v23 = vmul.f32 %v5447_v29, %v16735_v26  ;;  %v16737_v8 = vld [vmem:[#allocation86_spill] sm:$0xff]  ;;  %v16740_v26 = vld [vmem:[#allocation64_spill] sm:$0xff]  ;;  %vm14336_vm0 = vmxor %vm1987_vm3, %vm7688_vm13 }
 0x3da   : > { %v5778_v28 = vadd.f32 %v5777_v53, %v16733_v36  ;;  %v14308_v11 = vpop.eup %7638  ;;  %v3615_v41 = vmax.f32 %v7635_v5, 0.0001  ;;  %v3935_v15 = vmul.f32 0.6931472, %v7637_v57  ;;  %7640 = vpow2.f32 %v3230_v38  ;;  %vm2627_vm12 = vmand %vm7869_vm4, %vm14336_vm0 }
 0x3db   : > { %16734 = vst [vmem:[#allocation5_spill] sm:$0xff] %v14297_v16  ;;  %v3665_v53 = vmax.f32 %v16737_v8, 0.0001  ;;  %v4699_v36 = vmax.f32 %v4571_v9, -9.2103405  ;;  %v14316_v16 = vmul.f32 %v6800_v56, %v5582_v49  ;;  %v5188_v12 = vmul.f32 %v5060_v50, %v4420_v7  ;;  %v16742_v49 = vld [vmem:[#allocation76_spill] sm:$0xff]  ;;  %v1845_v56 = vpop.permute.xlu2 %1844 }
 0x3dc   : > { %16736 = vst [vmem:[#allocation74_spill] sm:$0xff] %v14308_v11  ;;  %v5779_v42 = vadd.f32 %v5778_v28, %v16738_v45  ;;  %v5182_v10 = vmul.f32 %v5054_v14, %v4414_v39  ;;  %v5566_v29 = vmul.f32 %v5438_v48, %v4798_v4  ;;  %v5908_v5 = vadd.f32 %v14225_v62, %v16740_v26  ;;  %v16741_v11 = vld [vmem:[#allocation33_spill] sm:$0xff]  ;;  %v16743_v62 = vld [vmem:[#allocation156_spill] sm:$0xff] }
 0x3dd   : > { %16739 = vst [vmem:[#allocation75_spill] sm:$0xff] %v14316_v16  ;;  %v6662_v57 = vsel %vm14291_vm11, 1.0, %v15680_v60  ;;  %v6790_v45 = vsel %vm2628_vm1, 1.0, %v15680_v60  ;;  %v6661_v50 = vsel %vm2115_vm14, 1.0, %v15680_v60  ;;  %v4177_v48 = vsub.f32 0.0, %v16742_v49  ;;  %v16749_v26 = vld [vmem:[#allocation161_spill] sm:$0xff] }
 0x3de   : > { %v5780_v32 = vadd.f32 %v5779_v42, %v16741_v11  ;;  %v3743_v7 = vmin.f32 %v3615_v41, 0.9999  ;;  %v4127_v38 = vsub.f32 0.0, %v3935_v15  ;;  %v5909_v9 = vadd.f32 %v5908_v5, %v16743_v62 }
 0x3df   : > { %v3793_v39 = vmin.f32 %v3665_v53, 0.9999  ;;  %v14340_v19 = vmin.f32 %v4699_v36, -0.000100005  ;;  %v16747_v4 = vsub.f32 0.0, %v13965_v58  ;;  %v14345_v11 = vmul.f32 %v6662_v57, %v5188_v12  ;;  %v14354_v53 = vpop.permute.xlu0 %1811  ;;  %v16750_v36 = vld [vmem:[#allocation11_spill] sm:$0xff] }
 0x3e0   : > { %v5781_v28 = vadd.f32 %v5780_v32, %v16748_v44  ;;  %v7641_v41 = vpop.eup %7640  ;;  %v14348_v8 = vmul.f32 %v13938_v30, %v5182_v10  ;;  %v14351_v20 = vmul.f32 %v13994_v6, %v5566_v29  ;;  %v5910_v5 = vadd.f32 %v5909_v9, %v16749_v26  ;;  %v1815_v10 = vpop.permute.xlu1 %1814  ;;  %v16752_v9 = vld [vmem:[#allocation162_spill] sm:$0xff] }
 0x3e1   : > { %16746 = vst [vmem:[#allocation65_spill] sm:$0xff] %v14340_v19  ;;  %v4511_v14 = vsub.f32 %v16747_v4, %v3935_v15  ;;  %v6094_v49 = vadd.f32 %v6661_v50, %v6093_v37  ;;  %v14358_v58 = vmul.f32 %v6790_v45, %v14219_v31  ;;  %vm2001_vm15 = vcmp.eq.s32.totalorder %v1845_v56, %v7867_v24  ;;  %v16751_v15 = vld [vmem:[#allocation7_spill] sm:$0xff]  ;;  %v16753_v31 = vld [vmem:[#allocation70_spill] sm:$0xff] }
 0x3e2   : > { %v5782_v62 = vadd.f32 %v5781_v28, %v16750_v36  ;;  %v4305_v30 = vmax.f32 %v4177_v48, -9.2103405  ;;  %v4255_v6 = vmax.f32 %v4127_v38, -9.2103405  ;;  %v4895_v32 = vsub.f32 1.0, %v3743_v7  ;;  %vm14374_vm8 = vmxor %vm2001_vm15, %vm7688_vm13  ;;  %v16756_v38 = vld [vmem:[#allocation110_spill] sm:$0xff] }
 0x3e3   : > { %v5911_v12 = vadd.f32 %v5910_v5, %v16751_v15  ;;  %v4945_v37 = vsub.f32 1.0, %v3793_v39  ;;  %v4639_v29 = vmax.f32 %v4511_v14, -9.2103405  ;;  %v3391_v44 = vadd.f32 1.0, %v7641_v41  ;;  %vm2129_vm5 = vmand %vm7869_vm4, %vm2001_vm15 }
 0x3e4   : > { %v5783_v4 = vadd.f32 %v5782_v62, %v16752_v9  ;;  %vm1990_vm6 = vcmp.eq.s32.totalorder %v14354_v53, %v7867_v24  ;;  %v6789_v42 = vsel %vm2627_vm12, 1.0, %v15680_v60  ;;  %v6095_v28 = vadd.f32 %v6662_v57, %v6094_v49  ;;  %v16757_v49 = vld [vmem:[#allocation18_spill] sm:$0xff]  ;;  %vm2641_vm10 = vmand %vm7869_vm4, %vm14374_vm8 }
 0x3e5   : > { %v5912_v45 = vadd.f32 %v5911_v12, %v16753_v31  ;;  %v4167_v14 = vsub.f32 0.0, %v16756_v38  ;;  %v5407_v26 = vmul.f32 %v3743_v7, %v3743_v7  ;;  %v4433_v5 = vmin.f32 %v4305_v30, -0.000100005  ;;  %vm2118_vm7 = vmand %vm7869_vm4, %vm1990_vm6  ;;  %v16758_v30 = vld [vmem:[#allocation104_spill] sm:$0xff] }
 0x3e6   : > { %v5784_v41 = vadd.f32 %v5783_v4, %v13359_v27  ;;  %vm1991_vm2 = vcmp.eq.s32.totalorder %v1815_v10, %v7867_v24  ;;  %v5023_v57 = vmul.f32 %v4895_v32, %v4895_v32  ;;  %v5073_v62 = vmul.f32 %v4945_v37, %v4945_v37  ;;  %v16762_v31 = vld [vmem:[#allocation44_spill] sm:$0xff]  ;;  %vm14491_vm15 = vmxor %vm1990_vm6, %vm7688_vm13 }
 0x3e7   : > { %v5913_v36 = vadd.f32 %v5912_v45, %v16757_v49  ;;  %v5457_v15 = vmul.f32 %v3793_v39, %v3793_v39  ;;  %v4383_v27 = vmin.f32 %v4255_v6, -0.000100005  ;;  %v4767_v7 = vmin.f32 %v4639_v29, -0.000100005  ;;  %vm14406_vm3 = vmxor %vm1991_vm2, %vm7688_vm13  ;;  %v16761_v29 = vld [vmem:[#allocation8_spill] sm:$0xff] }
 0x3e8   : > { %v5785_v56 = vadd.f32 %v5784_v41, %v13582_v47  ;;  %7642 = vrcp.f32 %v3391_v44  ;;  %v14398_v39 = vmul.f32 %v6661_v50, %v14247_v59  ;;  %v14401_v12 = vsel %vm2129_vm5, 1.0, %v15680_v60  ;;  %vm2119_vm11 = vmand %vm7869_vm4, %vm1991_vm2  ;;  %v16763_v41 = vld [vmem:[#allocation144_spill] sm:$0xff] }
 0x3e9   : > { %v5914_v32 = vadd.f32 %v5913_v36, %v16758_v30  ;;  %v4295_v47 = vmax.f32 %v4167_v14, -9.2103405  ;;  %7644 = vlog2.f32 %v3391_v44  ;;  %v4935_v59 = vsub.f32 1.0, %v14234_v3  ;;  %v14422_v14 = vpop.permute.xlu0 %1820  ;;  %vm2631_vm1 = vmand %vm7869_vm4, %vm14406_vm3 }
 0x3ea   : > { %v5786_v37 = vadd.f32 %v5785_v56, %v13735_v35  ;;  %v14417_v50 = vsel %vm2118_vm7, 1.0, %v15680_v60  ;;  %v5201_v4 = vmul.f32 %v5073_v62, %v4433_v5  ;;  %v5585_v45 = vmul.f32 %v5457_v15, %v16762_v31  ;;  %v14441_v5 = vpop.permute.xlu1 %1823  ;;  %v16764_v62 = vld [vmem:[#allocation163_spill] sm:$0xff]  ;;  %v16767_v56 = vld [vmem:[#allocation170_spill] sm:$0xff]  ;;  %vm2630_vm5 = vmand %vm7869_vm4, %vm14491_vm15 }
 0x3eb   : > { %v5915_v9 = vadd.f32 %v5914_v32, %v16761_v29  ;;  %v6096_v38 = vadd.f32 %v13740_v1, %v6095_v28  ;;  %v5151_v35 = vmul.f32 %v5023_v57, %v4383_v27  ;;  %v5535_v44 = vmul.f32 %v5407_v26, %v4767_v7  ;;  %v16768_v32 = vld [vmem:[#allocation45_spill] sm:$0xff] }
 0x3ec   : > { %v5787_v10 = vadd.f32 %v5786_v37, %v13913_v0  ;;  %v6803_v3 = vsel %vm2641_vm10, 1.0, %v15680_v60  ;;  %v14437_v28 = vmul.f32 %v6789_v42, %v14230_v61  ;;  %v6665_v26 = vsel %vm2119_vm11, 1.0, %v15680_v60 }
 0x3ed   : > { %v5916_v1 = vadd.f32 %v5915_v9, %v16763_v41  ;;  %v6097_v0 = vadd.f32 %v14417_v50, %v6096_v38  ;;  %v4423_v49 = vmin.f32 %v4295_v47, -0.000100005  ;;  %v5063_v36 = vmul.f32 %v4935_v59, %v4935_v59  ;;  %v16769_v47 = vld [vmem:[#allocation105_spill] sm:$0xff] }
 0x3ee   : > { %v7643_v57 = vpop.eup %7642  ;;  %v5788_v48 = vadd.f32 %v5787_v10, %v14043_v54  ;;  %vm1993_vm14 = vcmp.eq.s32.totalorder %v14422_v14, %v7867_v24  ;;  %v14448_v27 = vmul.f32 %v14401_v12, %v5201_v4  ;;  %v14450_v61 = vmul.f32 %v6803_v3, %v5585_v45  ;;  %v16770_v3 = vld [vmem:[#allocation136_spill] sm:$0xff] }
 0x3ef   : > { %v5917_v15 = vadd.f32 %v5916_v1, %v16764_v62  ;;  %v6793_v42 = vsel %vm2631_vm1, 1.0, %v15680_v60  ;;  %v7645_v7 = vpop.eup %7644  ;;  %v5279_v30 = vmul.f32 %v16767_v56, %v5151_v35  ;;  %v5663_v6 = vmul.f32 %v16768_v32, %v5535_v44  ;;  %vm2121_vm0 = vmand %vm7869_vm4, %vm1993_vm14 }
 0x3f0   : > { %16765 = vst [vmem:[#allocation6_spill] sm:$0xff] %v14448_v27  ;;  %v5789_v54 = vadd.f32 %v5788_v48, %v14185_v17  ;;  %v4166_v37 = vsub.f32 0.0, %v16769_v47  ;;  %v3647_v29 = vmax.f32 %v7643_v57, 0.0001  ;;  %v15625_v9 = vsub.f32 0.0, %v14165_v63 }
 0x3f1   : > { %16766 = vst [vmem:[#allocation107_spill] sm:$0xff] %v14450_v61  ;;  %v5918_v59 = vadd.f32 %v5917_v15, %v13362_v2  ;;  %v6098_v4 = vadd.f32 %v6665_v26, %v6097_v0  ;;  %v5191_v45 = vmul.f32 %v5063_v36, %v4423_v49  ;;  %v4934_v38 = vsub.f32 1.0, %v14258_v18  ;;  %v14482_v49 = vpop.permute.xlu0 %1829 }
 0x3f2   : > { %v5790_v31 = vadd.f32 %v5789_v54, %v5279_v30  ;;  %v15624_v17 = vsub.f32 0.0, %v14156_v34  ;;  %v3999_v44 = vmul.f32 0.6931472, %v7645_v7  ;;  %v14468_v2 = vmul.f32 %v6793_v42, %v14306_v23  ;;  %v1854_v7 = vpop.permute.xlu2 %1853  ;;  %v14506_v32 = vpop.permute.xlu1 %1832  ;;  %v16775_v54 = vld [vmem:[#allocation60_spill] sm:$0xff] }
 0x3f3   : > { %v5919_v35 = vadd.f32 %v5918_v59, %v13574_v21  ;;  %v5446_v10 = vmul.f32 %v14258_v18, %v14258_v18  ;;  %v4294_v1 = vmax.f32 %v4166_v37, -9.2103405  ;;  %vm1994_vm12 = vcmp.eq.s32.totalorder %v14441_v5, %v7867_v24  ;;  %v16771_v18 = vld [vmem:[#allocation152_spill] sm:$0xff]  ;;  %v16776_v59 = vld [vmem:[#allocation109_spill] sm:$0xff]  ;;  %v16799_v5 = vld [vmem:[#allocation178_spill] sm:$0xff] }
 0x3f4   : > { %v5791_v41 = vadd.f32 %v5790_v31, %v16770_v3  ;;  %v14476_v0 = vsel %vm2121_vm0, 1.0, %v15680_v60  ;;  %v3775_v48 = vmin.f32 %v3647_v29, 0.9999  ;;  %v3288_v21 = vmul.f32 1.442695, %v15625_v9  ;;  %vm2122_vm6 = vmand %vm7869_vm4, %vm1994_vm12 }
 0x3f5   : > { %v5920_v57 = vadd.f32 %v5919_v35, %v13713_v43  ;;  %v6099_v23 = vadd.f32 %v13916_v13, %v6098_v4  ;;  %v14485_v62 = vmul.f32 %v6665_v26, %v5191_v45  ;;  %v5062_v43 = vmul.f32 %v4934_v38, %v4934_v38  ;;  %v16777_v4 = vld [vmem:[#allocation53_spill] sm:$0xff]  ;;  %v16778_v45 = vld [vmem:[#allocation43_spill] sm:$0xff] }
 0x3f6   : > { %v5792_v36 = vadd.f32 %v5791_v41, %v16771_v18  ;;  %v3290_v42 = vmul.f32 1.442695, %v15624_v17  ;;  %v4159_v56 = vsub.f32 0.0, %v3999_v44  ;;  %v16774_v30 = vsub.f32 0.0, %v14053_v55 }
 0x3f7   : > { %v5921_v13 = vadd.f32 %v5920_v57, %v13919_v52  ;;  %v6100_v53 = vadd.f32 %v14476_v0, %v6099_v23  ;;  %v4422_v37 = vmin.f32 %v4294_v1, -0.000100005  ;;  %v5574_v29 = vmul.f32 %v5446_v10, %v16776_v59  ;;  %v1236_v1 = vpop.f32.mrf.mxu3  ;;  %v16781_v57 = vld [vmem:[#allocation71_spill] sm:$0xff] }
 0x3f8   : > { %v4543_v26 = vsub.f32 %v16774_v30, %v3999_v44  ;;  %v5793_v47 = vadd.f32 %v5792_v36, %v16775_v54  ;;  %vm1996_vm8 = vcmp.eq.s32.totalorder %v14482_v49, %v7867_v24  ;;  %v4927_v55 = vsub.f32 1.0, %v3775_v48  ;;  %v14547_v36 = vld [vmem:[%s15432_s2] ss:$0 sm:$0xff]  ;;  %v16786_v30 = vld [vmem:[#allocation49_spill] sm:$0xff]  ;;  %v16873_v49 = vld [vmem:[#allocation80_spill] sm:$0xff] }
 0x3f9   : > { %v5922_v52 = vadd.f32 %v5921_v13, %v14046_v33  ;;  %7646 = vpow2.f32 %v3288_v21  ;;  %vm2004_vm2 = vcmp.eq.s32.totalorder %v1854_v7, %v7867_v24  ;;  %v3668_v38 = vmax.f32 %v16778_v45, 0.0001  ;;  %vm14530_vm7 = vmand %vm7869_vm4, %vm1996_vm8  ;;  %v16788_v7 = vld [vmem:[#allocation174_spill] sm:$0xff]  ;;  %v16789_v45 = vld [vmem:[#allocation36_spill] sm:$0xff] }
 0x3fa   : > { %v5794_v31 = vadd.f32 %v5793_v47, %v16777_v4  ;;  %7648 = vpow2.f32 %v3290_v42  ;;  %v14521_v35 = vsel %vm2122_vm6, 1.0, %v15680_v60  ;;  %v4287_v33 = vmax.f32 %v4159_v56, -9.2103405  ;;  %vm14540_vm10 = vmand %vm7869_vm4, %vm2004_vm2  ;;  %v14573_v4 = vpop.permute.xlu0 %1838 }
 0x3fb   : > { %v5923_v44 = vadd.f32 %v5922_v52, %v14200_v22  ;;  %v4671_v10 = vmax.f32 %v4543_v26, -9.2103405  ;;  %v6101_v3 = vadd.f32 %v14521_v35, %v6100_v53  ;;  %v6792_v23 = vsel %vm2630_vm5, 1.0, %v15680_v60  ;;  %vm14555_vm3 = vmxor %vm2004_vm2, %vm7688_vm13  ;;  %v16787_v53 = vld [vmem:[#allocation19_spill] sm:$0xff] }
 0x3fc   : > { %v5795_v21 = vadd.f32 %v5794_v31, %v16781_v57  ;;  %v5190_v22 = vmul.f32 %v5062_v43, %v4422_v37  ;;  %v14550_v15 = vadd.f32 %v14547_v36, %v1236_v1  ;;  %v5055_v13 = vmul.f32 %v4927_v55, %v4927_v55  ;;  %vm2644_vm1 = vmand %vm7869_vm4, %vm14555_vm3 }
 0x3fd   : > { %v5924_v42 = vadd.f32 %v5923_v44, %v5663_v6  ;;  %v5439_v56 = vmul.f32 %v3775_v48, %v3775_v48  ;;  %v4180_v26 = vsub.f32 0.0, %v16786_v30  ;;  %v3796_v47 = vmin.f32 %v3668_v38, 0.9999  ;;  %vm14615_vm6 = vmxor %vm1994_vm12, %vm7688_vm13 }
 0x3fe   : > { %v5796_v54 = vadd.f32 %v5795_v21, %v16787_v53  ;;  %vm1997_vm11 = vcmp.eq.s32.totalorder %v14506_v32, %v7867_v24  ;;  %v14566_v6 = vsel %vm14530_vm7, 1.0, %v15680_v60  ;;  %1368 = vst.msk [vmem:[%s7898_s10 + $0x3f0] sm:$0xff] %vm1241_vm9, %v14550_v15  ;;  %v4415_v59 = vmin.f32 %v4287_v33, -0.000100005  ;;  %v16792_v21 = vld [vmem:[#allocation169_spill] sm:$0xff]  ;;  %vm2634_vm5 = vmand %vm7869_vm4, %vm14615_vm6 }
 0x3ff   : > { %v7647_v48 = vpop.eup %7646  ;;  %v5925_v37 = vadd.f32 %v5924_v42, %v16788_v7  ;;  %v4799_v52 = vmin.f32 %v4671_v10, -0.000100005  ;;  %v6102_v55 = vadd.f32 %v14023_v46, %v6101_v3  ;;  %v14577_v44 = vmul.f32 %v14417_v50, %v5190_v22  ;;  %v16790_v46 = vld [vmem:[#allocation153_spill] sm:$0xff]  ;;  %v16791_v3 = vld [vmem:[#allocation139_spill] sm:$0xff]  ;;  %vm2125_vm0 = vmand %vm7869_vm4, %vm1997_vm11 }
 0x400   : > { %v7649_v31 = vpop.eup %7648  ;;  %v5797_v38 = vadd.f32 %v5796_v54, %v16789_v45  ;;  %v14579_v41 = vmul.f32 %v6792_v23, %v5574_v29  ;;  %v14584_v1 = vsel %vm14540_vm10, 1.0, %v15680_v60  ;;  %v4308_v10 = vmax.f32 %v4180_v26, -9.2103405  ;;  %v14598_v29 = vpop.permute.xlu1 %1841  ;;  %v16793_v42 = vld [vmem:[#allocation28_spill] sm:$0xff]  ;;  %v16794_v7 = vld [vmem:[#allocation119_spill] sm:$0xff]  ;;  %vm14678_vm3 = vmxor %vm1993_vm14, %vm7688_vm13 }
 0x401   : > { %v5926_v33 = vadd.f32 %v5925_v37, %v16790_v46  ;;  %v3658_v57 = vmax.f32 %v16791_v3, 0.0001  ;;  %v6103_v50 = vadd.f32 %v14566_v6, %v6102_v55  ;;  %v3420_v22 = vadd.f32 1.0, %v7647_v48  ;;  %v16805_v48 = vld [vmem:[#allocation23_spill] sm:$0xff] }
 0x402   : > { %v5798_v23 = vadd.f32 %v5797_v38, %v16792_v21  ;;  %v4948_v18 = vsub.f32 1.0, %v3796_v47  ;;  %vm1999_vm15 = vcmp.eq.s32.totalorder %v14573_v4, %v7867_v24  ;;  %v5183_v26 = vmul.f32 %v5055_v13, %v4415_v59  ;;  %v16797_v13 = vld [vmem:[#allocation135_spill] sm:$0xff] }
 0x403   : > { %v5927_v30 = vadd.f32 %v5926_v33, %v16793_v42  ;;  %v5567_v53 = vmul.f32 %v5439_v56, %v4799_v52  ;;  %v3421_v54 = vadd.f32 1.0, %v7649_v31  ;;  %v6806_v55 = vsel %vm2644_vm1, 1.0, %v15680_v60  ;;  %v16798_v52 = vld [vmem:[#allocation16_spill] sm:$0xff]  ;;  %vm2127_vm12 = vmand %vm7869_vm4, %vm1999_vm15  ;;  %v16800_v21 = vld [vmem:[#allocation91_spill] sm:$0xff] }
 0x404   : > { %v5799_v37 = vadd.f32 %v5798_v23, %v16794_v7  ;;  %v4170_v56 = vsub.f32 0.0, %v16797_v13  ;;  %v14621_v59 = vsel %vm2125_vm0, 1.0, %v15680_v60  ;;  %v4436_v45 = vmin.f32 %v4308_v10, -0.000100005  ;;  %v16801_v10 = vld [vmem:[#allocation31_spill] sm:$0xff]  ;;  %vm2633_vm0 = vmand %vm7869_vm4, %vm14678_vm3 }
 0x405   : > { %v5928_v31 = vadd.f32 %v5927_v30, %v16798_v52  ;;  %v3786_v38 = vmin.f32 %v3658_v57, 0.9999  ;;  %v6104_v43 = vadd.f32 %v14621_v59, %v6103_v50  ;;  %7650 = vlog2.f32 %v3420_v22  ;;  %v16802_v50 = vld [vmem:[#allocation173_spill] sm:$0xff]  ;;  %v14651_v52 = vpop.permute.xlu0 %1847 }
 0x406   : > { %v5800_v46 = vadd.f32 %v5799_v37, %v16799_v5  ;;  %v5076_v33 = vmul.f32 %v4948_v18, %v4948_v18  ;;  %v5460_v3 = vmul.f32 %v3796_v47, %v3796_v47  ;;  %v14633_v42 = vmul.f32 %v13372_v51, %v5183_v26  ;;  %v16803_v51 = vld [vmem:[#allocation79_spill] sm:$0xff] }
 0x407   : > { %v5929_v23 = vadd.f32 %v5928_v31, %v16800_v21  ;;  %v14636_v57 = vmul.f32 %v16801_v10, %v5567_v53  ;;  %7652 = vlog2.f32 %v3421_v54  ;;  %v4298_v7 = vmax.f32 %v4170_v56, -9.2103405  ;;  %v16804_v53 = vld [vmem:[#allocation128_spill] sm:$0xff]  ;;  %v16807_v21 = vld [vmem:[#allocation141_spill] sm:$0xff] }
 0x408   : > { %v5801_v30 = vadd.f32 %v5800_v46, %v16802_v50  ;;  %vm2000_vm2 = vcmp.eq.s32.totalorder %v14598_v29, %v7867_v24  ;;  %v14646_v47 = vsel %vm2127_vm12, 1.0, %v15680_v60  ;;  %v4938_v26 = vsub.f32 1.0, %v3786_v38  ;;  %v16806_v56 = vld [vmem:[#allocation52_spill] sm:$0xff] }
 0x409   : > { %v5930_v18 = vadd.f32 %v5929_v23, %v16803_v51  ;;  %v3657_v37 = vmax.f32 %v16804_v53, 0.0001  ;;  %v6105_v13 = vadd.f32 %v14269_v40, %v6104_v43  ;;  %7654 = vrcp.f32 %v3421_v54  ;;  %vm14662_vm7 = vmand %vm7869_vm4, %vm2000_vm2  ;;  %v14667_v54 = vpop.permute.xlu1 %1850  ;;  %v1863_v51 = vpop.permute.xlu2 %1862 }
 0x40a   : > { %v5802_v31 = vadd.f32 %v5801_v30, %v16805_v48  ;;  %v5204_v5 = vmul.f32 %v5076_v33, %v4436_v45  ;;  %v5588_v46 = vmul.f32 %v5460_v3, %v16806_v56  ;;  %7656 = vrcp.f32 %v3420_v22  ;;  %v16810_v33 = vld [vmem:[#allocation122_spill] sm:$0xff]  ;;  %v16811_v22 = vld [vmem:[#allocation125_spill] sm:$0xff] }
 0x40b   : > { %v5931_v10 = vadd.f32 %v5930_v18, %v16807_v21  ;;  %v6796_v50 = vsel %vm2634_vm5, 1.0, %v15680_v60  ;;  %v6106_v43 = vadd.f32 %v14646_v47, %v6105_v13  ;;  %v7651_v45 = vpop.eup %7650  ;;  %v5450_v23 = vmul.f32 %v3786_v38, %v3786_v38  ;;  %v1238_v18 = vpop.f32.mrf.mxu3  ;;  %v16812_v48 = vld [vmem:[#allocation166_spill] sm:$0xff]  ;;  %v16828_v13 = vld [vmem:[#allocation171_spill] sm:$0xff] }
 0x40c   : > { %v5803_v3 = vadd.f32 %v5802_v31, %v16810_v33  ;;  %v4169_v30 = vsub.f32 0.0, %v16811_v22  ;;  %vm2002_vm10 = vcmp.eq.s32.totalorder %v14651_v52, %v7867_v24  ;;  %v4426_v21 = vmin.f32 %v4298_v7, -0.000100005  ;;  %v16815_v31 = vld [vmem:[#allocation149_spill] sm:$0xff] }
 0x40d   : > { %v7653_v53 = vpop.eup %7652  ;;  %v5932_v56 = vadd.f32 %v5931_v10, %v16812_v48  ;;  %v5066_v17 = vmul.f32 %v4938_v26, %v4938_v26  ;;  %v3785_v38 = vmin.f32 %v3657_v37, 0.9999  ;;  %v14684_v22 = vmul.f32 %v14584_v1, %v5204_v5  ;;  %v16818_v26 = vld [vmem:[#allocation103_spill] sm:$0xff]  ;;  %vm14701_vm1 = vmand %vm7869_vm4, %vm2002_vm10 }
 0x40e   : > { %v5804_v33 = vadd.f32 %v5803_v3, %v16815_v31  ;;  %v14686_v9 = vmul.f32 %v6806_v55, %v5588_v46  ;;  %v14691_v7 = vsel %vm14662_vm7, 1.0, %v15680_v60  ;;  %vm2007_vm14 = vcmp.eq.s32.totalorder %v1863_v51, %v7867_v24  ;;  %v16821_v46 = vld [vmem:[#allocation112_spill] sm:$0xff]  ;;  %v16823_v48 = vld [vmem:[#allocation35_spill] sm:$0xff] }
 0x40f   : > { %16816 = vst [vmem:[#allocation38_spill] sm:$0xff] %v14684_v22  ;;  %v5933_v10 = vadd.f32 %v5932_v56, %v16818_v26  ;;  %v6107_v14 = vadd.f32 %v14691_v7, %v6106_v43  ;;  %v14706_v37 = vadd.f32 %v14547_v36, %v1238_v18  ;;  %v14708_v5 = vpop.eup %7654  ;;  %v14711_v3 = vmul.f32 0.6931472, %v7651_v45  ;;  %v16825_v26 = vld [vmem:[#allocation177_spill] sm:$0xff]  ;;  %v16826_v45 = vld [vmem:[#allocation154_spill] sm:$0xff]  ;;  %vm14739_vm12 = vmxor %vm2007_vm14, %vm7688_vm13 }
 0x410   : > { %16817 = vst [vmem:[#allocation62_spill] sm:$0xff] %v14686_v9  ;;  %v5805_v40 = vadd.f32 %v5804_v33, %v16821_v46  ;;  %v5578_v43 = vmul.f32 %v5450_v23, %v16823_v48  ;;  %v4297_v56 = vmax.f32 %v4169_v30, -9.2103405  ;;  %v14718_v31 = vpop.eup %7656  ;;  %v14721_v36 = vmul.f32 0.6931472, %v7653_v53  ;;  %vm2647_vm7 = vmand %vm7869_vm4, %vm14739_vm12  ;;  %v16845_v22 = vld [vmem:[#allocation12_spill] sm:$0xff] }
 0x411   : > { %16822 = vst [vmem:[#allocation106_spill] sm:$0xff] %v14711_v3  ;;  %v5934_v19 = vadd.f32 %v5933_v10, %v16825_v26  ;;  %v5194_v18 = vmul.f32 %v5066_v17, %v4426_v21  ;;  %v4937_v9 = vsub.f32 1.0, %v3785_v38  ;;  %v5449_v23 = vmul.f32 %v3785_v38, %v3785_v38  ;;  %v16831_v21 = vld [vmem:[#allocation188_spill] sm:$0xff]  ;;  %v14771_v51 = vpop.permute.xlu1 %1859 }
 0x412   : > { %16824 = vst [vmem:[#allocation29_spill] sm:$0xff] %v14718_v31  ;;  %v5806_v33 = vadd.f32 %v5805_v40, %v16826_v45  ;;  %vm2003_vm6 = vcmp.eq.s32.totalorder %v14667_v54, %v7867_v24  ;;  %v14732_v30 = vsel %vm14701_vm1, 1.0, %v15680_v60  ;;  %v6795_v53 = vsel %vm2633_vm0, 1.0, %v15680_v60  ;;  %v16832_v40 = vld [vmem:[#allocation140_spill] sm:$0xff]  ;;  %vm14818_vm1 = vmxor %vm1997_vm11, %vm7688_vm13 }
 0x413   : > { %1369 = vst.msk [vmem:[%s7898_s10 + $0x3f8] sm:$0xff] %vm1241_vm9, %v14706_v37  ;;  %v5935_v10 = vadd.f32 %v5934_v19, %v16828_v13  ;;  %v3671_v38 = vmax.f32 %v16831_v21, 0.0001  ;;  %v6108_v46 = vadd.f32 %v14401_v12, %v6107_v14  ;;  %v16833_v55 = vsub.f32 0.0, %v14165_v63  ;;  %vm14755_vm9 = vmand %vm7869_vm4, %vm2007_vm14  ;;  %v14759_v21 = vpop.permute.xlu0 %1856  ;;  %v16837_v12 = vld [vmem:[#allocation3_spill] sm:$0xff] }
 0x414   : > { %16827 = vst [vmem:[#allocation84_spill] sm:$0xff] %v14732_v30  ;;  %v5807_v48 = vadd.f32 %v5806_v33, %v16832_v40  ;;  %v14749_v19 = vmul.f32 %v6796_v50, %v5578_v43  ;;  %v4425_v45 = vmin.f32 %v4297_v56, -0.000100005  ;;  %v14763_v33 = vmul.f32 %v14521_v35, %v5194_v18  ;;  %vm2131_vm5 = vmand %vm7869_vm4, %vm2003_vm6  ;;  %v16839_v43 = vld [vmem:[#allocation184_spill] sm:$0xff]  ;;  %v16842_v35 = vld [vmem:[#allocation131_spill] sm:$0xff] }
 0x415   : > { %v4572_v26 = vsub.f32 %v16833_v55, %v14711_v3  ;;  %16836 = vst [vmem:[#allocation85_spill] sm:$0xff] %v14759_v21  ;;  %v5936_v14 = vadd.f32 %v5935_v10, %v16837_v12  ;;  %v5065_v63 = vmul.f32 %v4937_v9, %v4937_v9  ;;  %v6109_v50 = vadd.f32 %v14732_v30, %v6108_v46  ;;  %v16843_v9 = vld [vmem:[#allocation82_spill] sm:$0xff]  ;;  %vm2637_vm11 = vmand %vm7869_vm4, %vm14818_vm1 }
 0x416   : > { %16838 = vst [vmem:[#allocation4_spill] sm:$0xff] %v14771_v51  ;;  %v5808_v56 = vadd.f32 %v5807_v48, %v16839_v43  ;;  %v16840_v40 = vsub.f32 0.0, %v14156_v34  ;;  %v5577_v18 = vmul.f32 %v5449_v23, %v16842_v35  ;;  %v4183_v55 = vsub.f32 0.0, %v16843_v9  ;;  %v16844_v12 = vld [vmem:[#allocation22_spill] sm:$0xff] }
 0x417   : > { %v5937_v46 = vadd.f32 %v5936_v14, %v16844_v12  ;;  %v3799_v61 = vmin.f32 %v3671_v38, 0.9999  ;;  %v3661_v16 = vmax.f32 %v16845_v22, 0.0001  ;;  %vm2005_vm3 = vcmp.eq.s32.totalorder %v14759_v21, %v7867_v24  ;;  %v16846_v34 = vld [vmem:[#allocation182_spill] sm:$0xff]  ;;  %v16849_v12 = vld [vmem:[#allocation159_spill] sm:$0xff] }
 0x418   : > { %v14777_v10 = vsub.f32 %v16840_v40, %v14721_v36  ;;  %v5809_v48 = vadd.f32 %v5808_v56, %v16846_v34  ;;  %v4700_v43 = vmax.f32 %v4572_v26, -9.2103405  ;;  %v14793_v23 = vsel %vm14755_vm9, 1.0, %v15680_v60  ;;  %v16847_v40 = vld [vmem:[#allocation143_spill] sm:$0xff]  ;;  %vm2133_vm14 = vmand %vm7869_vm4, %vm2005_vm3  ;;  %v16868_v30 = vld [vmem:[#allocation98_spill] sm:$0xff] }
 0x419   : > { %v14796_v17 = vsel %vm2131_vm5, 1.0, %v15680_v60  ;;  %v5938_v35 = vadd.f32 %v5937_v46, %v16847_v40  ;;  %v5193_v14 = vmul.f32 %v5065_v63, %v4425_v45  ;;  %v14800_v38 = vsel %vm2647_vm7, 1.0, %v15680_v60  ;;  %v16848_v26 = vld [vmem:[#allocation95_spill] sm:$0xff]  ;;  %v16850_v46 = vld [vmem:[#allocation25_spill] sm:$0xff]  ;;  %vm14868_vm5 = vmxor %vm1996_vm8, %vm7688_vm13 }
 0x41a   : > { %16841 = vst [vmem:[#allocation114_spill] sm:$0xff] %v14777_v10  ;;  %v6110_v22 = vadd.f32 %v14796_v17, %v6109_v50  ;;  %v5810_v13 = vadd.f32 %v5809_v48, %v16848_v26  ;;  %v4311_v9 = vmax.f32 %v4183_v55, -9.2103405  ;;  %v4173_v34 = vsub.f32 0.0, %v16849_v12  ;;  %v16853_v48 = vld [vmem:[#allocation21_spill] sm:$0xff]  ;;  %v16858_v10 = vld [vmem:[#allocation59_spill] sm:$0xff] }
 0x41b   : > { %v5939_v45 = vadd.f32 %v5938_v35, %v16850_v46  ;;  %v14812_v63 = vmul.f32 %v6795_v53, %v5577_v18  ;;  %v4951_v40 = vsub.f32 1.0, %v3799_v61  ;;  %v3789_v21 = vmin.f32 %v3661_v16, 0.9999  ;;  %v16855_v53 = vld [vmem:[#allocation151_spill] sm:$0xff]  ;;  %v16857_v12 = vld [vmem:[#allocation61_spill] sm:$0xff] }
 0x41c   : > { %v5811_v26 = vadd.f32 %v5810_v13, %v16853_v48  ;;  %v5463_v56 = vmul.f32 %v3799_v61, %v3799_v61  ;;  %vm2006_vm0 = vcmp.eq.s32.totalorder %v14771_v51, %v7867_v24  ;;  %v14826_v55 = vsel %vm2133_vm14, 1.0, %v15680_v60  ;;  %v14841_v48 = vpop.permute.xlu0 %1865  ;;  %vm2636_vm14 = vmand %vm7869_vm4, %vm14868_vm5 }
 0x41d   : > { %16854 = vst [vmem:[#allocation115_spill] sm:$0xff] %v14826_v55  ;;  %v5940_v18 = vadd.f32 %v5939_v45, %v16855_v53  ;;  %v14829_v35 = vmin.f32 %v4700_v43, -0.000100005  ;;  %v3660_v32 = vmax.f32 %v16857_v12, 0.0001  ;;  %v6111_v46 = vadd.f32 %v14584_v1, %v6110_v22  ;;  %v16860_v43 = vld [vmem:[#allocation27_spill] sm:$0xff]  ;;  %vm14849_vm12 = vmand %vm7869_vm4, %vm2006_vm0 }
 0x41e   : > { %v5812_v3 = vadd.f32 %v5811_v26, %v16858_v10  ;;  %v14835_v16 = vmul.f32 %v14476_v0, %v5193_v14  ;;  %v4439_v61 = vmin.f32 %v4311_v9, -0.000100005  ;;  %v4301_v13 = vmax.f32 %v4173_v34, -9.2103405  ;;  %16859 = vst [vmem:[#allocation81_spill] sm:$0xff] %v14841_v48  ;;  %v14854_v10 = vpop.permute.xlu1 %1868  ;;  %v16864_v14 = vld [vmem:[#allocation180_spill] sm:$0xff]  ;;  %vm14974_vm5 = vmxor %vm2000_vm2, %vm7688_vm13 }
 0x41f   : > { %16856 = vst [vmem:[#allocation111_spill] sm:$0xff] %v14829_v35  ;;  %v5941_v45 = vadd.f32 %v5940_v18, %v16860_v43  ;;  %v5079_v53 = vmul.f32 %v4951_v40, %v4951_v40  ;;  %v4941_v12 = vsub.f32 1.0, %v3789_v21  ;;  %v6112_v1 = vadd.f32 %v14826_v55, %v6111_v46  ;;  %v16865_v9 = vld [vmem:[#allocation189_spill] sm:$0xff]  ;;  %v1872_v18 = vpop.permute.xlu2 %1871  ;;  %v16867_v43 = vld [vmem:[#allocation39_spill] sm:$0xff] }
 0x420   : > { %16863 = vst [vmem:[#allocation46_spill] sm:$0xff] %v14854_v10  ;;  %v5813_v22 = vadd.f32 %v5812_v3, %v16864_v14  ;;  %v5591_v34 = vmul.f32 %v5463_v56, %v16865_v9  ;;  %v5453_v50 = vmul.f32 %v3789_v21, %v3789_v21  ;;  %v16866_v40 = vld [vmem:[#allocation13_spill] sm:$0xff]  ;;  %v6799_v51 = vsel %vm2637_vm11, 1.0, %v15680_v60  ;;  %v16871_v21 = vld [vmem:[#allocation167_spill] sm:$0xff] }
 0x421   : > { %v4172_v26 = vsub.f32 0.0, %v16866_v40  ;;  %v5942_v35 = vadd.f32 %v5941_v45, %v16867_v43  ;;  %v3788_v27 = vmin.f32 %v3660_v32, 0.9999  ;;  %vm2008_vm9 = vcmp.eq.s32.totalorder %v14841_v48, %v7867_v24  ;;  %v16872_v45 = vld [vmem:[#allocation132_spill] sm:$0xff] }
 0x422   : > { %v5814_v46 = vadd.f32 %v5813_v22, %v16868_v30  ;;  %v4429_v55 = vmin.f32 %v4301_v13, -0.000100005  ;;  %v3674_v56 = vmax.f32 %v16871_v21, 0.0001  ;;  %v14876_v32 = vsel %vm14849_vm12, 1.0, %v15680_v60  ;;  %vm2136_vm8 = vmand %vm7869_vm4, %vm2008_vm9  ;;  %v16874_v40 = vld [vmem:[#allocation88_spill] sm:$0xff] }
 0x423   : > { %v5943_v14 = vadd.f32 %v5942_v35, %v16872_v45  ;;  %v5069_v9 = vmul.f32 %v4941_v12, %v4941_v12  ;;  %vm2010_vm7 = vcmp.eq.s32.totalorder %v1872_v18, %v7867_v24  ;;  %v6113_v30 = vadd.f32 %v14876_v32, %v6112_v1  ;;  %v16875_v21 = vld [vmem:[#allocation96_spill] sm:$0xff] }
 0x424   : > { %v5815_v13 = vadd.f32 %v5814_v46, %v16873_v49  ;;  %v5207_v22 = vmul.f32 %v5079_v53, %v4439_v61  ;;  %v5581_v0 = vmul.f32 %v5453_v50, %v16874_v40  ;;  %v4300_v43 = vmax.f32 %v4172_v26, -9.2103405  ;;  %v16876_v1 = vld [vmem:[#allocation20_spill] sm:$0xff]  ;;  %vm14899_vm11 = vmxor %vm2010_vm7, %vm7688_vm13 }
 0x425   : > { %v5944_v31 = vadd.f32 %v5943_v14, %v16875_v21  ;;  %v4940_v35 = vsub.f32 1.0, %v3788_v27  ;;  %v5452_v12 = vmul.f32 %v3788_v27, %v3788_v27  ;;  %vm2009_vm1 = vcmp.eq.s32.totalorder %v14854_v10, %v7867_v24  ;;  %v16879_v50 = vld [vmem:[#allocation92_spill] sm:$0xff]  ;;  %v16880_v14 = vld [vmem:[#allocation185_spill] sm:$0xff]  ;;  %vm14915_vm12 = vmand %vm7869_vm4, %vm2010_vm7 }
 0x426   : > { %v5816_v45 = vadd.f32 %v5815_v13, %v16876_v1  ;;  %v3802_v53 = vmin.f32 %v3674_v56, 0.9999  ;;  %v4186_v26 = vsub.f32 0.0, %v16879_v50  ;;  %v14905_v46 = vsel %vm2136_vm8, 1.0, %v15680_v60  ;;  %v16884_v21 = vld [vmem:[#allocation120_spill] sm:$0xff]  ;;  %vm2137_vm8 = vmand %vm7869_vm4, %vm2009_vm1  ;;  %v16896_v10 = vld [vmem:[#allocation90_spill] sm:$0xff] }
 0x427   : > { %v5945_v27 = vadd.f32 %v5944_v31, %v16880_v14  ;;  %v14909_v49 = vmul.f32 %v14800_v38, %v5591_v34  ;;  %v5197_v40 = vmul.f32 %v5069_v9, %v4429_v55  ;;  %v6114_v56 = vadd.f32 %v14793_v23, %v6113_v30  ;;  %v16885_v55 = vld [vmem:[#allocation83_spill] sm:$0xff]  ;;  %v16886_v9 = vld [vmem:[#allocation24_spill] sm:$0xff]  ;;  %vm2650_vm7 = vmand %vm7869_vm4, %vm14899_vm11 }
 0x428   : > { %v5817_v1 = vadd.f32 %v5816_v45, %v16884_v21  ;;  %v14922_v50 = vmul.f32 %v14793_v23, %v5207_v22  ;;  %v14924_v31 = vmul.f32 %v6799_v51, %v5581_v0  ;;  %v4428_v38 = vmin.f32 %v4300_v43, -0.000100005  ;;  %v14938_v23 = vpop.permute.xlu1 %1877  ;;  %v16888_v30 = vld [vmem:[#allocation56_spill] sm:$0xff] }
 0x429   : > { %16881 = vst [vmem:[#allocation78_spill] sm:$0xff] %v14909_v49  ;;  %v5946_v34 = vadd.f32 %v5945_v27, %v16885_v55  ;;  %v5068_v18 = vmul.f32 %v4940_v35, %v4940_v35  ;;  %v5580_v14 = vmul.f32 %v5452_v12, %v16886_v9  ;;  %v6115_v51 = vadd.f32 %v14905_v46, %v6114_v56  ;;  %v16889_v12 = vld [vmem:[#allocation181_spill] sm:$0xff]  ;;  %v16890_v27 = vld [vmem:[#allocation142_spill] sm:$0xff] }
 0x42a   : > { %16887 = vst [vmem:[#allocation102_spill] sm:$0xff] %v14938_v23  ;;  %v5818_v22 = vadd.f32 %v5817_v1, %v16888_v30  ;;  %v6798_v0 = vsel %vm2636_vm14, 1.0, %v15680_v60  ;;  %v4314_v43 = vmax.f32 %v4186_v26, -9.2103405  ;;  %v4954_v35 = vsub.f32 1.0, %v3802_v53  ;;  %v16891_v1 = vld [vmem:[#allocation145_spill] sm:$0xff] }
 0x42b   : > { %v5947_v45 = vadd.f32 %v5946_v34, %v16889_v12  ;;  %v14949_v61 = vmul.f32 %v14621_v59, %v5197_v40  ;;  %v3664_v56 = vmax.f32 %v16890_v27, 0.0001  ;;  %v14953_v21 = vsel %vm2137_vm8, 1.0, %v15680_v60  ;;  %v14963_v34 = vpop.permute.xlu0 %1874  ;;  %v16894_v59 = vld [vmem:[#allocation97_spill] sm:$0xff]  ;;  %v16895_v27 = vld [vmem:[#allocation175_spill] sm:$0xff] }
 0x42c   : > { %v5819_v55 = vadd.f32 %v5818_v22, %v16891_v1  ;;  %v6684_v3 = vsel %vm14915_vm12, 1.0, %v15680_v60  ;;  %v14960_v9 = vsel %vm2650_vm7, 1.0, %v15680_v60  ;;  %v6116_v26 = vadd.f32 %v14953_v21, %v6115_v51  ;;  %16893 = vst [vmem:[#allocation66_spill] sm:$0xff] %v14963_v34  ;;  %v16899_v51 = vld [vmem:[#allocation55_spill] sm:$0xff]  ;;  %vm2640_vm12 = vmand %vm7869_vm4, %vm14974_vm5 }
 0x42d   : > { %16892 = vst [vmem:[#allocation137_spill] sm:$0xff] %v14960_v9  ;;  %v5948_v40 = vadd.f32 %v5947_v45, %v16894_v59  ;;  %v5196_v30 = vmul.f32 %v5068_v18, %v4428_v38  ;;  %v14966_v12 = vmul.f32 %v6798_v0, %v5580_v14  ;;  %v3663_v49 = vmax.f32 %v16895_v27, 0.0001  ;;  %v16900_v45 = vld [vmem:[#allocation187_spill] sm:$0xff]  ;;  %v16901_v0 = vld [vmem:[#allocation172_spill] sm:$0xff] }
 0x42e   : > { %v5820_v22 = vadd.f32 %v5819_v55, %v16896_v10  ;;  %v4442_v1 = vmin.f32 %v4314_v43, -0.000100005  ;;  %v5082_v48 = vmul.f32 %v4954_v35, %v4954_v35  ;;  %v4176_v9 = vsub.f32 0.0, %v16899_v51  ;;  %v14986_v43 = vpop.permute.xlu2 %1880 }
 0x42f   : > { %v5949_v38 = vadd.f32 %v5948_v40, %v16900_v45  ;;  %v3792_v18 = vmin.f32 %v3664_v56, 0.9999  ;;  %vm2012_vm14 = vcmp.eq.s32.totalorder %v14938_v23, %v7867_v24  ;;  %vm2011_vm11 = vcmp.eq.s32.totalorder %v14963_v34, %v7867_v24  ;;  %16902 = vst [vmem:[#allocation164_spill] sm:$0xff] %v14986_v43  ;;  %v16903_v56 = vld [vmem:[#allocation26_spill] sm:$0xff]  ;;  %v16916_v23 = vld [vmem:[#allocation57_spill] sm:$0xff] }
 0x430   : > { %v5821_v10 = vadd.f32 %v5820_v22, %v14348_v8  ;;  %v5466_v14 = vmul.f32 %v3802_v53, %v3802_v53  ;;  %v4175_v29 = vsub.f32 0.0, %v16901_v0  ;;  %v6117_v35 = vadd.f32 %v6684_v3, %v6116_v26  ;;  %vm2139_vm2 = vmand %vm7869_vm4, %vm2011_vm11  ;;  %v15015_v45 = vpop.permute.xlu1 %1886  ;;  %v16908_v0 = vld [vmem:[#allocation100_spill] sm:$0xff] }
 0x431   : > { %v5950_v55 = vadd.f32 %v5949_v38, %v16903_v56  ;;  %v14995_v59 = vmul.f32 %v14566_v6, %v5196_v30  ;;  %v3791_v8 = vmin.f32 %v3663_v49, 0.9999  ;;  %v15002_v53 = vsel %vm2139_vm2, 1.0, %v15680_v60  ;;  %vm2140_vm8 = vmand %vm7869_vm4, %vm2012_vm14  ;;  %v16904_v30 = vld [vmem:[#allocation118_spill] sm:$0xff] }
 0x432   : > { %v5822_v26 = vadd.f32 %v5821_v10, %v14633_v42  ;;  %v5210_v40 = vmul.f32 %v5082_v48, %v4442_v1  ;;  %v4304_v27 = vmax.f32 %v4176_v9, -9.2103405  ;;  %v6118_v6 = vadd.f32 %v15002_v53, %v6117_v35  ;;  %v16905_v42 = vld [vmem:[#allocation101_spill] sm:$0xff]  ;;  %v16906_v9 = vld [vmem:[#allocation15_spill] sm:$0xff]  ;;  %vm15032_vm2 = vmxor %vm1999_vm15, %vm7688_vm13 }
 0x433   : > { %v5951_v22 = vadd.f32 %v5950_v55, %v16904_v30  ;;  %v4944_v51 = vsub.f32 1.0, %v3792_v18  ;;  %v3038_v49 = vsub.f32 0.0, %v14550_v15  ;;  %vm15638_vm7 = vcmp.eq.s32.totalorder %v14986_v43, %v7867_v24  ;;  %v15050_v13 = vpop.permute.xlu0 %1883 }
 0x434   : > { %v5823_v48 = vadd.f32 %v5822_v26, %v16905_v42  ;;  %v15019_v1 = vmul.f32 %v5466_v14, %v16906_v9  ;;  %v5456_v38 = vmul.f32 %v3792_v18, %v3792_v18  ;;  %v4303_v10 = vmax.f32 %v4175_v29, -9.2103405  ;;  %v16912_v29 = vld [vmem:[#allocation69_spill] sm:$0xff]  ;;  %vm2141_vm5 = vmand %vm7869_vm4, %vm15638_vm7 }
 0x435   : > { %v5952_v56 = vadd.f32 %v5951_v22, %v16908_v0  ;;  %v6802_v35 = vsel %vm2640_vm12, 1.0, %v15680_v60  ;;  %v4943_v14 = vsub.f32 1.0, %v3791_v8  ;;  %v15037_v18 = vsel %vm2140_vm8, 1.0, %v15680_v60  ;;  %v16913_v22 = vld [vmem:[#allocation190_spill] sm:$0xff]  ;;  %vm2639_vm12 = vmand %vm7869_vm4, %vm15032_vm2 }
 0x436   : > { %16907 = vst [vmem:[#allocation2_spill] sm:$0xff] %v15019_v1  ;;  %v5824_v26 = vadd.f32 %v5823_v48, %v16912_v29  ;;  %v15040_v30 = vmul.f32 %v6684_v3, %v5210_v40  ;;  %v6119_v4 = vadd.f32 %v15037_v18, %v6118_v6  ;;  %vm2015_vm15 = vcmp.eq.s32.totalorder %v15015_v45, %v7867_v24  ;;  %v16914_v40 = vld [vmem:[#allocation157_spill] sm:$0xff]  ;;  %v16915_v29 = vld [vmem:[#allocation51_spill] sm:$0xff]  ;;  %vm15128_vm2 = vmxor %vm2003_vm6, %vm7688_vm13 }
 0x437   : > { %16911 = vst [vmem:[#allocation121_spill] sm:$0xff] %v15037_v18  ;;  %v5953_v42 = vadd.f32 %v5952_v56, %v16913_v22  ;;  %v4432_v9 = vmin.f32 %v4304_v27, -0.000100005  ;;  %v5072_v0 = vmul.f32 %v4944_v51, %v4944_v51  ;;  %v3292_v3 = vmul.f32 1.442695, %v3038_v49  ;;  %vm15070_vm8 = vmand %vm7869_vm4, %vm2015_vm15 }
 0x438   : > { %v5825_v48 = vadd.f32 %v5824_v26, %v16914_v40  ;;  %v5584_v1 = vmul.f32 %v5456_v38, %v16915_v29  ;;  %v4431_v6 = vmin.f32 %v4303_v10, -0.000100005  ;;  %v5455_v43 = vmul.f32 %v3791_v8, %v3791_v8  ;;  %v16922_v29 = vld [vmem:[#allocation47_spill] sm:$0xff]  ;;  %vm2643_vm6 = vmand %vm7869_vm4, %vm15128_vm2 }
 0x439   : > { %v5954_v34 = vadd.f32 %v5953_v42, %v16916_v23  ;;  %v5071_v18 = vmul.f32 %v4943_v14, %v4943_v14  ;;  %v15063_v27 = vsel %vm2141_vm5, 1.0, %v15680_v60  ;;  %vm2014_vm7 = vcmp.eq.s32.totalorder %v15050_v13, %v7867_v24  ;;  %v16919_v14 = vld [vmem:[#allocation94_spill] sm:$0xff]  ;;  %vm15295_vm2 = vmxor %vm2008_vm9, %vm7688_vm13 }
 0x43a   : > { %v5826_v8 = vadd.f32 %v5825_v48, %v14398_v39  ;;  %v3677_v23 = vmax.f32 %v14708_v5, 0.0001  ;;  %v4189_v38 = vsub.f32 0.0, %v14721_v36  ;;  %v6120_v10 = vadd.f32 %v15063_v27, %v6119_v4  ;;  %vm2142_vm5 = vmand %vm7869_vm4, %vm2014_vm7 }
 0x43b   : > { %v5955_v56 = vadd.f32 %v5954_v34, %v14351_v20  ;;  %7658 = vpow2.f32 %v3292_v3  ;;  %v3667_v26 = vmax.f32 %v16919_v14, 0.0001  ;;  %v15088_v39 = vsel %vm2142_vm5, 1.0, %v15680_v60  ;;  %v16920_v34 = vld [vmem:[#allocation63_spill] sm:$0xff]  ;;  %vm15265_vm5 = vmxor %vm2006_vm0, %vm7688_vm13 }
 0x43c   : > { %v5827_v5 = vadd.f32 %v5826_v8, %v14345_v11  ;;  %v5200_v36 = vmul.f32 %v5072_v0, %v4432_v9  ;;  %v6801_v4 = vsel %vm2639_vm12, 1.0, %v15680_v60  ;;  %v6121_v22 = vadd.f32 %v15088_v39, %v6120_v10  ;;  %v16921_v9 = vld [vmem:[#allocation130_spill] sm:$0xff]  ;;  %v16923_v10 = vld [vmem:[#allocation73_spill] sm:$0xff]  ;;  %vm15157_vm12 = vmxor %vm2002_vm10, %vm7688_vm13 }
 0x43d   : > { %v5956_v20 = vadd.f32 %v5955_v56, %v14636_v57  ;;  %v5583_v42 = vmul.f32 %v5455_v43, %v16920_v34  ;;  %v15639_v3 = vsub.f32 0.0, %v14706_v37  ;;  %v15104_v11 = vsel %vm15070_vm8, 1.0, %v15680_v60  ;;  %vm2642_vm10 = vmand %vm7869_vm4, %vm15157_vm12 }
 0x43e   : > { %v5828_v0 = vadd.f32 %v5827_v5, %v16921_v9  ;;  %v5199_v40 = vmul.f32 %v5071_v18, %v4431_v6  ;;  %v15107_v48 = vmin.f32 %v3677_v23, 0.9999  ;;  %v6122_v55 = vadd.f32 %v15104_v11, %v6121_v22  ;;  %v16924_v5 = vld [vmem:[#allocation68_spill] sm:$0xff]  ;;  %vm15252_vm8 = vmxor %vm2005_vm3, %vm7688_vm13 }
 0x43f   : > { %v5957_v8 = vadd.f32 %v5956_v20, %v16922_v29  ;;  %v15112_v57 = vmax.f32 %v4189_v38, -9.2103405  ;;  %v3795_v43 = vmin.f32 %v3667_v26, 0.9999  ;;  %v4179_v56 = vsub.f32 0.0, %v16923_v10  ;;  %v16929_v29 = vld [vmem:[#allocation146_spill] sm:$0xff]  ;;  %vm2645_vm3 = vmand %vm7869_vm4, %vm15252_vm8 }
 0x440   : > { %v5829_v51 = vadd.f32 %v5828_v0, %v14577_v44  ;;  %v15117_v14 = vmul.f32 %v14691_v7, %v5200_v36  ;;  %v15119_v18 = vmul.f32 %v6802_v35, %v5584_v1  ;;  %v6123_v6 = vrot.slane %v6122_v55, 4  ;;  %v16927_v44 = vld [vmem:[#allocation176_spill] sm:$0xff]  ;;  %vm2646_vm0 = vmand %vm7869_vm4, %vm15265_vm5 }
 0x441   : > { %v7659_v23 = vpop.eup %7658  ;;  %v5958_v22 = vadd.f32 %v5957_v8, %v16924_v5  ;;  %v15122_v34 = vmul.f32 %v6801_v4, %v5583_v42  ;;  %v3666_v26 = vmax.f32 %v16927_v44, 0.0001  ;;  %v3294_v7 = vmul.f32 1.442695, %v15639_v3  ;;  %v16928_v4 = vld [vmem:[#allocation67_spill] sm:$0xff]  ;;  %vm15309_vm9 = vmxor %vm2009_vm1, %vm7688_vm13 }
 0x442   : > { %v5830_v1 = vadd.f32 %v5829_v51, %v14485_v62  ;;  %v15137_v35 = vmul.f32 %v14646_v47, %v5199_v40  ;;  %v4957_v36 = vsub.f32 1.0, %v15107_v48  ;;  %v6124_v54 = vadd.f32 %v6123_v6, %v6122_v55  ;;  %v16932_v51 = vld [vmem:[#allocation108_spill] sm:$0xff]  ;;  %vm2648_vm1 = vmand %vm7869_vm4, %vm15295_vm2 }
 0x443   : > { %v5959_v20 = vadd.f32 %v5958_v22, %v16928_v4  ;;  %v4445_v42 = vmin.f32 %v15112_v57, -0.000100005  ;;  %v4307_v9 = vmax.f32 %v4179_v56, -9.2103405  ;;  %v4947_v0 = vsub.f32 1.0, %v3795_v43  ;;  %vm15339_vm12 = vmxor %vm2011_vm11, %vm7688_vm13 }
 0x444   : > { %v5831_v8 = vadd.f32 %v5830_v1, %v16929_v29  ;;  %v3422_v10 = vadd.f32 1.0, %v7659_v23  ;;  %v5459_v62 = vmul.f32 %v3795_v43, %v3795_v43  ;;  %v6125_v47 = vrot.slane %v6124_v54, 2  ;;  %v16933_v43 = vld [vmem:[#allocation127_spill] sm:$0xff]  ;;  %vm15355_vm11 = vmxor %vm2012_vm14, %vm7688_vm13 }
 0x445   : > { %v5960_v40 = vadd.f32 %v5959_v20, %v14437_v28  ;;  %v3794_v56 = vmin.f32 %v3666_v26, 0.9999  ;;  %v4178_v6 = vsub.f32 0.0, %v16932_v51  ;;  %7660 = vpow2.f32 %v3294_v7  ;;  %vm2652_vm5 = vmand %vm7869_vm4, %vm15355_vm11 }
 0x446   : > { %v5832_v23 = vadd.f32 %v5831_v8, %v14835_v16  ;;  %v15163_v5 = vmul.f32 %v4957_v36, %v4957_v36  ;;  %v3669_v22 = vmax.f32 %v16933_v43, 0.0001  ;;  %v6126_v28 = vadd.f32 %v6125_v47, %v6124_v54  ;;  %v16934_v16 = vld [vmem:[#allocation186_spill] sm:$0xff]  ;;  %v16935_v36 = vld [vmem:[#allocation129_spill] sm:$0xff]  ;;  %v16936_v54 = vld [vmem:[#allocation179_spill] sm:$0xff] }
 0x447   : > { %v5961_v38 = vadd.f32 %v5960_v40, %v14358_v58  ;;  %v6805_v52 = vsel %vm2643_vm6, 1.0, %v15680_v60  ;;  %v4435_v44 = vmin.f32 %v4307_v9, -0.000100005  ;;  %v5075_v1 = vmul.f32 %v4947_v0, %v4947_v0  ;;  %v16938_v47 = vld [vmem:[#allocation126_spill] sm:$0xff]  ;;  %vm2649_vm6 = vmand %vm7869_vm4, %vm15309_vm9 }
 0x448   : > { %v5833_v4 = vadd.f32 %v5832_v23, %v14763_v33  ;;  %7662 = vrcp.f32 %v3422_v10  ;;  %v3670_v26 = vmax.f32 %v16934_v16, 0.0001  ;;  %v6127_v7 = vrot.slane %v6126_v28, 1  ;;  %v16937_v33 = vld [vmem:[#allocation41_spill] sm:$0xff]  ;;  %v16939_v16 = vld [vmem:[#allocation158_spill] sm:$0xff] }
 0x449   : > { %v5962_v20 = vadd.f32 %v5961_v38, %v16935_v36  ;;  %v5587_v29 = vmul.f32 %v5459_v62, %v16936_v54  ;;  %v4306_v58 = vmax.f32 %v4178_v6, -9.2103405  ;;  %v4946_v8 = vsub.f32 1.0, %v3794_v56 }
 0x44a   : > { %v5834_v9 = vadd.f32 %v5833_v4, %v16937_v33  ;;  %v15183_v0 = vmin.f32 %v3669_v22, 0.9999  ;;  %v4181_v40 = vsub.f32 0.0, %v16938_v47  ;;  %v6128_v51 = vadd.f32 %v6127_v7, %v6126_v28  ;;  %v16942_v47 = vld [vmem:[#allocation14_spill] sm:$0xff] }
 0x44b   : > { %v7661_v23 = vpop.eup %7660  ;;  %v5963_v43 = vadd.f32 %v5962_v20, %v14579_v41  ;;  %7664 = vlog2.f32 %v3422_v10  ;;  %v5203_v62 = vmul.f32 %v5075_v1, %v4435_v44  ;;  %v6804_v6 = vsel %vm2642_vm10, 1.0, %v15680_v60  ;;  %v16940_v44 = vld [vmem:[#allocation34_spill] sm:$0xff]  ;;  %vm2651_vm10 = vmand %vm7869_vm4, %vm15339_vm12 }
 0x44c   : > { %v5835_v38 = vadd.f32 %v5834_v9, %v14995_v59  ;;  %v5458_v4 = vmul.f32 %v3794_v56, %v3794_v56  ;;  %v15194_v22 = vmin.f32 %v3670_v26, 0.9999  ;;  %v4182_v36 = vsub.f32 0.0, %v16939_v16  ;;  %6129 = vst [vmem:[%s15180_s6 + $0x2] sm:$0x1] %v6128_v51  ;;  %v16941_v56 = vld [vmem:[#allocation123_spill] sm:$0xff] }
 0x44d   : > { %v5964_v28 = vadd.f32 %v5963_v43, %v14468_v2  ;;  %v4434_v41 = vmin.f32 %v4306_v58, -0.000100005  ;;  %v5074_v10 = vmul.f32 %v4946_v8, %v4946_v8  ;;  %v3672_v1 = vmax.f32 %v16940_v44, 0.0001  ;;  %v16943_v58 = vld [vmem:[#allocation5_spill] sm:$0xff]  ;;  %v16944_v51 = vld [vmem:[#allocation32_spill] sm:$0xff] }
 0x44e   : > { %v15200_v7 = vpop.eup %7662  ;;  %v5836_v55 = vadd.f32 %v5835_v38, %v14949_v61  ;;  %v3423_v20 = vadd.f32 1.0, %v7661_v23  ;;  %v4309_v54 = vmax.f32 %v4181_v40, -9.2103405  ;;  %v4949_v59 = vsub.f32 1.0, %v15183_v0 }
 0x44f   : > { %v5965_v26 = vadd.f32 %v5964_v28, %v16941_v56  ;;  %v5331_v33 = vmul.f32 %v14796_v17, %v5203_v62  ;;  %v15206_v9 = vmul.f32 %v6805_v52, %v5587_v29  ;;  %v3673_v2 = vmax.f32 %v16942_v47, 0.0001  ;;  %v16945_v28 = vld [vmem:[#allocation58_spill] sm:$0xff] }
 0x450   : > { %v5837_v8 = vadd.f32 %v5836_v55, %v16943_v58  ;;  %v5586_v43 = vmul.f32 %v5458_v4, %v16944_v51  ;;  %v4310_v16 = vmax.f32 %v4182_v36, -9.2103405  ;;  %v4950_v44 = vsub.f32 1.0, %v15194_v22  ;;  %v16946_v36 = vld [vmem:[#allocation168_spill] sm:$0xff] }
 0x451   : > { %v7665_v61 = vpop.eup %7664  ;;  %v5966_v40 = vadd.f32 %v5965_v26, %v14812_v63  ;;  %v5202_v23 = vmul.f32 %v5074_v10, %v4434_v41  ;;  %v15213_v38 = vmin.f32 %v3672_v1, 0.9999  ;;  %v4184_v56 = vsub.f32 0.0, %v16945_v28  ;;  %v16947_v10 = vld [vmem:[#allocation74_spill] sm:$0xff]  ;;  %v16948_v26 = vld [vmem:[#allocation72_spill] sm:$0xff] }
 0x452   : > { %v5838_v17 = vadd.f32 %v5837_v8, %v15137_v35  ;;  %7666 = vrcp.f32 %v3423_v20  ;;  %v4437_v52 = vmin.f32 %v4309_v54, -0.000100005  ;;  %v5077_v29 = vmul.f32 %v4949_v59, %v4949_v59  ;;  %v16949_v54 = vld [vmem:[#allocation29_spill] sm:$0xff]  ;;  %v16950_v8 = vld [vmem:[#allocation84_spill] sm:$0xff] }
 0x453   : > { %v5967_v62 = vadd.f32 %v5966_v40, %v14749_v19  ;;  %7668 = vlog2.f32 %v3423_v20  ;;  %v15218_v4 = vmin.f32 %v3673_v2, 0.9999  ;;  %v4185_v55 = vsub.f32 0.0, %v16946_v36  ;;  %v16951_v2 = vld [vmem:[#allocation6_spill] sm:$0xff] }
 0x454   : > { %v5839_v47 = vadd.f32 %v5838_v17, %v15117_v14  ;;  %v4438_v63 = vmin.f32 %v4310_v16, -0.000100005  ;;  %v5078_v41 = vmul.f32 %v4950_v44, %v4950_v44  ;;  %v3675_v1 = vmax.f32 %v16947_v10, 0.0001  ;;  %v16952_v44 = vld [vmem:[#allocation99_spill] sm:$0xff] }
 0x455   : > { %v5968_v58 = vadd.f32 %v5967_v62, %v16948_v26  ;;  %v4312_v51 = vmax.f32 %v4184_v56, -9.2103405  ;;  %v4952_v35 = vsub.f32 1.0, %v15213_v38  ;;  %v3676_v59 = vmax.f32 %v16949_v54, 0.0001 }
 0x456   : > { %v5330_v19 = vmul.f32 %v16950_v8, %v5202_v23  ;;  %v5714_v20 = vmul.f32 %v6804_v6, %v5586_v43  ;;  %v5840_v40 = vadd.f32 %v5839_v47, %v16951_v2  ;;  %v5205_v28 = vmul.f32 %v5077_v29, %v4437_v52  ;;  %v16953_v29 = vld [vmem:[#allocation115_spill] sm:$0xff]  ;;  %v16954_v47 = vld [vmem:[#allocation106_spill] sm:$0xff] }
 0x457   : > { %v5969_v36 = vadd.f32 %v5968_v58, %v14966_v12  ;;  %v4313_v14 = vmax.f32 %v4185_v55, -9.2103405  ;;  %v4953_v16 = vsub.f32 1.0, %v15218_v4  ;;  %v4187_v17 = vsub.f32 0.0, %v16952_v44 }
 0x458   : > { %v7667_v10 = vpop.eup %7666  ;;  %v15231_v62 = vmul.f32 0.6931472, %v7665_v61  ;;  %v5841_v56 = vadd.f32 %v5840_v40, %v5330_v19  ;;  %v5206_v26 = vmul.f32 %v5078_v41, %v4438_v63  ;;  %v15233_v3 = vmin.f32 %v3675_v1, 0.9999  ;;  %v16955_v61 = vld [vmem:[#allocation75_spill] sm:$0xff]  ;;  %v16956_v40 = vld [vmem:[#allocation38_spill] sm:$0xff] }
 0x459   : > { %v7669_v54 = vpop.eup %7668  ;;  %v5970_v6 = vadd.f32 %v5969_v36, %v14924_v31  ;;  %v4440_v43 = vmin.f32 %v4312_v51, -0.000100005  ;;  %v5080_v23 = vmul.f32 %v4952_v35, %v4952_v35  ;;  %v15236_v52 = vmin.f32 %v3676_v59, 0.9999 }
 0x45a   : > { %v5842_v12 = vadd.f32 %v5841_v56, %v5331_v33  ;;  %v5333_v55 = vmul.f32 %v16953_v29, %v5205_v28  ;;  %v4188_v58 = vsub.f32 0.0, %v16954_v47  ;;  %v3678_v8 = vmax.f32 %v15200_v7, 0.0001  ;;  %v16963_v29 = vld [vmem:[#allocation107_spill] sm:$0xff]  ;;  %v16968_v7 = vld [vmem:[#allocation30_spill] sm:$0xff] }
 0x45b   : > { %v5971_v2 = vadd.f32 %v5970_v6, %v16955_v61  ;;  %v4441_v19 = vmin.f32 %v4313_v14, -0.000100005  ;;  %v5081_v63 = vmul.f32 %v4953_v16, %v4953_v16  ;;  %v4315_v41 = vmax.f32 %v4187_v17, -9.2103405 }
 0x45c   : > { %v15242_v1 = vmul.f32 0.6931472, %v7669_v54  ;;  %v5843_v31 = vadd.f32 %v5842_v12, %v16956_v40  ;;  %v4955_v51 = vsub.f32 1.0, %v15233_v3  ;;  %v3679_v35 = vmax.f32 %v7667_v10, 0.0001  ;;  %v16964_v40 = vld [vmem:[#allocation183_spill] sm:$0xff] }
 0x45d   : > { %v5972_v33 = vadd.f32 %v5971_v2, %v15122_v34  ;;  %v5334_v59 = vmul.f32 %v14876_v32, %v5206_v26  ;;  %v5208_v36 = vmul.f32 %v5080_v23, %v4440_v43  ;;  %v4956_v14 = vsub.f32 1.0, %v15236_v52 }
 0x45e   : > { %v5844_v16 = vadd.f32 %v5843_v31, %v5333_v55  ;;  %v4316_v44 = vmax.f32 %v4188_v58, -9.2103405  ;;  %v15257_v17 = vmin.f32 %v3678_v8, 0.9999  ;;  %v4190_v10 = vsub.f32 0.0, %v15231_v62 }
 0x45f   : > { %v5973_v34 = vadd.f32 %v5972_v33, %v15119_v18  ;;  %v5461_v26 = vmul.f32 %v15183_v0, %v15183_v0  ;;  %v5209_v54 = vmul.f32 %v5081_v63, %v4441_v19  ;;  %v4443_v6 = vmin.f32 %v4315_v41, -0.000100005 }
 0x460   : > { %v5845_v43 = vadd.f32 %v5844_v16, %v5334_v59  ;;  %v5083_v18 = vmul.f32 %v4955_v51, %v4955_v51  ;;  %v15275_v23 = vmin.f32 %v3679_v35, 0.9999  ;;  %v4191_v12 = vsub.f32 0.0, %v15242_v1  ;;  %v16983_v51 = vld [vmem:[#allocation78_spill] sm:$0xff]  ;;  %v16990_v16 = vld [vmem:[#allocation65_spill] sm:$0xff] }
 0x461   : > { %v5974_v55 = vadd.f32 %v5973_v34, %v16963_v29  ;;  %v5462_v47 = vmul.f32 %v15194_v22, %v15194_v22  ;;  %v5336_v0 = vmul.f32 %v14905_v46, %v5208_v36  ;;  %v5084_v58 = vmul.f32 %v4956_v14, %v4956_v14 }
 0x462   : > { %v5846_v8 = vadd.f32 %v5845_v43, %v14922_v50  ;;  %v4444_v61 = vmin.f32 %v4316_v44, -0.000100005  ;;  %v4318_v2 = vmax.f32 %v4190_v10, -9.2103405  ;;  %v4958_v19 = vsub.f32 1.0, %v15257_v17 }
 0x463   : > { %v5975_v63 = vadd.f32 %v5974_v55, %v5714_v20  ;;  %v6807_v41 = vsel %vm2645_vm3, 1.0, %v15680_v60  ;;  %v5589_v31 = vmul.f32 %v5461_v26, %v16964_v40  ;;  %v5337_v22 = vmul.f32 %v14953_v21, %v5209_v54  ;;  %v16972_v26 = vld [vmem:[#allocation62_spill] sm:$0xff]  ;;  %vm15392_vm3 = vmxor %vm2014_vm7, %vm7688_vm13 }
 0x464   : > { %v5847_v50 = vadd.f32 %v5846_v8, %v5336_v0  ;;  %v5211_v35 = vmul.f32 %v5083_v18, %v4443_v6  ;;  %v4319_v33 = vmax.f32 %v4191_v12, -9.2103405  ;;  %v4959_v59 = vsub.f32 1.0, %v15275_v23  ;;  %vm15408_vm7 = vmxor %vm2015_vm15, %vm7688_vm13 }
 0x465   : > { %v5976_v20 = vadd.f32 %v5975_v63, %v15206_v9  ;;  %v6808_v28 = vsel %vm2646_vm0, 1.0, %v15680_v60  ;;  %v5590_v36 = vmul.f32 %v5462_v47, %v16968_v7  ;;  %v5464_v21 = vmul.f32 %v15213_v38, %v15213_v38  ;;  %vm2654_vm2 = vmand %vm7869_vm4, %vm15392_vm3 }
 0x466   : > { %v5848_v44 = vadd.f32 %v5847_v50, %v5337_v22  ;;  %v5212_v10 = vmul.f32 %v5084_v58, %v4444_v61  ;;  %v4446_v34 = vmin.f32 %v4318_v2, -0.000100005  ;;  %v5086_v32 = vmul.f32 %v4958_v19, %v4958_v19  ;;  %v16979_v61 = vld [vmem:[#allocation191_spill] sm:$0xff] }
 0x467   : > { %v5213_v9 = vmul.f32 %v15163_v5, %v4445_v42  ;;  %v5717_v56 = vmul.f32 %v6807_v41, %v5589_v31  ;;  %v5977_v54 = vadd.f32 %v5976_v20, %v16972_v26  ;;  %v5465_v38 = vmul.f32 %v15218_v4, %v15218_v4  ;;  %v16973_v4 = vld [vmem:[#allocation40_spill] sm:$0xff] }
 0x468   : > { %v5339_v6 = vmul.f32 %v15002_v53, %v5211_v35  ;;  %v5849_v43 = vadd.f32 %v5848_v44, %v15040_v30  ;;  %v4447_v18 = vmin.f32 %v4319_v33, -0.000100005  ;;  %v5087_v12 = vmul.f32 %v4959_v59, %v4959_v59  ;;  %v16974_v53 = vld [vmem:[#allocation121_spill] sm:$0xff]  ;;  %v16986_v59 = vld [vmem:[#allocation164_spill] sm:$0xff] }
 0x469   : > { %v4574_v57 = vsub.f32 %v3038_v49, %v15231_v62  ;;  %v5718_v42 = vmul.f32 %v6808_v28, %v5590_v36  ;;  %v5978_v5 = vadd.f32 %v5977_v54, %v5717_v56  ;;  %v5592_v29 = vmul.f32 %v5464_v21, %v16973_v4 }
 0x46a   : > { %v6810_v55 = vsel %vm2648_vm1, 1.0, %v15680_v60  ;;  %v5340_v47 = vmul.f32 %v16974_v53, %v5212_v10  ;;  %v5850_v49 = vadd.f32 %v5849_v43, %v5339_v6  ;;  %v5214_v62 = vmul.f32 %v5086_v32, %v4446_v34  ;;  %v16991_v10 = vld [vmem:[#allocation2_spill] sm:$0xff]  ;;  %v16992_v34 = vld [vmem:[#allocation137_spill] sm:$0xff] }
 0x46b   : > { %v16978_v0 = vsub.f32 0.0, %v14706_v37  ;;  %v5979_v8 = vadd.f32 %v5978_v5, %v5718_v42  ;;  %v5593_v2 = vmul.f32 %v5465_v38, %v16979_v61  ;;  %v5467_v19 = vmul.f32 %v15233_v3, %v15233_v3  ;;  %v16995_v38 = vld [vmem:[#allocation111_spill] sm:$0xff] }
 0x46c   : > { %v5341_v63 = vmul.f32 %v15063_v27, %v5213_v9  ;;  %v6811_v41 = vsel %vm2649_vm6, 1.0, %v15680_v60  ;;  %v5851_v37 = vadd.f32 %v5850_v49, %v5340_v47  ;;  %v4702_v22 = vmax.f32 %v4574_v57, -9.2103405  ;;  %v16984_v27 = vld [vmem:[#allocation114_spill] sm:$0xff] }
 0x46d   : > { %v4575_v58 = vsub.f32 %v16978_v0, %v15242_v1  ;;  %v5215_v1 = vmul.f32 %v5087_v12, %v4447_v18  ;;  %v5720_v46 = vmul.f32 %v6810_v55, %v5592_v29  ;;  %v5980_v50 = vadd.f32 %v5979_v8, %v16983_v51 }
 0x46e   : > { %v5468_v3 = vmul.f32 %v15236_v52, %v15236_v52  ;;  %v16985_v35 = vmax.f32 %v16984_v27, -9.2103405  ;;  %vm16987_vm14 = vcmp.eq.s32.totalorder %v16986_v59, %v7867_v24  ;;  %v5469_v28 = vmul.f32 %v15107_v48, %v15107_v48 }
 0x46f   : > { %vm15372_vm8 = vmxor %vm16987_vm14, %vm7688_vm13  ;;  %v5342_v52 = vmul.f32 %v15088_v39, %v5214_v62  ;;  %v5852_v7 = vadd.f32 %v5851_v37, %v5341_v63  ;;  %v4703_v36 = vmax.f32 %v4575_v58, -9.2103405  ;;  %v5721_v21 = vmul.f32 %v6811_v41, %v5593_v2 }
 0x470   : > { %v4829_v33 = vmin.f32 %v16985_v35, -0.000100005  ;;  %v5981_v14 = vadd.f32 %v5980_v50, %v5720_v46  ;;  %v5595_v44 = vmul.f32 %v5467_v19, %v16990_v16  ;;  %v5722_v32 = vmul.f32 %v16992_v34, %v16991_v10  ;;  %vm2653_vm0 = vmand %vm7869_vm4, %vm15372_vm8 }
 0x471   : > { %v6813_v9 = vsel %vm2651_vm10, 1.0, %v15680_v60  ;;  %v5343_v48 = vmul.f32 %v15104_v11, %v5215_v1  ;;  %v5853_v56 = vadd.f32 %v5852_v7, %v5342_v52  ;;  %v4830_v26 = vmin.f32 %v4702_v22, -0.000100005  ;;  %vm2655_vm13 = vmand %vm7869_vm4, %vm15408_vm7 }
 0x472   : > { %v5982_v54 = vadd.f32 %v5981_v14, %v5721_v21  ;;  %v5596_v6 = vmul.f32 %v5468_v3, %v16995_v38  ;;  %v5470_v11 = vmul.f32 %v15257_v17, %v15257_v17  ;;  %v5597_v43 = vmul.f32 %v5469_v28, %v4829_v33 }
 0x473   : > { %v6814_v13 = vsel %vm2652_vm5, 1.0, %v15680_v60  ;;  %v5854_v12 = vadd.f32 %v5853_v56, %v5343_v48  ;;  %v4831_v57 = vmin.f32 %v4703_v36, -0.000100005  ;;  %v5723_v42 = vmul.f32 %v6813_v9, %v5595_v44 }
 0x474   : > { %v5983_v5 = vadd.f32 %v5982_v54, %v5722_v32  ;;  %v5471_v4 = vmul.f32 %v15275_v23, %v15275_v23  ;;  %v6815_v17 = vsel %vm2653_vm0, 1.0, %v15680_v60  ;;  %v5724_v24 = vmul.f32 %v6814_v13, %v5596_v6 }
 0x475   : > { %v5855_v29 = vrot.slane %v5854_v12, 4  ;;  %v5598_v55 = vmul.f32 %v5470_v11, %v4830_v26  ;;  %v6816_v53 = vsel %vm2654_vm2, 1.0, %v15680_v60  ;;  %v5725_v47 = vmul.f32 %v6815_v17, %v5597_v43 }
 0x476   : > { %v5984_v45 = vadd.f32 %v5983_v5, %v5723_v42  ;;  %v5599_v15 = vmul.f32 %v5471_v4, %v4831_v57  ;;  %v6817_v49 = vsel %vm2655_vm13, 1.0, %v15680_v60 }
 0x477   : > { %v5856_v23 = vadd.f32 %v5855_v29, %v5854_v12  ;;  %v5726_v0 = vmul.f32 %v6816_v53, %v5598_v55 }
 0x478   : > { %v5985_v30 = vadd.f32 %v5984_v45, %v5724_v24  ;;  %v5727_v61 = vmul.f32 %v6817_v49, %v5599_v15 }
 0x479   : > { %v5857_v62 = vrot.slane %v5856_v23, 2 }
 0x47a   : > { %v5986_v58 = vadd.f32 %v5985_v30, %v5725_v47 }
 0x47b   : > { %v5858_v8 = vadd.f32 %v5857_v62, %v5856_v23 }
 0x47c   : > { %v5987_v2 = vadd.f32 %v5986_v58, %v5726_v0 }
 0x47d   : > { %v5859_v19 = vrot.slane %v5858_v8, 1 }
 0x47e   : > { %v5988_v25 = vadd.f32 %v5987_v2, %v5727_v61 }
 0x47f   : > { %v5860_v63 = vadd.f32 %v5859_v19, %v5858_v8 }
 0x480   : > { %v5989_v41 = vrot.slane %v5988_v25, 4 }
 0x481   : > { %5861 = vst [vmem:[%s15180_s6] sm:$0x1] %v5860_v63 }
 0x482   : > { %v5990_v40 = vadd.f32 %v5989_v41, %v5988_v25 }
 0x484   : > { %v5991_v31 = vrot.slane %v5990_v40, 2 }
 0x486   : > { %v5992_v37 = vadd.f32 %v5991_v31, %v5990_v40 }
 0x488   : > { %v5993_v1 = vrot.slane %v5992_v37, 1 }
 0x48a   : > { %v5994_v22 = vadd.f32 %v5993_v1, %v5992_v37 }
 0x48c   : > { %5995 = vst [vmem:[%s15180_s6 + $0x1] sm:$0x1] %v5994_v22 }
 0x48d PF: > { %s16_s18 = sadd.s32 1, %s7684_s18  }
 0x48e   : > { %p13_p5 = scmp.ge.s32.totalorder %s16_s18, 4  }
 0x490   :  { %15 = sbr.rel (!%p13_p5) target bundleno = 1 (0x1), region = 81 }

</bundles_post_ra>
